<compile_context>
chip_gen: v7x
topology: tpu7x:2x2x1
jax: 0.10.0
libtpu: 0.0.40
codegen_flags: <defaults>
</compile_context>

<pallas_src>
import functools

import jax
import jax.numpy as jnp
from jax.experimental import pallas as pl
from jax.experimental.pallas import tpu as pltpu


# ---------------------------------------------------------------------------
# In-kernel helpers (trace-time Python, all static shapes)
# ---------------------------------------------------------------------------
def _conv_halo(slab_ref, w_ref, b_ref, *, H, W, Cin):
    """3x3 conv on a zero-halo slab as ONE K=9*Cin matmul.

    slab_ref : ((H+3)*(W+2), Cin) bf16, row (h+1)*(W+2) + (w+1) = pixel (h, w),
               halo rows/columns are zero.
    Returns  : (H*(W+2), Cout) f32, ReLU'd; row h*(W+2)+w is valid for w < W
               (w in {W, W+1} are throw-away columns, never read downstream).
    """
    Wp = W + 2
    M = H * Wp
    pieces = []
    for dy in range(3):
        for dx in range(3):
            off = dy * Wp + dx
            pieces.append(slab_ref[off:off + M, :])
    xcat = jnp.concatenate(pieces, axis=-1)                    # (M, 9*Cin) bf16
    y = jnp.dot(xcat, w_ref[...], preferred_element_type=jnp.float32)
    return jnp.maximum(y + b_ref[...], 0.0)


def _pool_to_slab(src_ref, dst_ref, *, H, W, src_line):
    """2x2 / stride-2 maxpool of a conv output staged in src_ref into the next
    layer's zero-halo slab dst_ref.

    src_ref : (H*src_line, C) f32, row h*src_line + w (valid w < W; src_line is W for the
              dense conv0 layout or W+2 for the halo layout).  src_line is even.
    dst_ref : ((Ho+3)*(Wo+2), C) bf16 next-layer slab (fully rewritten here).
    """
    Ho, Wo = H // 2, W // 2
    half = src_line // 2
    wpn = Wo + 2
    m = H * src_line
    dst_ref[...] = jnp.zeros_like(dst_ref)
    # horizontal pair max with a single stride-2 read pair over the whole slab
    ev = src_ref[pl.ds(0, m // 2, stride=2), :]
    od = src_ref[pl.ds(1, m // 2, stride=2), :]
    src_ref[0:m // 2, :] = jnp.maximum(ev, od)                 # row = h*half + w//2
    # vertical pair max, written into the interior of the zero-halo slab
    for ho in range(Ho):
        top = src_ref[(2 * ho) * half:(2 * ho) * half + Wo, :]
        bot = src_ref[(2 * ho + 1) * half:(2 * ho + 1) * half + Wo, :]
        dst_ref[(ho + 1) * wpn + 1:(ho + 1) * wpn + 1 + Wo, :] = (
            jnp.maximum(top, bot).astype(dst_ref.dtype))


# ---------------------------------------------------------------------------
# Fused whole-network kernel (one image per grid step)
# ---------------------------------------------------------------------------
def _fused_cnn_kernel(x0_ref,
                      cw0, cb0, cw1, cb1, cw2, cb2, cw3, cb3,
                      fw0, fb0, fw1, fb1, fw2, fb2, fw3, fb3, fw4, fb4,
                      o_ref,
                      s0, slab1, s1, slab2, s2, slab3, s3,
                      *, img):
    H0 = img
    H1, H2, H3 = img // 2, img // 4, img // 8

    # conv0 + BN + ReLU : one (H0*W0, 9*C) x (9*C, 32) matmul (im2col built in wrapper)
    y0 = jnp.dot(x0_ref[...], cw0[...], preferred_element_type=jnp.float32)
    s0[...] = jnp.maximum(y0 + cb0[...], 0.0)
    _pool_to_slab(s0, slab1, H=H0, W=H0, src_line=H0)

    # conv1..conv3 on zero-halo slabs, one K=9*Cin matmul each
    s1[...] = _conv_halo(slab1, cw1, cb1, H=H1, W=H1, Cin=32)
    _pool_to_slab(s1, slab2, H=H1, W=H1, src_line=H1 + 2)

    s2[...] = _conv_halo(slab2, cw2, cb2, H=H2, W=H2, Cin=64)
    _pool_to_slab(s2, slab3, H=H2, W=H2, src_line=H2 + 2)

    s3[...] = _conv_halo(slab3, cw3, cb3, H=H3, W=H3, Cin=128)

    # 5-layer MLP head (Dropout(0.1) = identity in eval mode).
    # fc0 is accumulated per spatial position so no activation reorder is needed; the
    # NCHW-flatten permutation is already folded into fw0 (shape (HWf, 256, 1024)).
    wp3 = H3 + 2
    h = fb0[...]                                               # (1, 1024) f32
    p = 0
    for hh in range(H3):
        for ww in range(H3):
            row = hh * wp3 + ww                                # valid conv3 output row
            h = h + jnp.dot(s3[row:row + 1, :].astype(jnp.bfloat16), fw0[p],
                            preferred_element_type=jnp.float32)
            p += 1
    h = jnp.maximum(h, 0.0).astype(jnp.bfloat16)
    for w_r, b_r in ((fw1, fb1), (fw2, fb2), (fw3, fb3)):
        z = jnp.dot(h, w_r[...], preferred_element_type=jnp.float32) + b_r[...]
        h = jnp.maximum(z, 0.0).astype(jnp.bfloat16)
    o_ref[...] = jnp.dot(h, fw4[...], preferred_element_type=jnp.float32) + fb4[...]


def _fused_call(x0, flat, *, img):
    N = x0.shape[0]
    label = flat[-1].shape[1]
    H1, H2, H3 = img // 2, img // 4, img // 8

    def cmap2(n):
        return (0, 0)

    def cmap3(n):
        return (0, 0, 0)

    in_specs = [pl.BlockSpec((None,) + x0.shape[1:], lambda n: (n, 0, 0))]
    for a in flat:
        in_specs.append(pl.BlockSpec(a.shape, cmap2 if a.ndim == 2 else cmap3))

    scratch = [
        pltpu.VMEM((img * img, 32), jnp.float32),                     # conv0 staging
        pltpu.VMEM(((H1 + 3) * (H1 + 2), 32), jnp.bfloat16),          # layer-1 halo slab
        pltpu.VMEM((H1 * (H1 + 2), 64), jnp.float32),                 # conv1 staging
        pltpu.VMEM(((H2 + 3) * (H2 + 2), 64), jnp.bfloat16),          # layer-2 halo slab
        pltpu.VMEM((H2 * (H2 + 2), 128), jnp.float32),                # conv2 staging
        pltpu.VMEM(((H3 + 3) * (H3 + 2), 128), jnp.bfloat16),         # layer-3 halo slab
        pltpu.VMEM((H3 * (H3 + 2), 256), jnp.float32),                # conv3 output
    ]

    kernel = functools.partial(_fused_cnn_kernel, img=img)
    return pl.pallas_call(
        kernel,
        out_shape=jax.ShapeDtypeStruct((N, 1, label), jnp.float32),
        grid_spec=pltpu.PrefetchScalarGridSpec(
            num_scalar_prefetch=0,
            grid=(N,),
            in_specs=in_specs,
            out_specs=pl.BlockSpec((None, 1, label), lambda n: (n, 0, 0)),
            scratch_shapes=scratch,
        ),
        compiler_params=pltpu.CompilerParams(
            dimension_semantics=("parallel",),
            vmem_limit_bytes=32 * 1024 * 1024,
        ),
    )(x0, *flat)


# ---------------------------------------------------------------------------
# Deterministic synthetic parameters (shapes mirror CNNModel.__init__; eval-mode BN folded).
# Porting real PyTorch weights needs: conv w.transpose(2,3,1,0).reshape(9*Cin,Cout),
# linear w.T, plus the fc0 NCHW-flatten row permutation below.
# ---------------------------------------------------------------------------
def init_params(key, channel_size, img_size, label_size):
    eps = 1e-5
    kc, kf = jax.random.split(key)
    params = {}
    chans = [channel_size, 32, 64, 128, 256]
    ckeys = jax.random.split(kc, 12)
    for i in range(4):
        cin, cout = chans[i], chans[i + 1]
        wgt = jax.random.normal(ckeys[3 * i], (3, 3, cin, cout), jnp.float32) / jnp.sqrt(9.0 * cin)
        gamma = 1.0 + 0.01 * jax.random.normal(ckeys[3 * i + 1], (cout,), jnp.float32)
        beta = 0.01 * jax.random.normal(ckeys[3 * i + 2], (cout,), jnp.float32)
        rmean = jnp.zeros((cout,), jnp.float32)
        rvar = jnp.ones((cout,), jnp.float32)
        scale = gamma / jnp.sqrt(rvar + eps)
        bias = (beta - rmean * scale).reshape(1, cout)
        # fold BN scale into the conv weight; tap-major rows (dy*3+dx)*Cin + c; bf16 for MXU
        wfold = (wgt * scale).reshape(9 * cin, cout).astype(jnp.bfloat16)
        params[f"conv{i}"] = (wfold, bias)

    hw_f = (img_size // 8) ** 2
    in_feature = hw_f * 256
    dims = [in_feature, 1024, 512, 128, 32, label_size]
    fkeys = jax.random.split(kf, 10)
    for i in range(5):
        din, dout = dims[i], dims[i + 1]
        wgt = jax.random.normal(fkeys[2 * i], (din, dout), jnp.float32) / jnp.sqrt(float(din))
        b = 0.01 * jax.random.normal(fkeys[2 * i + 1], (dout,), jnp.float32).reshape(1, dout)
        if i == 0:
            # fold the NCHW flatten (x1.view(-1, in_feature)): PyTorch row order is
            # (c, h, w); kernel accumulates per spatial position p=(h,w) with 256 channels.
            wgt = wgt.reshape(256, hw_f, dout).transpose(1, 0, 2)   # (hw_f, 256, dout)
        params[f"fc{i}"] = (wgt.astype(jnp.bfloat16), b)
    return params


# ---------------------------------------------------------------------------
# Forward pass
# ---------------------------------------------------------------------------
def cnn_forward(params, x_nchw):
    N, C, H, W = x_nchw.shape
    assert H == W and H % 8 == 0
    # wrapper-side im2col for conv0 only (K = 9*C; ~18 KB HBM, negligible)
    xh = jnp.transpose(x_nchw, (0, 2, 3, 1))
    xp = jnp.pad(xh, ((0, 0), (1, 1), (1, 1), (0, 0)))
    cols = [xp[:, dy:dy + H, dx:dx + W, :] for dy in range(3) for dx in range(3)]
    x0 = jnp.concatenate(cols, axis=-1).reshape(N, H * W, 9 * C).astype(jnp.bfloat16)

    flat = []
    for i in range(4):
        flat += list(params[f"conv{i}"])
    for i in range(5):
        flat += list(params[f"fc{i}"])

    label = flat[-1].shape[1]
    out = _fused_call(x0, flat, img=H)
    return out.reshape(N, label)


if __name__ == "__main__":
    channel_size, img_size, label_size, batch = 4, 16, 10, 2

    key = jax.random.PRNGKey(0)
    k_params, k_input = jax.random.split(key)
    params = init_params(k_params, channel_size, img_size, label_size)
    x = jax.random.normal(k_input, (batch, channel_size, img_size, img_size), jnp.float32)

    fwd = jax.jit(cnn_forward)
    out = jax.block_until_ready(fwd(params, x))
    assert out.shape == (batch, label_size), out.shape
    assert bool(jnp.all(jnp.isfinite(out)))
    print("KERNEL_OK")
</pallas_src>

<mosaic_0001>
module attributes {stable_mosaic.version = 11 : i64} {
  func.func @_fused_cnn_kernel(%arg0: i32, %arg1: memref<1x256x36xbf16, #tpu.memory_space<vmem>>, %arg2: memref<36x32xbf16, #tpu.memory_space<vmem>>, %arg3: memref<1x32xf32, #tpu.memory_space<vmem>>, %arg4: memref<288x64xbf16, #tpu.memory_space<vmem>>, %arg5: memref<1x64xf32, #tpu.memory_space<vmem>>, %arg6: memref<576x128xbf16, #tpu.memory_space<vmem>>, %arg7: memref<1x128xf32, #tpu.memory_space<vmem>>, %arg8: memref<1152x256xbf16, #tpu.memory_space<vmem>>, %arg9: memref<1x256xf32, #tpu.memory_space<vmem>>, %arg10: memref<4x256x1024xbf16, #tpu.memory_space<vmem>>, %arg11: memref<1x1024xf32, #tpu.memory_space<vmem>>, %arg12: memref<1024x512xbf16, #tpu.memory_space<vmem>>, %arg13: memref<1x512xf32, #tpu.memory_space<vmem>>, %arg14: memref<512x128xbf16, #tpu.memory_space<vmem>>, %arg15: memref<1x128xf32, #tpu.memory_space<vmem>>, %arg16: memref<128x32xbf16, #tpu.memory_space<vmem>>, %arg17: memref<1x32xf32, #tpu.memory_space<vmem>>, %arg18: memref<32x10xbf16, #tpu.memory_space<vmem>>, %arg19: memref<1x10xf32, #tpu.memory_space<vmem>>, %arg20: memref<1x1x10xf32, #tpu.memory_space<vmem>>, %arg21: memref<256x32xf32, #tpu.memory_space<vmem>>, %arg22: memref<110x32xbf16, #tpu.memory_space<vmem>>, %arg23: memref<80x64xf32, #tpu.memory_space<vmem>>, %arg24: memref<42x64xbf16, #tpu.memory_space<vmem>>, %arg25: memref<24x128xf32, #tpu.memory_space<vmem>>, %arg26: memref<20x128xbf16, #tpu.memory_space<vmem>>, %arg27: memref<8x256xf32, #tpu.memory_space<vmem>>) attributes {dimension_semantics = [#tpu.dimension_semantics<parallel>], iteration_bounds = array<i64: 2>, scalar_prefetch = 0 : i64, scratch_operands = 7 : i64, tpu.core_type = #tpu.core_type<tc>, window_params = [{transform_indices = @transform_0, window_bounds = array<i64: 1, 256, 36>}, {pipeline_mode = #tpu.pipeline_mode<synchronous>, transform_indices = @transform_1, window_bounds = array<i64: 36, 32>}, {pipeline_mode = #tpu.pipeline_mode<synchronous>, transform_indices = @transform_2, window_bounds = array<i64: 1, 32>}, {pipeline_mode = #tpu.pipeline_mode<synchronous>, transform_indices = @transform_3, window_bounds = array<i64: 288, 64>}, {pipeline_mode = #tpu.pipeline_mode<synchronous>, transform_indices = @transform_4, window_bounds = array<i64: 1, 64>}, {pipeline_mode = #tpu.pipeline_mode<synchronous>, transform_indices = @transform_5, window_bounds = array<i64: 576, 128>}, {pipeline_mode = #tpu.pipeline_mode<synchronous>, transform_indices = @transform_6, window_bounds = array<i64: 1, 128>}, {pipeline_mode = #tpu.pipeline_mode<synchronous>, transform_indices = @transform_7, window_bounds = array<i64: 1152, 256>}, {pipeline_mode = #tpu.pipeline_mode<synchronous>, transform_indices = @transform_8, window_bounds = array<i64: 1, 256>}, {pipeline_mode = #tpu.pipeline_mode<synchronous>, transform_indices = @transform_9, window_bounds = array<i64: 4, 256, 1024>}, {pipeline_mode = #tpu.pipeline_mode<synchronous>, transform_indices = @transform_10, window_bounds = array<i64: 1, 1024>}, {pipeline_mode = #tpu.pipeline_mode<synchronous>, transform_indices = @transform_11, window_bounds = array<i64: 1024, 512>}, {pipeline_mode = #tpu.pipeline_mode<synchronous>, transform_indices = @transform_12, window_bounds = array<i64: 1, 512>}, {pipeline_mode = #tpu.pipeline_mode<synchronous>, transform_indices = @transform_13, window_bounds = array<i64: 512, 128>}, {pipeline_mode = #tpu.pipeline_mode<synchronous>, transform_indices = @transform_14, window_bounds = array<i64: 1, 128>}, {pipeline_mode = #tpu.pipeline_mode<synchronous>, transform_indices = @transform_15, window_bounds = array<i64: 128, 32>}, {pipeline_mode = #tpu.pipeline_mode<synchronous>, transform_indices = @transform_16, window_bounds = array<i64: 1, 32>}, {pipeline_mode = #tpu.pipeline_mode<synchronous>, transform_indices = @transform_17, window_bounds = array<i64: 32, 10>}, {pipeline_mode = #tpu.pipeline_mode<synchronous>, transform_indices = @transform_18, window_bounds = array<i64: 1, 10>}, {transform_indices = @transform_19, window_bounds = array<i64: 1, 1, 10>}]} {
    %c0 = arith.constant 0 : index
    %c0_0 = arith.constant 0 : index
    %c0_1 = arith.constant 0 : index
    %0 = vector.load %arg1[%c0, %c0_0, %c0_1] : memref<1x256x36xbf16, #tpu.memory_space<vmem>>, vector<1x256x36xbf16>
    %1 = vector.shape_cast %0 : vector<1x256x36xbf16> to vector<256x36xbf16>
    %c0_2 = arith.constant 0 : index
    %c0_3 = arith.constant 0 : index
    %2 = vector.load %arg2[%c0_2, %c0_3] : memref<36x32xbf16, #tpu.memory_space<vmem>>, vector<36x32xbf16>
    %cst = arith.constant dense<0.000000e+00> : vector<256x32xf32>
    %3 = tpu.matmul %1, %2, %cst {dimension_numbers = #tpu.dot_dimension_numbers<[1], [0], [0], [1], [0, 0, 1, 1], [], []>} : vector<256x36xbf16>, vector<36x32xbf16>, vector<256x32xf32> -> vector<256x32xf32>
    %c0_4 = arith.constant 0 : index
    %c0_5 = arith.constant 0 : index
    %4 = vector.load %arg3[%c0_4, %c0_5] : memref<1x32xf32, #tpu.memory_space<vmem>>, vector<1x32xf32>
    %5 = vector.broadcast %4 : vector<1x32xf32> to vector<256x32xf32>
    %6 = arith.addf %3, %5 : vector<256x32xf32>
    %cst_6 = arith.constant 0.000000e+00 : f32
    %7 = vector.broadcast %cst_6 : f32 to vector<256x32xf32>
    %8 = arith.maximumf %6, %7 : vector<256x32xf32>
    %c0_7 = arith.constant 0 : index
    %c0_8 = arith.constant 0 : index
    %9 = vector.load %arg21[%c0_7, %c0_8] : memref<256x32xf32, #tpu.memory_space<vmem>>, vector<256x32xf32>
    tpu.vector_store %arg21[%c0_7, %c0_8], %8 {strides = array<i32>} : memref<256x32xf32, #tpu.memory_space<vmem>>, vector<256x32xf32>,
    %cst_9 = arith.constant 0.000000e+00 : bf16
    %10 = vector.broadcast %cst_9 : bf16 to vector<110x32xbf16>
    %c0_10 = arith.constant 0 : index
    %c0_11 = arith.constant 0 : index
    %11 = vector.load %arg22[%c0_10, %c0_11] : memref<110x32xbf16, #tpu.memory_space<vmem>>, vector<110x32xbf16>
    tpu.vector_store %arg22[%c0_10, %c0_11], %10 {strides = array<i32>} : memref<110x32xbf16, #tpu.memory_space<vmem>>, vector<110x32xbf16>,
    %c0_12 = arith.constant 0 : index
    %c0_13 = arith.constant 0 : index
    %12 = tpu.strided_load %arg21[%c0_12, %c0_13] {strides = array<i32: 2, 1>} : memref<256x32xf32, #tpu.memory_space<vmem>>, vector<128x32xf32>
    %c1 = arith.constant 1 : index
    %c0_14 = arith.constant 0 : index
    %13 = tpu.strided_load %arg21[%c1, %c0_14] {strides = array<i32: 2, 1>} : memref<256x32xf32, #tpu.memory_space<vmem>>, vector<128x32xf32>
    %14 = arith.maximumf %12, %13 : vector<128x32xf32>
    %c0_15 = arith.constant 0 : index
    %c0_16 = arith.constant 0 : index
    %15 = vector.load %arg21[%c0_15, %c0_16] : memref<256x32xf32, #tpu.memory_space<vmem>>, vector<128x32xf32>
    tpu.vector_store %arg21[%c0_15, %c0_16], %14 {strides = array<i32>} : memref<256x32xf32, #tpu.memory_space<vmem>>, vector<128x32xf32>,
    %c0_17 = arith.constant 0 : index
    %c0_18 = arith.constant 0 : index
    %16 = vector.load %arg21[%c0_17, %c0_18] : memref<256x32xf32, #tpu.memory_space<vmem>>, vector<8x32xf32>
    %c8 = arith.constant 8 : index
    %c0_19 = arith.constant 0 : index
    %17 = vector.load %arg21[%c8, %c0_19] : memref<256x32xf32, #tpu.memory_space<vmem>>, vector<8x32xf32>
    %18 = arith.maximumf %16, %17 : vector<8x32xf32>
    %19 = arith.truncf %18 : vector<8x32xf32> to vector<8x32xbf16>
    %c11 = arith.constant 11 : index
    %c0_20 = arith.constant 0 : index
    %20 = vector.load %arg22[%c11, %c0_20] : memref<110x32xbf16, #tpu.memory_space<vmem>>, vector<8x32xbf16>
    tpu.vector_store %arg22[%c11, %c0_20], %19 {strides = array<i32>} : memref<110x32xbf16, #tpu.memory_space<vmem>>, vector<8x32xbf16>,
    %c16 = arith.constant 16 : index
    %c0_21 = arith.constant 0 : index
    %21 = vector.load %arg21[%c16, %c0_21] : memref<256x32xf32, #tpu.memory_space<vmem>>, vector<8x32xf32>
    %c24 = arith.constant 24 : index
    %c0_22 = arith.constant 0 : index
    %22 = vector.load %arg21[%c24, %c0_22] : memref<256x32xf32, #tpu.memory_space<vmem>>, vector<8x32xf32>
    %23 = arith.maximumf %21, %22 : vector<8x32xf32>
    %24 = arith.truncf %23 : vector<8x32xf32> to vector<8x32xbf16>
    %c21 = arith.constant 21 : index
    %c0_23 = arith.constant 0 : index
    %25 = vector.load %arg22[%c21, %c0_23] : memref<110x32xbf16, #tpu.memory_space<vmem>>, vector<8x32xbf16>
    tpu.vector_store %arg22[%c21, %c0_23], %24 {strides = array<i32>} : memref<110x32xbf16, #tpu.memory_space<vmem>>, vector<8x32xbf16>,
    %c32 = arith.constant 32 : index
    %c0_24 = arith.constant 0 : index
    %26 = vector.load %arg21[%c32, %c0_24] : memref<256x32xf32, #tpu.memory_space<vmem>>, vector<8x32xf32>
    %c40 = arith.constant 40 : index
    %c0_25 = arith.constant 0 : index
    %27 = vector.load %arg21[%c40, %c0_25] : memref<256x32xf32, #tpu.memory_space<vmem>>, vector<8x32xf32>
    %28 = arith.maximumf %26, %27 : vector<8x32xf32>
    %29 = arith.truncf %28 : vector<8x32xf32> to vector<8x32xbf16>
    %c31 = arith.constant 31 : index
    %c0_26 = arith.constant 0 : index
    %30 = vector.load %arg22[%c31, %c0_26] : memref<110x32xbf16, #tpu.memory_space<vmem>>, vector<8x32xbf16>
    tpu.vector_store %arg22[%c31, %c0_26], %29 {strides = array<i32>} : memref<110x32xbf16, #tpu.memory_space<vmem>>, vector<8x32xbf16>,
    %c48 = arith.constant 48 : index
    %c0_27 = arith.constant 0 : index
    %31 = vector.load %arg21[%c48, %c0_27] : memref<256x32xf32, #tpu.memory_space<vmem>>, vector<8x32xf32>
    %c56 = arith.constant 56 : index
    %c0_28 = arith.constant 0 : index
    %32 = vector.load %arg21[%c56, %c0_28] : memref<256x32xf32, #tpu.memory_space<vmem>>, vector<8x32xf32>
    %33 = arith.maximumf %31, %32 : vector<8x32xf32>
    %34 = arith.truncf %33 : vector<8x32xf32> to vector<8x32xbf16>
    %c41 = arith.constant 41 : index
    %c0_29 = arith.constant 0 : index
    %35 = vector.load %arg22[%c41, %c0_29] : memref<110x32xbf16, #tpu.memory_space<vmem>>, vector<8x32xbf16>
    tpu.vector_store %arg22[%c41, %c0_29], %34 {strides = array<i32>} : memref<110x32xbf16, #tpu.memory_space<vmem>>, vector<8x32xbf16>,
    %c64 = arith.constant 64 : index
    %c0_30 = arith.constant 0 : index
    %36 = vector.load %arg21[%c64, %c0_30] : memref<256x32xf32, #tpu.memory_space<vmem>>, vector<8x32xf32>
    %c72 = arith.constant 72 : index
    %c0_31 = arith.constant 0 : index
    %37 = vector.load %arg21[%c72, %c0_31] : memref<256x32xf32, #tpu.memory_space<vmem>>, vector<8x32xf32>
    %38 = arith.maximumf %36, %37 : vector<8x32xf32>
    %39 = arith.truncf %38 : vector<8x32xf32> to vector<8x32xbf16>
    %c51 = arith.constant 51 : index
    %c0_32 = arith.constant 0 : index
    %40 = vector.load %arg22[%c51, %c0_32] : memref<110x32xbf16, #tpu.memory_space<vmem>>, vector<8x32xbf16>
    tpu.vector_store %arg22[%c51, %c0_32], %39 {strides = array<i32>} : memref<110x32xbf16, #tpu.memory_space<vmem>>, vector<8x32xbf16>,
    %c80 = arith.constant 80 : index
    %c0_33 = arith.constant 0 : index
    %41 = vector.load %arg21[%c80, %c0_33] : memref<256x32xf32, #tpu.memory_space<vmem>>, vector<8x32xf32>
    %c88 = arith.constant 88 : index
    %c0_34 = arith.constant 0 : index
    %42 = vector.load %arg21[%c88, %c0_34] : memref<256x32xf32, #tpu.memory_space<vmem>>, vector<8x32xf32>
    %43 = arith.maximumf %41, %42 : vector<8x32xf32>
    %44 = arith.truncf %43 : vector<8x32xf32> to vector<8x32xbf16>
    %c61 = arith.constant 61 : index
    %c0_35 = arith.constant 0 : index
    %45 = vector.load %arg22[%c61, %c0_35] : memref<110x32xbf16, #tpu.memory_space<vmem>>, vector<8x32xbf16>
    tpu.vector_store %arg22[%c61, %c0_35], %44 {strides = array<i32>} : memref<110x32xbf16, #tpu.memory_space<vmem>>, vector<8x32xbf16>,
    %c96 = arith.constant 96 : index
    %c0_36 = arith.constant 0 : index
    %46 = vector.load %arg21[%c96, %c0_36] : memref<256x32xf32, #tpu.memory_space<vmem>>, vector<8x32xf32>
    %c104 = arith.constant 104 : index
    %c0_37 = arith.constant 0 : index
    %47 = vector.load %arg21[%c104, %c0_37] : memref<256x32xf32, #tpu.memory_space<vmem>>, vector<8x32xf32>
    %48 = arith.maximumf %46, %47 : vector<8x32xf32>
    %49 = arith.truncf %48 : vector<8x32xf32> to vector<8x32xbf16>
    %c71 = arith.constant 71 : index
    %c0_38 = arith.constant 0 : index
    %50 = vector.load %arg22[%c71, %c0_38] : memref<110x32xbf16, #tpu.memory_space<vmem>>, vector<8x32xbf16>
    tpu.vector_store %arg22[%c71, %c0_38], %49 {strides = array<i32>} : memref<110x32xbf16, #tpu.memory_space<vmem>>, vector<8x32xbf16>,
    %c112 = arith.constant 112 : index
    %c0_39 = arith.constant 0 : index
    %51 = vector.load %arg21[%c112, %c0_39] : memref<256x32xf32, #tpu.memory_space<vmem>>, vector<8x32xf32>
    %c120 = arith.constant 120 : index
    %c0_40 = arith.constant 0 : index
    %52 = vector.load %arg21[%c120, %c0_40] : memref<256x32xf32, #tpu.memory_space<vmem>>, vector<8x32xf32>
    %53 = arith.maximumf %51, %52 : vector<8x32xf32>
    %54 = arith.truncf %53 : vector<8x32xf32> to vector<8x32xbf16>
    %c81 = arith.constant 81 : index
    %c0_41 = arith.constant 0 : index
    %55 = vector.load %arg22[%c81, %c0_41] : memref<110x32xbf16, #tpu.memory_space<vmem>>, vector<8x32xbf16>
    tpu.vector_store %arg22[%c81, %c0_41], %54 {strides = array<i32>} : memref<110x32xbf16, #tpu.memory_space<vmem>>, vector<8x32xbf16>,
    %c0_42 = arith.constant 0 : index
    %c0_43 = arith.constant 0 : index
    %56 = vector.load %arg22[%c0_42, %c0_43] : memref<110x32xbf16, #tpu.memory_space<vmem>>, vector<80x32xbf16>
    %c1_44 = arith.constant 1 : index
    %c0_45 = arith.constant 0 : index
    %57 = vector.load %arg22[%c1_44, %c0_45] : memref<110x32xbf16, #tpu.memory_space<vmem>>, vector<80x32xbf16>
    %c2 = arith.constant 2 : index
    %c0_46 = arith.constant 0 : index
    %58 = vector.load %arg22[%c2, %c0_46] : memref<110x32xbf16, #tpu.memory_space<vmem>>, vector<80x32xbf16>
    %c10 = arith.constant 10 : index
    %c0_47 = arith.constant 0 : index
    %59 = vector.load %arg22[%c10, %c0_47] : memref<110x32xbf16, #tpu.memory_space<vmem>>, vector<80x32xbf16>
    %c11_48 = arith.constant 11 : index
    %c0_49 = arith.constant 0 : index
    %60 = vector.load %arg22[%c11_48, %c0_49] : memref<110x32xbf16, #tpu.memory_space<vmem>>, vector<80x32xbf16>
    %c12 = arith.constant 12 : index
    %c0_50 = arith.constant 0 : index
    %61 = vector.load %arg22[%c12, %c0_50] : memref<110x32xbf16, #tpu.memory_space<vmem>>, vector<80x32xbf16>
    %c20 = arith.constant 20 : index
    %c0_51 = arith.constant 0 : index
    %62 = vector.load %arg22[%c20, %c0_51] : memref<110x32xbf16, #tpu.memory_space<vmem>>, vector<80x32xbf16>
    %c21_52 = arith.constant 21 : index
    %c0_53 = arith.constant 0 : index
    %63 = vector.load %arg22[%c21_52, %c0_53] : memref<110x32xbf16, #tpu.memory_space<vmem>>, vector<80x32xbf16>
    %c22 = arith.constant 22 : index
    %c0_54 = arith.constant 0 : index
    %64 = vector.load %arg22[%c22, %c0_54] : memref<110x32xbf16, #tpu.memory_space<vmem>>, vector<80x32xbf16>
    %65 = tpu.concatenate %56, %57, %58, %59, %60, %61, %62, %63, %64 in 1 : vector<80x32xbf16>, vector<80x32xbf16>, vector<80x32xbf16>, vector<80x32xbf16>, vector<80x32xbf16>, vector<80x32xbf16>, vector<80x32xbf16>, vector<80x32xbf16>, vector<80x32xbf16> -> vector<80x288xbf16>
    %c0_55 = arith.constant 0 : index
    %c0_56 = arith.constant 0 : index
    %66 = vector.load %arg4[%c0_55, %c0_56] : memref<288x64xbf16, #tpu.memory_space<vmem>>, vector<288x64xbf16>
    %cst_57 = arith.constant dense<0.000000e+00> : vector<80x64xf32>
    %67 = tpu.matmul %65, %66, %cst_57 {dimension_numbers = #tpu.dot_dimension_numbers<[1], [0], [0], [1], [0, 0, 1, 1], [], []>} : vector<80x288xbf16>, vector<288x64xbf16>, vector<80x64xf32> -> vector<80x64xf32>
    %c0_58 = arith.constant 0 : index
    %c0_59 = arith.constant 0 : index
    %68 = vector.load %arg5[%c0_58, %c0_59] : memref<1x64xf32, #tpu.memory_space<vmem>>, vector<1x64xf32>
    %69 = vector.broadcast %68 : vector<1x64xf32> to vector<80x64xf32>
    %70 = arith.addf %67, %69 : vector<80x64xf32>
    %cst_60 = arith.constant 0.000000e+00 : f32
    %71 = vector.broadcast %cst_60 : f32 to vector<80x64xf32>
    %72 = arith.maximumf %70, %71 : vector<80x64xf32>
    %c0_61 = arith.constant 0 : index
    %c0_62 = arith.constant 0 : index
    %73 = vector.load %arg23[%c0_61, %c0_62] : memref<80x64xf32, #tpu.memory_space<vmem>>, vector<80x64xf32>
    tpu.vector_store %arg23[%c0_61, %c0_62], %72 {strides = array<i32>} : memref<80x64xf32, #tpu.memory_space<vmem>>, vector<80x64xf32>,
    %cst_63 = arith.constant 0.000000e+00 : bf16
    %74 = vector.broadcast %cst_63 : bf16 to vector<42x64xbf16>
    %c0_64 = arith.constant 0 : index
    %c0_65 = arith.constant 0 : index
    %75 = vector.load %arg24[%c0_64, %c0_65] : memref<42x64xbf16, #tpu.memory_space<vmem>>, vector<42x64xbf16>
    tpu.vector_store %arg24[%c0_64, %c0_65], %74 {strides = array<i32>} : memref<42x64xbf16, #tpu.memory_space<vmem>>, vector<42x64xbf16>,
    %c0_66 = arith.constant 0 : index
    %c0_67 = arith.constant 0 : index
    %76 = tpu.strided_load %arg23[%c0_66, %c0_67] {strides = array<i32: 2, 1>} : memref<80x64xf32, #tpu.memory_space<vmem>>, vector<40x64xf32>
    %c1_68 = arith.constant 1 : index
    %c0_69 = arith.constant 0 : index
    %77 = tpu.strided_load %arg23[%c1_68, %c0_69] {strides = array<i32: 2, 1>} : memref<80x64xf32, #tpu.memory_space<vmem>>, vector<40x64xf32>
    %78 = arith.maximumf %76, %77 : vector<40x64xf32>
    %c0_70 = arith.constant 0 : index
    %c0_71 = arith.constant 0 : index
    %79 = vector.load %arg23[%c0_70, %c0_71] : memref<80x64xf32, #tpu.memory_space<vmem>>, vector<40x64xf32>
    tpu.vector_store %arg23[%c0_70, %c0_71], %78 {strides = array<i32>} : memref<80x64xf32, #tpu.memory_space<vmem>>, vector<40x64xf32>,
    %c0_72 = arith.constant 0 : index
    %c0_73 = arith.constant 0 : index
    %80 = vector.load %arg23[%c0_72, %c0_73] : memref<80x64xf32, #tpu.memory_space<vmem>>, vector<4x64xf32>
    %c5 = arith.constant 5 : index
    %c0_74 = arith.constant 0 : index
    %81 = vector.load %arg23[%c5, %c0_74] : memref<80x64xf32, #tpu.memory_space<vmem>>, vector<4x64xf32>
    %82 = arith.maximumf %80, %81 : vector<4x64xf32>
    %83 = arith.truncf %82 : vector<4x64xf32> to vector<4x64xbf16>
    %c7 = arith.constant 7 : index
    %c0_75 = arith.constant 0 : index
    %84 = vector.load %arg24[%c7, %c0_75] : memref<42x64xbf16, #tpu.memory_space<vmem>>, vector<4x64xbf16>
    tpu.vector_store %arg24[%c7, %c0_75], %83 {strides = array<i32>} : memref<42x64xbf16, #tpu.memory_space<vmem>>, vector<4x64xbf16>,
    %c10_76 = arith.constant 10 : index
    %c0_77 = arith.constant 0 : index
    %85 = vector.load %arg23[%c10_76, %c0_77] : memref<80x64xf32, #tpu.memory_space<vmem>>, vector<4x64xf32>
    %c15 = arith.constant 15 : index
    %c0_78 = arith.constant 0 : index
    %86 = vector.load %arg23[%c15, %c0_78] : memref<80x64xf32, #tpu.memory_space<vmem>>, vector<4x64xf32>
    %87 = arith.maximumf %85, %86 : vector<4x64xf32>
    %88 = arith.truncf %87 : vector<4x64xf32> to vector<4x64xbf16>
    %c13 = arith.constant 13 : index
    %c0_79 = arith.constant 0 : index
    %89 = vector.load %arg24[%c13, %c0_79] : memref<42x64xbf16, #tpu.memory_space<vmem>>, vector<4x64xbf16>
    tpu.vector_store %arg24[%c13, %c0_79], %88 {strides = array<i32>} : memref<42x64xbf16, #tpu.memory_space<vmem>>, vector<4x64xbf16>,
    %c20_80 = arith.constant 20 : index
    %c0_81 = arith.constant 0 : index
    %90 = vector.load %arg23[%c20_80, %c0_81] : memref<80x64xf32, #tpu.memory_space<vmem>>, vector<4x64xf32>
    %c25 = arith.constant 25 : index
    %c0_82 = arith.constant 0 : index
    %91 = vector.load %arg23[%c25, %c0_82] : memref<80x64xf32, #tpu.memory_space<vmem>>, vector<4x64xf32>
    %92 = arith.maximumf %90, %91 : vector<4x64xf32>
    %93 = arith.truncf %92 : vector<4x64xf32> to vector<4x64xbf16>
    %c19 = arith.constant 19 : index
    %c0_83 = arith.constant 0 : index
    %94 = vector.load %arg24[%c19, %c0_83] : memref<42x64xbf16, #tpu.memory_space<vmem>>, vector<4x64xbf16>
    tpu.vector_store %arg24[%c19, %c0_83], %93 {strides = array<i32>} : memref<42x64xbf16, #tpu.memory_space<vmem>>, vector<4x64xbf16>,
    %c30 = arith.constant 30 : index
    %c0_84 = arith.constant 0 : index
    %95 = vector.load %arg23[%c30, %c0_84] : memref<80x64xf32, #tpu.memory_space<vmem>>, vector<4x64xf32>
    %c35 = arith.constant 35 : index
    %c0_85 = arith.constant 0 : index
    %96 = vector.load %arg23[%c35, %c0_85] : memref<80x64xf32, #tpu.memory_space<vmem>>, vector<4x64xf32>
    %97 = arith.maximumf %95, %96 : vector<4x64xf32>
    %98 = arith.truncf %97 : vector<4x64xf32> to vector<4x64xbf16>
    %c25_86 = arith.constant 25 : index
    %c0_87 = arith.constant 0 : index
    %99 = vector.load %arg24[%c25_86, %c0_87] : memref<42x64xbf16, #tpu.memory_space<vmem>>, vector<4x64xbf16>
    tpu.vector_store %arg24[%c25_86, %c0_87], %98 {strides = array<i32>} : memref<42x64xbf16, #tpu.memory_space<vmem>>, vector<4x64xbf16>,
    %c0_88 = arith.constant 0 : index
    %c0_89 = arith.constant 0 : index
    %100 = vector.load %arg24[%c0_88, %c0_89] : memref<42x64xbf16, #tpu.memory_space<vmem>>, vector<24x64xbf16>
    %c1_90 = arith.constant 1 : index
    %c0_91 = arith.constant 0 : index
    %101 = vector.load %arg24[%c1_90, %c0_91] : memref<42x64xbf16, #tpu.memory_space<vmem>>, vector<24x64xbf16>
    %c2_92 = arith.constant 2 : index
    %c0_93 = arith.constant 0 : index
    %102 = vector.load %arg24[%c2_92, %c0_93] : memref<42x64xbf16, #tpu.memory_space<vmem>>, vector<24x64xbf16>
    %c6 = arith.constant 6 : index
    %c0_94 = arith.constant 0 : index
    %103 = vector.load %arg24[%c6, %c0_94] : memref<42x64xbf16, #tpu.memory_space<vmem>>, vector<24x64xbf16>
    %c7_95 = arith.constant 7 : index
    %c0_96 = arith.constant 0 : index
    %104 = vector.load %arg24[%c7_95, %c0_96] : memref<42x64xbf16, #tpu.memory_space<vmem>>, vector<24x64xbf16>
    %c8_97 = arith.constant 8 : index
    %c0_98 = arith.constant 0 : index
    %105 = vector.load %arg24[%c8_97, %c0_98] : memref<42x64xbf16, #tpu.memory_space<vmem>>, vector<24x64xbf16>
    %c12_99 = arith.constant 12 : index
    %c0_100 = arith.constant 0 : index
    %106 = vector.load %arg24[%c12_99, %c0_100] : memref<42x64xbf16, #tpu.memory_space<vmem>>, vector<24x64xbf16>
    %c13_101 = arith.constant 13 : index
    %c0_102 = arith.constant 0 : index
    %107 = vector.load %arg24[%c13_101, %c0_102] : memref<42x64xbf16, #tpu.memory_space<vmem>>, vector<24x64xbf16>
    %c14 = arith.constant 14 : index
    %c0_103 = arith.constant 0 : index
    %108 = vector.load %arg24[%c14, %c0_103] : memref<42x64xbf16, #tpu.memory_space<vmem>>, vector<24x64xbf16>
    %109 = tpu.concatenate %100, %101, %102, %103, %104, %105, %106, %107, %108 in 1 : vector<24x64xbf16>, vector<24x64xbf16>, vector<24x64xbf16>, vector<24x64xbf16>, vector<24x64xbf16>, vector<24x64xbf16>, vector<24x64xbf16>, vector<24x64xbf16>, vector<24x64xbf16> -> vector<24x576xbf16>
    %c0_104 = arith.constant 0 : index
    %c0_105 = arith.constant 0 : index
    %110 = vector.load %arg6[%c0_104, %c0_105] : memref<576x128xbf16, #tpu.memory_space<vmem>>, vector<576x128xbf16>
    %cst_106 = arith.constant dense<0.000000e+00> : vector<24x128xf32>
    %111 = tpu.matmul %109, %110, %cst_106 {dimension_numbers = #tpu.dot_dimension_numbers<[1], [0], [0], [1], [0, 0, 1, 1], [], []>} : vector<24x576xbf16>, vector<576x128xbf16>, vector<24x128xf32> -> vector<24x128xf32>
    %c0_107 = arith.constant 0 : index
    %c0_108 = arith.constant 0 : index
    %112 = vector.load %arg7[%c0_107, %c0_108] : memref<1x128xf32, #tpu.memory_space<vmem>>, vector<1x128xf32>
    %113 = vector.broadcast %112 : vector<1x128xf32> to vector<24x128xf32>
    %114 = arith.addf %111, %113 : vector<24x128xf32>
    %cst_109 = arith.constant 0.000000e+00 : f32
    %115 = vector.broadcast %cst_109 : f32 to vector<24x128xf32>
    %116 = arith.maximumf %114, %115 : vector<24x128xf32>
    %c0_110 = arith.constant 0 : index
    %c0_111 = arith.constant 0 : index
    %117 = vector.load %arg25[%c0_110, %c0_111] : memref<24x128xf32, #tpu.memory_space<vmem>>, vector<24x128xf32>
    tpu.vector_store %arg25[%c0_110, %c0_111], %116 {strides = array<i32>} : memref<24x128xf32, #tpu.memory_space<vmem>>, vector<24x128xf32>,
    %cst_112 = arith.constant 0.000000e+00 : bf16
    %118 = vector.broadcast %cst_112 : bf16 to vector<20x128xbf16>
    %c0_113 = arith.constant 0 : index
    %c0_114 = arith.constant 0 : index
    %119 = vector.load %arg26[%c0_113, %c0_114] : memref<20x128xbf16, #tpu.memory_space<vmem>>, vector<20x128xbf16>
    tpu.vector_store %arg26[%c0_113, %c0_114], %118 {strides = array<i32>} : memref<20x128xbf16, #tpu.memory_space<vmem>>, vector<20x128xbf16>,
    %c0_115 = arith.constant 0 : index
    %c0_116 = arith.constant 0 : index
    %120 = tpu.strided_load %arg25[%c0_115, %c0_116] {strides = array<i32: 2, 1>} : memref<24x128xf32, #tpu.memory_space<vmem>>, vector<12x128xf32>
    %c1_117 = arith.constant 1 : index
    %c0_118 = arith.constant 0 : index
    %121 = tpu.strided_load %arg25[%c1_117, %c0_118] {strides = array<i32: 2, 1>} : memref<24x128xf32, #tpu.memory_space<vmem>>, vector<12x128xf32>
    %122 = arith.maximumf %120, %121 : vector<12x128xf32>
    %c0_119 = arith.constant 0 : index
    %c0_120 = arith.constant 0 : index
    %123 = vector.load %arg25[%c0_119, %c0_120] : memref<24x128xf32, #tpu.memory_space<vmem>>, vector<12x128xf32>
    tpu.vector_store %arg25[%c0_119, %c0_120], %122 {strides = array<i32>} : memref<24x128xf32, #tpu.memory_space<vmem>>, vector<12x128xf32>,
    %c0_121 = arith.constant 0 : index
    %c0_122 = arith.constant 0 : index
    %124 = vector.load %arg25[%c0_121, %c0_122] : memref<24x128xf32, #tpu.memory_space<vmem>>, vector<2x128xf32>
    %c3 = arith.constant 3 : index
    %c0_123 = arith.constant 0 : index
    %125 = vector.load %arg25[%c3, %c0_123] : memref<24x128xf32, #tpu.memory_space<vmem>>, vector<2x128xf32>
    %126 = arith.maximumf %124, %125 : vector<2x128xf32>
    %127 = arith.truncf %126 : vector<2x128xf32> to vector<2x128xbf16>
    %c5_124 = arith.constant 5 : index
    %c0_125 = arith.constant 0 : index
    %128 = vector.load %arg26[%c5_124, %c0_125] : memref<20x128xbf16, #tpu.memory_space<vmem>>, vector<2x128xbf16>
    tpu.vector_store %arg26[%c5_124, %c0_125], %127 {strides = array<i32>} : memref<20x128xbf16, #tpu.memory_space<vmem>>, vector<2x128xbf16>,
    %c6_126 = arith.constant 6 : index
    %c0_127 = arith.constant 0 : index
    %129 = vector.load %arg25[%c6_126, %c0_127] : memref<24x128xf32, #tpu.memory_space<vmem>>, vector<2x128xf32>
    %c9 = arith.constant 9 : index
    %c0_128 = arith.constant 0 : index
    %130 = vector.load %arg25[%c9, %c0_128] : memref<24x128xf32, #tpu.memory_space<vmem>>, vector<2x128xf32>
    %131 = arith.maximumf %129, %130 : vector<2x128xf32>
    %132 = arith.truncf %131 : vector<2x128xf32> to vector<2x128xbf16>
    %c9_129 = arith.constant 9 : index
    %c0_130 = arith.constant 0 : index
    %133 = vector.load %arg26[%c9_129, %c0_130] : memref<20x128xbf16, #tpu.memory_space<vmem>>, vector<2x128xbf16>
    tpu.vector_store %arg26[%c9_129, %c0_130], %132 {strides = array<i32>} : memref<20x128xbf16, #tpu.memory_space<vmem>>, vector<2x128xbf16>,
    %c0_131 = arith.constant 0 : index
    %c0_132 = arith.constant 0 : index
    %134 = vector.load %arg26[%c0_131, %c0_132] : memref<20x128xbf16, #tpu.memory_space<vmem>>, vector<8x128xbf16>
    %c1_133 = arith.constant 1 : index
    %c0_134 = arith.constant 0 : index
    %135 = vector.load %arg26[%c1_133, %c0_134] : memref<20x128xbf16, #tpu.memory_space<vmem>>, vector<8x128xbf16>
    %c2_135 = arith.constant 2 : index
    %c0_136 = arith.constant 0 : index
    %136 = vector.load %arg26[%c2_135, %c0_136] : memref<20x128xbf16, #tpu.memory_space<vmem>>, vector<8x128xbf16>
    %c4 = arith.constant 4 : index
    %c0_137 = arith.constant 0 : index
    %137 = vector.load %arg26[%c4, %c0_137] : memref<20x128xbf16, #tpu.memory_space<vmem>>, vector<8x128xbf16>
    %c5_138 = arith.constant 5 : index
    %c0_139 = arith.constant 0 : index
    %138 = vector.load %arg26[%c5_138, %c0_139] : memref<20x128xbf16, #tpu.memory_space<vmem>>, vector<8x128xbf16>
    %c6_140 = arith.constant 6 : index
    %c0_141 = arith.constant 0 : index
    %139 = vector.load %arg26[%c6_140, %c0_141] : memref<20x128xbf16, #tpu.memory_space<vmem>>, vector<8x128xbf16>
    %c8_142 = arith.constant 8 : index
    %c0_143 = arith.constant 0 : index
    %140 = vector.load %arg26[%c8_142, %c0_143] : memref<20x128xbf16, #tpu.memory_space<vmem>>, vector<8x128xbf16>
    %c9_144 = arith.constant 9 : index
    %c0_145 = arith.constant 0 : index
    %141 = vector.load %arg26[%c9_144, %c0_145] : memref<20x128xbf16, #tpu.memory_space<vmem>>, vector<8x128xbf16>
    %c10_146 = arith.constant 10 : index
    %c0_147 = arith.constant 0 : index
    %142 = vector.load %arg26[%c10_146, %c0_147] : memref<20x128xbf16, #tpu.memory_space<vmem>>, vector<8x128xbf16>
    %143 = tpu.concatenate %134, %135, %136, %137, %138, %139, %140, %141, %142 in 1 : vector<8x128xbf16>, vector<8x128xbf16>, vector<8x128xbf16>, vector<8x128xbf16>, vector<8x128xbf16>, vector<8x128xbf16>, vector<8x128xbf16>, vector<8x128xbf16>, vector<8x128xbf16> -> vector<8x1152xbf16>
    %c0_148 = arith.constant 0 : index
    %c0_149 = arith.constant 0 : index
    %144 = vector.load %arg8[%c0_148, %c0_149] : memref<1152x256xbf16, #tpu.memory_space<vmem>>, vector<1152x256xbf16>
    %cst_150 = arith.constant dense<0.000000e+00> : vector<8x256xf32>
    %145 = tpu.matmul %143, %144, %cst_150 {dimension_numbers = #tpu.dot_dimension_numbers<[1], [0], [0], [1], [0, 0, 1, 1], [], []>} : vector<8x1152xbf16>, vector<1152x256xbf16>, vector<8x256xf32> -> vector<8x256xf32>
    %c0_151 = arith.constant 0 : index
    %c0_152 = arith.constant 0 : index
    %146 = vector.load %arg9[%c0_151, %c0_152] : memref<1x256xf32, #tpu.memory_space<vmem>>, vector<1x256xf32>
    %147 = vector.broadcast %146 : vector<1x256xf32> to vector<8x256xf32>
    %148 = arith.addf %145, %147 : vector<8x256xf32>
    %cst_153 = arith.constant 0.000000e+00 : f32
    %149 = vector.broadcast %cst_153 : f32 to vector<8x256xf32>
    %150 = arith.maximumf %148, %149 : vector<8x256xf32>
    %c0_154 = arith.constant 0 : index
    %c0_155 = arith.constant 0 : index
    %151 = vector.load %arg27[%c0_154, %c0_155] : memref<8x256xf32, #tpu.memory_space<vmem>>, vector<8x256xf32>
    tpu.vector_store %arg27[%c0_154, %c0_155], %150 {strides = array<i32>} : memref<8x256xf32, #tpu.memory_space<vmem>>, vector<8x256xf32>,
    %c0_156 = arith.constant 0 : index
    %c0_157 = arith.constant 0 : index
    %152 = vector.load %arg11[%c0_156, %c0_157] : memref<1x1024xf32, #tpu.memory_space<vmem>>, vector<1x1024xf32>
    %c0_158 = arith.constant 0 : index
    %c0_159 = arith.constant 0 : index
    %153 = vector.load %arg27[%c0_158, %c0_159] : memref<8x256xf32, #tpu.memory_space<vmem>>, vector<1x256xf32>
    %154 = arith.truncf %153 : vector<1x256xf32> to vector<1x256xbf16>
    %c0_160 = arith.constant 0 : index
    %c0_161 = arith.constant 0 : index
    %c0_162 = arith.constant 0 : index
    %155 = vector.load %arg10[%c0_160, %c0_161, %c0_162] : memref<4x256x1024xbf16, #tpu.memory_space<vmem>>, vector<1x256x1024xbf16>
    %156 = vector.shape_cast %155 : vector<1x256x1024xbf16> to vector<256x1024xbf16>
    %cst_163 = arith.constant dense<0.000000e+00> : vector<1x1024xf32>
    %157 = tpu.matmul %154, %156, %cst_163 {dimension_numbers = #tpu.dot_dimension_numbers<[1], [0], [0], [1], [0, 0, 1, 1], [], []>} : vector<1x256xbf16>, vector<256x1024xbf16>, vector<1x1024xf32> -> vector<1x1024xf32>
    %158 = arith.addf %152, %157 : vector<1x1024xf32>
    %c1_164 = arith.constant 1 : index
    %c0_165 = arith.constant 0 : index
    %159 = vector.load %arg27[%c1_164, %c0_165] : memref<8x256xf32, #tpu.memory_space<vmem>>, vector<1x256xf32>
    %160 = arith.truncf %159 : vector<1x256xf32> to vector<1x256xbf16>
    %c1_166 = arith.constant 1 : index
    %c0_167 = arith.constant 0 : index
    %c0_168 = arith.constant 0 : index
    %161 = vector.load %arg10[%c1_166, %c0_167, %c0_168] : memref<4x256x1024xbf16, #tpu.memory_space<vmem>>, vector<1x256x1024xbf16>
    %162 = vector.shape_cast %161 : vector<1x256x1024xbf16> to vector<256x1024xbf16>
    %cst_169 = arith.constant dense<0.000000e+00> : vector<1x1024xf32>
    %163 = tpu.matmul %160, %162, %cst_169 {dimension_numbers = #tpu.dot_dimension_numbers<[1], [0], [0], [1], [0, 0, 1, 1], [], []>} : vector<1x256xbf16>, vector<256x1024xbf16>, vector<1x1024xf32> -> vector<1x1024xf32>
    %164 = arith.addf %158, %163 : vector<1x1024xf32>
    %c4_170 = arith.constant 4 : index
    %c0_171 = arith.constant 0 : index
    %165 = vector.load %arg27[%c4_170, %c0_171] : memref<8x256xf32, #tpu.memory_space<vmem>>, vector<1x256xf32>
    %166 = arith.truncf %165 : vector<1x256xf32> to vector<1x256xbf16>
    %c2_172 = arith.constant 2 : index
    %c0_173 = arith.constant 0 : index
    %c0_174 = arith.constant 0 : index
    %167 = vector.load %arg10[%c2_172, %c0_173, %c0_174] : memref<4x256x1024xbf16, #tpu.memory_space<vmem>>, vector<1x256x1024xbf16>
    %168 = vector.shape_cast %167 : vector<1x256x1024xbf16> to vector<256x1024xbf16>
    %cst_175 = arith.constant dense<0.000000e+00> : vector<1x1024xf32>
    %169 = tpu.matmul %166, %168, %cst_175 {dimension_numbers = #tpu.dot_dimension_numbers<[1], [0], [0], [1], [0, 0, 1, 1], [], []>} : vector<1x256xbf16>, vector<256x1024xbf16>, vector<1x1024xf32> -> vector<1x1024xf32>
    %170 = arith.addf %164, %169 : vector<1x1024xf32>
    %c5_176 = arith.constant 5 : index
    %c0_177 = arith.constant 0 : index
    %171 = vector.load %arg27[%c5_176, %c0_177] : memref<8x256xf32, #tpu.memory_space<vmem>>, vector<1x256xf32>
    %172 = arith.truncf %171 : vector<1x256xf32> to vector<1x256xbf16>
    %c3_178 = arith.constant 3 : index
    %c0_179 = arith.constant 0 : index
    %c0_180 = arith.constant 0 : index
    %173 = vector.load %arg10[%c3_178, %c0_179, %c0_180] : memref<4x256x1024xbf16, #tpu.memory_space<vmem>>, vector<1x256x1024xbf16>
    %174 = vector.shape_cast %173 : vector<1x256x1024xbf16> to vector<256x1024xbf16>
    %cst_181 = arith.constant dense<0.000000e+00> : vector<1x1024xf32>
    %175 = tpu.matmul %172, %174, %cst_181 {dimension_numbers = #tpu.dot_dimension_numbers<[1], [0], [0], [1], [0, 0, 1, 1], [], []>} : vector<1x256xbf16>, vector<256x1024xbf16>, vector<1x1024xf32> -> vector<1x1024xf32>
    %176 = arith.addf %170, %175 : vector<1x1024xf32>
    %cst_182 = arith.constant 0.000000e+00 : f32
    %177 = vector.broadcast %cst_182 : f32 to vector<1x1024xf32>
    %178 = arith.maximumf %176, %177 : vector<1x1024xf32>
    %179 = arith.truncf %178 : vector<1x1024xf32> to vector<1x1024xbf16>
    %c0_183 = arith.constant 0 : index
    %c0_184 = arith.constant 0 : index
    %180 = vector.load %arg12[%c0_183, %c0_184] : memref<1024x512xbf16, #tpu.memory_space<vmem>>, vector<1024x512xbf16>
    %cst_185 = arith.constant dense<0.000000e+00> : vector<1x512xf32>
    %181 = tpu.matmul %179, %180, %cst_185 {dimension_numbers = #tpu.dot_dimension_numbers<[1], [0], [0], [1], [0, 0, 1, 1], [], []>} : vector<1x1024xbf16>, vector<1024x512xbf16>, vector<1x512xf32> -> vector<1x512xf32>
    %c0_186 = arith.constant 0 : index
    %c0_187 = arith.constant 0 : index
    %182 = vector.load %arg13[%c0_186, %c0_187] : memref<1x512xf32, #tpu.memory_space<vmem>>, vector<1x512xf32>
    %183 = arith.addf %181, %182 : vector<1x512xf32>
    %cst_188 = arith.constant 0.000000e+00 : f32
    %184 = vector.broadcast %cst_188 : f32 to vector<1x512xf32>
    %185 = arith.maximumf %183, %184 : vector<1x512xf32>
    %186 = arith.truncf %185 : vector<1x512xf32> to vector<1x512xbf16>
    %c0_189 = arith.constant 0 : index
    %c0_190 = arith.constant 0 : index
    %187 = vector.load %arg14[%c0_189, %c0_190] : memref<512x128xbf16, #tpu.memory_space<vmem>>, vector<512x128xbf16>
    %cst_191 = arith.constant dense<0.000000e+00> : vector<1x128xf32>
    %188 = tpu.matmul %186, %187, %cst_191 {dimension_numbers = #tpu.dot_dimension_numbers<[1], [0], [0], [1], [0, 0, 1, 1], [], []>} : vector<1x512xbf16>, vector<512x128xbf16>, vector<1x128xf32> -> vector<1x128xf32>
    %c0_192 = arith.constant 0 : index
    %c0_193 = arith.constant 0 : index
    %189 = vector.load %arg15[%c0_192, %c0_193] : memref<1x128xf32, #tpu.memory_space<vmem>>, vector<1x128xf32>
    %190 = arith.addf %188, %189 : vector<1x128xf32>
    %cst_194 = arith.constant 0.000000e+00 : f32
    %191 = vector.broadcast %cst_194 : f32 to vector<1x128xf32>
    %192 = arith.maximumf %190, %191 : vector<1x128xf32>
    %193 = arith.truncf %192 : vector<1x128xf32> to vector<1x128xbf16>
    %c0_195 = arith.constant 0 : index
    %c0_196 = arith.constant 0 : index
    %194 = vector.load %arg16[%c0_195, %c0_196] : memref<128x32xbf16, #tpu.memory_space<vmem>>, vector<128x32xbf16>
    %cst_197 = arith.constant dense<0.000000e+00> : vector<1x32xf32>
    %195 = tpu.matmul %193, %194, %cst_197 {dimension_numbers = #tpu.dot_dimension_numbers<[1], [0], [0], [1], [0, 0, 1, 1], [], []>} : vector<1x128xbf16>, vector<128x32xbf16>, vector<1x32xf32> -> vector<1x32xf32>
    %c0_198 = arith.constant 0 : index
    %c0_199 = arith.constant 0 : index
    %196 = vector.load %arg17[%c0_198, %c0_199] : memref<1x32xf32, #tpu.memory_space<vmem>>, vector<1x32xf32>
    %197 = arith.addf %195, %196 : vector<1x32xf32>
    %cst_200 = arith.constant 0.000000e+00 : f32
    %198 = vector.broadcast %cst_200 : f32 to vector<1x32xf32>
    %199 = arith.maximumf %197, %198 : vector<1x32xf32>
    %200 = arith.truncf %199 : vector<1x32xf32> to vector<1x32xbf16>
    %c0_201 = arith.constant 0 : index
    %c0_202 = arith.constant 0 : index
    %201 = vector.load %arg18[%c0_201, %c0_202] : memref<32x10xbf16, #tpu.memory_space<vmem>>, vector<32x10xbf16>
    %cst_203 = arith.constant dense<0.000000e+00> : vector<1x10xf32>
    %202 = tpu.matmul %200, %201, %cst_203 {dimension_numbers = #tpu.dot_dimension_numbers<[1], [0], [0], [1], [0, 0, 1, 1], [], []>} : vector<1x32xbf16>, vector<32x10xbf16>, vector<1x10xf32> -> vector<1x10xf32>
    %c0_204 = arith.constant 0 : index
    %c0_205 = arith.constant 0 : index
    %203 = vector.load %arg19[%c0_204, %c0_205] : memref<1x10xf32, #tpu.memory_space<vmem>>, vector<1x10xf32>
    %204 = arith.addf %202, %203 : vector<1x10xf32>
    %c0_206 = arith.constant 0 : index
    %c0_207 = arith.constant 0 : index
    %c0_208 = arith.constant 0 : index
    %205 = vector.load %arg20[%c0_206, %c0_207, %c0_208] : memref<1x1x10xf32, #tpu.memory_space<vmem>>, vector<1x1x10xf32>
    %206 = vector.shape_cast %205 : vector<1x1x10xf32> to vector<1x10xf32>
    %207 = vector.shape_cast %204 : vector<1x10xf32> to vector<1x1x10xf32>
    tpu.vector_store %arg20[%c0_206, %c0_207, %c0_208], %207 {strides = array<i32>} : memref<1x1x10xf32, #tpu.memory_space<vmem>>, vector<1x1x10xf32>,
    return
  }
  func.func @transform_0(%arg0: i32) -> (i32, i32, i32) {
    %c0_i32 = arith.constant 0 : i32
    %c0_i32_0 = arith.constant 0 : i32
    %c0_i32_1 = arith.constant 0 : i32
    return %arg0, %c0_i32, %c0_i32_0 : i32, i32, i32
  }
  func.func @transform_1(%arg0: i32) -> (i32, i32) {
    %c0_i32 = arith.constant 0 : i32
    %c0_i32_0 = arith.constant 0 : i32
    %c0_i32_1 = arith.constant 0 : i32
    return %c0_i32, %c0_i32_0 : i32, i32
  }
  func.func @transform_2(%arg0: i32) -> (i32, i32) {
    %c0_i32 = arith.constant 0 : i32
    %c0_i32_0 = arith.constant 0 : i32
    %c0_i32_1 = arith.constant 0 : i32
    return %c0_i32, %c0_i32_0 : i32, i32
  }
  func.func @transform_3(%arg0: i32) -> (i32, i32) {
    %c0_i32 = arith.constant 0 : i32
    %c0_i32_0 = arith.constant 0 : i32
    %c0_i32_1 = arith.constant 0 : i32
    return %c0_i32, %c0_i32_0 : i32, i32
  }
  func.func @transform_4(%arg0: i32) -> (i32, i32) {
    %c0_i32 = arith.constant 0 : i32
    %c0_i32_0 = arith.constant 0 : i32
    %c0_i32_1 = arith.constant 0 : i32
    return %c0_i32, %c0_i32_0 : i32, i32
  }
  func.func @transform_5(%arg0: i32) -> (i32, i32) {
    %c0_i32 = arith.constant 0 : i32
    %c0_i32_0 = arith.constant 0 : i32
    %c0_i32_1 = arith.constant 0 : i32
    return %c0_i32, %c0_i32_0 : i32, i32
  }
  func.func @transform_6(%arg0: i32) -> (i32, i32) {
    %c0_i32 = arith.constant 0 : i32
    %c0_i32_0 = arith.constant 0 : i32
    %c0_i32_1 = arith.constant 0 : i32
    return %c0_i32, %c0_i32_0 : i32, i32
  }
  func.func @transform_7(%arg0: i32) -> (i32, i32) {
    %c0_i32 = arith.constant 0 : i32
    %c0_i32_0 = arith.constant 0 : i32
    %c0_i32_1 = arith.constant 0 : i32
    return %c0_i32, %c0_i32_0 : i32, i32
  }
  func.func @transform_8(%arg0: i32) -> (i32, i32) {
    %c0_i32 = arith.constant 0 : i32
    %c0_i32_0 = arith.constant 0 : i32
    %c0_i32_1 = arith.constant 0 : i32
    return %c0_i32, %c0_i32_0 : i32, i32
  }
  func.func @transform_9(%arg0: i32) -> (i32, i32, i32) {
    %c0_i32 = arith.constant 0 : i32
    %c0_i32_0 = arith.constant 0 : i32
    %c0_i32_1 = arith.constant 0 : i32
    %c0_i32_2 = arith.constant 0 : i32
    return %c0_i32, %c0_i32_0, %c0_i32_1 : i32, i32, i32
  }
  func.func @transform_10(%arg0: i32) -> (i32, i32) {
    %c0_i32 = arith.constant 0 : i32
    %c0_i32_0 = arith.constant 0 : i32
    %c0_i32_1 = arith.constant 0 : i32
    return %c0_i32, %c0_i32_0 : i32, i32
  }
  func.func @transform_11(%arg0: i32) -> (i32, i32) {
    %c0_i32 = arith.constant 0 : i32
    %c0_i32_0 = arith.constant 0 : i32
    %c0_i32_1 = arith.constant 0 : i32
    return %c0_i32, %c0_i32_0 : i32, i32
  }
  func.func @transform_12(%arg0: i32) -> (i32, i32) {
    %c0_i32 = arith.constant 0 : i32
    %c0_i32_0 = arith.constant 0 : i32
    %c0_i32_1 = arith.constant 0 : i32
    return %c0_i32, %c0_i32_0 : i32, i32
  }
  func.func @transform_13(%arg0: i32) -> (i32, i32) {
    %c0_i32 = arith.constant 0 : i32
    %c0_i32_0 = arith.constant 0 : i32
    %c0_i32_1 = arith.constant 0 : i32
    return %c0_i32, %c0_i32_0 : i32, i32
  }
  func.func @transform_14(%arg0: i32) -> (i32, i32) {
    %c0_i32 = arith.constant 0 : i32
    %c0_i32_0 = arith.constant 0 : i32
    %c0_i32_1 = arith.constant 0 : i32
    return %c0_i32, %c0_i32_0 : i32, i32
  }
  func.func @transform_15(%arg0: i32) -> (i32, i32) {
    %c0_i32 = arith.constant 0 : i32
    %c0_i32_0 = arith.constant 0 : i32
    %c0_i32_1 = arith.constant 0 : i32
    return %c0_i32, %c0_i32_0 : i32, i32
  }
  func.func @transform_16(%arg0: i32) -> (i32, i32) {
    %c0_i32 = arith.constant 0 : i32
    %c0_i32_0 = arith.constant 0 : i32
    %c0_i32_1 = arith.constant 0 : i32
    return %c0_i32, %c0_i32_0 : i32, i32
  }
  func.func @transform_17(%arg0: i32) -> (i32, i32) {
    %c0_i32 = arith.constant 0 : i32
    %c0_i32_0 = arith.constant 0 : i32
    %c0_i32_1 = arith.constant 0 : i32
    return %c0_i32, %c0_i32_0 : i32, i32
  }
  func.func @transform_18(%arg0: i32) -> (i32, i32) {
    %c0_i32 = arith.constant 0 : i32
    %c0_i32_0 = arith.constant 0 : i32
    %c0_i32_1 = arith.constant 0 : i32
    return %c0_i32, %c0_i32_0 : i32, i32
  }
  func.func @transform_19(%arg0: i32) -> (i32, i32, i32) {
    %c0_i32 = arith.constant 0 : i32
    %c0_i32_0 = arith.constant 0 : i32
    %c0_i32_1 = arith.constant 0 : i32
    return %arg0, %c0_i32, %c0_i32_0 : i32, i32, i32
  }
}

</mosaic_0001>

<bundles_post_ra>
// kernel: cnn_forward.1
= control target key start
LH: loop header
LB: loop body
LE: loop exit
PB: predicated region body
PF: predicated region fallthrough
CT: control target
= control target key end

     0   :  { %s17472_s0 = inlined_call_operand.vmem [shape: bf16[2,256,36], index: 0, kind: input, shape index: {}]   ;;  %s17473_s1 = inlined_call_operand.vmem [shape: bf16[36,32], index: 1, kind: input, shape index: {}]   ;;  %s17474_s2 = inlined_call_operand.vmem [shape: f32[1,32], index: 2, kind: input, shape index: {}]   ;;  %s17475_s3 = inlined_call_operand.vmem [shape: bf16[288,64], index: 3, kind: input, shape index: {}]   ;;  %s17476_s4 = inlined_call_operand.vmem [shape: f32[1,64], index: 4, kind: input, shape index: {}]   ;;  %s17477_s5 = inlined_call_operand.vmem [shape: bf16[576,128], index: 5, kind: input, shape index: {}]   ;;  %s17478_s6 = inlined_call_operand.vmem [shape: f32[1,128], index: 6, kind: input, shape index: {}]   ;;  %s17479_s7 = inlined_call_operand.vmem [shape: bf16[1152,256], index: 7, kind: input, shape index: {}]   ;;  %s17480_s8 = inlined_call_operand.vmem [shape: f32[1,256], index: 8, kind: input, shape index: {}]   ;;  %s17481_s9 = inlined_call_operand.vmem [shape: bf16[4,256,1024], index: 9, kind: input, shape index: {}]   ;;  %s17482_s10 = inlined_call_operand.vmem [shape: f32[1,1024], index: 10, kind: input, shape index: {}]   ;;  %s17483_s11 = inlined_call_operand.vmem [shape: bf16[1024,512], index: 11, kind: input, shape index: {}]   ;;  %s17484_s12 = inlined_call_operand.vmem [shape: f32[1,512], index: 12, kind: input, shape index: {}]   ;;  %s17485_s13 = inlined_call_operand.vmem [shape: bf16[512,128], index: 13, kind: input, shape index: {}]   ;;  %s17486_s14 = inlined_call_operand.vmem [shape: f32[1,128], index: 14, kind: input, shape index: {}]   ;;  %s17487_s15 = inlined_call_operand.vmem [shape: bf16[128,32], index: 15, kind: input, shape index: {}]   ;;  %s17488_s16 = inlined_call_operand.vmem [shape: f32[1,32], index: 16, kind: input, shape index: {}]   ;;  %s17489_s17 = inlined_call_operand.vmem [shape: bf16[32,10], index: 17, kind: input, shape index: {}]   ;;  %s17490_s18 = inlined_call_operand.vmem [shape: f32[1,10], index: 18, kind: input, shape index: {}]   ;;  %s17491_s19 = inlined_call_operand.hbm [shape: f32[2,1,10], index: 19, kind: output, shape index: {}]  }
   0x1   :  { %17505 = sst [smem:[#allocation17_spill]] %s17472_s0 }
   0x2   :  { %17506 = sst [smem:[#allocation18_spill]] %s17473_s1 }
   0x3   :  { %17507 = sst [smem:[#allocation19_spill]] %s17474_s2 }
   0x4   :  { %17508 = sst [smem:[#allocation20_spill]] %s17475_s3 }
   0x5   :  { %17509 = sst [smem:[#allocation21_spill]] %s17476_s4 }
   0x6   :  { %17510 = sst [smem:[#allocation22_spill]] %s17477_s5 }
   0x7   :  { %24 = vsyncpa [#allocation10], 0 }
   0x8   :  { %26 = vsyncpa [#allocation10 + $0x1], 0  ;;  %s13409_s0 = smov 0   ;;  %s13411_s30 = smov 0  }
   0x9   :  { %s13413_s20 = smov 0   ;;  %s13415_s21 = smov 0  }
   0xa LB: > { %17511 = sst [smem:[#allocation12_spill]] %s13287_s0  ;;  %s13430_s1 = sadd.s32 4294967295, %s13299_s21   ;;  %s13299_s21 = sphi %s13415_s21, %s17548_s21   ;;  %s13295_s20 = sphi %s13413_s20, %s17550_s20   ;;  %s13291_s30 = sphi %s13411_s30, %s17552_s30   ;;  %s13287_s0 = sphi %s13409_s0, %s17551_s0  }
   0xb   : > { %17512 = sst [smem:[#allocation13_spill]] %s13295_s20  ;;  %s10598_s22 = sadd.s32 4294967294, %s13299_s21  }
   0xc   : > { %s13434_s2 = sadd.s32 1, %s13299_s21   ;;  %s443_s23 = sadd.s32 1, %s13295_s20 }
   0xd   : > { %17513 = sst [smem:[#allocation14_spill]] %s13434_s2  ;;  %s440_s24 = ssub.s32 %s13299_s21, %s13434_s2 }
   0xe   : > { %p453_p0 = scmp.ne.s32.totalorder %s13295_s20, %s13291_s30  ;;  %p441_p1 = scmp.eq.s32.totalorder %s440_s24, 0 }
   0xf   : > { %p454_p2 = scmp.eq.s32.totalorder %s13430_s1, 1  ;;  %p459_p3 = scmp.ne.s32.totalorder %s13291_s30, %s13287_s0 }
  0x10   : > { %p460_p4 = scmp.eq.s32.totalorder %s10598_s22, 1  ;;  %p10601_p7 = scmp.ge.s32.totalorder %s13299_s21, 1 }
  0x11   : > { %s13445_s25 = scalar_select %p441_p1, %s13295_s20, %s443_s23  }
  0x12   : > { %p13447_p5 = por %p454_p2, %p453_p0  ;;  %p13451_p6 = por %p460_p4, %p459_p3 }
  0x13   : > { %17514 = sst [smem:[#allocation15_spill]] %s13445_s25  ;;  %p540_p8 = scmp.lt.s32.totalorder %s13299_s21, 3 }
  0x14   : > { %s17516_s26 = scalar_select %p13451_p6, 1, 0 }
  0x15   : > { %p541_p9 = pnand %p10601_p7, %p540_p8 }
  0x16   : > { %17517 = sst [smem:[#allocation16_spill]] %s17516_s26  ;;  %s17518_s29 = sld [smem:[#allocation18_spill]] (!%p541_p9)  ;;  %vm17499_vm0 = vcmask (!%p541_p9), 1041408   ;;  %vm740_vm1 = vcmask (!%p541_p9), 293888   ;;  %vm1019_vm2 = vcmask (!%p541_p9), 257024   ;;  %v13301_v20 = vmov (!%p541_p9), 0  }
  0x17   : > { %544 = sbr.rel (%p541_p9) target bundleno = 3573 (0xdf5), region = 96  ;;  %p595_p10 = scmp.lt.s32.totalorder (!%p541_p9), %s13430_s1, 1  ;;  %1020 = vst.msk [vmem:[#allocation3] sm:$0xf] (!%p541_p9), %vm1019_vm2, %v13301_v20  ;;  %1021 = vst.msk [vmem:[#allocation3 + $0x4] sm:$0xf] (!%p541_p9), %vm1019_vm2, %v13301_v20 }
  0x18   : > { %s17519_s26 = sld [smem:[#allocation17_spill]] (!%p541_p9)  ;;  %1022 = vst.msk [vmem:[#allocation3 + $0x8] sm:$0xf] (!%p541_p9), %vm1019_vm2, %v13301_v20  ;;  %1023 = vst.msk [vmem:[#allocation3 + $0xc] sm:$0xf] (!%p541_p9), %vm1019_vm2, %v13301_v20  ;;  %vm1033_vm3 = vcmask (!%p541_p9), 256000  }
  0x19   : > { %1026 = vst.msk [vmem:[#allocation3 + $0x18] sm:$0xf] (!%p541_p9), %vm1019_vm2, %v13301_v20  ;;  %1024 = vst.msk [vmem:[#allocation3 + $0x10] sm:$0xf] (!%p541_p9), %vm1019_vm2, %v13301_v20  ;;  %vm1243_vm4 = vsmask.f32 (!%p541_p9), 256 }
  0x1a   : > { %1025 = vst.msk [vmem:[#allocation3 + $0x14] sm:$0xf] (!%p541_p9), %vm1019_vm2, %v13301_v20  ;;  %1027 = vst.msk [vmem:[#allocation3 + $0x1c] sm:$0xf] (!%p541_p9), %vm1019_vm2, %v13301_v20  ;;  %vm2100_vm5 = vcmask (!%p541_p9), 516096   ;;  %vm986_vm7 = vcmask (!%p541_p9), 261120  }
  0x1b   : > { %1028 = vst.msk [vmem:[#allocation3 + $0x20] sm:$0xf] (!%p541_p9), %vm1019_vm2, %v13301_v20  ;;  %1029 = vst.msk [vmem:[#allocation3 + $0x24] sm:$0xf] (!%p541_p9), %vm1019_vm2, %v13301_v20  ;;  %s17523_s22 = sld [smem:[#allocation20_spill]] (!%p541_p9)  ;;  %vm1148_vm8 = vcmask (!%p541_p9), 257025  }
  0x1c   : > { %v12499_v0 = vld [vmem:[%s17518_s29] sm:$0xff] (!%p541_p9)   ;;  %v12500_v1 = vld [vmem:[%s17518_s29 + $0x8] sm:$0xff] (!%p541_p9)   ;;  %v12501_v2 = vld [vmem:[%s17518_s29 + $0x10] ss:$0 sps:$4 sm:$0x33] (!%p541_p9)   ;;  %vm1154_vm10 = vcmask (!%p541_p9), 254976  }
  0x1d   : > { %12304 = vmatprep.subr.bf16.mxu0 (!%p541_p9), %v12499_v0  ;;  %v791_v4 = vsel (!%p541_p9), %vm17499_vm0, %v12501_v2, 0  ;;  %1030 = vst.msk [vmem:[#allocation3 + $0x28] sm:$0xf] (!%p541_p9), %vm1019_vm2, %v13301_v20  ;;  %1031 = vst.msk [vmem:[#allocation3 + $0x2c] sm:$0xf] (!%p541_p9), %vm1019_vm2, %v13301_v20  ;;  %vm1178_vm15 = vcmask (!%p541_p9), 257026  }
  0x1e   : > { %12305 = vmatpush3.bf16.msra.mxu0 %v12499_v0  ;;  %s596_s20 = scalar_select %p595_p10, %s13430_s1, 1  ;;  %1032 = vst.msk [vmem:[#allocation3 + $0x30] sm:$0xf] %vm1019_vm2, %v13301_v20  ;;  %2839 = vst [vmem:[#allocation7] sm:$0xf] %v13301_v20 }
  0x1f   : > { %12306 = vmatprep.subr.bf16.mxu0 %v12500_v1  ;;  %2840 = vst [vmem:[#allocation7 + $0x4] sm:$0xf] %v13301_v20  ;;  %2841 = vst [vmem:[#allocation7 + $0x8] sm:$0x3] %v13301_v20  ;;  %vm1149_vm9 = vsmask.f32 7942 }
  0x20   : > { %s12099_s2 = sshll.u32 %s596_s20, 7  ;;  %vm13537_vm6 = vmand %vm2100_vm5, %vm1243_vm4  ;;  %vm17501_vm11 = vsmask.f32 1280  ;;  %vm17500_vm14 = vsmask.f32 7946  ;;  %s13304_s20 = smov 96  }
  0x21   : > { %s13471_s0 = scalar_lea.vmem %s17519_s26, %s12099_s2  ;;  %s17522_s2 = sld [smem:[#allocation19_spill]]  ;;  %v12529_v33 = vld [vmem:[%s17523_s22 + $0x40] sm:$0xff]   ;;  %v12531_v35 = vld [vmem:[%s17523_s22 + $0x48] sm:$0xff]   ;;  %v12533_v40 = vld [vmem:[%s17523_s22 + $0x50] sm:$0xff]  }
  0x22   : > { %12307 = vmatpush3.bf16.msra.mxu0 %v12500_v1  ;;  %v12502_v3 = vld [vmem:[%s13471_s0] sm:$0xff]   ;;  %v12503_v5 = vld [vmem:[%s13471_s0 + $0x8] sm:$0xff]   ;;  %v12504_v6 = vld [vmem:[%s13471_s0 + $0x10] sm:$0xff]   ;;  %12133 = vmatprep.subr.bf16.mxu1 %v12529_v33  ;;  %s17502_s26 = smov 64   ;;  %s17540_s5 = sld [smem:[#allocation22_spill]] }
  0x23   : > { %12452 = vmatprep.subr.msk.bf16.mxu0 %vm17499_vm0, %v12501_v2  ;;  %12310 = vmatprep.mubr.msk.bf16.mxu0 %vm740_vm1, %v12502_v3  ;;  %v12505_v7 = vld [vmem:[%s13471_s0 + $0x18] sm:$0xff]   ;;  %v12506_v8 = vld [vmem:[%s13471_s0 + $0x20] sm:$0xff]   ;;  %v12507_v9 = vld [vmem:[%s13471_s0 + $0x28] sm:$0xff]   ;;  %vm1393_vm0 = vsmask.f32 7424  ;;  %s17541_s4 = sld [smem:[#allocation21_spill]] }
  0x24   : > { %v12508_v10 = vld [vmem:[%s13471_s0 + $0x30] sm:$0xff]   ;;  %v12509_v11 = vld [vmem:[%s13471_s0 + $0x38] sm:$0xff]   ;;  %v12510_v12 = vld [vmem:[%s13471_s0 + $0x40] sm:$0xff]   ;;  %s593_s28 = sand.u32 1, %s13291_s30  }
  0x25   : > { %v12511_v13 = vld [vmem:[%s13471_s0 + $0x48] sm:$0xff]   ;;  %v12512_v14 = vld [vmem:[%s13471_s0 + $0x50] sm:$0xff]   ;;  %v12513_v15 = vld [vmem:[%s13471_s0 + $0x58] sm:$0xff]  }
  0x26   : > { %12309 = vmatpush3.bf16.msra.mxu0 %v791_v4  ;;  %v12514_v16 = vld [vmem:[%s13471_s0 + $0x60] sm:$0xff]   ;;  %v12515_v17 = vld [vmem:[%s13471_s0 + $0x68] sm:$0xff]   ;;  %v12516_v18 = vld [vmem:[%s13471_s0 + $0x70] sm:$0xff]  }
  0x27   : > { %v12517_v19 = vld [vmem:[%s13471_s0 + $0x78] sm:$0xff]   ;;  %v13544_v22 = vld [vmem:[%s17522_s2] ss:$0 sm:$0xff]  ;;  %v12532_v38 = vld [vmem:[%s17523_s22 + $0x8] sm:$0xff]   ;;  %s13303_s0 = smov 32   ;;  %s12096_s2 = sshll.u32 %s13430_s1, 4 }
  0x28   : > { %v12530_v34 = vld [vmem:[%s17523_s22] sm:$0xff]   ;;  %v12534_v48 = vld [vmem:[%s17523_s22 + $0x10] sm:$0xff]   ;;  %v12535_v51 = vld [vmem:[%s17523_s22 + $0x58] sm:$0xff]   ;;  %s10531_s1 = scalar_lea.sflag [#allocation10], %s593_s28 }
  0x29   : > { %12311 = vmatmul.mubr.msk.bf16.vlgmr.msra.gmra.mrb[0].mxu0 %vm740_vm1, %v12503_v5  ;;  %12134 = vmatpush3.bf16.msra.mxu1 %v12530_v34  ;;  %v12536_v59 = vld [vmem:[%s17523_s22 + $0x18] sm:$0xff]   ;;  %vm13610_vm12 = vmand %vm1148_vm8, %vm1149_vm9  ;;  %vm1208_vm8 = vcmask 257027   ;;  %vm1209_vm9 = vsmask.f32 7950 }
  0x2a   : > { %12314 = vmatprep.mubr.msk.bf16.mxu0 %vm740_vm1, %v12504_v6  ;;  %12135 = vmatprep.subr.bf16.mxu1 %v12531_v35  ;;  %vm13619_vm13 = vmand %vm1154_vm10, %vm17501_vm11 }
  0x2b   : > { %vm13637_vm5 = vmand %vm1178_vm15, %vm17500_vm14  ;;  %vm1215_vm15 = vsmask.f32 3328  ;;  %vm1451_vm14 = vcmask 1046528  }
  0x2d   : > { %12136 = vmatpush3.bf16.msra.mxu1 %v12532_v38 }
  0x2e   : > { %12137 = vmatprep.subr.bf16.mxu1 %v12533_v40 }
  0x31   : > { %12315 = vmatmul.mubr.msk.bf16.gmra.mrb[4].mxu0 %vm740_vm1, %v12505_v7  ;;  %12138 = vmatpush3.bf16.msra.mxu1 %v12534_v48 }
  0x32   : > { %12318 = vmatprep.mubr.msk.bf16.mxu0 %vm740_vm1, %v12506_v8  ;;  %12139 = vmatprep.subr.bf16.mxu1 %v12535_v51 }
  0x35   : > { %12140 = vmatpush3.bf16.msra.mxu1 %v12536_v59  ;;  %v1157_v59 = vld [vmem:[#allocation3 + $0x8] sm:$0x3] }
  0x39   : > { %12319 = vmatmul.mubr.msk.bf16.gmra.mrb[8].mxu0 %vm740_vm1, %v12507_v9 }
  0x3a   : > { %12322 = vmatprep.mubr.msk.bf16.mxu0 %vm740_vm1, %v12508_v10 }
  0x41   : > { %12323 = vmatmul.mubr.msk.bf16.gmra.mrb[12].mxu0 %vm740_vm1, %v12509_v11 }
  0x42   : > { %12326 = vmatprep.mubr.msk.bf16.mxu0 %vm740_vm1, %v12510_v12 }
  0x49   : > { %12327 = vmatmul.mubr.msk.bf16.gmra.mrb[16].mxu0 %vm740_vm1, %v12511_v13 }
  0x4a   : > { %12330 = vmatprep.mubr.msk.bf16.mxu0 %vm740_vm1, %v12512_v14 }
  0x51   : > { %12331 = vmatmul.mubr.msk.bf16.gmra.mrb[20].mxu0 %vm740_vm1, %v12513_v15 }
  0x52   : > { %12334 = vmatprep.mubr.msk.bf16.mxu0 %vm740_vm1, %v12514_v16 }
  0x59   : > { %12335 = vmatmul.mubr.msk.bf16.gmra.mrb[24].mxu0 %vm740_vm1, %v12515_v17 }
  0x5a   : > { %12338 = vmatprep.mubr.msk.bf16.mxu0 %vm740_vm1, %v12516_v18 }
  0x61   : > { %12339 = vmatmul.mubr.msk.bf16.gmra.mrb[28].mxu0 %vm740_vm1, %v12517_v19  ;;  %vm1185_vm1 = vsmask.f32 2304 }
  0x62   : > { %vm13646_vm10 = vmand %vm1033_vm3, %vm1185_vm1  ;;  %vm1237_vm1 = vsmask.f32 7938 }
  0x63   : > { %vm13658_vm3 = vmand %vm1208_vm8, %vm1209_vm9 }
  0x64   : > { %vm13690_vm8 = vmand %vm1019_vm2, %vm1215_vm15  ;;  %vm1242_vm15 = vcmask 253952  }
  0x65   : > { %vm13719_vm11 = vmand %vm1019_vm2, %vm1237_vm1  ;;  %vm1566_vm2 = vcmask 1045504  }
  0x66   : > { %vm13757_vm1 = vmand %vm1242_vm15, %vm1243_vm4  ;;  %vm1621_vm4 = vsmask.f32 5376 }
  0xfc   : > { %v12312_v23 = vpop.f32.mrb[0].mxu0 }
  0xfd   : > { %v836_v24 = vadd.f32 %v12312_v23, %v13544_v22  ;;  %v827_v25 = vpop.f32.mrb[1].mxu0 }
  0xfe   : > { %v828_v26 = vadd.f32 %v13544_v22, %v827_v25  ;;  %v12313_v27 = vpop.f32.mrb[2].mxu0 }
  0xff   : > { %v956_v28 = vmax.f32 %v836_v24, 0.0  ;;  %v839_v29 = vadd.f32 %v12313_v27, %v13544_v22  ;;  %v830_v30 = vpop.f32.mrb[3].mxu0 }
 0x100   : > { %v954_v31 = vmax.f32 %v828_v26, 0.0  ;;  %v831_v32 = vadd.f32 %v13544_v22, %v830_v30 }
 0x101   : > { %989 = vst.msk [vmem:[#allocation2 + $0x10] sm:$0xff] %vm986_vm7, %v956_v28  ;;  %v957_v36 = vmax.f32 %v839_v29, 0.0 }
 0x102   : > { %987 = vst.msk [vmem:[#allocation2] sm:$0xff] %vm986_vm7, %v954_v31  ;;  %v955_v37 = vmax.f32 %v831_v32, 0.0 }
 0x103   : > { %990 = vst.msk [vmem:[#allocation2 + $0x18] sm:$0xff] %vm986_vm7, %v957_v36 }
 0x104   : > { %988 = vst.msk [vmem:[#allocation2 + $0x8] sm:$0xff] %vm986_vm7, %v955_v37  ;;  %v12316_v39 = vpop.f32.mrb[4].mxu0 }
 0x105   : > { %v852_v41 = vadd.f32 %v12316_v39, %v13544_v22  ;;  %v843_v42 = vpop.f32.mrb[5].mxu0 }
 0x106   : > { %v844_v43 = vadd.f32 %v13544_v22, %v843_v42  ;;  %v12317_v44 = vpop.f32.mrb[6].mxu0 }
 0x107   : > { %v960_v45 = vmax.f32 %v852_v41, 0.0  ;;  %v855_v46 = vadd.f32 %v12317_v44, %v13544_v22  ;;  %v846_v47 = vpop.f32.mrb[7].mxu0 }
 0x108   : > { %v958_v49 = vmax.f32 %v844_v43, 0.0  ;;  %v847_v50 = vadd.f32 %v13544_v22, %v846_v47 }
 0x109   : > { %993 = vst.msk [vmem:[#allocation2 + $0x30] sm:$0xff] %vm986_vm7, %v960_v45  ;;  %v961_v52 = vmax.f32 %v855_v46, 0.0 }
 0x10a   : > { %v1037_v53 = vld [vmem:[#allocation2 + $0x10] ss:$2 sm:$0xff]  ;;  %v1069_v54 = vld [vmem:[#allocation2 + $0x11] ss:$2 sm:$0xff]  ;;  %991 = vst.msk [vmem:[#allocation2 + $0x20] sm:$0xff] %vm986_vm7, %v958_v49  ;;  %v959_v55 = vmax.f32 %v847_v50, 0.0 }
 0x10b   : > { %v1035_v56 = vld [vmem:[#allocation2] ss:$2 sm:$0xff]  ;;  %v1067_v57 = vld [vmem:[#allocation2 + $0x1] ss:$2 sm:$0xff]  ;;  %v1099_v58 = vmax.f32 %v1037_v53, %v1069_v54  ;;  %994 = vst.msk [vmem:[#allocation2 + $0x38] sm:$0xff] %vm986_vm7, %v961_v52 }
 0x10c   : > { %v1098_v60 = vmax.f32 %v1035_v56, %v1067_v57  ;;  %992 = vst.msk [vmem:[#allocation2 + $0x28] sm:$0xff] %vm986_vm7, %v959_v55  ;;  %v12320_v61 = vpop.f32.mrb[8].mxu0  ;;  %v1151_v49 = vld [vmem:[#allocation3 + $0x4] sm:$0xe] }
 0x10d   : > { %1115 = vst.msk [vmem:[#allocation2 + $0x8] sm:$0xff] %vm986_vm7, %v1099_v58  ;;  %v868_v62 = vadd.f32 %v12320_v61, %v13544_v22  ;;  %v859_v63 = vpop.f32.mrb[9].mxu0 }
 0x10e   : > { %1114 = vst.msk [vmem:[#allocation2] sm:$0xff] %vm986_vm7, %v1098_v60  ;;  %v860_v0 = vadd.f32 %v13544_v22, %v859_v63  ;;  %v12321_v1 = vpop.f32.mrb[10].mxu0 }
 0x10f   : > { %v964_v2 = vmax.f32 %v868_v62, 0.0  ;;  %v871_v3 = vadd.f32 %v12321_v1, %v13544_v22  ;;  %v862_v4 = vpop.f32.mrb[11].mxu0 }
 0x110   : > { %v962_v5 = vmax.f32 %v860_v0, 0.0  ;;  %v863_v6 = vadd.f32 %v13544_v22, %v862_v4 }
 0x111   : > { %997 = vst.msk [vmem:[#allocation2 + $0x50] sm:$0xff] %vm986_vm7, %v964_v2  ;;  %v965_v7 = vmax.f32 %v871_v3, 0.0 }
 0x112   : > { %v1041_v8 = vld [vmem:[#allocation2 + $0x30] ss:$2 sm:$0xff]  ;;  %v1073_v9 = vld [vmem:[#allocation2 + $0x31] ss:$2 sm:$0xff]  ;;  %995 = vst.msk [vmem:[#allocation2 + $0x40] sm:$0xff] %vm986_vm7, %v962_v5  ;;  %v963_v10 = vmax.f32 %v863_v6, 0.0 }
 0x113   : > { %v1101_v11 = vmax.f32 %v1041_v8, %v1073_v9  ;;  %v1039_v12 = vld [vmem:[#allocation2 + $0x20] ss:$2 sm:$0xff]  ;;  %v1071_v13 = vld [vmem:[#allocation2 + $0x21] ss:$2 sm:$0xff]  ;;  %998 = vst.msk [vmem:[#allocation2 + $0x58] sm:$0xff] %vm986_vm7, %v965_v7 }
 0x114   : > { %v1131_v14 = vld [vmem:[#allocation2 + $0x8] sm:$0xff]  ;;  %v1100_v15 = vmax.f32 %v1039_v12, %v1071_v13  ;;  %996 = vst.msk [vmem:[#allocation2 + $0x48] sm:$0xff] %vm986_vm7, %v963_v10  ;;  %v12324_v16 = vpop.f32.mrb[12].mxu0 }
 0x115   : > { %v1130_v17 = vld [vmem:[#allocation2] sm:$0xff]  ;;  %1117 = vst.msk [vmem:[#allocation2 + $0x18] sm:$0xff] %vm986_vm7, %v1101_v11  ;;  %v884_v18 = vadd.f32 %v12324_v16, %v13544_v22  ;;  %v875_v19 = vpop.f32.mrb[13].mxu0 }
 0x116   : > { %v1132_v23 = vmax.f32 %v1130_v17, %v1131_v14  ;;  %1116 = vst.msk [vmem:[#allocation2 + $0x10] sm:$0xff] %vm986_vm7, %v1100_v15  ;;  %v876_v24 = vadd.f32 %v13544_v22, %v875_v19  ;;  %v12325_v25 = vpop.f32.mrb[14].mxu0 }
 0x117   : > { %v968_v26 = vmax.f32 %v884_v18, 0.0  ;;  %v887_v27 = vadd.f32 %v12325_v25, %v13544_v22  ;;  %v878_v28 = vpop.f32.mrb[15].mxu0  ;;  %v1181_v25 = vld [vmem:[#allocation3 + $0x8] sm:$0xc] }
 0x118   : > { %v12100_v29 = vpack.c.bf16 %v1132_v23, %v1132_v23  ;;  %v966_v30 = vmax.f32 %v876_v24, 0.0  ;;  %v879_v31 = vadd.f32 %v13544_v22, %v878_v28 }
 0x119   : > { %1001 = vst.msk [vmem:[#allocation2 + $0x70] sm:$0xff] %vm986_vm7, %v968_v26  ;;  %v969_v32 = vmax.f32 %v887_v27, 0.0 }
 0x11a   : > { %v1138_v33 = vshrl.u32 %v12100_v29, 16  ;;  %v1141_v34 = vshll.u32 %v12100_v29, 16  ;;  %v1045_v35 = vld [vmem:[#allocation2 + $0x50] ss:$2 sm:$0xff]  ;;  %v1077_v36 = vld [vmem:[#allocation2 + $0x51] ss:$2 sm:$0xff] }
 0x11b   : > { %999 = vst.msk [vmem:[#allocation2 + $0x60] sm:$0xff] %vm986_vm7, %v966_v30  ;;  %v1103_v37 = vmax.f32 %v1045_v35, %v1077_v36  ;;  %v1043_v38 = vld [vmem:[#allocation2 + $0x40] ss:$2 sm:$0xff]  ;;  %v1075_v39 = vld [vmem:[#allocation2 + $0x41] ss:$2 sm:$0xff]  ;;  %1002 = vst.msk [vmem:[#allocation2 + $0x78] sm:$0xff] %vm986_vm7, %v969_v32 }
 0x11c   : > { %v967_v40 = vmax.f32 %v879_v31, 0.0  ;;  %v1140_v41 = vrot.slane %v1138_v33, 6  ;;  %v1143_v42 = vrot.slane %v1141_v34, 7  ;;  %v1102_v43 = vmax.f32 %v1043_v38, %v1075_v39  ;;  %v12328_v44 = vpop.f32.mrb[16].mxu0  ;;  %v1161_v45 = vld [vmem:[#allocation2 + $0x18] sm:$0xff] }
 0x11d   : > { %1119 = vst.msk [vmem:[#allocation2 + $0x28] sm:$0xff] %vm986_vm7, %v1103_v37  ;;  %v900_v46 = vadd.f32 %v12328_v44, %v13544_v22  ;;  %v891_v47 = vpop.f32.mrb[17].mxu0  ;;  %v1160_v50 = vld [vmem:[#allocation2 + $0x10] sm:$0xff]  ;;  %v1187_v34 = vld [vmem:[#allocation3 + $0xc] sm:$0x7] }
 0x11e   : > { %1000 = vst.msk [vmem:[#allocation2 + $0x68] sm:$0xff] %vm986_vm7, %v967_v40  ;;  %1118 = vst.msk [vmem:[#allocation2 + $0x20] sm:$0xff] %vm986_vm7, %v1102_v43  ;;  %v892_v51 = vadd.f32 %v13544_v22, %v891_v47  ;;  %v12329_v52 = vpop.f32.mrb[18].mxu0  ;;  %v1144_v53 = vor.u32 %v1143_v42, %v1140_v41  ;;  %v1162_v54 = vmax.f32 %v1160_v50, %v1161_v45  ;;  %v1343_v39 = vld [vmem:[#allocation3] sm:$0xf] }
 0x11f   : > { %v972_v55 = vmax.f32 %v900_v46, 0.0  ;;  %v903_v56 = vadd.f32 %v12329_v52, %v13544_v22  ;;  %v894_v57 = vpop.f32.mrb[19].mxu0 }
 0x120   : > { %v970_v60 = vmax.f32 %v892_v51, 0.0  ;;  %v895_v61 = vadd.f32 %v13544_v22, %v894_v57  ;;  %v1145_v62 = vrot.slane %v1144_v53, 4  ;;  %v1152_v63 = vsel %vm13610_vm12, %v1144_v53, %v1151_v49  ;;  %v1211_v51 = vld [vmem:[#allocation3 + $0xc] sm:$0x8] }
 0x121   : > { %1005 = vst.msk [vmem:[#allocation2 + $0x90] sm:$0xff] %vm986_vm7, %v972_v55  ;;  %v973_v0 = vmax.f32 %v903_v56, 0.0  ;;  %1153 = vst [vmem:[#allocation3 + $0x4] sm:$0xe] %v1152_v63  ;;  %v12101_v1 = vpack.c.bf16 %v1162_v54, %v1162_v54 }
 0x122   : > { %v1049_v2 = vld [vmem:[#allocation2 + $0x70] ss:$2 sm:$0xff]  ;;  %v1081_v3 = vld [vmem:[#allocation2 + $0x71] ss:$2 sm:$0xff]  ;;  %1003 = vst.msk [vmem:[#allocation2 + $0x80] sm:$0xff] %vm986_vm7, %v970_v60  ;;  %v971_v4 = vmax.f32 %v895_v61, 0.0  ;;  %v1158_v5 = vsel %vm13619_vm13, %v1145_v62, %v1157_v59 }
 0x123   : > { %v1105_v6 = vmax.f32 %v1049_v2, %v1081_v3  ;;  %1006 = vst.msk [vmem:[#allocation2 + $0x98] sm:$0xff] %vm986_vm7, %v973_v0  ;;  %1159 = vst [vmem:[#allocation3 + $0x8] sm:$0x3] %v1158_v5  ;;  %v1168_v7 = vshrl.u32 %v12101_v1, 16  ;;  %v1171_v8 = vshll.u32 %v12101_v1, 16  ;;  %v12537_v3 = vld [vmem:[%s17523_s22 + $0x60] sm:$0xff]  }
 0x124   : > { %1004 = vst.msk [vmem:[#allocation2 + $0x88] sm:$0xff] %vm986_vm7, %v971_v4  ;;  %v12332_v11 = vpop.f32.mrb[20].mxu0  ;;  %v1191_v12 = vld [vmem:[#allocation2 + $0x28] sm:$0xff]  ;;  %v1354_v60 = vld [vmem:[#allocation3] sm:$0xe]  ;;  %12141 = vmatprep.subr.bf16.mxu1 %v12537_v3 }
 0x125   : > { %v1047_v9 = vld [vmem:[#allocation2 + $0x60] ss:$2 sm:$0xff]  ;;  %v1079_v10 = vld [vmem:[#allocation2 + $0x61] ss:$2 sm:$0xff]  ;;  %1121 = vst.msk [vmem:[#allocation2 + $0x38] sm:$0xff] %vm986_vm7, %v1105_v6  ;;  %v916_v14 = vadd.f32 %v12332_v11, %v13544_v22  ;;  %v907_v15 = vpop.f32.mrb[21].mxu0 }
 0x126   : > { %v1104_v13 = vmax.f32 %v1047_v9, %v1079_v10  ;;  %v1170_v16 = vrot.slane %v1168_v7, 5  ;;  %v1173_v17 = vrot.slane %v1171_v8, 6  ;;  %v1190_v18 = vld [vmem:[#allocation2 + $0x20] sm:$0xff]  ;;  %v908_v19 = vadd.f32 %v13544_v22, %v907_v15  ;;  %v12333_v23 = vpop.f32.mrb[22].mxu0 }
 0x127   : > { %v1192_v26 = vmax.f32 %v1190_v18, %v1191_v12  ;;  %v976_v27 = vmax.f32 %v916_v14, 0.0  ;;  %v919_v28 = vadd.f32 %v12333_v23, %v13544_v22  ;;  %v910_v29 = vpop.f32.mrb[23].mxu0  ;;  %v12538_v4 = vld [vmem:[%s17523_s22 + $0x20] sm:$0xff]  }
 0x128   : > { %1120 = vst.msk [vmem:[#allocation2 + $0x30] sm:$0xff] %vm986_vm7, %v1104_v13  ;;  %v1174_v30 = vor.u32 %v1173_v17, %v1170_v16  ;;  %v974_v31 = vmax.f32 %v908_v19, 0.0  ;;  %v911_v32 = vadd.f32 %v13544_v22, %v910_v29  ;;  %v13653_v40 = vld [vmem:[#allocation3 + $0x4] sm:$0xf]  ;;  %v1217_v17 = vld [vmem:[#allocation3 + $0x10] sm:$0xf]  ;;  %12142 = vmatpush3.bf16.msra.mxu1 %v12538_v4 }
 0x129   : > { %v12102_v35 = vpack.c.bf16 %v1192_v26, %v1192_v26  ;;  %1009 = vst.msk [vmem:[#allocation2 + $0xb0] sm:$0xff] %vm986_vm7, %v976_v27  ;;  %v977_v36 = vmax.f32 %v919_v28, 0.0  ;;  %v13669_v61 = vcombine.low %v1343_v39, %v13653_v40  ;;  %v10654_v14 = vcombine.low %v1354_v60, %v13653_v40  ;;  %v12540_v39 = vld [vmem:[%s17523_s22 + $0x28] sm:$0xff]  }
 0x12a   : > { %v1175_v37 = vrot.slane %v1174_v30, 4  ;;  %v1182_v38 = vsel %vm13637_vm5, %v1174_v30, %v1181_v25  ;;  %v1053_v41 = vld [vmem:[#allocation2 + $0x90] ss:$2 sm:$0xff]  ;;  %v1085_v42 = vld [vmem:[#allocation2 + $0x91] ss:$2 sm:$0xff]  ;;  %1007 = vst.msk [vmem:[#allocation2 + $0xa0] sm:$0xff] %vm986_vm7, %v974_v31 }
 0x12b   : > { %v975_v43 = vmax.f32 %v911_v32, 0.0  ;;  %1183 = vst [vmem:[#allocation3 + $0x8] sm:$0xc] %v1182_v38  ;;  %v1198_v44 = vshll.u32 %v12102_v35, 16  ;;  %v1107_v46 = vmax.f32 %v1053_v41, %v1085_v42  ;;  %v1051_v47 = vld [vmem:[#allocation2 + $0x80] ss:$2 sm:$0xff] }
 0x12c   : > { %v1083_v49 = vld [vmem:[#allocation2 + $0x81] ss:$2 sm:$0xff]  ;;  %1010 = vst.msk [vmem:[#allocation2 + $0xb8] sm:$0xff] %vm986_vm7, %v977_v36  ;;  %v1188_v50 = vsel %vm13646_vm10, %v1175_v37, %v1187_v34  ;;  %v12336_v53 = vpop.f32.mrb[24].mxu0  ;;  %v1201_v55 = vshrl.u32 %v12102_v35, 16  ;;  %v1221_v56 = vld [vmem:[#allocation2 + $0x38] sm:$0xff] }
 0x12d   : > { %v1106_v52 = vmax.f32 %v1051_v47, %v1083_v49  ;;  %1008 = vst.msk [vmem:[#allocation2 + $0xa8] sm:$0xff] %vm986_vm7, %v975_v43  ;;  %1189 = vst [vmem:[#allocation3 + $0xc] sm:$0x7] %v1188_v50  ;;  %v1200_v54 = vrot.slane %v1198_v44, 5  ;;  %v932_v57 = vadd.f32 %v12336_v53, %v13544_v22  ;;  %v923_v59 = vpop.f32.mrb[25].mxu0  ;;  %v1397_v15 = vshll.u32 %v13669_v61, 16 }
 0x12e   : > { %1123 = vst.msk [vmem:[#allocation2 + $0x48] sm:$0xff] %vm986_vm7, %v1107_v46  ;;  %v924_v62 = vadd.f32 %v13544_v22, %v923_v59  ;;  %v12337_v63 = vpop.f32.mrb[26].mxu0  ;;  %v1203_v1 = vrot.slane %v1201_v55, 4  ;;  %v1355_v31 = vld [vmem:[#allocation3 + $0x4] sm:$0xe]  ;;  %v1395_v36 = vshrl.u32 %v13669_v61, 16 }
 0x12f   : > { %1122 = vst.msk [vmem:[#allocation2 + $0x40] sm:$0xff] %vm986_vm7, %v1106_v52  ;;  %v1212_v0 = vsel %vm13658_vm3, %v1200_v54, %v1211_v51  ;;  %v1220_v2 = vld [vmem:[#allocation2 + $0x30] sm:$0xff]  ;;  %v980_v5 = vmax.f32 %v932_v57, 0.0  ;;  %v935_v6 = vadd.f32 %v12337_v63, %v13544_v22  ;;  %v926_v7 = vpop.f32.mrb[27].mxu0  ;;  %v12539_v38 = vld [vmem:[%s17523_s22 + $0x68] sm:$0xff]   ;;  %v1452_v43 = vrot.slane %v10654_v14, 1 }
 0x130   : > { %1213 = vst [vmem:[#allocation3 + $0xc] sm:$0x8] %v1212_v0  ;;  %v1222_v8 = vmax.f32 %v1220_v2, %v1221_v56  ;;  %v978_v9 = vmax.f32 %v924_v62, 0.0  ;;  %v927_v10 = vadd.f32 %v13544_v22, %v926_v7  ;;  %v1204_v11 = vor.u32 %v1203_v1, %v1200_v54  ;;  %v12541_v47 = vld [vmem:[%s17523_s22 + $0x70] sm:$0xff]   ;;  %12143 = vmatprep.subr.bf16.mxu1 %v12539_v38  ;;  %v1359_v0 = vld [vmem:[#allocation3 + $0x4] sm:$0xc] }
 0x131   : > { %1013 = vst.msk [vmem:[#allocation2 + $0xd0] sm:$0xff] %vm986_vm7, %v980_v5  ;;  %v981_v12 = vmax.f32 %v935_v6, 0.0  ;;  %v1399_v53 = vrot.slane %v1397_v15, 1  ;;  %v1239_v55 = vld [vmem:[#allocation3 + $0x14] sm:$0xf]  ;;  %12144 = vmatpush3.bf16.msra.mxu1 %v12540_v39 }
 0x132   : > { %v13684_v13 = vld [vmem:[#allocation3 + $0x8] sm:$0xf]  ;;  %v12103_v18 = vpack.c.bf16 %v1222_v8, %v1222_v8  ;;  %1011 = vst.msk [vmem:[#allocation2 + $0xc0] sm:$0xff] %vm986_vm7, %v978_v9  ;;  %v979_v25 = vmax.f32 %v927_v10, 0.0  ;;  %v1205_v26 = vrot.slane %v1204_v11, 4  ;;  %v12542_v1 = vld [vmem:[%s17523_s22 + $0x30] sm:$0xff]   ;;  %12145 = vmatprep.subr.bf16.mxu1 %v12541_v47 }
 0x133   : > { %v1057_v19 = vld [vmem:[#allocation2 + $0xb0] ss:$2 sm:$0xff]  ;;  %v1089_v23 = vld [vmem:[#allocation2 + $0xb1] ss:$2 sm:$0xff]  ;;  %1014 = vst.msk [vmem:[#allocation2 + $0xd8] sm:$0xff] %vm986_vm7, %v981_v12  ;;  %v13724_v56 = vcombine.low %v1355_v31, %v13684_v13  ;;  %v10662_v5 = vcombine.low %v1359_v0, %v13684_v13  ;;  %v1400_v15 = vor.u32 %v1399_v53, %v1395_v36 }
 0x134   : > { %v1109_v27 = vmax.f32 %v1057_v19, %v1089_v23  ;;  %v1055_v28 = vld [vmem:[#allocation2 + $0xa0] ss:$2 sm:$0xff]  ;;  %v1087_v29 = vld [vmem:[#allocation2 + $0xa1] ss:$2 sm:$0xff]  ;;  %v1228_v30 = vshrl.u32 %v12103_v18, 16  ;;  %1012 = vst.msk [vmem:[#allocation2 + $0xc8] sm:$0xff] %vm986_vm7, %v979_v25  ;;  %v1218_v37 = vsel %vm13690_vm8, %v1205_v26, %v1217_v17 }
 0x135   : > { %v1108_v32 = vmax.f32 %v1055_v28, %v1087_v29  ;;  %v12340_v34 = vpop.f32.mrb[28].mxu0  ;;  %v1249_v35 = vld [vmem:[#allocation2 + $0x48] sm:$0xff]  ;;  %1219 = vst [vmem:[#allocation3 + $0x10] sm:$0xf] %v1218_v37  ;;  %v1231_v46 = vshll.u32 %v12103_v18, 16  ;;  %12146 = vmatpush3.bf16.msra.mxu1 %v12542_v1  ;;  %v1485_v31 = vrot.slane %v13724_v56, 1 }
 0x136   : > { %1125 = vst.msk [vmem:[#allocation2 + $0x58] sm:$0xff] %vm986_vm7, %v1109_v27  ;;  %v948_v40 = vadd.f32 %v12340_v34, %v13544_v22  ;;  %v939_v41 = vpop.f32.mrb[29].mxu0  ;;  %v1248_v42 = vld [vmem:[#allocation2 + $0x40] sm:$0xff]  ;;  %v13708_v44 = vrot.slane %v1228_v30, 7  ;;  %v1360_v10 = vld [vmem:[#allocation3 + $0x8] sm:$0xc] }
 0x137   : > { %1124 = vst.msk [vmem:[#allocation2 + $0x50] sm:$0xff] %vm986_vm7, %v1108_v32  ;;  %v940_v49 = vadd.f32 %v13544_v22, %v939_v41  ;;  %v12341_v50 = vpop.f32.mrb[30].mxu0  ;;  %v1250_v51 = vmax.f32 %v1248_v42, %v1249_v35  ;;  %v13715_v52 = vld [vmem:[#allocation3 + $0xc] sm:$0xf]  ;;  %v1245_v27 = vld [vmem:[#allocation3 + $0x18] sm:$0x1] }
 0x138   : > { %v984_v57 = vmax.f32 %v948_v40, 0.0  ;;  %v951_v59 = vadd.f32 %v12341_v50, %v13544_v22  ;;  %v942_v60 = vpop.f32.mrb[31].mxu0  ;;  %v13729_v62 = vcombine.low %v13684_v13, %v13715_v52  ;;  %v1233_v63 = vor.u32 %v1231_v46, %v13708_v44  ;;  %v12543_v40 = vld [vmem:[%s17523_s22 + $0x78] sm:$0xff]  }
 0x139   : > { %v982_v2 = vmax.f32 %v940_v49, 0.0  ;;  %v943_v3 = vadd.f32 %v13544_v22, %v942_v60  ;;  %v12104_v4 = vpack.c.bf16 %v1250_v51, %v1250_v51  ;;  %v13744_v13 = vcombine.low %v1360_v10, %v13715_v52  ;;  %v12544_v41 = vld [vmem:[%s17523_s22 + $0x38] sm:$0xff]   ;;  %12147 = vmatprep.subr.bf16.mxu1 %v12543_v40 }
 0x13a   : > { %1017 = vst.msk [vmem:[#allocation2 + $0xf0] sm:$0xff] %vm986_vm7, %v984_v57  ;;  %v985_v6 = vmax.f32 %v951_v59, 0.0  ;;  %v1453_v7 = vrot.slane %v13729_v62, 1  ;;  %v1402_v8 = vshll.u32 %v13729_v62, 16  ;;  %v1240_v9 = vsel %vm13719_vm11, %v1233_v63, %v1239_v55  ;;  %v1061_v11 = vld [vmem:[#allocation2 + $0xd0] ss:$2 sm:$0xff]  ;;  %12148 = vmatpush3.bf16.msra.mxu1 %v12544_v41 }
 0x13b   : > { %v1093_v12 = vld [vmem:[#allocation2 + $0xd1] ss:$2 sm:$0xff]  ;;  %1015 = vst.msk [vmem:[#allocation2 + $0xe0] sm:$0xff] %vm986_vm7, %v982_v2  ;;  %v983_v22 = vmax.f32 %v943_v3, 0.0  ;;  %v1256_v14 = vshrl.u32 %v12104_v4, 16  ;;  %v1259_v23 = vshll.u32 %v12104_v4, 16 }
 0x13c   : > { %1241 = vst [vmem:[#allocation3 + $0x14] sm:$0xf] %v1240_v9  ;;  %v1111_v17 = vmax.f32 %v1061_v11, %v1093_v12  ;;  %v1059_v18 = vld [vmem:[#allocation2 + $0xc0] ss:$2 sm:$0xff]  ;;  %v1091_v19 = vld [vmem:[#allocation2 + $0xc1] ss:$2 sm:$0xff]  ;;  %v1454_v25 = vsel %vm1451_vm14, %v1452_v43, %v1453_v7 }
 0x13d   : > { %1018 = vst.msk [vmem:[#allocation2 + $0xf8] sm:$0xff] %vm986_vm7, %v985_v6  ;;  %v13750_v26 = vrot.slane %v1402_v8, 1  ;;  %v1110_v28 = vmax.f32 %v1059_v18, %v1091_v19  ;;  %1016 = vst.msk [vmem:[#allocation2 + $0xe8] sm:$0xff] %vm986_vm7, %v983_v22  ;;  %v1258_v29 = vrot.slane %v1256_v14, 6  ;;  %1463 = vrot.lane.b32.xlu1 %v1454_v25, %s17502_s26  ;;  %v1347_v30 = vld [vmem:[#allocation3 + $0x10] sm:$0xf] }
 0x13e   : > { %v1273_v34 = vld [vmem:[#allocation2 + $0x58] sm:$0xff]  ;;  %1127 = vst.msk [vmem:[#allocation2 + $0x68] sm:$0xff] %vm986_vm7, %v1111_v17  ;;  %v1261_v35 = vrot.slane %v1259_v23, 7  ;;  %v13765_v37 = vcombine.low %v13715_v52, %v1347_v30  ;;  %v1567_v38 = vrot.slane %v10662_v5, 2  ;;  %v1272_v39 = vld [vmem:[#allocation2 + $0x50] sm:$0xff]  ;;  %v1623_v43 = vshrl.u32 %v13744_v13, 16 }
 0x13f   : > { %v1405_v36 = vsel %vm1393_vm0, %v1400_v15, %v13750_v26  ;;  %1126 = vst.msk [vmem:[#allocation2 + $0x60] sm:$0xff] %vm986_vm7, %v1110_v28  ;;  %v1266_v42 = vld [vmem:[#allocation3 + $0x18] sm:$0xe]  ;;  %v1234_v46 = vrot.slane %v13708_v44, 4  ;;  %v1274_v47 = vmax.f32 %v1272_v39, %v1273_v34  ;;  %v1511_v49 = vshrl.u32 %v13724_v56, 16 }
 0x140   : > { %1438 = vrot.lane.b32.xlu0 %v1405_v36, %s13303_s0  ;;  %v1262_v50 = vor.u32 %v1261_v35, %v1258_v29  ;;  %v1486_v51 = vrot.slane %v13765_v37, 1  ;;  %v1568_v53 = vrot.slane %v13765_v37, 2  ;;  %v1626_v55 = vshll.u32 %v13744_v13, 16  ;;  %v1269_v60 = vld [vmem:[#allocation3 + $0x1c] sm:$0x3] }
 0x141   : > { %v1597_v57 = vrot.slane %v13744_v13, 2  ;;  %v1246_v59 = vsel %vm13757_vm1, %v1234_v46, %v1245_v27  ;;  %v12105_v63 = vpack.c.bf16 %v1274_v47, %v1274_v47  ;;  %v1514_v44 = vshll.u32 %v13724_v56, 16  ;;  %v1290_v34 = vld [vmem:[#allocation3 + $0x1c] sm:$0xc] }
 0x142   : > { %v1263_v0 = vrot.slane %v1262_v50, 4  ;;  %v1267_v1 = vsel %vm13610_vm12, %v1262_v50, %v1266_v42  ;;  %v1487_v3 = vsel %vm1451_vm14, %v1485_v31, %v1486_v51  ;;  %v1569_v4 = vsel %vm1566_vm2, %v1567_v38, %v1568_v53  ;;  %1247 = vst [vmem:[#allocation3 + $0x18] sm:$0x1] %v1246_v59  ;;  %v1293_v42 = vld [vmem:[#allocation3 + $0x20] sm:$0x7] }
 0x143   : > { %v1348_v2 = vld [vmem:[#allocation3 + $0x14] sm:$0xf]  ;;  %1268 = vst [vmem:[#allocation3 + $0x18] sm:$0xe] %v1267_v1  ;;  %1496 = vrot.lane.b32.xlu1 %v1487_v3, %s13304_s20  ;;  %v1280_v48 = vshrl.u32 %v12105_v63, 16  ;;  %v1283_v56 = vshll.u32 %v12105_v63, 16 }
 0x144   : > { %v1065_v5 = vld [vmem:[#allocation2 + $0xf0] ss:$2 sm:$0xff]  ;;  %v1097_v6 = vld [vmem:[#allocation2 + $0xf1] ss:$2 sm:$0xff]  ;;  %v13793_v8 = vcombine.low %v1347_v30, %v1348_v2  ;;  %1578 = vrot.lane.b32.xlu0 %v1569_v4, %s13303_s0  ;;  %v1063_v10 = vld [vmem:[#allocation2 + $0xe0] ss:$2 sm:$0xff]  ;;  %v1270_v14 = vsel %vm13619_vm13, %v1263_v0, %v1269_v60 }
 0x145   : > { %v1113_v9 = vmax.f32 %v1065_v5, %v1097_v6  ;;  %v1095_v11 = vld [vmem:[#allocation2 + $0xe1] ss:$2 sm:$0xff]  ;;  %v1625_v12 = vrot.slane %v1623_v43, 2  ;;  %v1628_v22 = vrot.slane %v1626_v55, 3  ;;  %vm1509_vm12 = vsmask.f32 6400 }
 0x146   : > { %v1112_v15 = vmax.f32 %v1063_v10, %v1095_v11  ;;  %v1598_v13 = vrot.slane %v13793_v8, 2  ;;  %v1410_v17 = vshll.u32 %v13793_v8, 16  ;;  %1271 = vst [vmem:[#allocation3 + $0x1c] sm:$0x3] %v1270_v14  ;;  %v1297_v18 = vld [vmem:[#allocation2 + $0x68] sm:$0xff]  ;;  %v1519_v19 = vshrl.u32 %v13765_v37, 16 }
 0x147   : > { %1129 = vst.msk [vmem:[#allocation2 + $0x78] sm:$0xff] %vm986_vm7, %v1113_v9  ;;  %v1414_v23 = vshrl.u32 %v13793_v8, 16  ;;  %v1406_v25 = vshrl.u32 %v13729_v62, 16  ;;  %v1282_v27 = vrot.slane %v1280_v48, 5  ;;  %v1285_v28 = vrot.slane %v1283_v56, 6  ;;  %v1296_v58 = vld [vmem:[#allocation2 + $0x60] sm:$0xff] }
 0x148   : > { %1128 = vst.msk [vmem:[#allocation2 + $0x70] sm:$0xff] %vm986_vm7, %v1112_v15  ;;  %v1599_v29 = vsel %vm1566_vm2, %v1597_v57, %v1598_v13  ;;  %v1455_v30 = vrot.slane %v13793_v8, 1  ;;  %v1631_v31 = vrot.slane %v1410_v17, 3  ;;  %v1513_v35 = vrot.slane %v1511_v49, 1 }
 0x149   : > { %1608 = vrot.lane.b32.xlu1 %v1599_v29, %s17502_s26  ;;  %v1629_v36 = vor.u32 %v1628_v22, %v1625_v12  ;;  %v1630_v38 = vrot.slane %v1414_v23, 2  ;;  %v1286_v39 = vor.u32 %v1285_v28, %v1282_v27  ;;  %v1298_v40 = vmax.f32 %v1296_v58, %v1297_v18  ;;  %v1317_v27 = vld [vmem:[#allocation3 + $0x24] sm:$0xf] }
 0x14a   : > { %v13813_v41 = vrot.slane %v1410_v17, 1  ;;  %v1516_v43 = vrot.slane %v1514_v44, 2  ;;  %v1521_v46 = vrot.slane %v1519_v19, 1  ;;  %v1522_v47 = vshll.u32 %v13765_v37, 16  ;;  %v1349_v55 = vld [vmem:[#allocation3 + $0x18] sm:$0xf] }
 0x14b   : > { %v13816_v50 = vor.u32 %v1631_v31, %v1630_v38  ;;  %v1291_v49 = vsel %vm13637_vm5, %v1286_v39, %v1290_v34  ;;  %v1287_v57 = vrot.slane %v1286_v39, 4  ;;  %v12106_v59 = vpack.c.bf16 %v1298_v40, %v1298_v40 }
 0x14c   : > { %v1456_v60 = vsel %vm1451_vm14, %v1453_v7, %v1455_v30  ;;  %v1408_v63 = vor.u32 %v1406_v25, %v13750_v26  ;;  %1292 = vst [vmem:[#allocation3 + $0x1c] sm:$0xc] %v1291_v49  ;;  %v13826_v44 = vcombine.low %v1348_v2, %v1349_v55  ;;  %v1524_v0 = vrot.slane %v1522_v47, 2  ;;  %v1314_v26 = vld [vmem:[#allocation3 + $0x20] sm:$0x8] }
 0x14d   : > { %1465 = vrot.lane.b32.xlu1 %v1456_v60, %s17502_s26  ;;  %v1633_v24 = vsel %vm1621_vm4, %v1629_v36, %v13816_v50  ;;  %v1294_v1 = vsel %vm13646_vm10, %v1287_v57, %v1293_v42  ;;  %v1304_v3 = vshll.u32 %v12106_v59, 16  ;;  %v1307_v4 = vshrl.u32 %v12106_v59, 16  ;;  %v1340_v57 = vld [vmem:[#allocation3 + $0x2c] sm:$0x1] }
 0x14e   : > { %1660 = vrot.lane.b32.xlu0 %v1633_v24, %s13304_s20  ;;  %v1570_v7 = vrot.slane %v13826_v44, 2  ;;  %1295 = vst [vmem:[#allocation3 + $0x20] sm:$0x7] %v1294_v1  ;;  %v1321_v5 = vld [vmem:[#allocation2 + $0x78] sm:$0xff]  ;;  %v1517_v2 = vor.u32 %v1516_v43, %v1513_v35  ;;  %v1525_v6 = vor.u32 %v1524_v0, %v1521_v46  ;;  %v1528_v48 = vshrl.u32 %v13826_v44, 16 }
 0x14f   : > { %v1413_v56 = vsel %vm1393_vm0, %v1408_v63, %v13813_v41  ;;  %v1306_v9 = vrot.slane %v1304_v3, 5  ;;  %v1309_v10 = vrot.slane %v1307_v4, 4  ;;  %v1320_v33 = vld [vmem:[#allocation2 + $0x70] sm:$0xff]  ;;  %v1531_v11 = vshll.u32 %v13826_v44, 16 }
 0x150   : > { %v1571_v12 = vsel %vm1566_vm2, %v1568_v53, %v1570_v7  ;;  %v1488_v22 = vrot.slane %v13826_v44, 1  ;;  %v1322_v14 = vmax.f32 %v1320_v33, %v1321_v5  ;;  %v13846_v15 = vsel %vm1509_vm12, %v1517_v2, %v1525_v6 }
 0x151   : > { %1440 = vrot.lane.b32.xlu1 %v1413_v56, %s13303_s0  ;;  %v1310_v17 = vor.u32 %v1309_v10, %v1306_v9  ;;  %v1315_v18 = vsel %vm13658_vm3, %v1306_v9, %v1314_v26  ;;  %v1530_v19 = vrot.slane %v1528_v48, 1  ;;  %v1533_v25 = vrot.slane %v1531_v11, 2 }
 0x152   : > { %1580 = vrot.lane.b32.xlu0 %v1571_v12, %s13303_s0  ;;  %1316 = vst [vmem:[#allocation3 + $0x20] sm:$0x8] %v1315_v18  ;;  %v12107_v28 = vpack.c.bf16 %v1322_v14, %v1322_v14  ;;  %v1489_v34 = vsel %vm1451_vm14, %v1486_v51, %v1488_v22  ;;  %v13305_v51 = vmov 0.0   ;;  %vm1695_vm13 = vcmask 523264  }
 0x153   : > { %v1350_v53 = vld [vmem:[#allocation3 + $0x1c] sm:$0xf]  ;;  %v1311_v58 = vrot.slane %v1310_v17, 4  ;;  %v1534_v29 = vor.u32 %v1533_v25, %v1530_v19  ;;  %12342 = vmatprep.subr.bf16.mxu1 %v13305_v51  ;;  %vm1706_vm5 = vcmask 785408   ;;  %vm13306_vm10 = vmmov 0  }
 0x154   : > { %v13852_v31 = vcombine.low %v1349_v55, %v1350_v53  ;;  %v1328_v35 = vshrl.u32 %v12107_v28, 16  ;;  %v1331_v36 = vshll.u32 %v12107_v28, 16  ;;  %v1337_v55 = vld [vmem:[#allocation3 + $0x28] sm:$0xf]  ;;  %vm2094_vm3 = vcmask 519168  }
 0x155   : > { %1498 = vrot.lane.b32.xlu1 %v1489_v34, %s13304_s20  ;;  %v1318_v45 = vsel %vm13690_vm8, %v1311_v58, %v1317_v27  ;;  %v13861_v38 = vsel %vm1509_vm12, %v1525_v6, %v1534_v29  ;;  %2096 = vst.msk [vmem:[#allocation5 + $0x4] sm:$0xf] %vm2094_vm3, %v13301_v20  ;;  %2097 = vst.msk [vmem:[#allocation5 + $0x8] sm:$0xf] %vm2094_vm3, %v13301_v20  ;;  %vm2149_vm8 = vcmask 519171  }
 0x156   : > { %v1457_v39 = vrot.slane %v13852_v31, 1  ;;  %v1600_v40 = vrot.slane %v13852_v31, 2  ;;  %v1418_v42 = vshll.u32 %v13852_v31, 16  ;;  %v1422_v37 = vshrl.u32 %v13852_v31, 16  ;;  %1319 = vst [vmem:[#allocation3 + $0x24] sm:$0xf] %v1318_v45  ;;  %vm2150_vm15 = vmand %vm2149_vm8, %vm1209_vm9 }
 0x157   : > { %v1330_v43 = vrot.slane %v1328_v35, 7  ;;  %2098 = vst.msk [vmem:[#allocation5 + $0xc] sm:$0xf] %vm2094_vm3, %v13301_v20  ;;  %2099 = vst.msk [vmem:[#allocation5 + $0x10] sm:$0xf] %vm2094_vm3, %v13301_v20  ;;  %vm2177_vm9 = vcmask 519170  }
 0x158   : > { %v1458_v16 = vsel %vm1451_vm14, %v1455_v30, %v1457_v39  ;;  %v1601_v46 = vsel %vm1566_vm2, %v1598_v13, %v1600_v40  ;;  %v1420_v47 = vrot.slane %v1418_v42, 1  ;;  %v1634_v49 = vrot.slane %v1422_v37, 2  ;;  %2095 = vst.msk [vmem:[#allocation5] sm:$0xf] %vm2094_vm3, %v13301_v20 }
 0x159   : > { %1467 = vrot.lane.b32.xlu1 %v1458_v16, %s17502_s26  ;;  %1610 = vrot.lane.b32.xlu0 %v1601_v46, %s17502_s26  ;;  %v1635_v59 = vrot.slane %v1418_v42, 3  ;;  %v1351_v60 = vld [vmem:[#allocation3 + $0x20] sm:$0xf]  ;;  %v1333_v63 = vor.u32 %v1331_v36, %v1330_v43  ;;  %v1334_v0 = vrot.slane %v1330_v43, 4  ;;  %v1416_v30 = vor.u32 %v1414_v23, %v13813_v41 }
 0x15a   : > { %v10658_v24 = vcombine.low %v1350_v53, %v1351_v60  ;;  %v1424_v58 = vor.u32 %v1422_v37, %v1420_v47  ;;  %vm17543_vm3 = vsmask.f32 7946 }
 0x15b   : > { %v1636_v1 = vor.u32 %v1635_v59, %v1634_v49  ;;  %v1338_v13 = vsel %vm13719_vm11, %v1333_v63, %v1337_v55  ;;  %v1341_v3 = vsel %vm13757_vm1, %v1334_v0, %v1340_v57  ;;  %v1421_v4 = vsel %vm1393_vm0, %v1416_v30, %v1420_v47  ;;  %vm2178_vm8 = vmand %vm2177_vm9, %vm17543_vm3 }
 0x15c   : > { %v1490_v26 = vrot.slane %v10658_v24, 1  ;;  %1339 = vst [vmem:[#allocation3 + $0x28] sm:$0xf] %v1338_v13  ;;  %1342 = vst [vmem:[#allocation3 + $0x2c] sm:$0x1] %v1341_v3  ;;  %v1537_v5 = vshrl.u32 %v10658_v24, 16 }
 0x15d   : > { %v1540_v2 = vshll.u32 %v10658_v24, 16  ;;  %1442 = vrot.lane.b32.xlu1 %v1421_v4, %s13303_s0  ;;  %v1637_v23 = vsel %vm1621_vm4, %v13816_v50, %v1636_v1  ;;  %v1352_v41 = vld [vmem:[#allocation3 + $0x24] sm:$0xf]  ;;  %v1572_v6 = vrot.slane %v10658_v24, 2  ;;  %vm1673_vm11 = vcmask 1044480  }
 0x15e   : > { %1662 = vrot.lane.b32.xlu0 %v1637_v23, %s13304_s20  ;;  %v13888_v54 = vcombine.low %v1351_v60, %v1352_v41  ;;  %v1539_v32 = vrot.slane %v1537_v5, 1  ;;  %v1491_v56 = vsel %vm1451_vm14, %v1488_v22, %v1490_v26  ;;  %vm2154_vm1 = vcmask 517120  }
 0x15f   : > { %v1542_v48 = vrot.slane %v1540_v2, 2  ;;  %v1573_v50 = vsel %vm1566_vm2, %v1570_v7, %v1572_v6 }
 0x160   : > { %v1459_v9 = vrot.slane %v13888_v54, 1  ;;  %v1426_v10 = vshll.u32 %v13888_v54, 16  ;;  %v1430_v33 = vshrl.u32 %v13888_v54, 16  ;;  %v1602_v11 = vrot.slane %v13888_v54, 2 }
 0x161   : > { %1500 = vrot.lane.b32.xlu1 %v1491_v56, %s13304_s20  ;;  %v1543_v12 = vor.u32 %v1542_v48, %v1539_v32 }
 0x162   : > { %1582 = vrot.lane.b32.xlu0 %v1573_v50, %s13303_s0  ;;  %v1638_v14 = vrot.slane %v1430_v33, 2  ;;  %v1639_v17 = vrot.slane %v1426_v10, 3  ;;  %v1460_v19 = vsel %vm1451_vm14, %v1457_v39, %v1459_v9  ;;  %v1428_v25 = vrot.slane %v1426_v10, 1 }
 0x163   : > { %v1356_v22 = vld [vmem:[#allocation3 + $0x28] sm:$0xf]  ;;  %v13901_v18 = vsel %vm1509_vm12, %v1534_v29, %v1543_v12  ;;  %v1361_v7 = vld [vmem:[#allocation3 + $0x2c] sm:$0xf]  ;;  %v1603_v28 = vsel %vm1566_vm2, %v1600_v40, %v1602_v11 }
 0x164   : > { %v13906_v27 = vcombine.low %v1352_v41, %v1356_v22  ;;  %v12524_v44 = vld [vmem:[#allocation3 + $0x28] ss:$0 sps:$4 sm:$0x11]   ;;  %v1640_v53 = vor.u32 %v1639_v17, %v1638_v14  ;;  %v13911_v34 = vcombine.low %v1356_v22, %v1361_v7  ;;  %v12528_v29 = vld [vmem:[#allocation3 + $0x30] ss:$0 sps:$4 sm:$0x77]   ;;  %v1429_v36 = vsel %vm1393_vm0, %v1424_v58, %v1428_v25 }
 0x165   : > { %1469 = vrot.lane.b32.xlu1 %v1460_v19, %s17502_s26  ;;  %v12525_v45 = vld [vmem:[#allocation3 + $0x2c] ss:$0 sps:$4 sm:$0x33]   ;;  %v1434_v42 = vshll.u32 %v12524_v44, 16  ;;  %v1683_v46 = vrot.slane %v12528_v29, 3  ;;  %v1432_v3 = vor.u32 %v1430_v33, %v1428_v25  ;;  %v1461_v41 = vrot.slane %v12524_v44, 1 }
 0x166   : > { %1612 = vrot.lane.b32.xlu0 %v1603_v28, %s17502_s26  ;;  %v1492_v35 = vrot.slane %v13906_v27, 1  ;;  %v1574_v39 = vrot.slane %v13906_v27, 2  ;;  %v1641_v43 = vsel %vm1621_vm4, %v1636_v1, %v1640_v53  ;;  %v1604_v40 = vrot.slane %v13911_v34, 2  ;;  %v12526_v32 = vld [vmem:[#allocation3 + $0x2c] ss:$0 sps:$4 sm:$0x11]  }
 0x167   : > { %v1643_v37 = vshrl.u32 %v13911_v34, 16  ;;  %v1546_v16 = vshrl.u32 %v13906_v27, 16  ;;  %v1549_v49 = vshll.u32 %v13906_v27, 16  ;;  %v1555_v55 = vshrl.u32 %v12525_v45, 16 }
 0x168   : > { %v1493_v47 = vsel %vm1451_vm14, %v1490_v26, %v1492_v35  ;;  %v1558_v57 = vshll.u32 %v12525_v45, 16  ;;  %v1575_v59 = vsel %vm1566_vm2, %v1572_v6, %v1574_v39  ;;  %v1436_v60 = vrot.slane %v1434_v42, 1  ;;  %v12527_v22 = vld [vmem:[#allocation3 + $0x30] ss:$0 sps:$4 sm:$0x33]  }
 0x169   : > { %1444 = vrot.lane.b32.xlu1 %v1429_v36, %s13303_s0  ;;  %v1548_v63 = vrot.slane %v1546_v16, 1  ;;  %v1681_v0 = vrot.slane %v13911_v34, 3  ;;  %v1646_v30 = vshll.u32 %v13911_v34, 16  ;;  %v1551_v24 = vrot.slane %v1549_v49, 2  ;;  %v12548_v34 = vld [vmem:[%s17540_s5 + $0x108] sm:$0xff]  }
 0x16a   : > { %1664 = vrot.lane.b32.xlu0 %v1641_v43, %s13304_s20  ;;  %v1557_v1 = vrot.slane %v1555_v55, 1  ;;  %v1560_v13 = vrot.slane %v1558_v57, 2  ;;  %v1437_v2 = vsel %vm1393_vm0, %v1432_v3, %v1436_v60  ;;  %v1605_v23 = vsel %vm1566_vm2, %v1602_v11, %v1604_v40 }
 0x16b   : > { %v13932_v4 = vsel %vm1673_vm11, %v1681_v0, %v1683_v46  ;;  %v1552_v26 = vor.u32 %v1551_v24, %v1548_v63  ;;  %v1576_v6 = vrot.slane %v12525_v45, 2  ;;  %v1645_v48 = vrot.slane %v1643_v37, 2 }
 0x16c   : > { %v1561_v5 = vor.u32 %v1560_v13, %v1557_v1  ;;  %v1648_v56 = vrot.slane %v1646_v30, 3  ;;  %v1462_v50 = vsel %vm1451_vm14, %v1459_v9, %v1461_v41  ;;  %v1494_v11 = vrot.slane %v12526_v32, 1 }
 0x16d   : > { %1502 = vrot.lane.b32.xlu1 %v1493_v47, %s13304_s20  ;;  %v13938_v10 = vsel %vm1509_vm12, %v1543_v12, %v1552_v26  ;;  %v1577_v14 = vsel %vm1566_vm2, %v1574_v39, %v1576_v6  ;;  %v1652_v19 = vshrl.u32 %v12528_v29, 16  ;;  %v1655_v25 = vshll.u32 %v12528_v29, 16  ;;  %v12545_v47 = vld [vmem:[%s17523_s22 + $0x80] sm:$0xff]  }
 0x16e   : > { %1584 = vrot.lane.b32.xlu0 %v1575_v59, %s13303_s0  ;;  %v13941_v33 = vsel %vm1509_vm12, %v1552_v26, %v1561_v5  ;;  %v1649_v17 = vor.u32 %v1648_v56, %v1645_v48  ;;  %v1495_v12 = vsel %vm1451_vm14, %v1492_v35, %v1494_v11  ;;  %v1606_v44 = vrot.slane %v12527_v22, 2 }
 0x16f   : > { %v1654_v7 = vrot.slane %v1652_v19, 2  ;;  %v1657_v9 = vrot.slane %v1655_v25, 3  ;;  %vm17542_vm12 = vsmask.f32 1280 }
 0x170   : > { %v1650_v27 = vsel %vm1621_vm4, %v1640_v53, %v1649_v17  ;;  %v1607_v28 = vsel %vm1566_vm2, %v1604_v40, %v1606_v44 }
 0x171   : > { %1446 = vrot.lane.b32.xlu1 %v1437_v2, %s13303_s0  ;;  %v1658_v58 = vor.u32 %v1657_v9, %v1654_v7 }
 0x172   : > { %1614 = vrot.lane.b32.xlu0 %v1605_v23, %s17502_s26 }
 0x173   : > { %v1659_v29 = vsel %vm1621_vm4, %v1649_v17, %v1658_v58 }
 0x175   : > { %1471 = vrot.lane.b32.xlu1 %v1462_v50, %s17502_s26 }
 0x176   : > { %1586 = vrot.lane.b32.xlu0 %v1577_v14, %s13303_s0 }
 0x179   : > { %1504 = vrot.lane.b32.xlu1 %v1495_v12, %s13304_s20 }
 0x17a   : > { %1666 = vrot.lane.b32.xlu0 %v1650_v27, %s13304_s20 }
 0x17e   : > { %1616 = vrot.lane.b32.xlu0 %v1607_v28, %s17502_s26  ;;  %s17544_s26 = smov 64  }
 0x182   : > { %1668 = vrot.lane.b32.xlu0 %v1659_v29, %s13304_s20 }
 0x1af   : > { %v1464_v45 = vpop.permute.xlu1 %1463 }
 0x1b2   : > { %v1439_v35 = vpop.permute.xlu0 %1438 }
 0x1b3   : > { %v1686_v53 = vsel %vm986_vm7, %v13669_v61, %v1439_v35 }
 0x1b4   : > { %v1697_v37 = vsel %vm1695_vm13, %v1686_v53, %v1464_v45 }
 0x1b5   : > { %v1497_v36 = vpop.permute.xlu1 %1496 }
 0x1b6   : > { %v1579_v42 = vpop.permute.xlu0 %1578  ;;  %v1708_v61 = vsel %vm1706_vm5, %v1697_v37, %v1497_v36 }
 0x1b7   : > { %v1724_v43 = vsel %vm986_vm7, %v13846_v15, %v1579_v42  ;;  %v12546_v15 = vld [vmem:[%s17523_s22 + $0x88] sm:$0xff]  }
 0x1bb   : > { %v1609_v39 = vpop.permute.xlu1 %1608 }
 0x1bc   : > { %v1738_v16 = vsel %vm1695_vm13, %v1724_v43, %v1609_v39 }
 0x1bf   : > { %v1466_v40 = vpop.permute.xlu1 %1465 }
 0x1c0   : > { %v1661_v46 = vpop.permute.xlu0 %1660 }
 0x1c1   : > { %v1748_v49 = vsel %vm1706_vm5, %v1738_v16, %v1661_v46  ;;  %v1364_v16 = vld [vmem:[#allocation3 + $0x8] sm:$0x8]  ;;  %v1675_v46 = vrot.slane %v13793_v8, 3 }
 0x1c2   : > { %1960 = vmatprep.mubr.bf16.mxu1 %v1748_v49 }
 0x1c3   : > { %1961 = vmatmul.mubr.bf16.vlgmr.msra.gmra.mrb[0].mxu1 %v1708_v61  ;;  %v1441_v55 = vpop.permute.xlu1 %1440  ;;  %v1677_v61 = vrot.slane %v13852_v31, 3 }
 0x1c4   : > { %12343 = vmatpush3.bf16.msra.mxu1 %v12545_v47  ;;  %v1581_v57 = vpop.permute.xlu0 %1580  ;;  %v1688_v30 = vsel %vm986_vm7, %v13729_v62, %v1441_v55 }
 0x1c5   : > { %12344 = vmatprep.subr.bf16.mxu1 %v13305_v51  ;;  %v1727_v24 = vsel %vm986_vm7, %v13861_v38, %v1581_v57  ;;  %v1699_v5 = vsel %vm1695_vm13, %v1688_v30, %v1466_v40  ;;  %v1678_v55 = vsel %vm1673_vm11, %v1675_v46, %v1677_v61 }
 0x1c7   : > { %v1499_v59 = vpop.permute.xlu1 %1498 }
 0x1c8   : > { %12345 = vmatpush3.bf16.msra.mxu1 %v12546_v15  ;;  %v1711_v2 = vsel %vm1706_vm5, %v1699_v5, %v1499_v59 }
 0x1cb   : > { %v1468_v60 = vpop.permute.xlu1 %1467  ;;  %v1611_v63 = vpop.permute.xlu0 %1610 }
 0x1cc   : > { %v1740_v13 = vsel %vm1695_vm13, %v1727_v24, %v1611_v63 }
 0x1cf   : > { %v1443_v1 = vpop.permute.xlu1 %1442 }
 0x1d0   : > { %v1663_v3 = vpop.permute.xlu0 %1662  ;;  %v1690_v62 = vsel %vm986_vm7, %v13793_v8, %v1443_v1 }
 0x1d1   : > { %v1751_v26 = vsel %vm1706_vm5, %v1740_v13, %v1663_v3  ;;  %v1701_v14 = vsel %vm1695_vm13, %v1690_v62, %v1468_v60 }
 0x1d2   : > { %1968 = vmatprep.mubr.bf16.mxu1 %v1751_v26 }
 0x1d3   : > { %1969 = vmatmul.mubr.bf16.gmra.mrb[4].mxu1 %v1711_v2  ;;  %v1501_v23 = vpop.permute.xlu1 %1500  ;;  %v12555_v2 = vld [vmem:[%s17540_s5 + $0x40] sm:$0xff]  }
 0x1d4   : > { %v1583_v41 = vpop.permute.xlu0 %1582  ;;  %v1714_v17 = vsel %vm1706_vm5, %v1701_v14, %v1501_v23  ;;  %v12556_v23 = vld [vmem:[%s17540_s5] sm:$0xff]   ;;  %12186 = vmatprep.subr.bf16.mxu0 %v12555_v2  ;;  %v12560_v14 = vld [vmem:[%s17540_s5 + $0x10] sm:$0xff]  }
 0x1d5   : > { %v1730_v38 = vsel %vm986_vm7, %v13901_v18, %v1583_v41  ;;  %v12557_v41 = vld [vmem:[%s17540_s5 + $0x48] sm:$0xff]   ;;  %12187 = vmatpush3.bf16.msra.mxu0 %v12556_v23 }
 0x1d6   : > { %12188 = vmatprep.subr.bf16.mxu0 %v12557_v41 }
 0x1d7   : > { %v1470_v6 = vpop.permute.xlu1 %1469 }
 0x1d8   : > { %v1613_v32 = vpop.permute.xlu0 %1612 }
 0x1d9   : > { %v1742_v56 = vsel %vm1695_vm13, %v1730_v38, %v1613_v32 }
 0x1db   : > { %v1445_v48 = vpop.permute.xlu1 %1444 }
 0x1dc   : > { %v1665_v50 = vpop.permute.xlu0 %1664  ;;  %v1692_v18 = vsel %vm986_vm7, %v13852_v31, %v1445_v48  ;;  %v12558_v48 = vld [vmem:[%s17540_s5 + $0x8] sm:$0xff]  }
 0x1dd   : > { %v1754_v11 = vsel %vm1706_vm5, %v1742_v56, %v1665_v50  ;;  %v1703_v29 = vsel %vm1695_vm13, %v1692_v18, %v1470_v6  ;;  %v12559_v50 = vld [vmem:[%s17540_s5 + $0x50] sm:$0xff]   ;;  %12189 = vmatpush3.bf16.msra.mxu0 %v12558_v48 }
 0x1de   : > { %1976 = vmatprep.mubr.bf16.mxu1 %v1754_v11  ;;  %12190 = vmatprep.subr.bf16.mxu0 %v12559_v50 }
 0x1df   : > { %1977 = vmatmul.mubr.bf16.gmra.mrb[8].mxu1 %v1714_v17  ;;  %v1503_v19 = vpop.permute.xlu1 %1502  ;;  %v12561_v17 = vld [vmem:[%s17540_s5 + $0x58] sm:$0xff]  }
 0x1e0   : > { %v1585_v22 = vpop.permute.xlu0 %1584  ;;  %v1717_v45 = vsel %vm1706_vm5, %v1703_v29, %v1503_v19  ;;  %v12563_v19 = vld [vmem:[%s17540_s5 + $0x60] sm:$0xff]  }
 0x1e1   : > { %v1733_v44 = vsel %vm986_vm7, %v13938_v10, %v1585_v22  ;;  %12191 = vmatpush3.bf16.msra.mxu0 %v12560_v14  ;;  %v12562_v22 = vld [vmem:[%s17540_s5 + $0x18] sm:$0xff]  }
 0x1e2   : > { %12192 = vmatprep.subr.bf16.mxu0 %v12561_v17 }
 0x1e3   : > { %v1447_v12 = vpop.permute.xlu1 %1446 }
 0x1e4   : > { %v1615_v25 = vpop.permute.xlu0 %1614  ;;  %v1694_v10 = vsel %vm986_vm7, %v13888_v54, %v1447_v12  ;;  %v12565_v12 = vld [vmem:[%s17540_s5 + $0x68] sm:$0xff]  }
 0x1e5   : > { %v1744_v7 = vsel %vm1695_vm13, %v1733_v44, %v1615_v25  ;;  %12193 = vmatpush3.bf16.msra.mxu0 %v12562_v22  ;;  %v12564_v25 = vld [vmem:[%s17540_s5 + $0x20] sm:$0xff]  }
 0x1e6   : > { %12194 = vmatprep.subr.bf16.mxu0 %v12563_v19 }
 0x1e7   : > { %v1472_v28 = vpop.permute.xlu1 %1471 }
 0x1e8   : > { %v1587_v27 = vpop.permute.xlu0 %1586  ;;  %v1705_v43 = vsel %vm1695_vm13, %v1694_v10, %v1472_v28 }
 0x1e9   : > { %v1736_v36 = vsel %vm986_vm7, %v13941_v33, %v1587_v27  ;;  %v10667_v33 = vcombine.low %v1364_v16, %v13715_v52  ;;  %v1679_v52 = vrot.slane %v13888_v54, 3  ;;  %v12547_v54 = vld [vmem:[%s17540_s5 + $0x100] sm:$0xff]   ;;  %12195 = vmatpush3.bf16.msra.mxu0 %v12564_v25 }
 0x1ea   : > { %12366 = vmatprep.subr.bf16.mxu1 %v12547_v54  ;;  %12196 = vmatprep.subr.bf16.mxu0 %v12565_v12 }
 0x1eb   : > { %v1505_v39 = vpop.permute.xlu1 %1504  ;;  %v1674_v47 = vrot.slane %v10667_v33, 3  ;;  %v1680_v8 = vsel %vm1673_vm11, %v1677_v61, %v1679_v52  ;;  %v1682_v31 = vsel %vm1673_vm11, %v1679_v52, %v1681_v0  ;;  %v12549_v0 = vld [vmem:[%s17540_s5 + $0x110] sm:$0xff]  }
 0x1ec   : > { %v1667_v9 = vpop.permute.xlu0 %1666  ;;  %v1720_v37 = vsel %vm1706_vm5, %v1705_v43, %v1505_v39 }
 0x1ed   : > { %v1757_v58 = vsel %vm1706_vm5, %v1744_v7, %v1667_v9  ;;  %v1676_v49 = vsel %vm1673_vm11, %v1674_v47, %v1675_v46  ;;  %v12566_v9 = vld [vmem:[%s17540_s5 + $0x28] sm:$0xff]  }
 0x1ee   : > { %1984 = vmatprep.mubr.bf16.mxu1 %v1757_v58  ;;  %v12567_v58 = vld [vmem:[%s17540_s5 + $0x70] sm:$0xff]   ;;  %12197 = vmatpush3.bf16.msra.mxu0 %v12566_v9 }
 0x1ef   : > { %1985 = vmatmul.mubr.bf16.gmra.mrb[12].mxu1 %v1717_v45  ;;  %v12568_v45 = vld [vmem:[%s17540_s5 + $0x30] sm:$0xff]   ;;  %12198 = vmatprep.subr.bf16.mxu0 %v12567_v58 }
 0x1f0   : > { %v1617_v35 = vpop.permute.xlu0 %1616 }
 0x1f1   : > { %v1746_v53 = vsel %vm1695_vm13, %v1736_v36, %v1617_v35  ;;  %v12569_v35 = vld [vmem:[%s17540_s5 + $0x78] sm:$0xff]  }
 0x1f2   : > { %12199 = vmatpush3.bf16.msra.mxu0 %v12568_v45 }
 0x1f3   : > { %12200 = vmatprep.subr.bf16.mxu0 %v12569_v35 }
 0x1f4   : > { %v1669_v42 = vpop.permute.xlu0 %1668 }
 0x1f5   : > { %v1760_v40 = vsel %vm1706_vm5, %v1746_v53, %v1669_v42  ;;  %v12570_v42 = vld [vmem:[%s17540_s5 + $0x38] sm:$0xff]   ;;  %vm2155_vm5 = vmand %vm2154_vm1, %vm17542_vm12  ;;  %vm2204_vm1 = vsmask.f32 3334 }
 0x1f6   : > { %1992 = vmatprep.mubr.bf16.mxu1 %v1760_v40  ;;  %12201 = vmatpush3.bf16.msra.mxu0 %v12570_v42 }
 0x1f7   : > { %1993 = vmatmul.mubr.bf16.gmra.mrb[16].mxu1 %v1720_v37  ;;  %v14115_v37 = vld [vmem:[%s17541_s4] ss:$0 sm:$0xff]  ;;  %s594_s4 = scalar_lea.vmem [#allocation9], %s593_s28 }
 0x1f8   : > { %12346 = vmatprep.mubr.msk.bf16.mxu1 %vm13306_vm10, %v13305_v51  ;;  %s10543_s25 = sshll.u32 %s594_s4, 4  ;;  %s17432_s25 = int_to_ptr.vmem [resolvable:$true] %s10543_s25 }
 0x1f9   : > { %s13237_s24 = scalar_lea.vmem %s17432_s25, 16 }
 0x1fa   : > { %p13238_p11 = scmp.ne.s32.totalorder %s17432_s25, %s13237_s24 }
 0x1fc   : > { %p13239_p12 = pnand %p13238_p11, %p13447_p5 }
 0x1fe   : > { %p13240_p13 = pneg %p13239_p12 }
 0x1ff   : > { %12347 = vmatmul.mubr.msk.bf16.vlgmr.msra.gmra.mrb[20].mxu1 %vm986_vm7, %v1676_v49 }
 0x200   : > { %12350 = vmatprep.mubr.msk.bf16.mxu1 %vm13306_vm10, %v13305_v51  ;;  %12367 = vmatpush3.bf16.msra.mxu1 %v12547_v54 }
 0x201   : > { %12368 = vmatprep.subr.bf16.mxu1 %v12548_v34 }
 0x204   : > { %12369 = vmatpush3.bf16.msra.mxu1 %v12548_v34 }
 0x205   : > { %12370 = vmatprep.subr.bf16.mxu1 %v12549_v0 }
 0x207   : > { %12351 = vmatmul.mubr.msk.bf16.gmra.mrb[24].mxu1 %vm986_vm7, %v1678_v55 }
 0x208   : > { %12354 = vmatprep.mubr.msk.bf16.mxu1 %vm13306_vm10, %v13305_v51  ;;  %12371 = vmatpush3.bf16.msra.mxu1 %v12549_v0 }
 0x20f   : > { %12355 = vmatmul.mubr.msk.bf16.gmra.mrb[28].mxu1 %vm986_vm7, %v1680_v8 }
 0x210   : > { %12358 = vmatprep.mubr.msk.bf16.mxu1 %vm13306_vm10, %v13305_v51 }
 0x217   : > { %12359 = vmatmul.mubr.msk.bf16.gmra.mrb[32].mxu1 %vm986_vm7, %v1682_v31 }
 0x218   : > { %12362 = vmatprep.mubr.msk.bf16.mxu1 %vm13306_vm10, %v13305_v51 }
 0x21f   : > { %12363 = vmatmul.mubr.msk.bf16.gmra.mrb[36].mxu1 %vm986_vm7, %v13932_v4  ;;  %v12550_v4 = vld [vmem:[%s17540_s5 + $0x118] sm:$0xff]  }
 0x220   : > { %12372 = vmatprep.subr.bf16.mxu1 %v12550_v4 }
 0x221   : > { %12373 = vmatpush3.bf16.msra.mxu1 %v12550_v4 }
 0x296   : > { %v12149_v15 = vpop.f32.mrb[0].mxu1 }
 0x297   : > { %v12150_v57 = vpop.f32.mrb[1].mxu1 }
 0x298   : > { %v12151_v59 = vadd.f32 %v12150_v57, %v12149_v15  ;;  %v12152_v60 = vpop.f32.mrb[2].mxu1 }
 0x299   : > { %v12153_v63 = vpop.f32.mrb[3].mxu1 }
 0x29a   : > { %v12154_v30 = vadd.f32 %v12153_v63, %v12152_v60  ;;  %v1963_v16 = vadd.f32 %v12151_v59, %v14115_v37 }
 0x29c   : > { %v1966_v49 = vadd.f32 %v12154_v30, %v14115_v37 }
 0x2a6   : > { %v12155_v24 = vpop.f32.mrb[4].mxu1 }
 0x2a7   : > { %v12156_v1 = vpop.f32.mrb[5].mxu1 }
 0x2a8   : > { %v14048_v13 = vadd.f32 %v12156_v1, %v12155_v24  ;;  %v12158_v3 = vpop.f32.mrb[6].mxu1 }
 0x2a9   : > { %v12159_v26 = vpop.f32.mrb[7].mxu1 }
 0x2aa   : > { %v14050_v5 = vadd.f32 %v12159_v26, %v12158_v3  ;;  %v1971_v54 = vadd.f32 %v14048_v13, %v14115_v37 }
 0x2ac   : > { %v1974_v15 = vadd.f32 %v14050_v5, %v14115_v37 }
 0x2b2   : > { %v12161_v6 = vpop.f32.mrb[8].mxu1 }
 0x2b3   : > { %v12162_v32 = vpop.f32.mrb[9].mxu1 }
 0x2b4   : > { %v14061_v62 = vadd.f32 %v12162_v32, %v12161_v6  ;;  %v12164_v38 = vpop.f32.mrb[10].mxu1 }
 0x2b5   : > { %v12165_v56 = vpop.f32.mrb[11].mxu1 }
 0x2b6   : > { %v14069_v11 = vadd.f32 %v12165_v56, %v12164_v38  ;;  %v1979_v13 = vadd.f32 %v14061_v62, %v14115_v37 }
 0x2b8   : > { %v1982_v23 = vadd.f32 %v14069_v11, %v14115_v37 }
 0x2c2   : > { %v12167_v27 = vpop.f32.mrb[12].mxu1 }
 0x2c3   : > { %v12168_v18 = vpop.f32.mrb[13].mxu1 }
 0x2c4   : > { %v14089_v44 = vadd.f32 %v12168_v18, %v12167_v27  ;;  %v12170_v7 = vpop.f32.mrb[14].mxu1 }
 0x2c5   : > { %v12171_v28 = vpop.f32.mrb[15].mxu1 }
 0x2c6   : > { %v14097_v29 = vadd.f32 %v12171_v28, %v12170_v7  ;;  %v1987_v62 = vadd.f32 %v14089_v44, %v14115_v37 }
 0x2c8   : > { %v1990_v19 = vadd.f32 %v14097_v29, %v14115_v37 }
 0x2ca   : > { %v12173_v36 = vpop.f32.mrb[16].mxu1 }
 0x2cb   : > { %v12174_v39 = vpop.f32.mrb[17].mxu1 }
 0x2cc   : > { %v14105_v10 = vadd.f32 %v12174_v39, %v12173_v36  ;;  %v12176_v53 = vpop.f32.mrb[18].mxu1 }
 0x2cd   : > { %v12177_v43 = vpop.f32.mrb[19].mxu1 }
 0x2ce   : > { %v14110_v40 = vadd.f32 %v12177_v43, %v12176_v53  ;;  %v1995_v44 = vadd.f32 %v14105_v10, %v14115_v37 }
 0x2d0   : > { %v1998_v53 = vadd.f32 %v14110_v40, %v14115_v37 }
 0x2d2   : > { %v2035_v33 = vpop.f32.mrb[20].mxu1 }
 0x2d3   : > { %v2036_v46 = vadd.f32 %v2035_v33, %v1963_v16  ;;  %v12348_v47 = vpop.f32.mrb[21].mxu1 }
 0x2d4   : > { %v2038_v61 = vpop.f32.mrb[22].mxu1 }
 0x2d5   : > { %v2074_v55 = vmax.f32 %v2036_v46, 0.0  ;;  %v2039_v52 = vadd.f32 %v2038_v61, %v1966_v49  ;;  %v12349_v8 = vpop.f32.mrb[23].mxu1 }
 0x2d6   : > { %v2151_v8 = vld [vmem:[#allocation5] sm:$0x8] }
 0x2d7   : > { %2084 = vst.msk [vmem:[#allocation4] sm:$0xff] %vm1695_vm13, %v2074_v55  ;;  %v2075_v31 = vmax.f32 %v2039_v52, 0.0 }
 0x2d9   : > { %2085 = vst.msk [vmem:[#allocation4 + $0x8] sm:$0xff] %vm1695_vm13, %v2075_v31 }
 0x2da   : > { %v2043_v34 = vpop.f32.mrb[24].mxu1 }
 0x2db   : > { %v2044_v0 = vadd.f32 %v2043_v34, %v1971_v54  ;;  %v12352_v4 = vpop.f32.mrb[25].mxu1 }
 0x2dc   : > { %v2046_v57 = vpop.f32.mrb[26].mxu1 }
 0x2dd   : > { %v2076_v59 = vmax.f32 %v2044_v0, 0.0  ;;  %v2047_v60 = vadd.f32 %v2046_v57, %v1974_v15  ;;  %v12353_v63 = vpop.f32.mrb[27].mxu1  ;;  %v2156_v57 = vld [vmem:[#allocation5 + $0x4] sm:$0x3] }
 0x2df   : > { %2086 = vst.msk [vmem:[#allocation4 + $0x10] sm:$0xff] %vm1695_vm13, %v2076_v59  ;;  %v2077_v30 = vmax.f32 %v2047_v60, 0.0 }
 0x2e0   : > { %v2102_v24 = vld [vmem:[#allocation4] ss:$2 sm:$0xff]  ;;  %v2112_v1 = vld [vmem:[#allocation4 + $0x1] ss:$2 sm:$0xff] }
 0x2e1   : > { %v2121_v3 = vmax.f32 %v2102_v24, %v2112_v1  ;;  %2087 = vst.msk [vmem:[#allocation4 + $0x18] sm:$0xff] %vm1695_vm13, %v2077_v30 }
 0x2e2   : > { %v2051_v26 = vpop.f32.mrb[28].mxu1 }
 0x2e3   : > { %2126 = vst.msk [vmem:[#allocation4] sm:$0xff] %vm1695_vm13, %v2121_v3  ;;  %v2052_v2 = vadd.f32 %v2051_v26, %v1979_v13  ;;  %v12356_v5 = vpop.f32.mrb[29].mxu1 }
 0x2e4   : > { %v2054_v41 = vpop.f32.mrb[30].mxu1  ;;  %v2179_v5 = vld [vmem:[#allocation5 + $0x4] sm:$0xc] }
 0x2e5   : > { %v2078_v6 = vmax.f32 %v2052_v2, 0.0  ;;  %v2055_v32 = vadd.f32 %v2054_v41, %v1982_v23  ;;  %v12357_v38 = vpop.f32.mrb[31].mxu1  ;;  %v2184_v23 = vld [vmem:[#allocation5 + $0x8] sm:$0x1] }
 0x2e7   : > { %2088 = vst.msk [vmem:[#allocation4 + $0x20] sm:$0xff] %vm1695_vm13, %v2078_v6  ;;  %v2079_v48 = vmax.f32 %v2055_v32, 0.0 }
 0x2e8   : > { %v2104_v56 = vld [vmem:[#allocation4 + $0x10] ss:$2 sm:$0xff]  ;;  %v2114_v50 = vld [vmem:[#allocation4 + $0x11] ss:$2 sm:$0xff] }
 0x2e9   : > { %v2122_v14 = vmax.f32 %v2104_v56, %v2114_v50  ;;  %2089 = vst.msk [vmem:[#allocation4 + $0x28] sm:$0xff] %vm1695_vm13, %v2079_v48 }
 0x2ea   : > { %v2059_v17 = vpop.f32.mrb[32].mxu1  ;;  %v2131_v35 = vld [vmem:[#allocation4] sm:$0xf] }
 0x2eb   : > { %2127 = vst.msk [vmem:[#allocation4 + $0x8] sm:$0xff] %vm1695_vm13, %v2122_v14  ;;  %v2060_v22 = vadd.f32 %v2059_v17, %v1987_v62  ;;  %v12360_v11 = vpop.f32.mrb[33].mxu1 }
 0x2ec   : > { %v2062_v25 = vpop.f32.mrb[34].mxu1 }
 0x2ed   : > { %v2080_v12 = vmax.f32 %v2060_v22, 0.0  ;;  %v2063_v27 = vadd.f32 %v2062_v25, %v1990_v19  ;;  %v12361_v18 = vpop.f32.mrb[35].mxu1  ;;  %v2206_v19 = vld [vmem:[#allocation5 + $0x8] sm:$0xe] }
 0x2ef   : > { %2090 = vst.msk [vmem:[#allocation4 + $0x30] sm:$0xff] %vm1695_vm13, %v2080_v12  ;;  %v2081_v7 = vmax.f32 %v2063_v27, 0.0 }
 0x2f0   : > { %v2106_v9 = vld [vmem:[#allocation4 + $0x20] ss:$2 sm:$0xff]  ;;  %v2116_v28 = vld [vmem:[#allocation4 + $0x21] ss:$2 sm:$0xff] }
 0x2f1   : > { %v2123_v58 = vmax.f32 %v2106_v9, %v2116_v28  ;;  %2091 = vst.msk [vmem:[#allocation4 + $0x38] sm:$0xff] %vm1695_vm13, %v2081_v7 }
 0x2f2   : > { %v2067_v45 = vpop.f32.mrb[36].mxu1  ;;  %v2132_v36 = vld [vmem:[#allocation4 + $0x5] sm:$0xf]  ;;  %v2159_v54 = vld [vmem:[#allocation4 + $0xa] sm:$0xf] }
 0x2f3   : > { %2128 = vst.msk [vmem:[#allocation4 + $0x10] sm:$0xff] %vm1695_vm13, %v2123_v58  ;;  %v2068_v29 = vadd.f32 %v2067_v45, %v1995_v44  ;;  %v12364_v39 = vpop.f32.mrb[37].mxu1  ;;  %v2133_v42 = vmax.f32 %v2131_v35, %v2132_v36  ;;  %v2227_v36 = vld [vmem:[#allocation5 + $0xc] sm:$0x7] }
 0x2f4   : > { %v2070_v43 = vpop.f32.mrb[38].mxu1 }
 0x2f5   : > { %v2082_v16 = vmax.f32 %v2068_v29, 0.0  ;;  %v2071_v33 = vadd.f32 %v2070_v43, %v1998_v53  ;;  %v12365_v46 = vpop.f32.mrb[39].mxu1  ;;  %v12108_v47 = vpack.c.bf16 %v2133_v42, %v2133_v42 }
 0x2f7   : > { %2092 = vst.msk [vmem:[#allocation4 + $0x40] sm:$0xff] %vm1695_vm13, %v2082_v16  ;;  %v2083_v10 = vmax.f32 %v2071_v33, 0.0  ;;  %v2139_v49 = vshll.u32 %v12108_v47, 16  ;;  %v2142_v61 = vshrl.u32 %v12108_v47, 16 }
 0x2f8   : > { %v2108_v55 = vld [vmem:[#allocation4 + $0x30] ss:$2 sm:$0xff]  ;;  %v2118_v52 = vld [vmem:[#allocation4 + $0x31] ss:$2 sm:$0xff] }
 0x2f9   : > { %v2124_v31 = vmax.f32 %v2108_v55, %v2118_v52  ;;  %2093 = vst.msk [vmem:[#allocation4 + $0x48] sm:$0xff] %vm1695_vm13, %v2083_v10  ;;  %v2141_v40 = vrot.slane %v2139_v49, 5  ;;  %v2144_v37 = vrot.slane %v2142_v61, 4  ;;  %v12572_v49 = vld [vmem:[%s17540_s5 + $0xc0] sm:$0xff]  }
 0x2fa   : > { %v2160_v34 = vld [vmem:[#allocation4 + $0xf] sm:$0xf]  ;;  %v2187_v41 = vld [vmem:[#allocation4 + $0x14] sm:$0xf]  ;;  %12214 = vmatprep.subr.bf16.mxu0 %v12572_v49 }
 0x2fb   : > { %2129 = vst.msk [vmem:[#allocation4 + $0x18] sm:$0xff] %vm1695_vm13, %v2124_v31  ;;  %v2161_v0 = vmax.f32 %v2159_v54, %v2160_v34  ;;  %v2145_v4 = vor.u32 %v2144_v37, %v2141_v40  ;;  %v2152_v15 = vsel %vm2150_vm15, %v2141_v40, %v2151_v8  ;;  %vm2203_vm15 = vcmask 519169   ;;  %v2240_v40 = vld [vmem:[#allocation5 + $0x10] sm:$0x7]  ;;  %v12573_v49 = vld [vmem:[%s17540_s5 + $0x80] sm:$0xff]  }
 0x2fc   : > { %2153 = vst [vmem:[#allocation5] sm:$0x8] %v2152_v15  ;;  %vm2205_vm12 = vmand %vm2203_vm15, %vm2204_vm1 }
 0x2fd   : > { %v12109_v59 = vpack.c.bf16 %v2161_v0, %v2161_v0  ;;  %v2146_v60 = vrot.slane %v2145_v4, 4 }
 0x2ff   : > { %v2167_v63 = vshrl.u32 %v12109_v59, 16  ;;  %v2170_v30 = vshll.u32 %v12109_v59, 16  ;;  %v2157_v24 = vsel %vm2155_vm5, %v2146_v60, %v2156_v57  ;;  %vm2225_vm5 = vsmask.f32 2306  ;;  %v2239_v57 = vld [vmem:[#allocation5 + $0x10] sm:$0x3] }
 0x300   : > { %v2110_v1 = vld [vmem:[#allocation4 + $0x40] ss:$2 sm:$0xff]  ;;  %v2120_v3 = vld [vmem:[#allocation4 + $0x41] ss:$2 sm:$0xff]  ;;  %2158 = vst [vmem:[#allocation5 + $0x4] sm:$0x3] %v2157_v24 }
 0x301   : > { %v2125_v13 = vmax.f32 %v2110_v1, %v2120_v3  ;;  %v2169_v26 = vrot.slane %v2167_v63, 5  ;;  %v2172_v2 = vrot.slane %v2170_v30, 6 }
 0x302   : > { %v2188_v6 = vld [vmem:[#allocation4 + $0x19] sm:$0xf] }
 0x303   : > { %2130 = vst.msk [vmem:[#allocation4 + $0x20] sm:$0xff] %vm1695_vm13, %v2125_v13  ;;  %v2173_v32 = vor.u32 %v2172_v2, %v2169_v26  ;;  %v2174_v38 = vrot.slane %v2169_v26, 4  ;;  %v2189_v48 = vmax.f32 %v2187_v41, %v2188_v6  ;;  %v2230_v58 = vld [vmem:[#allocation5] sm:$0xf] }
 0x304   : > { %v2235_v39 = vld [vmem:[#allocation5] sm:$0x8] }
 0x305   : > { %v2180_v56 = vsel %vm2178_vm8, %v2173_v32, %v2179_v5  ;;  %v2185_v50 = vsel %vm13537_vm6, %v2174_v38, %v2184_v23  ;;  %v12110_v14 = vpack.c.bf16 %v2189_v48, %v2189_v48  ;;  %vm2224_vm6 = vcmask 518144   ;;  %v2234_v47 = vld [vmem:[#allocation5] sm:$0xe] }
 0x306   : > { %2181 = vst [vmem:[#allocation5 + $0x4] sm:$0xc] %v2180_v56  ;;  %2186 = vst [vmem:[#allocation5 + $0x8] sm:$0x1] %v2185_v50 }
 0x307   : > { %v2195_v62 = vshrl.u32 %v12110_v14, 16  ;;  %v2198_v17 = vshll.u32 %v12110_v14, 16  ;;  %vm2226_vm9 = vmand %vm2224_vm6, %vm2225_vm5 }
 0x309   : > { %v2197_v22 = vrot.slane %v2195_v62, 6  ;;  %v2200_v11 = vrot.slane %v2198_v17, 7 }
 0x30a   : > { %v2209_v25 = vld [vmem:[#allocation4 + $0x1e] sm:$0xf]  ;;  %v2210_v12 = vld [vmem:[#allocation4 + $0x23] sm:$0xf] }
 0x30b   : > { %v2201_v27 = vor.u32 %v2200_v11, %v2197_v22  ;;  %v2211_v18 = vmax.f32 %v2209_v25, %v2210_v12 }
 0x30d   : > { %v2207_v7 = vsel %vm2205_vm12, %v2201_v27, %v2206_v19  ;;  %v12111_v9 = vpack.c.bf16 %v2211_v18, %v2211_v18  ;;  %v14155_v21 = vld [vmem:[#allocation5 + $0x4] sm:$0xf] }
 0x30e   : > { %2208 = vst [vmem:[#allocation5 + $0x8] sm:$0xe] %v2207_v7  ;;  %v14158_v35 = vcombine.low %v2230_v58, %v14155_v21  ;;  %v10700_v53 = vcombine.low %v2235_v39, %v14155_v21  ;;  %v2238_v33 = vld [vmem:[#allocation5 + $0x4] sm:$0xc]  ;;  %v10699_v10 = vcombine.low %v2234_v47, %v14155_v21 }
 0x30f   : > { %v2217_v28 = vshrl.u32 %v12111_v9, 16  ;;  %v2220_v45 = vshll.u32 %v12111_v9, 16  ;;  %v2241_v52 = vld [vmem:[#allocation5 + $0x4] sm:$0x8] }
 0x310   : > { %v2256_v16 = vshll.u32 %v14158_v35, 16  ;;  %v2296_v61 = vshrl.u32 %v10700_v53, 16  ;;  %v2299_v55 = vshll.u32 %v10700_v53, 16  ;;  %v2254_v37 = vshrl.u32 %v14158_v35, 16 }
 0x311   : > { %v2219_v44 = vrot.slane %v2217_v28, 7  ;;  %v2284_v34 = vrot.slane %v10700_v53, 3  ;;  %v2275_v0 = vrot.slane %v10699_v10, 1 }
 0x312   : > { %v2258_v8 = vrot.slane %v2256_v16, 1  ;;  %v2298_v4 = vrot.slane %v2296_v61, 3  ;;  %v2301_v15 = vrot.slane %v2299_v55, 4 }
 0x313   : > { %v2222_v29 = vor.u32 %v2220_v45, %v2219_v44 }
 0x314   : > { %v2259_v30 = vor.u32 %v2258_v8, %v2254_v37  ;;  %v2302_v45 = vor.u32 %v2301_v15, %v2298_v4 }
 0x315   : > { %v2228_v42 = vsel %vm2226_vm9, %v2222_v29, %v2227_v36  ;;  %v14161_v43 = vld [vmem:[#allocation5 + $0x8] sm:$0xf] }
 0x316   : > { %2229 = vst [vmem:[#allocation5 + $0xc] sm:$0x7] %v2228_v42  ;;  %v10705_v46 = vcombine.low %v2238_v33, %v14161_v43  ;;  %v10708_v31 = vcombine.low %v2241_v52, %v14161_v43  ;;  %v10703_v33 = vcombine.low %v14155_v21, %v14161_v43  ;;  %v12574_v21 = vld [vmem:[%s17540_s5 + $0xc8] sm:$0xff]  }
 0x318   : > { %v2331_v54 = vshrl.u32 %v10705_v46, 16  ;;  %v2354_v1 = vrot.slane %v10708_v31, 3  ;;  %v2334_v2 = vshll.u32 %v10705_v46, 16  ;;  %v2324_v23 = vrot.slane %v10705_v46, 2  ;;  %v12575_v31 = vld [vmem:[%s17540_s5 + $0x88] sm:$0xff]  }
 0x31a   : > { %v2333_v26 = vrot.slane %v2331_v54, 2  ;;  %v2336_v7 = vrot.slane %v2334_v2, 3 }
 0x31c   : > { %v2337_v53 = vor.u32 %v2336_v7, %v2333_v26  ;;  %v12608_v7 = vld [vmem:[%s17479_s7 + $0x64] ss:$8 sps:$4 sm:$0xff]  }
 0x31d   : > { %v2237_v59 = vld [vmem:[#allocation5 + $0xc] sm:$0xf] }
 0x31e   : > { %v2236_v60 = vld [vmem:[#allocation5 + $0xc] sm:$0x7]  ;;  %v10707_v24 = vcombine.low %v2237_v59, %v2240_v40  ;;  %v10702_v5 = vcombine.low %v14161_v43, %v2237_v59  ;;  %v10706_v38 = vcombine.low %v2237_v59, %v2239_v57  ;;  %v10704_v46 = vcombine.low %v2237_v59, %v2237_v59  ;;  %v12580_v57 = vld [vmem:[%s17540_s5 + $0xe0] sm:$0xff]  }
 0x31f   : > { %v2233_v63 = vld [vmem:[#allocation5 + $0xc] sm:$0x1]  ;;  %v10701_v3 = vcombine.low %v14161_v43, %v2236_v60  ;;  %v12581_v59 = vld [vmem:[%s17540_s5 + $0xa0] sm:$0xff]   ;;  %v12582_v60 = vld [vmem:[%s17540_s5 + $0xe8] sm:$0xff]  }
 0x320   : > { %v10698_v13 = vcombine.low %v14161_v43, %v2233_v63  ;;  %v2355_v41 = vrot.slane %v10707_v24, 3  ;;  %v2339_v48 = vshrl.u32 %v10707_v24, 16  ;;  %v2342_v56 = vshll.u32 %v10707_v24, 16  ;;  %v12576_v40 = vld [vmem:[%s17540_s5 + $0xd0] sm:$0xff]   ;;  %v12583_v63 = vld [vmem:[%s17540_s5 + $0xa8] sm:$0xff]  }
 0x321   : > { %v2285_v6 = vrot.slane %v10701_v3, 3  ;;  %v2304_v14 = vshrl.u32 %v10702_v5, 16  ;;  %v2307_v11 = vshll.u32 %v10702_v5, 16  ;;  %v14181_v28 = vrot.slane %v10706_v38, 2  ;;  %v12585_v24 = vld [vmem:[%s17540_s5 + $0xb0] sm:$0xff]   ;;  %v12587_v3 = vld [vmem:[%s17540_s5 + $0xb8] sm:$0xff]  }
 0x322   : > { %v2261_v32 = vshll.u32 %v10698_v13, 16  ;;  %v2276_v50 = vrot.slane %v10698_v13, 1  ;;  %v2356_v62 = vsel %vm1673_vm11, %v2354_v1, %v2355_v41  ;;  %v2341_v19 = vrot.slane %v2339_v48, 2  ;;  %v12586_v1 = vld [vmem:[%s17540_s5 + $0xf8] sm:$0xff]   ;;  %v12588_v38 = vld [vmem:[%s17479_s7] ss:$8 sps:$4 sm:$0xff]  }
 0x323   : > { %v2286_v17 = vsel %vm1673_vm11, %v2284_v34, %v2285_v6  ;;  %12374 = vmatprep.mubr.msk.bf16.mxu1 %vm1695_vm13, %v2356_v62  ;;  %v2344_v25 = vrot.slane %v2342_v56, 3  ;;  %v2306_v27 = vrot.slane %v2304_v14, 3  ;;  %v2309_v9 = vrot.slane %v2307_v11, 4  ;;  %v12577_v34 = vld [vmem:[%s17540_s5 + $0x90] sm:$0xff]   ;;  %v12590_v48 = vld [vmem:[%s17479_s7 + $0x4] ss:$8 sps:$4 sm:$0xff]  }
 0x324   : > { %v2263_v22 = vrot.slane %v2261_v32, 1  ;;  %2287 = vrot.lane.b32.xlu0 %v2286_v17, %s17544_s26  ;;  %v2277_v12 = vsel %vm1451_vm14, %v2275_v0, %v2276_v50  ;;  %12375 = vmatmul.mubr.msk.bf16.vlgmr.msra.gmra.mrb[40].mxu1 %vm1695_vm13, %v2355_v41  ;;  %v2265_v58 = vshrl.u32 %v10698_v13, 16  ;;  %vm2294_vm11 = vsmask.f32 4352  ;;  %v12578_v0 = vld [vmem:[%s17540_s5 + $0xd8] sm:$0xff]  }
 0x325   : > { %v2345_v44 = vor.u32 %v2344_v25, %v2341_v19  ;;  %v14184_v36 = vor.u32 %v2309_v9, %v2306_v27  ;;  %v2326_v29 = vsel %vm1566_vm2, %v2324_v23, %v14181_v28  ;;  %v12593_v14 = vld [vmem:[%s17479_s7 + $0x14] ss:$8 sps:$4 sm:$0xff]   ;;  %v12591_v62 = vld [vmem:[%s17479_s7 + $0x10] ss:$8 sps:$4 sm:$0xff]   ;;  %v12596_v17 = vld [vmem:[%s17479_s7 + $0x24] ss:$8 sps:$4 sm:$0xff]  }
 0x326   : > { %v2264_v18 = vsel %vm1393_vm0, %v2259_v30, %v2263_v22  ;;  %v2267_v39 = vor.u32 %v2265_v58, %v2263_v22  ;;  %v12584_v30 = vld [vmem:[%s17540_s5 + $0xf0] sm:$0xff]   ;;  %v12594_v22 = vld [vmem:[%s17479_s7 + $0x20] ss:$8 sps:$4 sm:$0xff]   ;;  %v12602_v25 = vld [vmem:[%s17479_s7 + $0x44] ss:$8 sps:$4 sm:$0xff]   ;;  %vm2869_vm0 = vcmask 1043458  }
 0x327   : > { %2268 = vrot.lane.b32.xlu1 %v2264_v18, %s17544_s26  ;;  %v2311_v42 = vsel %vm2294_vm11, %v2302_v45, %v14184_v36  ;;  %v2346_v16 = vsel %vm1621_vm4, %v2337_v53, %v2345_v44  ;;  %v12599_v11 = vld [vmem:[%s17479_s7 + $0x34] ss:$8 sps:$4 sm:$0xff]   ;;  %v12597_v19 = vld [vmem:[%s17479_s7 + $0x30] ss:$8 sps:$4 sm:$0xff]   ;;  %v12606_v9 = vld [vmem:[%s17479_s7 + $0x60] ss:$8 sps:$4 sm:$0xff]  }
 0x328   : > { %2289 = vrot.lane.b32.xlu0 %v2285_v6, %s17544_s26  ;;  %v12605_v27 = vld [vmem:[%s17479_s7 + $0x54] ss:$8 sps:$4 sm:$0xff]   ;;  %v12603_v18 = vld [vmem:[%s17479_s7 + $0x50] ss:$8 sps:$4 sm:$0xff]   ;;  %v12612_v45 = vld [vmem:[%s17479_s7 + $0x80] ss:$8 sps:$4 sm:$0xff]  }
 0x329   : > { %v12609_v58 = vld [vmem:[%s17479_s7 + $0x70] ss:$8 sps:$4 sm:$0xff]   ;;  %v12618_v53 = vld [vmem:[%s17479_s7 + $0xa0] ss:$8 sps:$4 sm:$0xff]   ;;  %vm2870_vm14 = vsmask.f32 3338 }
 0x32a   : > { %vm2871_vm2 = vmand %vm2869_vm0, %vm2870_vm14  ;;  %vm2891_vm4 = vsmask.f32 1282 }
 0x32b   : > { %2270 = vrot.lane.b32.xlu1 %v2267_v39, %s17544_s26  ;;  %v12620_v39 = vld [vmem:[%s17479_s7 + $0xa4] ss:$8 sps:$4 sm:$0xff]  }
 0x32c   : > { %2347 = vrot.lane.b32.xlu0 %v2346_v16, %s17544_s26  ;;  %v12621_v16 = vld [vmem:[%s17479_s7 + $0xb0] ss:$8 sps:$4 sm:$0xff]  }
 0x32f   : > { %2314 = vrot.lane.b32.xlu1 %v10703_v33, %s17544_s26  ;;  %v12626_v33 = vld [vmem:[%s17479_s7 + $0xc4] ss:$8 sps:$4 sm:$0xff]  }
 0x330   : > { %2349 = vrot.lane.b32.xlu0 %v2345_v44, %s17544_s26  ;;  %v12614_v44 = vld [vmem:[%s17479_s7 + $0x84] ss:$8 sps:$4 sm:$0xff]  }
 0x333   : > { %2316 = vrot.lane.b32.xlu1 %v10704_v46, %s17544_s26  ;;  %v12624_v46 = vld [vmem:[%s17479_s7 + $0xc0] ss:$8 sps:$4 sm:$0xff]   ;;  %s17430_s26 = scalar_lea.hbm %s17491_s19, %s12096_s2 }
 0x396   : > { %v2288_v47 = vpop.permute.xlu0 %2287 }
 0x397   : > { %v2366_v10 = vsel %vm1695_vm13, %v2277_v12, %v2288_v47  ;;  %v12600_v12 = vld [vmem:[%s17479_s7 + $0x40] ss:$8 sps:$4 sm:$0xff]   ;;  %v12629_v47 = vld [vmem:[%s17479_s7 + $0xd4] ss:$8 sps:$4 sm:$0xff]  }
 0x398   : > { %2721 = vmatprep.mubr.bf16.mxu0 %v2366_v10  ;;  %v12627_v10 = vld [vmem:[%s17479_s7 + $0xd0] ss:$8 sps:$4 sm:$0xff]  }
 0x399   : > { %v2269_v61 = vpop.permute.xlu1 %2268 }
 0x39a   : > { %v2358_v55 = vsel %vm1695_vm13, %v14158_v35, %v2269_v61  ;;  %v2290_v52 = vpop.permute.xlu0 %2289  ;;  %v10697_v35 = vcombine.low %v14161_v43, %v14161_v43  ;;  %v12579_v43 = vld [vmem:[%s17540_s5 + $0x98] sm:$0xff]   ;;  %v12630_v61 = vld [vmem:[%s17479_s7 + $0xe0] ss:$8 sps:$4 sm:$0xff]   ;;  %s13308_s5 = smov [#allocation9]  }
 0x39b   : > { %2722 = vmatmul.mubr.bf16.vlgmr.msra.gmra.mrb[32].mxu0 %v2358_v55  ;;  %v2370_v8 = vsel %vm1695_vm13, %v2276_v50, %v2290_v52  ;;  %v12633_v55 = vld [vmem:[%s17479_s7 + $0xf0] ss:$8 sps:$4 sm:$0xff]   ;;  %v12639_v52 = vld [vmem:[%s17479_s7 + $0x104] ss:$8 sps:$4 sm:$0xff]   ;;  %s13241_s27 = sshll.u32 %s13308_s5, 4  ;;  %s13242_s27 = int_to_ptr.vmem [resolvable:$false] %s13241_s27 }
 0x39c   : > { %12215 = vmatpush3.bf16.msra.mxu0 %v12573_v49  ;;  %2729 = vmatprep.mubr.bf16.mxu0 %v2370_v8  ;;  %v12632_v49 = vld [vmem:[%s17479_s7 + $0xe4] ss:$8 sps:$4 sm:$0xff]   ;;  %s13243_s0 = scalar_lea.vmem %s13242_s27, 32  ;;  %p13244_p0 = scmp.lt.s32.totalorder %s17432_s25, %s13242_s27 }
 0x39d   : > { %12216 = vmatprep.subr.bf16.mxu0 %v12574_v21  ;;  %v2271_v37 = vpop.permute.xlu1 %2270  ;;  %v12635_v21 = vld [vmem:[%s17479_s7 + $0xf4] ss:$8 sps:$4 sm:$0xff]   ;;  %p13245_p1 = scmp.lt.s32.totalorder %s13243_s0, %s13237_s24 }
 0x39e   : > { %v2348_v54 = vpop.permute.xlu0 %2347  ;;  %v2362_v4 = vsel %vm1695_vm13, %v10697_v35, %v2271_v37 }
 0x39f   : > { %v2382_v15 = vsel %vm1695_vm13, %v2326_v29, %v2348_v54  ;;  %v12615_v29 = vld [vmem:[%s17479_s7 + $0x90] ss:$8 sps:$4 sm:$0xff]   ;;  %p13246_p2 = por %p13245_p1, %p13244_p0 }
 0x3a0   : > { %12217 = vmatpush3.bf16.msra.mxu0 %v12575_v31 }
 0x3a1   : > { %12218 = vmatprep.subr.bf16.mxu0 %v12576_v40  ;;  %v2315_v13 = vpop.permute.xlu1 %2314  ;;  %p13247_p3 = pnand %p13246_p2, %p13240_p13 }
 0x3a2   : > { %v2350_v26 = vpop.permute.xlu0 %2349  ;;  %v2374_v2 = vsel %vm1695_vm13, %v2311_v42, %v2315_v13  ;;  %v12623_v42 = vld [vmem:[%s17479_s7 + $0xb4] ss:$8 sps:$4 sm:$0xff]  }
 0x3a3   : > { %2730 = vmatmul.mubr.bf16.gmra.mrb[36].mxu0 %v2362_v4  ;;  %v2386_v5 = vsel %vm1695_vm13, %v14181_v28, %v2350_v26  ;;  %v12611_v28 = vld [vmem:[%s17479_s7 + $0x74] ss:$8 sps:$4 sm:$0xff]  }
 0x3a4   : > { %12219 = vmatpush3.bf16.msra.mxu0 %v12577_v34  ;;  %2769 = vmatprep.mubr.bf16.mxu0 %v2382_v15 }
 0x3a5   : > { %12220 = vmatprep.subr.bf16.mxu0 %v12578_v0  ;;  %v2317_v23 = vpop.permute.xlu1 %2316 }
 0x3a6   : > { %v2378_v41 = vsel %vm1695_vm13, %v14184_v36, %v2317_v23  ;;  %v12617_v36 = vld [vmem:[%s17479_s7 + $0x94] ss:$8 sps:$4 sm:$0xff]   ;;  %vm17545_vm13 = vcmask 1041408  }
 0x3a7   : > { %vm2892_vm3 = vmand %vm17545_vm13, %vm2891_vm4 }
 0x3a8   : > { %12221 = vmatpush3.bf16.msra.mxu0 %v12579_v43 }
 0x3a9   : > { %12222 = vmatprep.subr.bf16.mxu0 %v12580_v57  ;;  %v10709_v57 = vld [vmem:[%s17478_s6] ss:$0 sm:$0xff] }
 0x3ac   : > { %12223 = vmatpush3.bf16.msra.mxu0 %v12581_v59 }
 0x3ad   : > { %12224 = vmatprep.subr.bf16.mxu0 %v12582_v60 }
 0x3b0   : > { %12225 = vmatpush3.bf16.msra.mxu0 %v12583_v63 }
 0x3b1   : > { %12226 = vmatprep.subr.bf16.mxu0 %v12584_v30 }
 0x3b4   : > { %12227 = vmatpush3.bf16.msra.mxu0 %v12585_v24 }
 0x3b5   : > { %12228 = vmatprep.subr.bf16.mxu0 %v12586_v1 }
 0x3b8   : > { %12229 = vmatpush3.bf16.msra.mxu0 %v12587_v3 }
 0x3b9   : > { %3842 = vmatprep.subr.bf16.mxu0 %v12590_v48 }
 0x3bb   : > { %2770 = vmatmul.mubr.bf16.vlgmr.msra.gmra.mrb[40].mxu0 %v2374_v2 }
 0x3bc   : > { %2777 = vmatprep.mubr.bf16.mxu0 %v2386_v5  ;;  %3843 = vmatpush1.bf16.msra.mxu0 %v12588_v38 }
 0x3bd   : > { %3844 = vmatprep.subr.bf16.mxu0 %v12593_v14 }
 0x3c0   : > { %3845 = vmatpush1.bf16.msra.mxu0 %v12591_v62 }
 0x3c1   : > { %3846 = vmatprep.subr.bf16.mxu0 %v12596_v17 }
 0x3c3   : > { %2778 = vmatmul.mubr.bf16.gmra.mrb[44].mxu0 %v2378_v41 }
 0x3c4   : > { %3847 = vmatpush1.bf16.msra.mxu0 %v12594_v22 }
 0x3c5   : > { %3848 = vmatprep.subr.bf16.mxu0 %v12599_v11 }
 0x3c8   : > { %3849 = vmatpush1.bf16.msra.mxu0 %v12597_v19 }
 0x3c9   : > { %3850 = vmatprep.subr.bf16.mxu0 %v12602_v25 }
 0x3cc   : > { %3851 = vmatpush1.bf16.msra.mxu0 %v12600_v12 }
 0x3cd   : > { %3852 = vmatprep.subr.bf16.mxu0 %v12605_v27 }
 0x3d0   : > { %3853 = vmatpush1.bf16.msra.mxu0 %v12603_v18 }
 0x3d1   : > { %3854 = vmatprep.subr.bf16.mxu0 %v12608_v7 }
 0x3d4   : > { %3855 = vmatpush1.bf16.msra.mxu0 %v12606_v9 }
 0x3d5   : > { %3856 = vmatprep.subr.bf16.mxu0 %v12611_v28 }
 0x3d8   : > { %3857 = vmatpush1.bf16.msra.mxu0 %v12609_v58 }
 0x3d9   : > { %3858 = vmatprep.subr.bf16.mxu0 %v12614_v44 }
 0x3dc   : > { %3859 = vmatpush1.bf16.msra.mxu0 %v12612_v45 }
 0x3dd   : > { %3860 = vmatprep.subr.bf16.mxu0 %v12617_v36 }
 0x3e0   : > { %3861 = vmatpush1.bf16.msra.mxu0 %v12615_v29 }
 0x3e1   : > { %3862 = vmatprep.subr.bf16.mxu0 %v12620_v39 }
 0x3e4   : > { %3863 = vmatpush1.bf16.msra.mxu0 %v12618_v53 }
 0x3e5   : > { %3864 = vmatprep.subr.bf16.mxu0 %v12623_v42 }
 0x3e8   : > { %3865 = vmatpush1.bf16.msra.mxu0 %v12621_v16  ;;  %v2872_v16 = vld [vmem:[#allocation7] sm:$0xc] }
 0x3e9   : > { %3866 = vmatprep.subr.bf16.mxu0 %v12626_v33 }
 0x3ec   : > { %3867 = vmatpush1.bf16.msra.mxu0 %v12624_v46 }
 0x3ed   : > { %3868 = vmatprep.subr.bf16.mxu0 %v12629_v47 }
 0x3f0   : > { %3869 = vmatpush1.bf16.msra.mxu0 %v12627_v10 }
 0x3f1   : > { %3870 = vmatprep.subr.bf16.mxu0 %v12632_v49 }
 0x3f4   : > { %3871 = vmatpush1.bf16.msra.mxu0 %v12630_v61 }
 0x3f5   : > { %3872 = vmatprep.subr.bf16.mxu0 %v12635_v21  ;;  %v2893_v21 = vld [vmem:[#allocation7 + $0x4] sm:$0x3] }
 0x3f7   : > { %v14256_v6 = vpop.f32.mrb[40].mxu1 }
 0x3f8   : > { %v14258_v32 = vpop.f32.mrb[41].mxu1  ;;  %3873 = vmatpush1.bf16.msra.mxu0 %v12633_v55 }
 0x3f9   : > { %v12377_v56 = vpop.f32.mrb[42].mxu1  ;;  %3883 = vmatprep.subr.bf16.mxu0 %v12639_v52 }
 0x3fa   : > { %v14266_v50 = vpop.f32.mrb[43].mxu1 }
 0x46e   : > { %v12202_v8 = vpop.f32.mrb[32].mxu0 }
 0x46f   : > { %v12203_v31 = vpop.f32.mrb[33].mxu0 }
 0x470   : > { %v12204_v40 = vadd.f32 %v12203_v31, %v12202_v8  ;;  %v12205_v37 = vpop.f32.mrb[34].mxu0 }
 0x471   : > { %v12206_v54 = vpop.f32.mrb[35].mxu0 }
 0x472   : > { %v12207_v35 = vadd.f32 %v12206_v54, %v12205_v37  ;;  %v2724_v63 = vadd.f32 %v12204_v40, %v10709_v57 }
 0x474   : > { %v2727_v3 = vadd.f32 %v12207_v35, %v10709_v57 }
 0x476   : > { %v12208_v34 = vpop.f32.mrb[36].mxu0 }
 0x477   : > { %v12209_v0 = vpop.f32.mrb[37].mxu0 }
 0x478   : > { %v12210_v4 = vadd.f32 %v12209_v0, %v12208_v34  ;;  %v12211_v15 = vpop.f32.mrb[38].mxu0 }
 0x479   : > { %v12212_v43 = vpop.f32.mrb[39].mxu0 }
 0x47a   : > { %v2732_v56 = vadd.f32 %v12210_v4, %v10709_v57  ;;  %v12637_v43 = vld [vmem:[%s17479_s7 + $0x100] ss:$8 sps:$4 sm:$0xff]   ;;  %v12643_v57 = vld [vmem:[%s17479_s7 + $0x114] ss:$8 sps:$4 sm:$0xff]  }
 0x48e   : > { %v12230_v59 = vpop.f32.mrb[40].mxu0 }
 0x48f   : > { %v12231_v60 = vpop.f32.mrb[41].mxu0 }
 0x490   : > { %v12232_v30 = vadd.f32 %v12231_v60, %v12230_v59  ;;  %v12233_v24 = vpop.f32.mrb[42].mxu0  ;;  %v12641_v60 = vld [vmem:[%s17479_s7 + $0x110] ss:$8 sps:$4 sm:$0xff]  }
 0x491   : > { %v12234_v1 = vpop.f32.mrb[43].mxu0 }
 0x492   : > { %v2772_v13 = vadd.f32 %v12232_v30, %v2724_v63  ;;  %v12235_v26 = vadd.f32 %v12234_v1, %v12233_v24  ;;  %v12646_v63 = vld [vmem:[%s17479_s7 + $0x124] ss:$8 sps:$4 sm:$0xff]   ;;  %v12644_v30 = vld [vmem:[%s17479_s7 + $0x120] ss:$8 sps:$4 sm:$0xff]   ;;  %v12649_v24 = vld [vmem:[%s17479_s7 + $0x134] ss:$8 sps:$4 sm:$0xff]  }
 0x493   : > { %v12647_v1 = vld [vmem:[%s17479_s7 + $0x130] ss:$8 sps:$4 sm:$0xff]  }
 0x494   : > { %v2820_v2 = vadd.f32 %v14258_v32, %v2772_v13  ;;  %v2775_v5 = vadd.f32 %v12235_v26, %v2727_v3  ;;  %v12652_v3 = vld [vmem:[%s17479_s7 + $0x144] ss:$8 sps:$4 sm:$0xff]   ;;  %v12650_v13 = vld [vmem:[%s17479_s7 + $0x140] ss:$8 sps:$4 sm:$0xff]   ;;  %v12655_v26 = vld [vmem:[%s17479_s7 + $0x154] ss:$8 sps:$4 sm:$0xff]  }
 0x496   : > { %v2833_v23 = vmax.f32 %v2820_v2, 0.0  ;;  %v2823_v41 = vadd.f32 %v14266_v50, %v2775_v5  ;;  %v12236_v38 = vpop.f32.mrb[44].mxu0  ;;  %v12653_v2 = vld [vmem:[%s17479_s7 + $0x150] ss:$8 sps:$4 sm:$0xff]   ;;  %v12658_v5 = vld [vmem:[%s17479_s7 + $0x164] ss:$8 sps:$4 sm:$0xff]  }
 0x497   : > { %v12237_v48 = vpop.f32.mrb[45].mxu0 }
 0x498   : > { %2836 = vst [vmem:[#allocation6] sm:$0xff] %v2833_v23  ;;  %v2834_v14 = vmax.f32 %v2823_v41, 0.0  ;;  %v12238_v62 = vadd.f32 %v12237_v48, %v12236_v38  ;;  %v12239_v17 = vpop.f32.mrb[46].mxu0  ;;  %v12656_v23 = vld [vmem:[%s17479_s7 + $0x160] ss:$8 sps:$4 sm:$0xff]  }
 0x499   : > { %v12240_v22 = vpop.f32.mrb[47].mxu0  ;;  %v12661_v41 = vld [vmem:[%s17479_s7 + $0x174] ss:$8 sps:$4 sm:$0xff]   ;;  %v12659_v38 = vld [vmem:[%s17479_s7 + $0x170] ss:$8 sps:$4 sm:$0xff]  }
 0x49a   : > { %2837 = vst [vmem:[#allocation6 + $0x8] sm:$0xff] %v2834_v14  ;;  %v2780_v11 = vadd.f32 %v12238_v62, %v2732_v56  ;;  %v12664_v48 = vld [vmem:[%s17479_s7 + $0x184] ss:$8 sps:$4 sm:$0xff]   ;;  %v12662_v56 = vld [vmem:[%s17479_s7 + $0x180] ss:$8 sps:$4 sm:$0xff]  }
 0x49b   : > { %v12667_v14 = vld [vmem:[%s17479_s7 + $0x194] ss:$8 sps:$4 sm:$0xff]   ;;  %v12665_v62 = vld [vmem:[%s17479_s7 + $0x190] ss:$8 sps:$4 sm:$0xff]   ;;  %v12670_v17 = vld [vmem:[%s17479_s7 + $0x1a4] ss:$8 sps:$4 sm:$0xff]  }
 0x49c   : > { %v2828_v19 = vadd.f32 %v14256_v6, %v2780_v11  ;;  %v12668_v22 = vld [vmem:[%s17479_s7 + $0x1a0] ss:$8 sps:$4 sm:$0xff]   ;;  %v12673_v11 = vld [vmem:[%s17479_s7 + $0x1b4] ss:$8 sps:$4 sm:$0xff]  }
 0x49e   : > { %v2835_v25 = vmax.f32 %v2828_v19, 0.0  ;;  %v12671_v19 = vld [vmem:[%s17479_s7 + $0x1b0] ss:$8 sps:$4 sm:$0xff]  }
 0x4a0   : > { %2838 = vst [vmem:[#allocation6 + $0x10] sm:$0xff] %v2835_v25  ;;  %v12676_v25 = vld [vmem:[%s17479_s7 + $0x1c4] ss:$8 sps:$4 sm:$0xff]  }
 0x4a1   : > { %v2842_v12 = vld [vmem:[#allocation6] ss:$2 sm:$0xff]  ;;  %v2846_v32 = vld [vmem:[#allocation6 + $0x1] ss:$2 sm:$0xff] }
 0x4a2   : > { %v2849_v27 = vmax.f32 %v2842_v12, %v2846_v32  ;;  %v12674_v12 = vld [vmem:[%s17479_s7 + $0x1c0] ss:$8 sps:$4 sm:$0xff]   ;;  %v12679_v32 = vld [vmem:[%s17479_s7 + $0x1d4] ss:$8 sps:$4 sm:$0xff]  }
 0x4a4   : > { %2851 = vst [vmem:[#allocation6] sm:$0xff] %v2849_v27  ;;  %v12677_v27 = vld [vmem:[%s17479_s7 + $0x1d0] ss:$8 sps:$4 sm:$0xff]  }
 0x4a7   : > { %v2844_v18 = vld [vmem:[#allocation6 + $0x10] ss:$2 sm:$0xf]  ;;  %v2848_v50 = vld [vmem:[#allocation6 + $0x11] ss:$2 sm:$0xf] }
 0x4a8   : > { %v2850_v7 = vmax.f32 %v2844_v18, %v2848_v50  ;;  %v12682_v18 = vld [vmem:[%s17479_s7 + $0x1e4] ss:$8 sps:$4 sm:$0xff]   ;;  %v12680_v50 = vld [vmem:[%s17479_s7 + $0x1e0] ss:$8 sps:$4 sm:$0xff]  }
 0x4aa   : > { %2852 = vst [vmem:[#allocation6 + $0x8] sm:$0xf] %v2850_v7  ;;  %v12685_v7 = vld [vmem:[%s17479_s7 + $0x1f4] ss:$8 sps:$4 sm:$0xff]  }
 0x4ab   : > { %v2853_v9 = vld [vmem:[#allocation6] sm:$0x3]  ;;  %v2854_v28 = vld [vmem:[#allocation6 + $0x3] sm:$0x3]  ;;  %v2875_v29 = vld [vmem:[#allocation6 + $0x6] sm:$0x3] }
 0x4ac   : > { %v2855_v58 = vmax.f32 %v2853_v9, %v2854_v28  ;;  %v12683_v28 = vld [vmem:[%s17479_s7 + $0x1f0] ss:$8 sps:$4 sm:$0xff]  }
 0x4ae   : > { %v12112_v44 = vpack.c.bf16 %v2855_v58, %v2855_v58 }
 0x4b0   : > { %v2861_v45 = vshrl.u32 %v12112_v44, 16  ;;  %v2864_v36 = vshll.u32 %v12112_v44, 16 }
 0x4b1   : > { %v2876_v6 = vld [vmem:[#allocation6 + $0x9] sm:$0x3] }
 0x4b2   : > { %v2863_v39 = vrot.slane %v2861_v45, 5  ;;  %v2866_v53 = vrot.slane %v2864_v36, 6  ;;  %v2877_v42 = vmax.f32 %v2875_v29, %v2876_v6  ;;  %v12689_v45 = vld [vmem:[%s17479_s7 + $0x204] ss:$8 sps:$4 sm:$0xff]   ;;  %v12687_v6 = vld [vmem:[%s17479_s7 + $0x200] ss:$8 sps:$4 sm:$0xff]  }
 0x4b4   : > { %v2867_v33 = vor.u32 %v2866_v53, %v2863_v39  ;;  %v12113_v46 = vpack.c.bf16 %v2877_v42, %v2877_v42  ;;  %v12694_v53 = vld [vmem:[%s17479_s7 + $0x214] ss:$8 sps:$4 sm:$0xff]  }
 0x4b6   : > { %v2873_v47 = vsel %vm2871_vm2, %v2867_v33, %v2872_v16  ;;  %v2883_v10 = vshrl.u32 %v12113_v46, 16  ;;  %v2886_v61 = vshll.u32 %v12113_v46, 16  ;;  %v12692_v16 = vld [vmem:[%s17479_s7 + $0x210] ss:$8 sps:$4 sm:$0xff]   ;;  %v12697_v33 = vld [vmem:[%s17479_s7 + $0x224] ss:$8 sps:$4 sm:$0xff]  }
 0x4b7   : > { %2874 = vst [vmem:[#allocation7] sm:$0xc] %v2873_v47  ;;  %v12695_v46 = vld [vmem:[%s17479_s7 + $0x220] ss:$8 sps:$4 sm:$0xff]   ;;  %v12700_v47 = vld [vmem:[%s17479_s7 + $0x234] ss:$8 sps:$4 sm:$0xff]  }
 0x4b8   : > { %v2885_v49 = vrot.slane %v2883_v10, 7  ;;  %v12698_v10 = vld [vmem:[%s17479_s7 + $0x230] ss:$8 sps:$4 sm:$0xff]  }
 0x4ba   : > { %v2888_v55 = vor.u32 %v2886_v61, %v2885_v49  ;;  %v12703_v49 = vld [vmem:[%s17479_s7 + $0x244] ss:$8 sps:$4 sm:$0xff]   ;;  %v12701_v61 = vld [vmem:[%s17479_s7 + $0x240] ss:$8 sps:$4 sm:$0xff]  }
 0x4bc   : > { %v2894_v52 = vsel %vm2892_vm3, %v2888_v55, %v2893_v21  ;;  %v12706_v21 = vld [vmem:[%s17479_s7 + $0x254] ss:$8 sps:$4 sm:$0xff]   ;;  %v12704_v55 = vld [vmem:[%s17479_s7 + $0x250] ss:$8 sps:$4 sm:$0xff]  }
 0x4bd   : > { %2895 = vst [vmem:[#allocation7 + $0x4] sm:$0x3] %v2894_v52  ;;  %v12709_v52 = vld [vmem:[%s17479_s7 + $0x264] ss:$8 sps:$4 sm:$0xff]  }
 0x4be   : > { %v2896_v8 = vld [vmem:[#allocation7] sm:$0xf] }
 0x4bf   : > { %v14371_v35 = vld [vmem:[#allocation7] sm:$0xc] }
 0x4c0   : > { %v2898_v58 = vld [vmem:[#allocation7] sm:$0xe] }
 0x4c1   : > { %v2902_v36 = vld [vmem:[#allocation7] sm:$0x8] }
 0x4c4   : > { %v14368_v31 = vld [vmem:[#allocation7 + $0x4] sm:$0x1] }
 0x4c5   : > { %v10750_v40 = vcombine.low %v2896_v8, %v14368_v31  ;;  %v2900_v37 = vld [vmem:[#allocation7 + $0x4] sm:$0x3]  ;;  %v10751_v44 = vcombine.low %v2898_v58, %v14368_v31 }
 0x4c6   : > { %v10752_v4 = vcombine.low %v14371_v35, %v2900_v37  ;;  %v14464_v9 = vld [vmem:[#allocation7 + $0x4] sm:$0x7]  ;;  %v12715_v37 = vld [vmem:[%s17479_s7 + $0x284] ss:$8 sps:$4 sm:$0xff]  }
 0x4c7   : > { %v2914_v54 = vshll.u32 %v10750_v40, 16  ;;  %v2912_v34 = vshrl.u32 %v10750_v40, 16  ;;  %v10754_v29 = vcombine.low %v2902_v36, %v14464_v9  ;;  %v2922_v39 = vrot.slane %v10751_v44, 1  ;;  %v12712_v31 = vld [vmem:[%s17479_s7 + $0x274] ss:$8 sps:$4 sm:$0xff]  }
 0x4c8   : > { %v2929_v59 = vrot.slane %v10752_v4, 2  ;;  %v12710_v40 = vld [vmem:[%s17479_s7 + $0x270] ss:$8 sps:$4 sm:$0xff]   ;;  %v4070_v4 = vld [vmem:[%s17481_s9 + $0x20] sm:$0xff] }
 0x4c9   : > { %v2916_v0 = vrot.slane %v2914_v54, 1  ;;  %v2946_v42 = vrot.slane %v10754_v29, 3  ;;  %v12713_v54 = vld [vmem:[%s17479_s7 + $0x280] ss:$8 sps:$4 sm:$0xff]  }
 0x4ca   : > { %v12731_v36 = vld [vmem:[%s17479_s7 + $0x2e0] ss:$8 sps:$4 sm:$0xff]  }
 0x4cb   : > { %v2917_v15 = vor.u32 %v2916_v0, %v2912_v34  ;;  %v12718_v34 = vld [vmem:[%s17479_s7 + $0x294] ss:$8 sps:$4 sm:$0xff]   ;;  %v4066_v0 = vld [vmem:[%s17481_s9] sm:$0xff] }
 0x4cd   : > { %3874 = vmatprep.mubr.bf16.mxu0 %v2917_v15  ;;  %v12716_v15 = vld [vmem:[%s17479_s7 + $0x290] ss:$8 sps:$4 sm:$0xff]  }
 0x4ce   : > { %3875 = vmatmul.mubr.bf16.vlgmr.msra.gmra.mrb[48].mxu0 %v2896_v8  ;;  %v12707_v8 = vld [vmem:[%s17479_s7 + $0x260] ss:$8 sps:$4 sm:$0xff]  }
 0x4cf   : > { %3884 = vmatpush1.bf16.msra.mxu0 %v12637_v43  ;;  %3915 = vmatprep.mubr.bf16.mxu0 %v2929_v59  ;;  %v10901_v43 = vcombine.low %v4066_v0, %v4070_v4  ;;  %v4074_v59 = vld [vmem:[%s17481_s9 + $0x40] sm:$0xff] }
 0x4d0   : > { %3885 = vmatprep.subr.bf16.mxu0 %v12643_v57  ;;  %v10902_v57 = vcombine.high %v4066_v0, %v4070_v4 }
 0x4d2   : > { %4834 = vmatprep.subr.bf16.mxu1 %v10902_v57  ;;  %v4138_v57 = vld [vmem:[%s17481_s9 + $0x240] sm:$0xff] }
 0x4d3   : > { %3886 = vmatpush1.bf16.msra.mxu0 %v12641_v60  ;;  %v4078_v60 = vld [vmem:[%s17481_s9 + $0x60] sm:$0xff]  ;;  %4835 = vmatpush1.bf16.msra.mxu1 %v10901_v43  ;;  %v12741_v43 = vld [vmem:[%s17479_s7 + $0x310] ss:$8 sps:$4 sm:$0xff]  }
 0x4d4   : > { %3887 = vmatprep.subr.bf16.mxu0 %v12646_v63  ;;  %v12721_v63 = vld [vmem:[%s17479_s7 + $0x2a4] ss:$8 sps:$4 sm:$0xff]  }
 0x4d7   : > { %3888 = vmatpush1.bf16.msra.mxu0 %v12644_v30  ;;  %v10910_v30 = vcombine.high %v4074_v59, %v4078_v60 }
 0x4d8   : > { %3889 = vmatprep.subr.bf16.mxu0 %v12649_v24  ;;  %v10909_v24 = vcombine.low %v4074_v59, %v4078_v60  ;;  %v4142_v59 = vld [vmem:[%s17481_s9 + $0x260] sm:$0xff] }
 0x4d9   : > { %4836 = vmatprep.subr.bf16.mxu1 %v10910_v30  ;;  %v12746_v60 = vld [vmem:[%s17479_s7 + $0x324] ss:$8 sps:$4 sm:$0xff]   ;;  %v10973_v30 = vcombine.low %v4138_v57, %v4142_v59 }
 0x4da   : > { %4837 = vmatpush1.bf16.msra.mxu1 %v10909_v24  ;;  %v12744_v24 = vld [vmem:[%s17479_s7 + $0x320] ss:$8 sps:$4 sm:$0xff]  }
 0x4db   : > { %3890 = vmatpush1.bf16.msra.mxu0 %v12647_v1  ;;  %v12719_v1 = vld [vmem:[%s17479_s7 + $0x2a0] ss:$8 sps:$4 sm:$0xff]  }
 0x4dc   : > { %3891 = vmatprep.subr.bf16.mxu0 %v12652_v3  ;;  %v4082_v3 = vld [vmem:[%s17481_s9 + $0x80] sm:$0xff] }
 0x4df   : > { %3892 = vmatpush1.bf16.msra.mxu0 %v12650_v13  ;;  %v4086_v13 = vld [vmem:[%s17481_s9 + $0xa0] sm:$0xff] }
 0x4e0   : > { %3893 = vmatprep.subr.bf16.mxu0 %v12655_v26  ;;  %v12724_v26 = vld [vmem:[%s17479_s7 + $0x2b4] ss:$8 sps:$4 sm:$0xff]  }
 0x4e3   : > { %3894 = vmatpush1.bf16.msra.mxu0 %v12653_v2  ;;  %v10918_v2 = vcombine.high %v4082_v3, %v4086_v13 }
 0x4e4   : > { %3895 = vmatprep.subr.bf16.mxu0 %v12658_v5  ;;  %v10917_v5 = vcombine.low %v4082_v3, %v4086_v13  ;;  %v4150_v3 = vld [vmem:[%s17481_s9 + $0x2a0] sm:$0xff]  ;;  %v12749_v13 = vld [vmem:[%s17479_s7 + $0x334] ss:$8 sps:$4 sm:$0xff]  }
 0x4e5   : > { %4838 = vmatprep.subr.bf16.mxu1 %v10918_v2 }
 0x4e6   : > { %4839 = vmatpush1.bf16.msra.mxu1 %v10917_v5  ;;  %v12747_v5 = vld [vmem:[%s17479_s7 + $0x330] ss:$8 sps:$4 sm:$0xff]  }
 0x4e7   : > { %3896 = vmatpush1.bf16.msra.mxu0 %v12656_v23  ;;  %v12722_v23 = vld [vmem:[%s17479_s7 + $0x2b0] ss:$8 sps:$4 sm:$0xff]  }
 0x4e8   : > { %3897 = vmatprep.subr.bf16.mxu0 %v12661_v41  ;;  %v4090_v41 = vld [vmem:[%s17481_s9 + $0xc0] sm:$0xff] }
 0x4eb   : > { %3898 = vmatpush1.bf16.msra.mxu0 %v12659_v38  ;;  %v4094_v38 = vld [vmem:[%s17481_s9 + $0xe0] sm:$0xff] }
 0x4ec   : > { %3899 = vmatprep.subr.bf16.mxu0 %v12664_v48  ;;  %v12727_v48 = vld [vmem:[%s17479_s7 + $0x2c4] ss:$8 sps:$4 sm:$0xff]  }
 0x4ef   : > { %3900 = vmatpush1.bf16.msra.mxu0 %v12662_v56  ;;  %v10926_v56 = vcombine.high %v4090_v41, %v4094_v38 }
 0x4f0   : > { %3901 = vmatprep.subr.bf16.mxu0 %v12667_v14  ;;  %v10925_v14 = vcombine.low %v4090_v41, %v4094_v38  ;;  %v4158_v41 = vld [vmem:[%s17481_s9 + $0x2e0] sm:$0xff] }
 0x4f1   : > { %4840 = vmatprep.subr.bf16.mxu1 %v10926_v56  ;;  %v12752_v38 = vld [vmem:[%s17479_s7 + $0x344] ss:$8 sps:$4 sm:$0xff]  }
 0x4f2   : > { %4841 = vmatpush1.bf16.msra.mxu1 %v10925_v14  ;;  %v12750_v14 = vld [vmem:[%s17479_s7 + $0x340] ss:$8 sps:$4 sm:$0xff]  }
 0x4f3   : > { %3902 = vmatpush1.bf16.msra.mxu0 %v12665_v62  ;;  %v12725_v62 = vld [vmem:[%s17479_s7 + $0x2c0] ss:$8 sps:$4 sm:$0xff]  }
 0x4f4   : > { %3903 = vmatprep.subr.bf16.mxu0 %v12670_v17  ;;  %v4098_v17 = vld [vmem:[%s17481_s9 + $0x100] sm:$0xff] }
 0x4f7   : > { %3904 = vmatpush1.bf16.msra.mxu0 %v12668_v22  ;;  %v4102_v22 = vld [vmem:[%s17481_s9 + $0x120] sm:$0xff] }
 0x4f8   : > { %3905 = vmatprep.subr.bf16.mxu0 %v12673_v11  ;;  %v12730_v11 = vld [vmem:[%s17479_s7 + $0x2d4] ss:$8 sps:$4 sm:$0xff]  }
 0x4fb   : > { %3906 = vmatpush1.bf16.msra.mxu0 %v12671_v19  ;;  %v10934_v19 = vcombine.high %v4098_v17, %v4102_v22 }
 0x4fc   : > { %3907 = vmatprep.subr.bf16.mxu0 %v12676_v25  ;;  %v14582_v25 = vld [vmem:[#allocation7 + $0x4] sm:$0xf] }
 0x4fd   : > { %4842 = vmatprep.subr.bf16.mxu1 %v10934_v19  ;;  %v12761_v19 = vld [vmem:[%s17479_s7 + $0x374] ss:$8 sps:$4 sm:$0xff]  }
 0x4ff   : > { %3908 = vmatpush1.bf16.msra.mxu0 %v12674_v12  ;;  %v14584_v12 = vld [vmem:[#allocation7 + $0x8] sm:$0x1] }
 0x500   : > { %3909 = vmatprep.subr.bf16.mxu0 %v12679_v32  ;;  %v10933_v32 = vcombine.low %v4098_v17, %v4102_v22  ;;  %v10755_v44 = vcombine.low %v14582_v25, %v14584_v12  ;;  %v12753_v17 = vld [vmem:[%s17479_s7 + $0x350] ss:$8 sps:$4 sm:$0xff]   ;;  %v12758_v22 = vld [vmem:[%s17479_s7 + $0x364] ss:$8 sps:$4 sm:$0xff]  }
 0x502   : > { %4843 = vmatpush1.bf16.msra.mxu1 %v10933_v32  ;;  %v12759_v32 = vld [vmem:[%s17479_s7 + $0x370] ss:$8 sps:$4 sm:$0xff]  }
 0x503   : > { %3910 = vmatpush1.bf16.msra.mxu0 %v12677_v27  ;;  %v12728_v27 = vld [vmem:[%s17479_s7 + $0x2d0] ss:$8 sps:$4 sm:$0xff]  }
 0x504   : > { %3911 = vmatprep.subr.bf16.mxu0 %v12682_v18  ;;  %v4106_v18 = vld [vmem:[%s17481_s9 + $0x140] sm:$0xff] }
 0x507   : > { %3912 = vmatpush1.bf16.msra.mxu0 %v12680_v50  ;;  %v4110_v50 = vld [vmem:[%s17481_s9 + $0x160] sm:$0xff] }
 0x508   : > { %3913 = vmatprep.subr.bf16.mxu0 %v12685_v7  ;;  %v10753_v7 = vcombine.low %v14371_v35, %v14464_v9  ;;  %v10942_v58 = vcombine.high %v4106_v18, %v4110_v50  ;;  %v4114_v35 = vld [vmem:[%s17481_s9 + $0x180] sm:$0xff] }
 0x509   : > { %v4118_v9 = vld [vmem:[%s17481_s9 + $0x1a0] sm:$0xff] }
 0x50a   : > { %4844 = vmatprep.subr.bf16.mxu1 %v10942_v58  ;;  %v2935_v29 = vshrl.u32 %v10753_v7, 16  ;;  %v12768_v58 = vld [vmem:[%s17479_s7 + $0x3a0] ss:$8 sps:$4 sm:$0xff]  }
 0x50b   : > { %3914 = vmatpush1.bf16.msra.mxu0 %v12683_v28  ;;  %v12733_v28 = vld [vmem:[%s17479_s7 + $0x2e4] ss:$8 sps:$4 sm:$0xff]  }
 0x50c   : > { %3924 = vmatprep.subr.bf16.mxu0 %v12689_v45  ;;  %v10941_v45 = vcombine.low %v4106_v18, %v4110_v50  ;;  %v12762_v18 = vld [vmem:[%s17479_s7 + $0x380] ss:$8 sps:$4 sm:$0xff]   ;;  %v12767_v50 = vld [vmem:[%s17479_s7 + $0x394] ss:$8 sps:$4 sm:$0xff]  }
 0x50e   : > { %3916 = vmatmul.mubr.bf16.vlgmr.msra.gmra.mrb[48].mxu0 %v2922_v39  ;;  %v12736_v39 = vld [vmem:[%s17479_s7 + $0x2f4] ss:$8 sps:$4 sm:$0xff]   ;;  %4845 = vmatpush1.bf16.msra.mxu1 %v10941_v45  ;;  %v12771_v45 = vld [vmem:[%s17479_s7 + $0x3b0] ss:$8 sps:$4 sm:$0xff]  }
 0x50f   : > { %3925 = vmatpush1.bf16.msra.mxu0 %v12687_v6  ;;  %3956 = vmatprep.mubr.bf16.mxu0 %v2946_v42  ;;  %v2938_v6 = vshll.u32 %v10753_v7, 16  ;;  %v2956_v42 = vshll.u32 %v10755_v44, 16  ;;  %v12765_v7 = vld [vmem:[%s17479_s7 + $0x390] ss:$8 sps:$4 sm:$0xff]  }
 0x510   : > { %3926 = vmatprep.subr.bf16.mxu0 %v12694_v53  ;;  %v10950_v53 = vcombine.high %v4114_v35, %v4118_v9 }
 0x512   : > { %4846 = vmatprep.subr.bf16.mxu1 %v10950_v53  ;;  %v12785_v53 = vld [vmem:[%s17479_s7 + $0x3f4] ss:$8 sps:$4 sm:$0xff]  }
 0x513   : > { %3927 = vmatpush1.bf16.msra.mxu0 %v12692_v16  ;;  %v10949_v16 = vcombine.low %v4114_v35, %v4118_v9  ;;  %v12774_v35 = vld [vmem:[%s17479_s7 + $0x3c0] ss:$8 sps:$4 sm:$0xff]   ;;  %v12779_v9 = vld [vmem:[%s17479_s7 + $0x3d4] ss:$8 sps:$4 sm:$0xff]  }
 0x514   : > { %3928 = vmatprep.subr.bf16.mxu0 %v12697_v33  ;;  %v12734_v33 = vld [vmem:[%s17479_s7 + $0x2f0] ss:$8 sps:$4 sm:$0xff]  }
 0x515   : > { %4847 = vmatpush1.bf16.msra.mxu1 %v10949_v16  ;;  %v12788_v16 = vld [vmem:[%s17479_s7 + $0x404] ss:$8 sps:$4 sm:$0xff]  }
 0x517   : > { %3929 = vmatpush1.bf16.msra.mxu0 %v12695_v46  ;;  %v4122_v46 = vld [vmem:[%s17481_s9 + $0x1c0] sm:$0xff] }
 0x518   : > { %3930 = vmatprep.subr.bf16.mxu0 %v12700_v47  ;;  %v4126_v47 = vld [vmem:[%s17481_s9 + $0x1e0] sm:$0xff] }
 0x51b   : > { %3931 = vmatpush1.bf16.msra.mxu0 %v12698_v10  ;;  %v2937_v10 = vrot.slane %v2935_v29, 2  ;;  %v12777_v29 = vld [vmem:[%s17479_s7 + $0x3d0] ss:$8 sps:$4 sm:$0xff]  }
 0x51c   : > { %3932 = vmatprep.subr.bf16.mxu0 %v12703_v49  ;;  %v2940_v49 = vrot.slane %v2938_v6, 3  ;;  %v12782_v6 = vld [vmem:[%s17479_s7 + $0x3e4] ss:$8 sps:$4 sm:$0xff]  }
 0x51f   : > { %3933 = vmatpush1.bf16.msra.mxu0 %v12701_v61  ;;  %v12739_v61 = vld [vmem:[%s17479_s7 + $0x304] ss:$8 sps:$4 sm:$0xff]  }
 0x520   : > { %3934 = vmatprep.subr.bf16.mxu0 %v12706_v21  ;;  %v10958_v21 = vcombine.high %v4122_v46, %v4126_v47 }
 0x522   : > { %4848 = vmatprep.subr.bf16.mxu1 %v10958_v21  ;;  %v12798_v21 = vld [vmem:[%s17479_s7 + $0x440] ss:$8 sps:$4 sm:$0xff]  }
 0x523   : > { %3935 = vmatpush1.bf16.msra.mxu0 %v12704_v55  ;;  %v2958_v55 = vrot.slane %v2956_v42, 1  ;;  %v12783_v42 = vld [vmem:[%s17479_s7 + $0x3f0] ss:$8 sps:$4 sm:$0xff]  }
 0x524   : > { %3936 = vmatprep.subr.bf16.mxu0 %v12709_v52  ;;  %v10957_v52 = vcombine.low %v4122_v46, %v4126_v47  ;;  %v12791_v46 = vld [vmem:[%s17479_s7 + $0x414] ss:$8 sps:$4 sm:$0xff]   ;;  %v12789_v47 = vld [vmem:[%s17479_s7 + $0x410] ss:$8 sps:$4 sm:$0xff]  }
 0x526   : > { %4849 = vmatpush1.bf16.msra.mxu1 %v10957_v52  ;;  %v12801_v52 = vld [vmem:[%s17479_s7 + $0x450] ss:$8 sps:$4 sm:$0xff]  }
 0x527   : > { %3937 = vmatpush1.bf16.msra.mxu0 %v12707_v8  ;;  %v12737_v8 = vld [vmem:[%s17479_s7 + $0x300] ss:$8 sps:$4 sm:$0xff]  }
 0x528   : > { %3938 = vmatprep.subr.bf16.mxu0 %v12712_v31  ;;  %v2954_v31 = vshrl.u32 %v10755_v44, 16  ;;  %v12773_v44 = vld [vmem:[%s17479_s7 + $0x3b4] ss:$8 sps:$4 sm:$0xff]  }
 0x52a   : > { %v2959_v4 = vor.u32 %v2958_v55, %v2954_v31  ;;  %v12803_v55 = vld [vmem:[%s17479_s7 + $0x454] ss:$8 sps:$4 sm:$0xff]   ;;  %v12804_v31 = vld [vmem:[%s17479_s7 + $0x460] ss:$8 sps:$4 sm:$0xff]  }
 0x52b   : > { %3939 = vmatpush1.bf16.msra.mxu0 %v12710_v40  ;;  %v4130_v40 = vld [vmem:[%s17481_s9 + $0x200] sm:$0xff] }
 0x52c   : > { %3940 = vmatprep.subr.bf16.mxu0 %v12715_v37  ;;  %v4134_v37 = vld [vmem:[%s17481_s9 + $0x220] sm:$0xff] }
 0x52d   : > { %v10966_v0 = vcombine.high %v4130_v40, %v4134_v37 }
 0x52f   : > { %3941 = vmatpush1.bf16.msra.mxu0 %v12713_v54  ;;  %v2941_v54 = vor.u32 %v2940_v49, %v2937_v10  ;;  %4850 = vmatprep.subr.bf16.mxu1 %v10966_v0  ;;  %v12794_v10 = vld [vmem:[%s17479_s7 + $0x424] ss:$8 sps:$4 sm:$0xff]   ;;  %v12792_v49 = vld [vmem:[%s17479_s7 + $0x420] ss:$8 sps:$4 sm:$0xff]   ;;  %v12807_v0 = vld [vmem:[%s17479_s7 + $0x470] ss:$8 sps:$4 sm:$0xff]  }
 0x530   : > { %3942 = vmatprep.subr.bf16.mxu0 %v12718_v34  ;;  %v12743_v34 = vld [vmem:[%s17479_s7 + $0x314] ss:$8 sps:$4 sm:$0xff]  }
 0x533   : > { %3943 = vmatpush1.bf16.msra.mxu0 %v12716_v15  ;;  %v10965_v15 = vcombine.low %v4130_v40, %v4134_v37  ;;  %v12809_v40 = vld [vmem:[%s17479_s7 + $0x474] ss:$8 sps:$4 sm:$0xff]  }
 0x534   : > { %3944 = vmatprep.subr.bf16.mxu0 %v12721_v63  ;;  %v10974_v63 = vcombine.high %v4138_v57, %v4142_v59  ;;  %v2905_v37 = vld [vmem:[#allocation7 + $0x4] sm:$0xe]  ;;  %v11042_v57 = vld [vmem:[%s17481_s9 + $0x468] sm:$0xff] }
 0x535   : > { %4851 = vmatpush1.bf16.msra.mxu1 %v10965_v15 }
 0x536   : > { %4852 = vmatprep.subr.bf16.mxu1 %v10974_v63 }
 0x537   : > { %3945 = vmatpush1.bf16.msra.mxu0 %v12719_v1  ;;  %v4146_v1 = vld [vmem:[%s17481_s9 + $0x280] sm:$0xff] }
 0x538   : > { %3946 = vmatprep.subr.bf16.mxu0 %v12724_v26  ;;  %v10982_v26 = vcombine.high %v4146_v1, %v4150_v3  ;;  %v10981_v2 = vcombine.low %v4146_v1, %v4150_v3  ;;  %v11054_v3 = vld [vmem:[%s17481_s9 + $0x4c8] sm:$0xff] }
 0x539   : > { %4853 = vmatpush1.bf16.msra.mxu1 %v10973_v30  ;;  %v11046_v30 = vld [vmem:[%s17481_s9 + $0x488] sm:$0xff] }
 0x53a   : > { %4854 = vmatprep.subr.bf16.mxu1 %v10982_v26 }
 0x53b   : > { %3947 = vmatpush1.bf16.msra.mxu0 %v12722_v23  ;;  %v4154_v23 = vld [vmem:[%s17481_s9 + $0x2c0] sm:$0xff] }
 0x53c   : > { %3948 = vmatprep.subr.bf16.mxu0 %v12727_v48  ;;  %v10990_v48 = vcombine.high %v4154_v23, %v4158_v41  ;;  %v10989_v56 = vcombine.low %v4154_v23, %v4158_v41  ;;  %v11066_v23 = vld [vmem:[%s17481_s9 + $0x528] sm:$0xff] }
 0x53d   : > { %4855 = vmatpush1.bf16.msra.mxu1 %v10981_v2 }
 0x53e   : > { %4856 = vmatprep.subr.bf16.mxu1 %v10990_v48  ;;  %v11070_v48 = vld [vmem:[%s17481_s9 + $0x548] sm:$0xff] }
 0x53f   : > { %3949 = vmatpush1.bf16.msra.mxu0 %v12725_v62  ;;  %v12755_v62 = vld [vmem:[%s17479_s7 + $0x354] ss:$8 sps:$4 sm:$0xff]  }
 0x540   : > { %3950 = vmatprep.subr.bf16.mxu0 %v12730_v11  ;;  %v12756_v11 = vld [vmem:[%s17479_s7 + $0x360] ss:$8 sps:$4 sm:$0xff]  }
 0x541   : > { %4857 = vmatpush1.bf16.msra.mxu1 %v10989_v56  ;;  %v11074_v56 = vld [vmem:[%s17481_s9 + $0x568] sm:$0xff] }
 0x543   : > { %3951 = vmatpush1.bf16.msra.mxu0 %v12728_v27  ;;  %v12764_v27 = vld [vmem:[%s17479_s7 + $0x384] ss:$8 sps:$4 sm:$0xff]  }
 0x544   : > { %3952 = vmatprep.subr.bf16.mxu0 %v12733_v28  ;;  %v12770_v28 = vld [vmem:[%s17479_s7 + $0x3a4] ss:$8 sps:$4 sm:$0xff]  }
 0x547   : > { %3953 = vmatpush1.bf16.msra.mxu0 %v12731_v36  ;;  %v12776_v36 = vld [vmem:[%s17479_s7 + $0x3c4] ss:$8 sps:$4 sm:$0xff]  }
 0x548   : > { %3954 = vmatprep.subr.bf16.mxu0 %v12736_v39  ;;  %v12780_v39 = vld [vmem:[%s17479_s7 + $0x3e0] ss:$8 sps:$4 sm:$0xff]  }
 0x54b   : > { %3955 = vmatpush1.bf16.msra.mxu0 %v12734_v33  ;;  %v12786_v33 = vld [vmem:[%s17479_s7 + $0x400] ss:$8 sps:$4 sm:$0xff]  }
 0x54c   : > { %3965 = vmatprep.subr.bf16.mxu0 %v12739_v61  ;;  %v12800_v61 = vld [vmem:[%s17479_s7 + $0x444] ss:$8 sps:$4 sm:$0xff]  }
 0x54e   : > { %3957 = vmatmul.mubr.bf16.vlgmr.msra.gmra.mrb[48].mxu0 %v2941_v54  ;;  %v11030_v54 = vld [vmem:[%s17481_s9 + $0x408] sm:$0xff] }
 0x54f   : > { %3966 = vmatpush1.bf16.msra.mxu0 %v12737_v8  ;;  %3997 = vmatprep.mubr.bf16.mxu0 %v2959_v4  ;;  %v12806_v8 = vld [vmem:[%s17479_s7 + $0x464] ss:$8 sps:$4 sm:$0xff]   ;;  %v10756_v4 = vcombine.low %v2905_v37, %v14584_v12 }
 0x550   : > { %3967 = vmatprep.subr.bf16.mxu0 %v12743_v34  ;;  %v11034_v34 = vld [vmem:[%s17481_s9 + $0x428] sm:$0xff] }
 0x551   : > { %v11160_v15 = vcombine.high %v11030_v54, %v11034_v34  ;;  %v11159_v59 = vcombine.low %v11030_v54, %v11034_v34  ;;  %v11050_v12 = vld [vmem:[%s17481_s9 + $0x4a8] sm:$0xff]  ;;  %v4178_v54 = vld [vmem:[%s17481_s9 + $0x380] sm:$0xff] }
 0x552   : > { %v11176_v1 = vcombine.high %v11046_v30, %v11050_v12  ;;  %v11175_v26 = vcombine.low %v11046_v30, %v11050_v12  ;;  %v11138_v37 = vld [vmem:[%s17481_s9 + $0x768] sm:$0xff]  ;;  %v4186_v30 = vld [vmem:[%s17481_s9 + $0x3c0] sm:$0xff] }
 0x553   : > { %3968 = vmatpush1.bf16.msra.mxu0 %v12741_v43  ;;  %v11038_v43 = vld [vmem:[%s17481_s9 + $0x448] sm:$0xff]  ;;  %v4190_v12 = vld [vmem:[%s17481_s9 + $0x3e0] sm:$0xff] }
 0x554   : > { %3969 = vmatprep.subr.bf16.mxu0 %v12746_v60  ;;  %v2964_v60 = vrot.slane %v10756_v4, 1  ;;  %v11168_v63 = vcombine.high %v11038_v43, %v11042_v57  ;;  %v4182_v4 = vld [vmem:[%s17481_s9 + $0x3a0] sm:$0xff] }
 0x557   : > { %3970 = vmatpush1.bf16.msra.mxu0 %v12744_v24  ;;  %v11167_v24 = vcombine.low %v11038_v43, %v11042_v57  ;;  %v11146_v43 = vld [vmem:[%s17481_s9 + $0x7a8] sm:$0xff] }
 0x558   : > { %3971 = vmatprep.subr.bf16.mxu0 %v12749_v13  ;;  %v11058_v13 = vld [vmem:[%s17481_s9 + $0x4e8] sm:$0xff] }
 0x559   : > { %v11184_v2 = vcombine.high %v11054_v3, %v11058_v13  ;;  %v11183_v41 = vcombine.low %v11054_v3, %v11058_v13  ;;  %v11013_v3 = vcombine.low %v4178_v54, %v4182_v4 }
 0x55b   : > { %3972 = vmatpush1.bf16.msra.mxu0 %v12747_v5  ;;  %v11062_v5 = vld [vmem:[%s17481_s9 + $0x508] sm:$0xff] }
 0x55c   : > { %3973 = vmatprep.subr.bf16.mxu0 %v12752_v38  ;;  %v11192_v38 = vcombine.high %v11062_v5, %v11066_v23 }
 0x55f   : > { %3974 = vmatpush1.bf16.msra.mxu0 %v12750_v14  ;;  %v11191_v14 = vcombine.low %v11062_v5, %v11066_v23  ;;  %v11021_v5 = vcombine.low %v4186_v30, %v4190_v12  ;;  %v4067_v23 = vld [vmem:[%s17481_s9 + $0x8] sm:$0xff] }
 0x560   : > { %3975 = vmatprep.subr.bf16.mxu0 %v12755_v62  ;;  %v11200_v62 = vcombine.high %v11070_v48, %v11074_v56 }
 0x563   : > { %3976 = vmatpush1.bf16.msra.mxu0 %v12753_v17  ;;  %v11078_v17 = vld [vmem:[%s17481_s9 + $0x588] sm:$0xff] }
 0x564   : > { %3977 = vmatprep.subr.bf16.mxu0 %v12758_v22  ;;  %v11082_v22 = vld [vmem:[%s17481_s9 + $0x5a8] sm:$0xff] }
 0x567   : > { %3978 = vmatpush1.bf16.msra.mxu0 %v12756_v11  ;;  %v11199_v11 = vcombine.low %v11070_v48, %v11074_v56 }
 0x568   : > { %3979 = vmatprep.subr.bf16.mxu0 %v12761_v19  ;;  %v11208_v19 = vcombine.high %v11078_v17, %v11082_v22 }
 0x56b   : > { %3980 = vmatpush1.bf16.msra.mxu0 %v12759_v32  ;;  %v11086_v32 = vld [vmem:[%s17481_s9 + $0x5c8] sm:$0xff] }
 0x56c   : > { %3981 = vmatprep.subr.bf16.mxu0 %v12764_v27  ;;  %v11090_v27 = vld [vmem:[%s17481_s9 + $0x5e8] sm:$0xff] }
 0x56f   : > { %3982 = vmatpush1.bf16.msra.mxu0 %v12762_v18  ;;  %v11207_v18 = vcombine.low %v11078_v17, %v11082_v22 }
 0x570   : > { %3983 = vmatprep.subr.bf16.mxu0 %v12767_v50  ;;  %v11216_v50 = vcombine.high %v11086_v32, %v11090_v27 }
 0x573   : > { %3984 = vmatpush1.bf16.msra.mxu0 %v12765_v7  ;;  %v11094_v7 = vld [vmem:[%s17481_s9 + $0x608] sm:$0xff] }
 0x574   : > { %3985 = vmatprep.subr.bf16.mxu0 %v12770_v28  ;;  %v11098_v28 = vld [vmem:[%s17481_s9 + $0x628] sm:$0xff] }
 0x577   : > { %3986 = vmatpush1.bf16.msra.mxu0 %v12768_v58  ;;  %v11215_v58 = vcombine.low %v11086_v32, %v11090_v27  ;;  %v3110_v27 = vld [vmem:[%s17480_s8] sm:$0x3] }
 0x578   : > { %3987 = vmatprep.subr.bf16.mxu0 %v12773_v44  ;;  %v11224_v44 = vcombine.high %v11094_v7, %v11098_v28 }
 0x57b   : > { %3988 = vmatpush1.bf16.msra.mxu0 %v12771_v45  ;;  %v11102_v45 = vld [vmem:[%s17481_s9 + $0x648] sm:$0xff] }
 0x57c   : > { %3989 = vmatprep.subr.bf16.mxu0 %v12776_v36  ;;  %v11106_v36 = vld [vmem:[%s17481_s9 + $0x668] sm:$0xff] }
 0x57f   : > { %3990 = vmatpush1.bf16.msra.mxu0 %v12774_v35  ;;  %v11223_v35 = vcombine.low %v11094_v7, %v11098_v28 }
 0x580   : > { %3991 = vmatprep.subr.bf16.mxu0 %v12779_v9  ;;  %v11232_v9 = vcombine.high %v11102_v45, %v11106_v36 }
 0x583   : > { %3992 = vmatpush1.bf16.msra.mxu0 %v12777_v29  ;;  %v11110_v29 = vld [vmem:[%s17481_s9 + $0x688] sm:$0xff] }
 0x584   : > { %3993 = vmatprep.subr.bf16.mxu0 %v12782_v6  ;;  %v11114_v6 = vld [vmem:[%s17481_s9 + $0x6a8] sm:$0xff] }
 0x587   : > { %3994 = vmatpush1.bf16.msra.mxu0 %v12780_v39  ;;  %v11231_v39 = vcombine.low %v11102_v45, %v11106_v36 }
 0x588   : > { %3995 = vmatprep.subr.bf16.mxu0 %v12785_v53  ;;  %v11240_v53 = vcombine.high %v11110_v29, %v11114_v6 }
 0x58b   : > { %3996 = vmatpush1.bf16.msra.mxu0 %v12783_v42  ;;  %v11118_v42 = vld [vmem:[%s17481_s9 + $0x6c8] sm:$0xff] }
 0x58c   : > { %4006 = vmatprep.subr.bf16.mxu0 %v12788_v16  ;;  %v11122_v16 = vld [vmem:[%s17481_s9 + $0x6e8] sm:$0xff] }
 0x58e   : > { %3998 = vmatmul.mubr.bf16.vlgmr.msra.gmra.mrb[48].mxu0 %v14582_v25  ;;  %v12797_v25 = vld [vmem:[%s17479_s7 + $0x434] ss:$8 sps:$4 sm:$0xff]  }
 0x58f   : > { %4007 = vmatpush1.bf16.msra.mxu0 %v12786_v33  ;;  %4038 = vmatprep.mubr.bf16.mxu0 %v13301_v20  ;;  %v12795_v20 = vld [vmem:[%s17479_s7 + $0x430] ss:$8 sps:$4 sm:$0xff]   ;;  %v11239_v33 = vcombine.low %v11110_v29, %v11114_v6 }
 0x590   : > { %4008 = vmatprep.subr.bf16.mxu0 %v12791_v46  ;;  %v11248_v46 = vcombine.high %v11118_v42, %v11122_v16 }
 0x593   : > { %4009 = vmatpush1.bf16.msra.mxu0 %v12789_v47  ;;  %v11247_v47 = vcombine.low %v11118_v42, %v11122_v16 }
 0x594   : > { %4010 = vmatprep.subr.bf16.mxu0 %v12794_v10  ;;  %v4162_v10 = vld [vmem:[%s17481_s9 + $0x300] sm:$0xff] }
 0x597   : > { %4011 = vmatpush1.bf16.msra.mxu0 %v12792_v49  ;;  %v4166_v49 = vld [vmem:[%s17481_s9 + $0x320] sm:$0xff] }
 0x598   : > { %4012 = vmatprep.subr.bf16.mxu0 %v12797_v25  ;;  %v11126_v25 = vld [vmem:[%s17481_s9 + $0x708] sm:$0xff] }
 0x59b   : > { %4013 = vmatpush1.bf16.msra.mxu0 %v12795_v20  ;;  %v10997_v20 = vcombine.low %v4162_v10, %v4166_v49 }
 0x59c   : > { %4014 = vmatprep.subr.bf16.mxu0 %v12800_v61  ;;  %v10998_v61 = vcombine.high %v4162_v10, %v4166_v49  ;;  %v11040_v10 = vld [vmem:[%s17481_s9 + $0x458] sm:$0xff] }
 0x59d   : > { %v11044_v49 = vld [vmem:[%s17481_s9 + $0x478] sm:$0xff] }
 0x59e   : > { %4858 = vmatprep.subr.bf16.mxu1 %v10998_v61 }
 0x59f   : > { %4015 = vmatpush1.bf16.msra.mxu0 %v12798_v21  ;;  %v11130_v21 = vld [vmem:[%s17481_s9 + $0x728] sm:$0xff]  ;;  %4859 = vmatpush1.bf16.msra.mxu1 %v10997_v20 }
 0x5a0   : > { %4016 = vmatprep.subr.bf16.mxu0 %v12803_v55  ;;  %v4170_v55 = vld [vmem:[%s17481_s9 + $0x340] sm:$0xff] }
 0x5a3   : > { %4017 = vmatpush1.bf16.msra.mxu0 %v12801_v52  ;;  %v4174_v52 = vld [vmem:[%s17481_s9 + $0x360] sm:$0xff] }
 0x5a4   : > { %4018 = vmatprep.subr.bf16.mxu0 %v12806_v8  ;;  %v11255_v8 = vcombine.low %v11126_v25, %v11130_v21  ;;  %v11006_v34 = vcombine.high %v4170_v55, %v4174_v52  ;;  %v11005_v57 = vcombine.low %v4170_v55, %v4174_v52  ;;  %v4083_v55 = vld [vmem:[%s17481_s9 + $0x88] sm:$0xff] }
 0x5a6   : > { %4860 = vmatprep.subr.bf16.mxu1 %v11006_v34  ;;  %v11171_v34 = vcombine.low %v11040_v10, %v11044_v49 }
 0x5a7   : > { %4019 = vmatpush1.bf16.msra.mxu0 %v12804_v31  ;;  %v11256_v31 = vcombine.high %v11126_v25, %v11130_v21  ;;  %4861 = vmatpush1.bf16.msra.mxu1 %v11005_v57  ;;  %v11056_v57 = vld [vmem:[%s17481_s9 + $0x4d8] sm:$0xff] }
 0x5a8   : > { %4020 = vmatprep.subr.bf16.mxu0 %v12809_v40  ;;  %v11134_v40 = vld [vmem:[%s17481_s9 + $0x748] sm:$0xff] }
 0x5ab   : > { %4021 = vmatpush1.bf16.msra.mxu0 %v12807_v0  ;;  %v11264_v0 = vcombine.high %v11134_v40, %v11138_v37 }
 0x5ac   : > { %5882 = vmatprep.subr.bf16.mxu0 %v11160_v15  ;;  %v11142_v15 = vld [vmem:[%s17481_s9 + $0x788] sm:$0xff] }
 0x5ad   : > { %v11271_v13 = vcombine.low %v11142_v15, %v11146_v43 }
 0x5ae   : > { %4039 = vmatmul.mubr.bf16.vlgmr.msra.gmra.mrb[48].mxu0 %v2964_v60  ;;  %v11014_v60 = vcombine.high %v4178_v54, %v4182_v4 }
 0x5af   : > { %5883 = vmatpush1.bf16.msra.mxu0 %v11159_v59  ;;  %v11263_v59 = vcombine.low %v11134_v40, %v11138_v37  ;;  %v11048_v40 = vld [vmem:[%s17481_s9 + $0x498] sm:$0xff] }
 0x5b0   : > { %5884 = vmatprep.subr.bf16.mxu0 %v11168_v63  ;;  %v11272_v63 = vcombine.high %v11142_v15, %v11146_v43  ;;  %4862 = vmatprep.subr.bf16.mxu1 %v11014_v60  ;;  %v11052_v37 = vld [vmem:[%s17481_s9 + $0x4b8] sm:$0xff]  ;;  %v4091_v15 = vld [vmem:[%s17481_s9 + $0xc8] sm:$0xff] }
 0x5b1   : > { %4863 = vmatpush1.bf16.msra.mxu1 %v11013_v3  ;;  %v11180_v4 = vcombine.high %v11048_v40, %v11052_v37  ;;  %v4095_v43 = vld [vmem:[%s17481_s9 + $0xe8] sm:$0xff]  ;;  %v11064_v3 = vld [vmem:[%s17481_s9 + $0x518] sm:$0xff] }
 0x5b3   : > { %5885 = vmatpush1.bf16.msra.mxu0 %v11167_v24  ;;  %v11150_v24 = vld [vmem:[%s17481_s9 + $0x7c8] sm:$0xff] }
 0x5b4   : > { %5886 = vmatprep.subr.bf16.mxu0 %v11176_v1  ;;  %v11154_v1 = vld [vmem:[%s17481_s9 + $0x7e8] sm:$0xff] }
 0x5b5   : > { %v11279_v48 = vcombine.low %v11150_v24, %v11154_v1 }
 0x5b7   : > { %5887 = vmatpush1.bf16.msra.mxu0 %v11175_v26  ;;  %v11022_v26 = vcombine.high %v4186_v30, %v4190_v12  ;;  %v10928_v30 = vcombine.high %v4091_v15, %v4095_v43 }
 0x5b8   : > { %5888 = vmatprep.subr.bf16.mxu0 %v11184_v2  ;;  %v11280_v2 = vcombine.high %v11150_v24, %v11154_v1  ;;  %v4099_v24 = vld [vmem:[%s17481_s9 + $0x108] sm:$0xff] }
 0x5b9   : > { %4864 = vmatprep.subr.bf16.mxu1 %v11022_v26  ;;  %v4103_v1 = vld [vmem:[%s17481_s9 + $0x128] sm:$0xff]  ;;  %v10927_v26 = vcombine.low %v4091_v15, %v4095_v43 }
 0x5ba   : > { %4865 = vmatpush1.bf16.msra.mxu1 %v11021_v5  ;;  %v10936_v5 = vcombine.high %v4099_v24, %v4103_v1  ;;  %v4147_v15 = vld [vmem:[%s17481_s9 + $0x288] sm:$0xff] }
 0x5bb   : > { %5889 = vmatpush1.bf16.msra.mxu0 %v11183_v41  ;;  %v4071_v41 = vld [vmem:[%s17481_s9 + $0x28] sm:$0xff] }
 0x5bc   : > { %5890 = vmatprep.subr.bf16.mxu0 %v11192_v38  ;;  %v11032_v38 = vld [vmem:[%s17481_s9 + $0x418] sm:$0xff]  ;;  %v10903_v56 = vcombine.low %v4067_v23, %v4071_v41  ;;  %v4151_v43 = vld [vmem:[%s17481_s9 + $0x2a8] sm:$0xff] }
 0x5bf   : > { %5891 = vmatpush1.bf16.msra.mxu0 %v11191_v14  ;;  %v10904_v14 = vcombine.high %v4067_v23, %v4071_v41  ;;  %v4107_v41 = vld [vmem:[%s17481_s9 + $0x148] sm:$0xff] }
 0x5c0   : > { %5892 = vmatprep.subr.bf16.mxu0 %v11200_v62  ;;  %v11036_v62 = vld [vmem:[%s17481_s9 + $0x438] sm:$0xff] }
 0x5c1   : > { %v11163_v17 = vcombine.low %v11032_v38, %v11036_v62  ;;  %v11164_v22 = vcombine.high %v11032_v38, %v11036_v62  ;;  %4875 = vmatprep.subr.bf16.mxu1 %v10904_v14  ;;  %v4111_v38 = vld [vmem:[%s17481_s9 + $0x168] sm:$0xff]  ;;  %v10935_v14 = vcombine.low %v4099_v24, %v4103_v1 }
 0x5c2   : > { %v4155_v24 = vld [vmem:[%s17481_s9 + $0x2c8] sm:$0xff] }
 0x5c3   : > { %5893 = vmatpush1.bf16.msra.mxu0 %v11199_v11  ;;  %v3112_v11 = vlaneseq  ;;  %v4159_v1 = vld [vmem:[%s17481_s9 + $0x2e8] sm:$0xff] }
 0x5c4   : > { %5894 = vmatprep.subr.bf16.mxu0 %v11208_v19 }
 0x5c5   : > { %v14926_v19 = vshrl.u32 %v3112_v11, 7  ;;  %v4115_v11 = vld [vmem:[%s17481_s9 + $0x188] sm:$0xff] }
 0x5c7   : > { %5895 = vmatpush1.bf16.msra.mxu0 %v11207_v18  ;;  %v14929_v32 = vsub.s32 0, %v14926_v19  ;;  %v14935_v18 = vsub.s32 1, %v14926_v19 }
 0x5c8   : > { %5896 = vmatprep.subr.bf16.mxu0 %v11216_v50 }
 0x5c9   : > { %v3115_v50 = vrot.slane %v3110_v27, %v14929_v32  ;;  %v3119_v7 = vrot.slane %v3110_v27, %v14935_v18  ;;  %v4119_v27 = vld [vmem:[%s17481_s9 + $0x1a8] sm:$0xff] }
 0x5cb   : > { %5897 = vmatpush1.bf16.msra.mxu0 %v11215_v58 }
 0x5cc   : > { %5898 = vmatprep.subr.bf16.mxu0 %v11224_v44 }
 0x5cf   : > { %5899 = vmatpush1.bf16.msra.mxu0 %v11223_v35 }
 0x5d0   : > { %5900 = vmatprep.subr.bf16.mxu0 %v11232_v9 }
 0x5d3   : > { %5901 = vmatpush1.bf16.msra.mxu0 %v11231_v39 }
 0x5d4   : > { %5902 = vmatprep.subr.bf16.mxu0 %v11240_v53 }
 0x5d7   : > { %5903 = vmatpush1.bf16.msra.mxu0 %v11239_v33 }
 0x5d8   : > { %5904 = vmatprep.subr.bf16.mxu0 %v11248_v46  ;;  %v4075_v46 = vld [vmem:[%s17481_s9 + $0x48] sm:$0xff] }
 0x5db   : > { %5905 = vmatpush1.bf16.msra.mxu0 %v11247_v47  ;;  %v4079_v47 = vld [vmem:[%s17481_s9 + $0x68] sm:$0xff] }
 0x5dc   : > { %5906 = vmatprep.subr.bf16.mxu0 %v11256_v31  ;;  %v10912_v52 = vcombine.high %v4075_v46, %v4079_v47  ;;  %v4087_v31 = vld [vmem:[%s17481_s9 + $0xa8] sm:$0xff]  ;;  %v10911_v54 = vcombine.low %v4075_v46, %v4079_v47  ;;  %v11096_v46 = vld [vmem:[%s17481_s9 + $0x618] sm:$0xff] }
 0x5dd   : > { %v10919_v60 = vcombine.low %v4083_v55, %v4087_v31  ;;  %v11100_v47 = vld [vmem:[%s17481_s9 + $0x638] sm:$0xff] }
 0x5df   : > { %5907 = vmatpush1.bf16.msra.mxu0 %v11255_v8  ;;  %v11172_v8 = vcombine.high %v11040_v10, %v11044_v49 }
 0x5e0   : > { %5908 = vmatprep.subr.bf16.mxu0 %v11264_v0  ;;  %v10920_v0 = vcombine.high %v4083_v55, %v4087_v31  ;;  %v4143_v31 = vld [vmem:[%s17481_s9 + $0x268] sm:$0xff] }
 0x5e3   : > { %5909 = vmatpush1.bf16.msra.mxu0 %v11263_v59  ;;  %v11060_v59 = vld [vmem:[%s17481_s9 + $0x4f8] sm:$0xff] }
 0x5e4   : > { %5910 = vmatprep.subr.bf16.mxu0 %v11272_v63  ;;  %v11179_v63 = vcombine.low %v11048_v40, %v11052_v37  ;;  %v11188_v12 = vcombine.high %v11056_v57, %v11060_v59  ;;  %v11104_v40 = vld [vmem:[%s17481_s9 + $0x658] sm:$0xff] }
 0x5e5   : > { %v11108_v37 = vld [vmem:[%s17481_s9 + $0x678] sm:$0xff] }
 0x5e7   : > { %5911 = vmatpush1.bf16.msra.mxu0 %v11271_v13  ;;  %v11068_v13 = vld [vmem:[%s17481_s9 + $0x538] sm:$0xff] }
 0x5e8   : > { %5912 = vmatprep.subr.bf16.mxu0 %v11280_v2  ;;  %v11187_v2 = vcombine.low %v11056_v57, %v11060_v59  ;;  %v11196_v23 = vcombine.high %v11064_v3, %v11068_v13  ;;  %v11195_v62 = vcombine.low %v11064_v3, %v11068_v13  ;;  %v11112_v57 = vld [vmem:[%s17481_s9 + $0x698] sm:$0xff] }
 0x5e9   : > { %v11116_v59 = vld [vmem:[%s17481_s9 + $0x6b8] sm:$0xff] }
 0x5ea   : > { %v11120_v3 = vld [vmem:[%s17481_s9 + $0x6d8] sm:$0xff] }
 0x5eb   : > { %5913 = vmatpush1.bf16.msra.mxu0 %v11279_v48  ;;  %v11072_v48 = vld [vmem:[%s17481_s9 + $0x558] sm:$0xff] }
 0x5ec   : > { %5964 = vmatprep.subr.bf16.mxu0 %v11164_v22  ;;  %v11124_v13 = vld [vmem:[%s17481_s9 + $0x6f8] sm:$0xff] }
 0x681   : > { %v4040_v28 = vpop.f32.mrb[48].mxu0 }
 0x682   : > { %v12406_v58 = vadd.f32 %v4040_v28, %v3115_v50  ;;  %v4042_v44 = vpop.f32.mrb[49].mxu0  ;;  %v11080_v50 = vld [vmem:[%s17481_s9 + $0x598] sm:$0xff]  ;;  %v10943_v28 = vcombine.low %v4107_v41, %v4111_v38 }
 0x683   : > { %v12407_v45 = vadd.f32 %v4042_v44, %v3119_v7  ;;  %v4044_v36 = vpop.f32.mrb[50].mxu0  ;;  %v11084_v7 = vld [vmem:[%s17481_s9 + $0x5b8] sm:$0xff]  ;;  %v10952_v44 = vcombine.high %v4115_v11, %v4119_v27 }
 0x684   : > { %v4047_v35 = vmax.f32 %v12406_v58, 0.0  ;;  %v4045_v9 = vpop.f32.mrb[51].mxu0  ;;  %v4123_v36 = vld [vmem:[%s17481_s9 + $0x1c8] sm:$0xff] }
 0x685   : > { %v4048_v29 = vmax.f32 %v12407_v45, 0.0  ;;  %v11212_v45 = vcombine.high %v11080_v50, %v11084_v7  ;;  %v11088_v9 = vld [vmem:[%s17481_s9 + $0x5d8] sm:$0xff] }
 0x686   : > { %4049 = vst [vmem:[#allocation8] sm:$0xff] %v4047_v35  ;;  %v4127_v35 = vld [vmem:[%s17481_s9 + $0x1e8] sm:$0xff] }
 0x687   : > { %4050 = vst [vmem:[#allocation8 + $0x8] sm:$0xff] %v4048_v29  ;;  %v11092_v29 = vld [vmem:[%s17481_s9 + $0x5f8] sm:$0xff]  ;;  %v10959_v10 = vcombine.low %v4123_v36, %v4127_v35 }
 0x688   : > { %v11219_v49 = vcombine.low %v11088_v9, %v11092_v29 }
 0x68e   : > { %v4052_v6 = vld [vmem:[#allocation8] ss:$8 sm:$0x3]  ;;  %v5058_v39 = vld [vmem:[#allocation8 + $0x1] ss:$8 sm:$0x3] }
 0x68f   : > { %v4061_v53 = vrot.slane %v4052_v6, %v14935_v18  ;;  %v5067_v42 = vrot.slane %v5058_v39, %v14935_v18  ;;  %v4057_v16 = vrot.slane %v4052_v6, %v14929_v32  ;;  %v5063_v33 = vrot.slane %v5058_v39, %v14929_v32 }
 0x690   : > { %v10951_v6 = vcombine.low %v4115_v11, %v4119_v27  ;;  %v11211_v39 = vcombine.low %v11080_v50, %v11084_v7  ;;  %v4171_v11 = vld [vmem:[%s17481_s9 + $0x348] sm:$0xff]  ;;  %v11136_v50 = vld [vmem:[%s17481_s9 + $0x758] sm:$0xff] }
 0x691   : > { %v14955_v25 = vpack.c.bf16 %v4061_v53, %v4061_v53  ;;  %v14957_v20 = vpack.c.bf16 %v5067_v42, %v5067_v42  ;;  %v14959_v61 = vpack.c.bf16 %v4057_v16, %v4057_v16  ;;  %v14961_v21 = vpack.c.bf16 %v5063_v33, %v5063_v33  ;;  %v4131_v16 = vld [vmem:[%s17481_s9 + $0x208] sm:$0xff]  ;;  %v11140_v7 = vld [vmem:[%s17481_s9 + $0x778] sm:$0xff] }
 0x692   : > { %v10960_v53 = vcombine.high %v4123_v36, %v4127_v35  ;;  %v11220_v42 = vcombine.high %v11088_v9, %v11092_v29  ;;  %v4135_v33 = vld [vmem:[%s17481_s9 + $0x228] sm:$0xff]  ;;  %v11144_v9 = vld [vmem:[%s17481_s9 + $0x798] sm:$0xff] }
 0x693   : > { %4866 = vmatprep.mubr.bf16.mxu1 %v14955_v25  ;;  %5914 = vmatprep.mubr.bf16.mxu0 %v14957_v20  ;;  %v10968_v55 = vcombine.high %v4131_v16, %v4135_v33  ;;  %v4175_v27 = vld [vmem:[%s17481_s9 + $0x368] sm:$0xff]  ;;  %v11148_v29 = vld [vmem:[%s17481_s9 + $0x7b8] sm:$0xff] }
 0x694   : > { %4867 = vmatmul.mubr.bf16.vlgmr.msra.gmra.mrb[44].mxu1 %v14959_v61  ;;  %5915 = vmatmul.mubr.bf16.vlgmr.msra.gmra.mrb[52].mxu0 %v14961_v21  ;;  %v4179_v36 = vld [vmem:[%s17481_s9 + $0x388] sm:$0xff] }
 0x695   : > { %4876 = vmatpush1.bf16.msra.mxu1 %v10903_v56  ;;  %5965 = vmatpush1.bf16.msra.mxu0 %v11163_v17  ;;  %v11076_v56 = vld [vmem:[%s17481_s9 + $0x578] sm:$0xff]  ;;  %v10944_v17 = vcombine.high %v4107_v41, %v4111_v38  ;;  %v4163_v41 = vld [vmem:[%s17481_s9 + $0x308] sm:$0xff] }
 0x696   : > { %4907 = vmatprep.mubr.bf16.mxu1 %v14955_v25  ;;  %5996 = vmatprep.mubr.bf16.mxu0 %v14957_v20  ;;  %v11204_v22 = vcombine.high %v11072_v48, %v11076_v56  ;;  %v11203_v58 = vcombine.low %v11072_v48, %v11076_v56  ;;  %v4167_v38 = vld [vmem:[%s17481_s9 + $0x328] sm:$0xff]  ;;  %v11128_v48 = vld [vmem:[%s17481_s9 + $0x718] sm:$0xff] }
 0x697   : > { %4877 = vmatprep.subr.bf16.mxu1 %v10912_v52  ;;  %5966 = vmatprep.subr.bf16.mxu0 %v11172_v8  ;;  %v11228_v52 = vcombine.high %v11096_v46, %v11100_v47  ;;  %v4139_v8 = vld [vmem:[%s17481_s9 + $0x248] sm:$0xff]  ;;  %v11132_v56 = vld [vmem:[%s17481_s9 + $0x738] sm:$0xff] }
 0x698   : > { %v4183_v35 = vld [vmem:[%s17481_s9 + $0x3a8] sm:$0xff] }
 0x699   : > { %4878 = vmatpush1.bf16.msra.mxu1 %v10911_v54  ;;  %5967 = vmatpush1.bf16.msra.mxu0 %v11171_v34  ;;  %v10967_v54 = vcombine.low %v4131_v16, %v4135_v33  ;;  %v11227_v34 = vcombine.low %v11096_v46, %v11100_v47  ;;  %v4187_v16 = vld [vmem:[%s17481_s9 + $0x3c8] sm:$0xff]  ;;  %v11152_v46 = vld [vmem:[%s17481_s9 + $0x7d8] sm:$0xff] }
 0x69a   : > { %4879 = vmatprep.subr.bf16.mxu1 %v10920_v0  ;;  %5968 = vmatprep.subr.bf16.mxu0 %v11180_v4  ;;  %v10976_v0 = vcombine.high %v4139_v8, %v4143_v31  ;;  %v11236_v4 = vcombine.high %v11104_v40, %v11108_v37  ;;  %v4191_v33 = vld [vmem:[%s17481_s9 + $0x3e8] sm:$0xff]  ;;  %v11156_v47 = vld [vmem:[%s17481_s9 + $0x7f8] sm:$0xff] }
 0x69d   : > { %4880 = vmatpush1.bf16.msra.mxu1 %v10919_v60  ;;  %5969 = vmatpush1.bf16.msra.mxu0 %v11179_v63  ;;  %v10975_v60 = vcombine.low %v4139_v8, %v4143_v31  ;;  %v11235_v63 = vcombine.low %v11104_v40, %v11108_v37  ;;  %v4068_v8 = vld [vmem:[%s17481_s9 + $0x10] sm:$0xff]  ;;  %v11286_v40 = vld [vmem:[%s17481_s9 + $0x808] sm:$0xff] }
 0x69e   : > { %4881 = vmatprep.subr.bf16.mxu1 %v10928_v30  ;;  %5970 = vmatprep.subr.bf16.mxu0 %v11188_v12  ;;  %v10984_v30 = vcombine.high %v4147_v15, %v4151_v43  ;;  %v11244_v12 = vcombine.high %v11112_v57, %v11116_v59  ;;  %v4072_v31 = vld [vmem:[%s17481_s9 + $0x30] sm:$0xff]  ;;  %v11290_v37 = vld [vmem:[%s17481_s9 + $0x828] sm:$0xff] }
 0x6a1   : > { %4882 = vmatpush1.bf16.msra.mxu1 %v10927_v26  ;;  %5971 = vmatpush1.bf16.msra.mxu0 %v11187_v2  ;;  %v10983_v26 = vcombine.low %v4147_v15, %v4151_v43  ;;  %v11243_v2 = vcombine.low %v11112_v57, %v11116_v59  ;;  %v11416_v15 = vcombine.high %v11286_v40, %v11290_v37  ;;  %v4076_v43 = vld [vmem:[%s17481_s9 + $0x50] sm:$0xff] }
 0x6a2   : > { %4883 = vmatprep.subr.bf16.mxu1 %v10936_v5  ;;  %5972 = vmatprep.subr.bf16.mxu0 %v11196_v23  ;;  %v10992_v5 = vcombine.high %v4155_v24, %v4159_v1  ;;  %v11252_v23 = vcombine.high %v11120_v3, %v11124_v13  ;;  %v4080_v59 = vld [vmem:[%s17481_s9 + $0x70] sm:$0xff] }
 0x6a5   : > { %4884 = vmatpush1.bf16.msra.mxu1 %v10935_v14  ;;  %5973 = vmatpush1.bf16.msra.mxu0 %v11195_v62  ;;  %v10991_v14 = vcombine.low %v4155_v24, %v4159_v1  ;;  %v11251_v62 = vcombine.low %v11120_v3, %v11124_v13  ;;  %v10914_v24 = vcombine.high %v4076_v43, %v4080_v59  ;;  %v4084_v3 = vld [vmem:[%s17481_s9 + $0x90] sm:$0xff] }
 0x6a6   : > { %4885 = vmatprep.subr.bf16.mxu1 %v10944_v17  ;;  %5974 = vmatprep.subr.bf16.mxu0 %v11204_v22  ;;  %v11000_v17 = vcombine.high %v4163_v41, %v4167_v38  ;;  %v11260_v22 = vcombine.high %v11128_v48, %v11132_v56  ;;  %v4088_v13 = vld [vmem:[%s17481_s9 + $0xb0] sm:$0xff] }
 0x6a9   : > { %4886 = vmatpush1.bf16.msra.mxu1 %v10943_v28  ;;  %5975 = vmatpush1.bf16.msra.mxu0 %v11203_v58  ;;  %v10999_v28 = vcombine.low %v4163_v41, %v4167_v38  ;;  %v11259_v58 = vcombine.low %v11128_v48, %v11132_v56  ;;  %v10922_v38 = vcombine.high %v4084_v3, %v4088_v13  ;;  %v4092_v56 = vld [vmem:[%s17481_s9 + $0xd0] sm:$0xff] }
 0x6aa   : > { %4887 = vmatprep.subr.bf16.mxu1 %v10952_v44  ;;  %5976 = vmatprep.subr.bf16.mxu0 %v11212_v45  ;;  %v11008_v44 = vcombine.high %v4171_v11, %v4175_v27  ;;  %v11268_v45 = vcombine.high %v11136_v50, %v11140_v7 }
 0x6ad   : > { %4888 = vmatpush1.bf16.msra.mxu1 %v10951_v6  ;;  %5977 = vmatpush1.bf16.msra.mxu0 %v11211_v39  ;;  %v11007_v6 = vcombine.low %v4171_v11, %v4175_v27  ;;  %v11267_v39 = vcombine.low %v11136_v50, %v11140_v7  ;;  %v4100_v7 = vld [vmem:[%s17481_s9 + $0x110] sm:$0xff] }
 0x6ae   : > { %4889 = vmatprep.subr.bf16.mxu1 %v10960_v53  ;;  %5978 = vmatprep.subr.bf16.mxu0 %v11220_v42  ;;  %v11016_v53 = vcombine.high %v4179_v36, %v4183_v35  ;;  %v11276_v42 = vcombine.high %v11144_v9, %v11148_v29 }
 0x6b1   : > { %4890 = vmatpush1.bf16.msra.mxu1 %v10959_v10  ;;  %5979 = vmatpush1.bf16.msra.mxu0 %v11219_v49  ;;  %v11015_v10 = vcombine.low %v4179_v36, %v4183_v35  ;;  %v11275_v49 = vcombine.low %v11144_v9, %v11148_v29  ;;  %v4108_v29 = vld [vmem:[%s17481_s9 + $0x150] sm:$0xff] }
 0x6b2   : > { %4891 = vmatprep.subr.bf16.mxu1 %v10968_v55  ;;  %5980 = vmatprep.subr.bf16.mxu0 %v11228_v52  ;;  %v11024_v55 = vcombine.high %v4187_v16, %v4191_v33  ;;  %v11284_v52 = vcombine.high %v11152_v46, %v11156_v47 }
 0x6b5   : > { %4892 = vmatpush1.bf16.msra.mxu1 %v10967_v54  ;;  %5981 = vmatpush1.bf16.msra.mxu0 %v11227_v34  ;;  %v11023_v54 = vcombine.low %v4187_v16, %v4191_v33  ;;  %v11283_v34 = vcombine.low %v11152_v46, %v11156_v47  ;;  %v4116_v47 = vld [vmem:[%s17481_s9 + $0x190] sm:$0xff] }
 0x6b6   : > { %4893 = vmatprep.subr.bf16.mxu1 %v10976_v0  ;;  %5982 = vmatprep.subr.bf16.mxu0 %v11236_v4  ;;  %v15149_v0 = vld [vmem:[#allocation8 + $0x4] ss:$8 sm:$0x3]  ;;  %v10906_v4 = vcombine.high %v4068_v8, %v4072_v31 }
 0x6b7   : > { %v6074_v57 = vrot.slane %v15149_v0, %v14935_v18 }
 0x6b9   : > { %4894 = vmatpush1.bf16.msra.mxu1 %v10975_v60  ;;  %5983 = vmatpush1.bf16.msra.mxu0 %v11235_v63  ;;  %v11294_v60 = vld [vmem:[%s17481_s9 + $0x848] sm:$0xff] }
 0x6ba   : > { %4895 = vmatprep.subr.bf16.mxu1 %v10984_v30  ;;  %5984 = vmatprep.subr.bf16.mxu0 %v11244_v12  ;;  %v11298_v63 = vld [vmem:[%s17481_s9 + $0x868] sm:$0xff]  ;;  %v10905_v30 = vcombine.low %v4068_v8, %v4072_v31  ;;  %v11415_v12 = vcombine.low %v11286_v40, %v11290_v37  ;;  %v4124_v37 = vld [vmem:[%s17481_s9 + $0x1d0] sm:$0xff] }
 0x6bb   : > { %v11424_v1 = vcombine.high %v11294_v60, %v11298_v63  ;;  %v11423_v41 = vcombine.low %v11294_v60, %v11298_v63  ;;  %v4132_v60 = vld [vmem:[%s17481_s9 + $0x210] sm:$0xff] }
 0x6bc   : > { %v4136_v63 = vld [vmem:[%s17481_s9 + $0x230] sm:$0xff] }
 0x6bd   : > { %4896 = vmatpush1.bf16.msra.mxu1 %v10983_v26  ;;  %5985 = vmatpush1.bf16.msra.mxu0 %v11243_v2  ;;  %v15173_v26 = vpack.c.bf16 %v6074_v57, %v6074_v57  ;;  %v11302_v2 = vld [vmem:[%s17481_s9 + $0x888] sm:$0xff] }
 0x6be   : > { %4897 = vmatprep.subr.bf16.mxu1 %v10992_v5  ;;  %5986 = vmatprep.subr.bf16.mxu0 %v11252_v23  ;;  %v11306_v5 = vld [vmem:[%s17481_s9 + $0x8a8] sm:$0xff]  ;;  %v10913_v23 = vcombine.low %v4076_v43, %v4080_v59 }
 0x6bf   : > { %v11432_v48 = vcombine.high %v11302_v2, %v11306_v5  ;;  %v11431_v11 = vcombine.low %v11302_v2, %v11306_v5  ;;  %v4140_v2 = vld [vmem:[%s17481_s9 + $0x250] sm:$0xff] }
 0x6c0   : > { %v4144_v5 = vld [vmem:[%s17481_s9 + $0x270] sm:$0xff] }
 0x6c1   : > { %4898 = vmatpush1.bf16.msra.mxu1 %v10991_v14  ;;  %5987 = vmatpush1.bf16.msra.mxu0 %v11251_v62  ;;  %v4096_v14 = vld [vmem:[%s17481_s9 + $0xf0] sm:$0xff]  ;;  %v11310_v62 = vld [vmem:[%s17481_s9 + $0x8c8] sm:$0xff] }
 0x6c2   : > { %4899 = vmatprep.subr.bf16.mxu1 %v11000_v17  ;;  %5988 = vmatprep.subr.bf16.mxu0 %v11260_v22  ;;  %v11314_v17 = vld [vmem:[%s17481_s9 + $0x8e8] sm:$0xff]  ;;  %v10921_v22 = vcombine.low %v4084_v3, %v4088_v13  ;;  %v10930_v27 = vcombine.high %v4092_v56, %v4096_v14  ;;  %v10970_v3 = vcombine.high %v4132_v60, %v4136_v63 }
 0x6c3   : > { %v11440_v50 = vcombine.high %v11310_v62, %v11314_v17  ;;  %v11439_v36 = vcombine.low %v11310_v62, %v11314_v17  ;;  %v4148_v62 = vld [vmem:[%s17481_s9 + $0x290] sm:$0xff] }
 0x6c4   : > { %v4152_v17 = vld [vmem:[%s17481_s9 + $0x2b0] sm:$0xff] }
 0x6c5   : > { %4900 = vmatpush1.bf16.msra.mxu1 %v10999_v28  ;;  %5989 = vmatpush1.bf16.msra.mxu0 %v11259_v58  ;;  %v4104_v28 = vld [vmem:[%s17481_s9 + $0x130] sm:$0xff]  ;;  %v11318_v58 = vld [vmem:[%s17481_s9 + $0x908] sm:$0xff] }
 0x6c6   : > { %4901 = vmatprep.subr.bf16.mxu1 %v11008_v44  ;;  %5990 = vmatprep.subr.bf16.mxu0 %v11268_v45  ;;  %v11322_v44 = vld [vmem:[%s17481_s9 + $0x928] sm:$0xff]  ;;  %v10929_v45 = vcombine.low %v4092_v56, %v4096_v14  ;;  %v10938_v35 = vcombine.high %v4100_v7, %v4104_v28  ;;  %v10978_v56 = vcombine.high %v4140_v2, %v4144_v5 }
 0x6c7   : > { %v11448_v9 = vcombine.high %v11318_v58, %v11322_v44  ;;  %v11447_v16 = vcombine.low %v11318_v58, %v11322_v44  ;;  %v4156_v58 = vld [vmem:[%s17481_s9 + $0x2d0] sm:$0xff] }
 0x6c8   : > { %v4160_v44 = vld [vmem:[%s17481_s9 + $0x2f0] sm:$0xff] }
 0x6c9   : > { %4902 = vmatpush1.bf16.msra.mxu1 %v11007_v6  ;;  %5991 = vmatpush1.bf16.msra.mxu0 %v11267_v39  ;;  %v4112_v6 = vld [vmem:[%s17481_s9 + $0x170] sm:$0xff]  ;;  %v11326_v39 = vld [vmem:[%s17481_s9 + $0x948] sm:$0xff] }
 0x6ca   : > { %4903 = vmatprep.subr.bf16.mxu1 %v11016_v53  ;;  %5992 = vmatprep.subr.bf16.mxu0 %v11276_v42  ;;  %v11330_v53 = vld [vmem:[%s17481_s9 + $0x968] sm:$0xff]  ;;  %v10937_v42 = vcombine.low %v4100_v7, %v4104_v28  ;;  %v10946_v33 = vcombine.high %v4108_v29, %v4112_v6  ;;  %v10986_v7 = vcombine.high %v4148_v62, %v4152_v17 }
 0x6cb   : > { %v11456_v46 = vcombine.high %v11326_v39, %v11330_v53  ;;  %v11455_v8 = vcombine.low %v11326_v39, %v11330_v53  ;;  %v4164_v39 = vld [vmem:[%s17481_s9 + $0x310] sm:$0xff] }
 0x6cc   : > { %v4168_v53 = vld [vmem:[%s17481_s9 + $0x330] sm:$0xff] }
 0x6cd   : > { %4904 = vmatpush1.bf16.msra.mxu1 %v11015_v10  ;;  %5993 = vmatpush1.bf16.msra.mxu0 %v11275_v49  ;;  %v4120_v10 = vld [vmem:[%s17481_s9 + $0x1b0] sm:$0xff]  ;;  %v11334_v49 = vld [vmem:[%s17481_s9 + $0x988] sm:$0xff] }
 0x6ce   : > { %4905 = vmatprep.subr.bf16.mxu1 %v11024_v55  ;;  %5994 = vmatprep.subr.bf16.mxu0 %v11284_v52  ;;  %v11338_v55 = vld [vmem:[%s17481_s9 + $0x9a8] sm:$0xff]  ;;  %v10945_v52 = vcombine.low %v4108_v29, %v4112_v6  ;;  %v10954_v31 = vcombine.high %v4116_v47, %v4120_v10  ;;  %v10994_v29 = vcombine.high %v4156_v58, %v4160_v44 }
 0x6cf   : > { %v11464_v40 = vcombine.high %v11334_v49, %v11338_v55  ;;  %v11463_v43 = vcombine.low %v11334_v49, %v11338_v55  ;;  %v4172_v49 = vld [vmem:[%s17481_s9 + $0x350] sm:$0xff] }
 0x6d0   : > { %v4176_v55 = vld [vmem:[%s17481_s9 + $0x370] sm:$0xff] }
 0x6d1   : > { %4906 = vmatpush1.bf16.msra.mxu1 %v11023_v54  ;;  %5995 = vmatpush1.bf16.msra.mxu0 %v11283_v34  ;;  %v4128_v54 = vld [vmem:[%s17481_s9 + $0x1f0] sm:$0xff]  ;;  %v11342_v34 = vld [vmem:[%s17481_s9 + $0x9c8] sm:$0xff] }
 0x6d2   : > { %4916 = vmatprep.subr.bf16.mxu1 %v10906_v4  ;;  %6889 = vmatprep.subr.bf16.mxu0 %v11416_v15  ;;  %v11346_v4 = vld [vmem:[%s17481_s9 + $0x9e8] sm:$0xff]  ;;  %v10953_v15 = vcombine.low %v4116_v47, %v4120_v10  ;;  %v10962_v57 = vcombine.high %v4124_v37, %v4128_v54  ;;  %v11002_v47 = vcombine.high %v4164_v39, %v4168_v53 }
 0x6d3   : > { %v11472_v59 = vcombine.high %v11342_v34, %v11346_v4 }
 0x6d4   : > { %4908 = vmatmul.mubr.bf16.vlgmr.msra.gmra.mrb[48].mxu1 %v14959_v61  ;;  %5997 = vmatmul.mubr.bf16.vlgmr.msra.gmra.mrb[56].mxu0 %v14961_v21 }
 0x6d5   : > { %4917 = vmatpush1.bf16.msra.mxu1 %v10905_v30  ;;  %4948 = vmatprep.mubr.bf16.mxu1 %v14955_v25  ;;  %v11350_v30 = vld [vmem:[%s17481_s9 + $0xa08] sm:$0xff] }
 0x6d6   : > { %6890 = vmatpush1.bf16.msra.mxu0 %v11415_v12  ;;  %6921 = vmatprep.mubr.bf16.mxu0 %v15173_v26  ;;  %v11354_v12 = vld [vmem:[%s17481_s9 + $0xa28] sm:$0xff] }
 0x6d7   : > { %4918 = vmatprep.subr.bf16.mxu1 %v10914_v24  ;;  %6891 = vmatprep.subr.bf16.mxu0 %v11424_v1  ;;  %v10961_v24 = vcombine.low %v4124_v37, %v4128_v54  ;;  %v11471_v1 = vcombine.low %v11342_v34, %v11346_v4  ;;  %v11480_v13 = vcombine.high %v11350_v30, %v11354_v12  ;;  %v4180_v34 = vld [vmem:[%s17481_s9 + $0x390] sm:$0xff] }
 0x6d8   : > { %v11010_v37 = vcombine.high %v4172_v49, %v4176_v55  ;;  %v4184_v4 = vld [vmem:[%s17481_s9 + $0x3b0] sm:$0xff] }
 0x6d9   : > { %4919 = vmatpush1.bf16.msra.mxu1 %v10913_v23  ;;  %v11358_v23 = vld [vmem:[%s17481_s9 + $0xa48] sm:$0xff] }
 0x6da   : > { %6892 = vmatpush1.bf16.msra.mxu0 %v11423_v41  ;;  %4920 = vmatprep.subr.bf16.mxu1 %v10922_v38  ;;  %v11362_v41 = vld [vmem:[%s17481_s9 + $0xa68] sm:$0xff]  ;;  %v10969_v38 = vcombine.low %v4132_v60, %v4136_v63  ;;  %v11018_v60 = vcombine.high %v4180_v34, %v4184_v4 }
 0x6db   : > { %6893 = vmatprep.subr.bf16.mxu0 %v11432_v48  ;;  %v11479_v48 = vcombine.low %v11350_v30, %v11354_v12  ;;  %v11488_v14 = vcombine.high %v11358_v23, %v11362_v41  ;;  %v4188_v30 = vld [vmem:[%s17481_s9 + $0x3d0] sm:$0xff] }
 0x6dc   : > { %v4192_v12 = vld [vmem:[%s17481_s9 + $0x3f0] sm:$0xff] }
 0x6dd   : > { %4921 = vmatpush1.bf16.msra.mxu1 %v10921_v22  ;;  %v11366_v22 = vld [vmem:[%s17481_s9 + $0xa88] sm:$0xff] }
 0x6de   : > { %6894 = vmatpush1.bf16.msra.mxu0 %v11431_v11  ;;  %4922 = vmatprep.subr.bf16.mxu1 %v10930_v27  ;;  %v11370_v11 = vld [vmem:[%s17481_s9 + $0xaa8] sm:$0xff]  ;;  %v10977_v27 = vcombine.low %v4140_v2, %v4144_v5  ;;  %v11026_v2 = vcombine.high %v4188_v30, %v4192_v12 }
 0x6df   : > { %6895 = vmatprep.subr.bf16.mxu0 %v11440_v50  ;;  %v11487_v50 = vcombine.low %v11358_v23, %v11362_v41  ;;  %v11496_v28 = vcombine.high %v11366_v22, %v11370_v11  ;;  %v4069_v23 = vld [vmem:[%s17481_s9 + $0x18] sm:$0xff] }
 0x6e0   : > { %v4073_v41 = vld [vmem:[%s17481_s9 + $0x38] sm:$0xff] }
 0x6e1   : > { %4923 = vmatpush1.bf16.msra.mxu1 %v10929_v45  ;;  %v11374_v45 = vld [vmem:[%s17481_s9 + $0xac8] sm:$0xff] }
 0x6e2   : > { %6896 = vmatpush1.bf16.msra.mxu0 %v11439_v36  ;;  %4924 = vmatprep.subr.bf16.mxu1 %v10938_v35  ;;  %v11378_v36 = vld [vmem:[%s17481_s9 + $0xae8] sm:$0xff]  ;;  %v10985_v35 = vcombine.low %v4148_v62, %v4152_v17  ;;  %v10908_v62 = vcombine.high %v4069_v23, %v4073_v41  ;;  %v6070_v17 = vrot.slane %v15149_v0, %v14929_v32 }
 0x6e3   : > { %6897 = vmatprep.subr.bf16.mxu0 %v11448_v9  ;;  %v11495_v9 = vcombine.low %v11366_v22, %v11370_v11  ;;  %v11504_v6 = vcombine.high %v11374_v45, %v11378_v36  ;;  %v4077_v11 = vld [vmem:[%s17481_s9 + $0x58] sm:$0xff] }
 0x6e5   : > { %4925 = vmatpush1.bf16.msra.mxu1 %v10937_v42  ;;  %v11382_v42 = vld [vmem:[%s17481_s9 + $0xb08] sm:$0xff] }
 0x6e6   : > { %6898 = vmatpush1.bf16.msra.mxu0 %v11447_v16  ;;  %4926 = vmatprep.subr.bf16.mxu1 %v10946_v33  ;;  %v11386_v16 = vld [vmem:[%s17481_s9 + $0xb28] sm:$0xff]  ;;  %v10993_v33 = vcombine.low %v4156_v58, %v4160_v44  ;;  %v15365_v58 = vpack.c.bf16 %v6070_v17, %v6070_v17 }
 0x6e7   : > { %6899 = vmatprep.subr.bf16.mxu0 %v11456_v46  ;;  %v11503_v46 = vcombine.low %v11374_v45, %v11378_v36  ;;  %v11512_v10 = vcombine.high %v11382_v42, %v11386_v16  ;;  %v4085_v45 = vld [vmem:[%s17481_s9 + $0x98] sm:$0xff] }
 0x6e8   : > { %v4089_v36 = vld [vmem:[%s17481_s9 + $0xb8] sm:$0xff] }
 0x6e9   : > { %4927 = vmatpush1.bf16.msra.mxu1 %v10945_v52  ;;  %v11390_v52 = vld [vmem:[%s17481_s9 + $0xb48] sm:$0xff] }
 0x6ea   : > { %6900 = vmatpush1.bf16.msra.mxu0 %v11455_v8  ;;  %4928 = vmatprep.subr.bf16.mxu1 %v10954_v31  ;;  %v11394_v8 = vld [vmem:[%s17481_s9 + $0xb68] sm:$0xff]  ;;  %v11001_v31 = vcombine.low %v4164_v39, %v4168_v53  ;;  %v10924_v53 = vcombine.high %v4085_v45, %v4089_v36 }
 0x6eb   : > { %6901 = vmatprep.subr.bf16.mxu0 %v11464_v40  ;;  %v11511_v40 = vcombine.low %v11382_v42, %v11386_v16  ;;  %v11520_v54 = vcombine.high %v11390_v52, %v11394_v8  ;;  %v4093_v16 = vld [vmem:[%s17481_s9 + $0xd8] sm:$0xff] }
 0x6ed   : > { %4929 = vmatpush1.bf16.msra.mxu1 %v10953_v15  ;;  %v11398_v15 = vld [vmem:[%s17481_s9 + $0xb88] sm:$0xff] }
 0x6ee   : > { %6902 = vmatpush1.bf16.msra.mxu0 %v11463_v43  ;;  %4930 = vmatprep.subr.bf16.mxu1 %v10962_v57  ;;  %v11402_v43 = vld [vmem:[%s17481_s9 + $0xba8] sm:$0xff]  ;;  %v11009_v57 = vcombine.low %v4172_v49, %v4176_v55 }
 0x6ef   : > { %6903 = vmatprep.subr.bf16.mxu0 %v11472_v59  ;;  %v11519_v59 = vcombine.low %v11390_v52, %v11394_v8  ;;  %v11528_v63 = vcombine.high %v11398_v15, %v11402_v43  ;;  %v4101_v52 = vld [vmem:[%s17481_s9 + $0x118] sm:$0xff] }
 0x6f0   : > { %v4105_v8 = vld [vmem:[%s17481_s9 + $0x138] sm:$0xff] }
 0x6f1   : > { %4931 = vmatpush1.bf16.msra.mxu1 %v10961_v24  ;;  %v11406_v24 = vld [vmem:[%s17481_s9 + $0xbc8] sm:$0xff] }
 0x6f2   : > { %6904 = vmatpush1.bf16.msra.mxu0 %v11471_v1  ;;  %4932 = vmatprep.subr.bf16.mxu1 %v10970_v3  ;;  %v11410_v1 = vld [vmem:[%s17481_s9 + $0xbe8] sm:$0xff]  ;;  %v11017_v3 = vcombine.low %v4180_v34, %v4184_v4  ;;  %v10940_v34 = vcombine.high %v4101_v52, %v4105_v8 }
 0x6f3   : > { %6905 = vmatprep.subr.bf16.mxu0 %v11480_v13  ;;  %v11527_v13 = vcombine.low %v11398_v15, %v11402_v43  ;;  %v11536_v5 = vcombine.high %v11406_v24, %v11410_v1  ;;  %v4109_v15 = vld [vmem:[%s17481_s9 + $0x158] sm:$0xff] }
 0x6f4   : > { %v4113_v43 = vld [vmem:[%s17481_s9 + $0x178] sm:$0xff] }
 0x6f5   : > { %4933 = vmatpush1.bf16.msra.mxu1 %v10969_v38  ;;  %v11288_v38 = vld [vmem:[%s17481_s9 + $0x818] sm:$0xff] }
 0x6f6   : > { %6906 = vmatpush1.bf16.msra.mxu0 %v11479_v48  ;;  %4934 = vmatprep.subr.bf16.mxu1 %v10978_v56  ;;  %v11292_v48 = vld [vmem:[%s17481_s9 + $0x838] sm:$0xff]  ;;  %v11025_v56 = vcombine.low %v4188_v30, %v4192_v12  ;;  %v10948_v30 = vcombine.high %v4109_v15, %v4113_v43 }
 0x6f7   : > { %6907 = vmatprep.subr.bf16.mxu0 %v11488_v14  ;;  %v11535_v14 = vcombine.low %v11406_v24, %v11410_v1  ;;  %v11420_v22 = vcombine.high %v11288_v38, %v11292_v48  ;;  %v11419_v0 = vcombine.low %v11288_v38, %v11292_v48  ;;  %v4117_v24 = vld [vmem:[%s17481_s9 + $0x198] sm:$0xff] }
 0x6f8   : > { %v4121_v1 = vld [vmem:[%s17481_s9 + $0x1b8] sm:$0xff] }
 0x6f9   : > { %4935 = vmatpush1.bf16.msra.mxu1 %v10977_v27  ;;  %v4081_v27 = vld [vmem:[%s17481_s9 + $0x78] sm:$0xff] }
 0x6fa   : > { %6908 = vmatpush1.bf16.msra.mxu0 %v11487_v50  ;;  %4936 = vmatprep.subr.bf16.mxu1 %v10986_v7  ;;  %v10907_v50 = vcombine.low %v4069_v23, %v4073_v41  ;;  %v11296_v7 = vld [vmem:[%s17481_s9 + $0x858] sm:$0xff]  ;;  %v10916_v44 = vcombine.high %v4077_v11, %v4081_v27  ;;  %v10956_v23 = vcombine.high %v4117_v24, %v4121_v1 }
 0x6fb   : > { %6909 = vmatprep.subr.bf16.mxu0 %v11496_v28  ;;  %v11300_v28 = vld [vmem:[%s17481_s9 + $0x878] sm:$0xff] }
 0x6fc   : > { %v11427_v39 = vcombine.low %v11296_v7, %v11300_v28  ;;  %v4125_v38 = vld [vmem:[%s17481_s9 + $0x1d8] sm:$0xff] }
 0x6fd   : > { %4937 = vmatpush1.bf16.msra.mxu1 %v10985_v35  ;;  %v11428_v35 = vcombine.high %v11296_v7, %v11300_v28  ;;  %v4129_v48 = vld [vmem:[%s17481_s9 + $0x1f8] sm:$0xff] }
 0x6fe   : > { %6910 = vmatpush1.bf16.msra.mxu0 %v11495_v9  ;;  %4938 = vmatprep.subr.bf16.mxu1 %v10994_v29  ;;  %v11304_v9 = vld [vmem:[%s17481_s9 + $0x898] sm:$0xff] }
 0x6ff   : > { %6911 = vmatprep.subr.bf16.mxu0 %v11504_v6  ;;  %v11308_v29 = vld [vmem:[%s17481_s9 + $0x8b8] sm:$0xff]  ;;  %v10915_v6 = vcombine.low %v4077_v11, %v4081_v27 }
 0x700   : > { %v11436_v42 = vcombine.high %v11304_v9, %v11308_v29  ;;  %v4133_v27 = vld [vmem:[%s17481_s9 + $0x218] sm:$0xff] }
 0x701   : > { %4939 = vmatpush1.bf16.msra.mxu1 %v10993_v33  ;;  %v4097_v33 = vld [vmem:[%s17481_s9 + $0xf8] sm:$0xff] }
 0x702   : > { %6912 = vmatpush1.bf16.msra.mxu0 %v11503_v46  ;;  %4940 = vmatprep.subr.bf16.mxu1 %v11002_v47  ;;  %v11316_v46 = vld [vmem:[%s17481_s9 + $0x8f8] sm:$0xff]  ;;  %v10923_v47 = vcombine.low %v4085_v45, %v4089_v36  ;;  %v10932_v49 = vcombine.high %v4093_v16, %v4097_v33 }
 0x703   : > { %6913 = vmatprep.subr.bf16.mxu0 %v11512_v10  ;;  %v11435_v10 = vcombine.low %v11304_v9, %v11308_v29  ;;  %v11352_v7 = vld [vmem:[%s17481_s9 + $0xa18] sm:$0xff] }
 0x704   : > { %v11356_v28 = vld [vmem:[%s17481_s9 + $0xa38] sm:$0xff] }
 0x705   : > { %4941 = vmatpush1.bf16.msra.mxu1 %v11001_v31  ;;  %v11320_v31 = vld [vmem:[%s17481_s9 + $0x918] sm:$0xff]  ;;  %v11484_v36 = vcombine.high %v11352_v7, %v11356_v28 }
 0x706   : > { %6914 = vmatpush1.bf16.msra.mxu0 %v11511_v40  ;;  %4942 = vmatprep.subr.bf16.mxu1 %v11010_v37  ;;  %v11324_v40 = vld [vmem:[%s17481_s9 + $0x938] sm:$0xff]  ;;  %v10931_v37 = vcombine.low %v4093_v16, %v4097_v33 }
 0x707   : > { %6915 = vmatprep.subr.bf16.mxu0 %v11520_v54  ;;  %v11452_v4 = vcombine.high %v11320_v31, %v11324_v40  ;;  %v4145_v9 = vld [vmem:[%s17481_s9 + $0x278] sm:$0xff] }
 0x708   : > { %v11360_v29 = vld [vmem:[%s17481_s9 + $0xa58] sm:$0xff] }
 0x709   : > { %4943 = vmatpush1.bf16.msra.mxu1 %v11009_v57  ;;  %v11328_v57 = vld [vmem:[%s17481_s9 + $0x958] sm:$0xff] }
 0x70a   : > { %6916 = vmatpush1.bf16.msra.mxu0 %v11519_v59  ;;  %4944 = vmatprep.subr.bf16.mxu1 %v11018_v60  ;;  %v11332_v59 = vld [vmem:[%s17481_s9 + $0x978] sm:$0xff]  ;;  %v10939_v60 = vcombine.low %v4101_v52, %v4105_v8 }
 0x70b   : > { %6917 = vmatprep.subr.bf16.mxu0 %v11528_v63  ;;  %v11451_v63 = vcombine.low %v11320_v31, %v11324_v40  ;;  %v11460_v12 = vcombine.high %v11328_v57, %v11332_v59  ;;  %v4149_v33 = vld [vmem:[%s17481_s9 + $0x298] sm:$0xff] }
 0x70c   : > { %v4157_v8 = vld [vmem:[%s17481_s9 + $0x2d8] sm:$0xff] }
 0x70d   : > { %4945 = vmatpush1.bf16.msra.mxu1 %v11017_v3  ;;  %v11336_v3 = vld [vmem:[%s17481_s9 + $0x998] sm:$0xff] }
 0x70e   : > { %6918 = vmatpush1.bf16.msra.mxu0 %v11527_v13  ;;  %4946 = vmatprep.subr.bf16.mxu1 %v11026_v2  ;;  %v11340_v13 = vld [vmem:[%s17481_s9 + $0x9b8] sm:$0xff]  ;;  %v10947_v2 = vcombine.low %v4109_v15, %v4113_v43 }
 0x70f   : > { %6919 = vmatprep.subr.bf16.mxu0 %v11536_v5  ;;  %v11459_v5 = vcombine.low %v11328_v57, %v11332_v59  ;;  %v11468_v41 = vcombine.high %v11336_v3, %v11340_v13  ;;  %v11467_v17 = vcombine.low %v11336_v3, %v11340_v13  ;;  %v4161_v31 = vld [vmem:[%s17481_s9 + $0x2f8] sm:$0xff] }
 0x710   : > { %v11376_v40 = vld [vmem:[%s17481_s9 + $0xad8] sm:$0xff] }
 0x711   : > { %4947 = vmatpush1.bf16.msra.mxu1 %v11025_v56  ;;  %v11344_v56 = vld [vmem:[%s17481_s9 + $0x9d8] sm:$0xff] }
 0x712   : > { %6920 = vmatpush1.bf16.msra.mxu0 %v11535_v14  ;;  %4957 = vmatprep.subr.bf16.mxu1 %v10908_v62  ;;  %v11348_v14 = vld [vmem:[%s17481_s9 + $0x9f8] sm:$0xff]  ;;  %v10955_v62 = vcombine.low %v4117_v24, %v4121_v1 }
 0x713   : > { %6971 = vmatprep.subr.bf16.mxu0 %v11420_v22  ;;  %v10964_v22 = vcombine.high %v4125_v38, %v4129_v48  ;;  %v11476_v11 = vcombine.high %v11344_v56, %v11348_v14  ;;  %v4165_v43 = vld [vmem:[%s17481_s9 + $0x318] sm:$0xff] }
 0x714   : > { %4949 = vmatmul.mubr.bf16.vlgmr.msra.gmra.mrb[52].mxu1 %v14959_v61  ;;  %v4169_v57 = vld [vmem:[%s17481_s9 + $0x338] sm:$0xff] }
 0x715   : > { %6922 = vmatmul.mubr.bf16.vlgmr.msra.gmra.mrb[60].mxu0 %v15365_v58  ;;  %4958 = vmatpush1.bf16.msra.mxu1 %v10907_v50  ;;  %v4137_v50 = vld [vmem:[%s17481_s9 + $0x238] sm:$0xff] }
 0x716   : > { %4989 = vmatprep.mubr.bf16.mxu1 %v14955_v25  ;;  %6972 = vmatpush1.bf16.msra.mxu0 %v11419_v0  ;;  %v11312_v25 = vld [vmem:[%s17481_s9 + $0x8d8] sm:$0xff]  ;;  %v10963_v0 = vcombine.low %v4125_v38, %v4129_v48  ;;  %v10972_v45 = vcombine.high %v4133_v27, %v4137_v50 }
 0x717   : > { %7003 = vmatprep.mubr.bf16.mxu0 %v15173_v26  ;;  %4959 = vmatprep.subr.bf16.mxu1 %v10916_v44  ;;  %v11444_v55 = vcombine.high %v11312_v25, %v11316_v46  ;;  %v11443_v54 = vcombine.low %v11312_v25, %v11316_v46  ;;  %v11475_v44 = vcombine.low %v11344_v56, %v11348_v14  ;;  %v4153_v25 = vld [vmem:[%s17481_s9 + $0x2b8] sm:$0xff] }
 0x718   : > { %6973 = vmatprep.subr.bf16.mxu0 %v11428_v35  ;;  %v4141_v35 = vld [vmem:[%s17481_s9 + $0x258] sm:$0xff] }
 0x719   : > { %4960 = vmatpush1.bf16.msra.mxu1 %v10915_v6  ;;  %v11364_v6 = vld [vmem:[%s17481_s9 + $0xa78] sm:$0xff] }
 0x71a   : > { %6974 = vmatpush1.bf16.msra.mxu0 %v11427_v39  ;;  %4961 = vmatprep.subr.bf16.mxu1 %v10924_v53  ;;  %v10971_v39 = vcombine.low %v4133_v27, %v4137_v50  ;;  %v11483_v53 = vcombine.low %v11352_v7, %v11356_v28  ;;  %v11492_v16 = vcombine.high %v11360_v29, %v11364_v6  ;;  %v11368_v46 = vld [vmem:[%s17481_s9 + $0xa98] sm:$0xff] }
 0x71b   : > { %6975 = vmatprep.subr.bf16.mxu0 %v11436_v42  ;;  %v10980_v42 = vcombine.high %v4141_v35, %v4145_v9  ;;  %v11384_v59 = vld [vmem:[%s17481_s9 + $0xb18] sm:$0xff] }
 0x71c   : > { %v4173_v1 = vld [vmem:[%s17481_s9 + $0x358] sm:$0xff] }
 0x71d   : > { %4962 = vmatpush1.bf16.msra.mxu1 %v10923_v47  ;;  %v11372_v47 = vld [vmem:[%s17481_s9 + $0xab8] sm:$0xff] }
 0x71e   : > { %6976 = vmatpush1.bf16.msra.mxu0 %v11435_v10  ;;  %4963 = vmatprep.subr.bf16.mxu1 %v10932_v49  ;;  %v10979_v10 = vcombine.low %v4141_v35, %v4145_v9  ;;  %v11491_v49 = vcombine.low %v11360_v29, %v11364_v6  ;;  %v11500_v52 = vcombine.high %v11368_v46, %v11372_v47  ;;  %v4177_v3 = vld [vmem:[%s17481_s9 + $0x378] sm:$0xff]  ;;  %v11029_v9 = vld [vmem:[%s17481_s9 + $0x400] sm:$0xff]  ;;  %v11542_v6 = vld [vmem:[%s17481_s9 + $0xc08] sm:$0xff] }
 0x71f   : > { %6977 = vmatprep.subr.bf16.mxu0 %v11444_v55  ;;  %v10988_v55 = vcombine.high %v4149_v33, %v4153_v25  ;;  %v11392_v13 = vld [vmem:[%s17481_s9 + $0xb58] sm:$0xff]  ;;  %v11033_v29 = vld [vmem:[%s17481_s9 + $0x420] sm:$0xff] }
 0x720   : > { %v4181_v48 = vld [vmem:[%s17481_s9 + $0x398] sm:$0xff] }
 0x721   : > { %4964 = vmatpush1.bf16.msra.mxu1 %v10931_v37  ;;  %v11380_v37 = vld [vmem:[%s17481_s9 + $0xaf8] sm:$0xff] }
 0x722   : > { %6978 = vmatpush1.bf16.msra.mxu0 %v11443_v54  ;;  %4965 = vmatprep.subr.bf16.mxu1 %v10940_v34  ;;  %v10987_v54 = vcombine.low %v4149_v33, %v4153_v25  ;;  %v11499_v34 = vcombine.low %v11368_v46, %v11372_v47  ;;  %v11508_v15 = vcombine.high %v11376_v40, %v11380_v37  ;;  %v4185_v56 = vld [vmem:[%s17481_s9 + $0x3b8] sm:$0xff]  ;;  %v15551_v33 = vld [vmem:[#allocation8 + $0x5] ss:$8 sm:$0x3]  ;;  %v11037_v46 = vld [vmem:[%s17481_s9 + $0x440] sm:$0xff] }
 0x723   : > { %6979 = vmatprep.subr.bf16.mxu0 %v11452_v4  ;;  %v10996_v4 = vcombine.high %v4157_v8, %v4161_v31  ;;  %v11400_v14 = vld [vmem:[%s17481_s9 + $0xb98] sm:$0xff]  ;;  %v11041_v47 = vld [vmem:[%s17481_s9 + $0x460] sm:$0xff] }
 0x724   : > { %v4189_v50 = vld [vmem:[%s17481_s9 + $0x3d8] sm:$0xff] }
 0x725   : > { %4966 = vmatpush1.bf16.msra.mxu1 %v10939_v60  ;;  %v11388_v60 = vld [vmem:[%s17481_s9 + $0xb38] sm:$0xff] }
 0x726   : > { %6980 = vmatpush1.bf16.msra.mxu0 %v11451_v63  ;;  %4967 = vmatprep.subr.bf16.mxu1 %v10948_v30  ;;  %v10995_v63 = vcombine.low %v4157_v8, %v4161_v31  ;;  %v11507_v30 = vcombine.low %v11376_v40, %v11380_v37  ;;  %v11516_v24 = vcombine.high %v11384_v59, %v11388_v60  ;;  %v4193_v7 = vld [vmem:[%s17481_s9 + $0x3f8] sm:$0xff]  ;;  %v11045_v40 = vld [vmem:[%s17481_s9 + $0x480] sm:$0xff] }
 0x727   : > { %6981 = vmatprep.subr.bf16.mxu0 %v11460_v12  ;;  %v11004_v12 = vcombine.high %v4165_v43, %v4169_v57  ;;  %v11408_v28 = vld [vmem:[%s17481_s9 + $0xbd8] sm:$0xff]  ;;  %v11166_v31 = vcombine.high %v11037_v46, %v11041_v47  ;;  %v11049_v37 = vld [vmem:[%s17481_s9 + $0x4a0] sm:$0xff] }
 0x729   : > { %4968 = vmatpush1.bf16.msra.mxu1 %v10947_v2  ;;  %v11396_v2 = vld [vmem:[%s17481_s9 + $0xb78] sm:$0xff] }
 0x72a   : > { %6982 = vmatpush1.bf16.msra.mxu0 %v11459_v5  ;;  %4969 = vmatprep.subr.bf16.mxu1 %v10956_v23  ;;  %v11003_v5 = vcombine.low %v4165_v43, %v4169_v57  ;;  %v11515_v23 = vcombine.low %v11384_v59, %v11388_v60  ;;  %v11524_v38 = vcombine.high %v11392_v13, %v11396_v2  ;;  %v11053_v60 = vld [vmem:[%s17481_s9 + $0x4c0] sm:$0xff] }
 0x72b   : > { %6983 = vmatprep.subr.bf16.mxu0 %v11468_v41  ;;  %v11012_v41 = vcombine.high %v4173_v1, %v4177_v3  ;;  %v11165_v43 = vcombine.low %v11037_v46, %v11041_v47  ;;  %v11598_v47 = vld [vmem:[%s17481_s9 + $0xdc8] sm:$0xff] }
 0x72d   : > { %4970 = vmatpush1.bf16.msra.mxu1 %v10955_v62  ;;  %v11404_v62 = vld [vmem:[%s17481_s9 + $0xbb8] sm:$0xff] }
 0x72e   : > { %6984 = vmatpush1.bf16.msra.mxu0 %v11467_v17  ;;  %4971 = vmatprep.subr.bf16.mxu1 %v10964_v22  ;;  %v11011_v17 = vcombine.low %v4173_v1, %v4177_v3  ;;  %v11523_v22 = vcombine.low %v11392_v13, %v11396_v2  ;;  %v11532_v27 = vcombine.high %v11400_v14, %v11404_v62  ;;  %v11061_v2 = vld [vmem:[%s17481_s9 + $0x500] sm:$0xff] }
 0x72f   : > { %6985 = vmatprep.subr.bf16.mxu0 %v11476_v11  ;;  %v11020_v11 = vcombine.high %v4181_v48, %v4185_v56 }
 0x731   : > { %4972 = vmatpush1.bf16.msra.mxu1 %v10963_v0  ;;  %v11412_v0 = vld [vmem:[%s17481_s9 + $0xbf8] sm:$0xff] }
 0x732   : > { %6986 = vmatpush1.bf16.msra.mxu0 %v11475_v44  ;;  %4973 = vmatprep.subr.bf16.mxu1 %v10972_v45  ;;  %v11019_v44 = vcombine.low %v4181_v48, %v4185_v56  ;;  %v11531_v45 = vcombine.low %v11400_v14, %v11404_v62  ;;  %v11540_v35 = vcombine.high %v11408_v28, %v11412_v0  ;;  %v11069_v62 = vld [vmem:[%s17481_s9 + $0x540] sm:$0xff] }
 0x733   : > { %6987 = vmatprep.subr.bf16.mxu0 %v11484_v36  ;;  %v11028_v36 = vcombine.high %v4189_v50, %v4193_v7 }
 0x735   : > { %4974 = vmatpush1.bf16.msra.mxu1 %v10971_v39  ;;  %v11546_v39 = vld [vmem:[%s17481_s9 + $0xc28] sm:$0xff] }
 0x736   : > { %6988 = vmatpush1.bf16.msra.mxu0 %v11483_v53  ;;  %4975 = vmatprep.subr.bf16.mxu1 %v10980_v42  ;;  %v11027_v53 = vcombine.low %v4189_v50, %v4193_v7  ;;  %v11539_v42 = vcombine.low %v11408_v28, %v11412_v0  ;;  %v11672_v25 = vcombine.high %v11542_v6, %v11546_v39  ;;  %v11077_v0 = vld [vmem:[%s17481_s9 + $0x580] sm:$0xff] }
 0x737   : > { %6989 = vmatprep.subr.bf16.mxu0 %v11492_v16  ;;  %v11158_v16 = vcombine.high %v11029_v9, %v11033_v29  ;;  %v11671_v8 = vcombine.low %v11542_v6, %v11546_v39 }
 0x739   : > { %4976 = vmatpush1.bf16.msra.mxu1 %v10979_v10  ;;  %v11157_v10 = vcombine.low %v11029_v9, %v11033_v29 }
 0x73a   : > { %6990 = vmatpush1.bf16.msra.mxu0 %v11491_v49  ;;  %4977 = vmatprep.subr.bf16.mxu1 %v10988_v55  ;;  %v7081_v49 = vrot.slane %v15551_v33, %v14935_v18  ;;  %v11550_v55 = vld [vmem:[%s17481_s9 + $0xc48] sm:$0xff] }
 0x73b   : > { %6991 = vmatprep.subr.bf16.mxu0 %v11500_v52  ;;  %v11554_v52 = vld [vmem:[%s17481_s9 + $0xc68] sm:$0xff] }
 0x73c   : > { %v11679_v57 = vcombine.low %v11550_v55, %v11554_v52 }
 0x73d   : > { %4978 = vmatpush1.bf16.msra.mxu1 %v10987_v54  ;;  %v11680_v54 = vcombine.high %v11550_v55, %v11554_v52 }
 0x73e   : > { %6992 = vmatpush1.bf16.msra.mxu0 %v11499_v34  ;;  %4979 = vmatprep.subr.bf16.mxu1 %v10996_v4  ;;  %v11558_v34 = vld [vmem:[%s17481_s9 + $0xc88] sm:$0xff] }
 0x73f   : > { %6993 = vmatprep.subr.bf16.mxu0 %v11508_v15  ;;  %v11562_v4 = vld [vmem:[%s17481_s9 + $0xca8] sm:$0xff]  ;;  %v15581_v15 = vpack.c.bf16 %v7081_v49, %v7081_v49 }
 0x740   : > { %v11688_v59 = vcombine.high %v11558_v34, %v11562_v4  ;;  %v11687_v1 = vcombine.low %v11558_v34, %v11562_v4 }
 0x741   : > { %4980 = vmatpush1.bf16.msra.mxu1 %v10995_v63  ;;  %v11057_v63 = vld [vmem:[%s17481_s9 + $0x4e0] sm:$0xff] }
 0x742   : > { %6994 = vmatpush1.bf16.msra.mxu0 %v11507_v30  ;;  %4981 = vmatprep.subr.bf16.mxu1 %v11004_v12  ;;  %v11566_v30 = vld [vmem:[%s17481_s9 + $0xcc8] sm:$0xff]  ;;  %v11182_v3 = vcombine.high %v11053_v60, %v11057_v63 }
 0x743   : > { %6995 = vmatprep.subr.bf16.mxu0 %v11516_v24  ;;  %v11570_v12 = vld [vmem:[%s17481_s9 + $0xce8] sm:$0xff]  ;;  %v11173_v24 = vcombine.low %v11045_v40, %v11049_v37 }
 0x744   : > { %v11696_v13 = vcombine.high %v11566_v30, %v11570_v12  ;;  %v11695_v48 = vcombine.low %v11566_v30, %v11570_v12 }
 0x745   : > { %4982 = vmatpush1.bf16.msra.mxu1 %v11003_v5  ;;  %v11065_v5 = vld [vmem:[%s17481_s9 + $0x520] sm:$0xff] }
 0x746   : > { %6996 = vmatpush1.bf16.msra.mxu0 %v11515_v23  ;;  %4983 = vmatprep.subr.bf16.mxu1 %v11012_v41  ;;  %v11574_v23 = vld [vmem:[%s17481_s9 + $0xd08] sm:$0xff]  ;;  %v11190_v56 = vcombine.high %v11061_v2, %v11065_v5 }
 0x747   : > { %6997 = vmatprep.subr.bf16.mxu0 %v11524_v38  ;;  %v11578_v41 = vld [vmem:[%s17481_s9 + $0xd28] sm:$0xff]  ;;  %v11181_v38 = vcombine.low %v11053_v60, %v11057_v63 }
 0x748   : > { %v11704_v14 = vcombine.high %v11574_v23, %v11578_v41  ;;  %v11703_v50 = vcombine.low %v11574_v23, %v11578_v41 }
 0x749   : > { %4984 = vmatpush1.bf16.msra.mxu1 %v11011_v17  ;;  %v11073_v17 = vld [vmem:[%s17481_s9 + $0x560] sm:$0xff] }
 0x74a   : > { %6998 = vmatpush1.bf16.msra.mxu0 %v11523_v22  ;;  %4985 = vmatprep.subr.bf16.mxu1 %v11020_v11  ;;  %v11582_v22 = vld [vmem:[%s17481_s9 + $0xd48] sm:$0xff]  ;;  %v11198_v7 = vcombine.high %v11069_v62, %v11073_v17 }
 0x74b   : > { %6999 = vmatprep.subr.bf16.mxu0 %v11532_v27  ;;  %v11586_v11 = vld [vmem:[%s17481_s9 + $0xd68] sm:$0xff]  ;;  %v11189_v27 = vcombine.low %v11061_v2, %v11065_v5 }
 0x74c   : > { %v11712_v28 = vcombine.high %v11582_v22, %v11586_v11  ;;  %v11711_v9 = vcombine.low %v11582_v22, %v11586_v11 }
 0x74d   : > { %4986 = vmatpush1.bf16.msra.mxu1 %v11019_v44  ;;  %v11081_v44 = vld [vmem:[%s17481_s9 + $0x5a0] sm:$0xff] }
 0x74e   : > { %7000 = vmatpush1.bf16.msra.mxu0 %v11531_v45  ;;  %4987 = vmatprep.subr.bf16.mxu1 %v11028_v36  ;;  %v11590_v45 = vld [vmem:[%s17481_s9 + $0xd88] sm:$0xff]  ;;  %v11206_v29 = vcombine.high %v11077_v0, %v11081_v44 }
 0x74f   : > { %7001 = vmatprep.subr.bf16.mxu0 %v11540_v35  ;;  %v11594_v36 = vld [vmem:[%s17481_s9 + $0xda8] sm:$0xff]  ;;  %v11197_v35 = vcombine.low %v11069_v62, %v11073_v17 }
 0x751   : > { %4988 = vmatpush1.bf16.msra.mxu1 %v11027_v53  ;;  %v11720_v53 = vcombine.high %v11590_v45, %v11594_v36 }
 0x752   : > { %7002 = vmatpush1.bf16.msra.mxu0 %v11539_v42  ;;  %5841 = vmatprep.subr.bf16.mxu1 %v11158_v16  ;;  %v11085_v42 = vld [vmem:[%s17481_s9 + $0x5c0] sm:$0xff] }
 0x753   : > { %7896 = vmatprep.subr.bf16.mxu0 %v11672_v25  ;;  %v11089_v16 = vld [vmem:[%s17481_s9 + $0x5e0] sm:$0xff] }
 0x754   : > { %4990 = vmatmul.mubr.bf16.vlgmr.msra.gmra.mrb[56].mxu1 %v14959_v61  ;;  %v11174_v61 = vcombine.high %v11045_v40, %v11049_v37  ;;  %v11214_v34 = vcombine.high %v11085_v42, %v11089_v16  ;;  %v11213_v60 = vcombine.low %v11085_v42, %v11089_v16 }
 0x755   : > { %7004 = vmatmul.mubr.bf16.vlgmr.msra.gmra.mrb[64].mxu0 %v15365_v58  ;;  %5842 = vmatpush1.bf16.msra.mxu1 %v11157_v10  ;;  %v11602_v10 = vld [vmem:[%s17481_s9 + $0xde8] sm:$0xff] }
 0x756   : > { %5873 = vmatprep.mubr.bf16.mxu1 %v14957_v20  ;;  %7897 = vmatpush1.bf16.msra.mxu0 %v11671_v8  ;;  %v11728_v4 = vcombine.high %v11598_v47, %v11602_v10  ;;  %v11727_v63 = vcombine.low %v11598_v47, %v11602_v10 }
 0x757   : > { %7928 = vmatprep.mubr.bf16.mxu0 %v15581_v15  ;;  %5843 = vmatprep.subr.bf16.mxu1 %v11166_v31  ;;  %v11205_v31 = vcombine.low %v11077_v0, %v11081_v44 }
 0x758   : > { %7898 = vmatprep.subr.bf16.mxu0 %v11680_v54  ;;  %v11719_v54 = vcombine.low %v11590_v45, %v11594_v36 }
 0x759   : > { %5844 = vmatpush1.bf16.msra.mxu1 %v11165_v43  ;;  %v11093_v43 = vld [vmem:[%s17481_s9 + $0x600] sm:$0xff] }
 0x75a   : > { %7899 = vmatpush1.bf16.msra.mxu0 %v11679_v57  ;;  %5845 = vmatprep.subr.bf16.mxu1 %v11174_v61  ;;  %v11097_v57 = vld [vmem:[%s17481_s9 + $0x620] sm:$0xff]  ;;  %v11606_v61 = vld [vmem:[%s17481_s9 + $0xe08] sm:$0xff] }
 0x75b   : > { %7900 = vmatprep.subr.bf16.mxu0 %v11688_v59  ;;  %v11610_v59 = vld [vmem:[%s17481_s9 + $0xe28] sm:$0xff]  ;;  %v11222_v30 = vcombine.high %v11093_v43, %v11097_v57  ;;  %v11221_v2 = vcombine.low %v11093_v43, %v11097_v57  ;;  %v11141_v43 = vld [vmem:[%s17481_s9 + $0x780] sm:$0xff] }
 0x75c   : > { %v11736_v12 = vcombine.high %v11606_v61, %v11610_v59  ;;  %v11735_v5 = vcombine.low %v11606_v61, %v11610_v59  ;;  %v11145_v57 = vld [vmem:[%s17481_s9 + $0x7a0] sm:$0xff]  ;;  %v11654_v61 = vld [vmem:[%s17481_s9 + $0xf88] sm:$0xff] }
 0x75d   : > { %5846 = vmatpush1.bf16.msra.mxu1 %v11173_v24  ;;  %v11101_v24 = vld [vmem:[%s17481_s9 + $0x640] sm:$0xff]  ;;  %v11658_v59 = vld [vmem:[%s17481_s9 + $0xfa8] sm:$0xff] }
 0x75e   : > { %7901 = vmatpush1.bf16.msra.mxu0 %v11687_v1  ;;  %5847 = vmatprep.subr.bf16.mxu1 %v11182_v3  ;;  %v11105_v1 = vld [vmem:[%s17481_s9 + $0x660] sm:$0xff]  ;;  %v11614_v3 = vld [vmem:[%s17481_s9 + $0xe48] sm:$0xff] }
 0x75f   : > { %7902 = vmatprep.subr.bf16.mxu0 %v11696_v13  ;;  %v11618_v13 = vld [vmem:[%s17481_s9 + $0xe68] sm:$0xff]  ;;  %v11230_v23 = vcombine.high %v11101_v24, %v11105_v1  ;;  %v11229_v62 = vcombine.low %v11101_v24, %v11105_v1  ;;  %v11149_v24 = vld [vmem:[%s17481_s9 + $0x7c0] sm:$0xff] }
 0x760   : > { %v11744_v41 = vcombine.high %v11614_v3, %v11618_v13  ;;  %v11743_v17 = vcombine.low %v11614_v3, %v11618_v13  ;;  %v11153_v1 = vld [vmem:[%s17481_s9 + $0x7e0] sm:$0xff]  ;;  %v11662_v3 = vld [vmem:[%s17481_s9 + $0xfc8] sm:$0xff] }
 0x761   : > { %5848 = vmatpush1.bf16.msra.mxu1 %v11181_v38  ;;  %v11109_v38 = vld [vmem:[%s17481_s9 + $0x680] sm:$0xff]  ;;  %v11666_v13 = vld [vmem:[%s17481_s9 + $0xfe8] sm:$0xff] }
 0x762   : > { %7903 = vmatpush1.bf16.msra.mxu0 %v11695_v48  ;;  %5849 = vmatprep.subr.bf16.mxu1 %v11190_v56  ;;  %v11113_v48 = vld [vmem:[%s17481_s9 + $0x6a0] sm:$0xff]  ;;  %v11622_v56 = vld [vmem:[%s17481_s9 + $0xe88] sm:$0xff] }
 0x763   : > { %7904 = vmatprep.subr.bf16.mxu0 %v11704_v14  ;;  %v11626_v14 = vld [vmem:[%s17481_s9 + $0xea8] sm:$0xff]  ;;  %v11238_v22 = vcombine.high %v11109_v38, %v11113_v48  ;;  %v11237_v0 = vcombine.low %v11109_v38, %v11113_v48  ;;  %v11031_v38 = vld [vmem:[%s17481_s9 + $0x410] sm:$0xff] }
 0x764   : > { %v11752_v11 = vcombine.high %v11622_v56, %v11626_v14  ;;  %v11751_v44 = vcombine.low %v11622_v56, %v11626_v14  ;;  %v11035_v48 = vld [vmem:[%s17481_s9 + $0x430] sm:$0xff]  ;;  %v11544_v56 = vld [vmem:[%s17481_s9 + $0xc18] sm:$0xff] }
 0x765   : > { %5850 = vmatpush1.bf16.msra.mxu1 %v11189_v27  ;;  %v11117_v27 = vld [vmem:[%s17481_s9 + $0x6c0] sm:$0xff]  ;;  %v11548_v14 = vld [vmem:[%s17481_s9 + $0xc38] sm:$0xff] }
 0x766   : > { %7905 = vmatpush1.bf16.msra.mxu0 %v11703_v50  ;;  %5851 = vmatprep.subr.bf16.mxu1 %v11198_v7  ;;  %v11121_v50 = vld [vmem:[%s17481_s9 + $0x6e0] sm:$0xff]  ;;  %v11630_v7 = vld [vmem:[%s17481_s9 + $0xec8] sm:$0xff] }
 0x767   : > { %v15633_v6 = vpop.f32.mrb[44].mxu1  ;;  %v15635_v39 = vpop.f32.mrb[52].mxu0  ;;  %7906 = vmatprep.subr.bf16.mxu0 %v11712_v28  ;;  %v11634_v28 = vld [vmem:[%s17481_s9 + $0xee8] sm:$0xff]  ;;  %v11246_v45 = vcombine.high %v11117_v27, %v11121_v50  ;;  %v11245_v42 = vcombine.low %v11117_v27, %v11121_v50  ;;  %v11676_v27 = vcombine.high %v11544_v56, %v11548_v14  ;;  %v11039_v50 = vld [vmem:[%s17481_s9 + $0x450] sm:$0xff] }
 0x768   : > { %v15643_v25 = vpop.f32.mrb[45].mxu1  ;;  %v15645_v46 = vpop.f32.mrb[53].mxu0  ;;  %v11760_v36 = vcombine.high %v11630_v7, %v11634_v28  ;;  %v11759_v16 = vcombine.low %v11630_v7, %v11634_v28  ;;  %v11043_v7 = vld [vmem:[%s17481_s9 + $0x470] sm:$0xff]  ;;  %v11161_v28 = vcombine.low %v11031_v38, %v11035_v48 }
 0x769   : > { %v5006_v49 = vcombine.low %v15633_v6, %v15643_v25  ;;  %5852 = vmatpush1.bf16.msra.mxu1 %v11197_v35  ;;  %v6014_v55 = vcombine.low %v15635_v39, %v15645_v46  ;;  %v4872_v52 = vpop.f32.mrb[46].mxu1  ;;  %v5920_v8 = vpop.f32.mrb[54].mxu0  ;;  %v11125_v35 = vld [vmem:[%s17481_s9 + $0x700] sm:$0xff]  ;;  %v11612_v6 = vld [vmem:[%s17481_s9 + $0xe38] sm:$0xff] }
 0x76a   : > { %7907 = vmatpush1.bf16.msra.mxu0 %v11711_v9  ;;  %v4873_v40 = vpop.f32.mrb[47].mxu1  ;;  %v5921_v37 = vpop.f32.mrb[55].mxu0  ;;  %5853 = vmatprep.subr.bf16.mxu1 %v11206_v29  ;;  %v11129_v9 = vld [vmem:[%s17481_s9 + $0x720] sm:$0xff]  ;;  %v11638_v29 = vld [vmem:[%s17481_s9 + $0xf08] sm:$0xff] }
 0x76b   : > { %7908 = vmatprep.subr.bf16.mxu0 %v11720_v53  ;;  %v11642_v53 = vld [vmem:[%s17481_s9 + $0xf28] sm:$0xff]  ;;  %v11254_v47 = vcombine.high %v11125_v35, %v11129_v9  ;;  %v11133_v52 = vld [vmem:[%s17481_s9 + $0x740] sm:$0xff]  ;;  %v11253_v37 = vcombine.low %v11125_v35, %v11129_v9  ;;  %v11047_v35 = vld [vmem:[%s17481_s9 + $0x490] sm:$0xff] }
 0x76c   : > { %v11768_v10 = vcombine.high %v11638_v29, %v11642_v53  ;;  %v11137_v8 = vld [vmem:[%s17481_s9 + $0x760] sm:$0xff]  ;;  %v11650_v40 = vld [vmem:[%s17481_s9 + $0xf68] sm:$0xff]  ;;  %v11051_v9 = vld [vmem:[%s17481_s9 + $0x4b0] sm:$0xff] }
 0x76d   : > { %5854 = vmatpush1.bf16.msra.mxu1 %v11205_v31  ;;  %v11646_v31 = vld [vmem:[%s17481_s9 + $0xf48] sm:$0xff]  ;;  %v11613_v46 = vld [vmem:[%s17481_s9 + $0xe40] sm:$0xff] }
 0x76e   : > { %7909 = vmatpush1.bf16.msra.mxu0 %v11719_v54  ;;  %5855 = vmatprep.subr.bf16.mxu1 %v11214_v34  ;;  %v11767_v54 = vcombine.low %v11638_v29, %v11642_v53  ;;  %v11262_v34 = vcombine.high %v11133_v52, %v11137_v8  ;;  %v11560_v53 = vld [vmem:[%s17481_s9 + $0xc98] sm:$0xff] }
 0x76f   : > { %7910 = vmatprep.subr.bf16.mxu0 %v11728_v4  ;;  %v11776_v4 = vcombine.high %v11646_v31, %v11650_v40 }
 0x771   : > { %5856 = vmatpush1.bf16.msra.mxu1 %v11213_v60  ;;  %v11261_v60 = vcombine.low %v11133_v52, %v11137_v8  ;;  %v11055_v8 = vld [vmem:[%s17481_s9 + $0x4d0] sm:$0xff] }
 0x772   : > { %7911 = vmatpush1.bf16.msra.mxu0 %v11727_v63  ;;  %5857 = vmatprep.subr.bf16.mxu1 %v11222_v30  ;;  %v11775_v63 = vcombine.low %v11646_v31, %v11650_v40  ;;  %v11270_v30 = vcombine.high %v11141_v43, %v11145_v57  ;;  %v11059_v31 = vld [vmem:[%s17481_s9 + $0x4f0] sm:$0xff]  ;;  %v11572_v40 = vld [vmem:[%s17481_s9 + $0xcf8] sm:$0xff] }
 0x773   : > { %7912 = vmatprep.subr.bf16.mxu0 %v11736_v12  ;;  %v11784_v12 = vcombine.high %v11654_v61, %v11658_v59 }
 0x775   : > { %5858 = vmatpush1.bf16.msra.mxu1 %v11221_v2  ;;  %v11269_v2 = vcombine.low %v11141_v43, %v11145_v57  ;;  %v11063_v43 = vld [vmem:[%s17481_s9 + $0x510] sm:$0xff] }
 0x776   : > { %7913 = vmatpush1.bf16.msra.mxu0 %v11735_v5  ;;  %5859 = vmatprep.subr.bf16.mxu1 %v11230_v23  ;;  %v11783_v5 = vcombine.low %v11654_v61, %v11658_v59  ;;  %v11278_v23 = vcombine.high %v11149_v24, %v11153_v1  ;;  %v11067_v57 = vld [vmem:[%s17481_s9 + $0x530] sm:$0xff]  ;;  %v11576_v61 = vld [vmem:[%s17481_s9 + $0xd18] sm:$0xff] }
 0x777   : > { %7914 = vmatprep.subr.bf16.mxu0 %v11744_v41  ;;  %v11792_v41 = vcombine.high %v11662_v3, %v11666_v13  ;;  %v11580_v59 = vld [vmem:[%s17481_s9 + $0xd38] sm:$0xff] }
 0x779   : > { %5860 = vmatpush1.bf16.msra.mxu1 %v11229_v62  ;;  %v11277_v62 = vcombine.low %v11149_v24, %v11153_v1  ;;  %v11708_v1 = vcombine.high %v11576_v61, %v11580_v59 }
 0x77a   : > { %7915 = vmatpush1.bf16.msra.mxu0 %v11743_v17  ;;  %5861 = vmatprep.subr.bf16.mxu1 %v11238_v22  ;;  %v11791_v17 = vcombine.low %v11662_v3, %v11666_v13  ;;  %v11162_v22 = vcombine.high %v11031_v38, %v11035_v48  ;;  %v11071_v3 = vld [vmem:[%s17481_s9 + $0x550] sm:$0xff] }
 0x77b   : > { %7916 = vmatprep.subr.bf16.mxu0 %v11752_v11  ;;  %v7077_v11 = vrot.slane %v15551_v33, %v14929_v32  ;;  %v11675_v33 = vcombine.low %v11544_v56, %v11548_v14  ;;  %v11075_v13 = vld [vmem:[%s17481_s9 + $0x570] sm:$0xff] }
 0x77c   : > { %v11202_v38 = vcombine.high %v11071_v3, %v11075_v13  ;;  %v11079_v14 = vld [vmem:[%s17481_s9 + $0x590] sm:$0xff] }
 0x77d   : > { %5862 = vmatpush1.bf16.msra.mxu1 %v11237_v0  ;;  %v11552_v0 = vld [vmem:[%s17481_s9 + $0xc58] sm:$0xff] }
 0x77e   : > { %7917 = vmatpush1.bf16.msra.mxu0 %v11751_v44  ;;  %5863 = vmatprep.subr.bf16.mxu1 %v11246_v45  ;;  %v11556_v44 = vld [vmem:[%s17481_s9 + $0xc78] sm:$0xff]  ;;  %v15779_v45 = vpack.c.bf16 %v7077_v11, %v7077_v11  ;;  %v11201_v11 = vcombine.low %v11071_v3, %v11075_v13 }
 0x77f   : > { %7918 = vmatprep.subr.bf16.mxu0 %v11760_v36  ;;  %v11170_v36 = vcombine.high %v11039_v50, %v11043_v7  ;;  %v11684_v29 = vcombine.high %v11552_v0, %v11556_v44 }
 0x781   : > { %5864 = vmatpush1.bf16.msra.mxu1 %v11245_v42  ;;  %v11564_v42 = vld [vmem:[%s17481_s9 + $0xcb8] sm:$0xff] }
 0x782   : > { %7919 = vmatpush1.bf16.msra.mxu0 %v11759_v16  ;;  %5865 = vmatprep.subr.bf16.mxu1 %v11254_v47  ;;  %v11169_v16 = vcombine.low %v11039_v50, %v11043_v7  ;;  %v11683_v47 = vcombine.low %v11552_v0, %v11556_v44  ;;  %v11692_v52 = vcombine.high %v11560_v53, %v11564_v42 }
 0x783   : > { %7920 = vmatprep.subr.bf16.mxu0 %v11768_v10  ;;  %v11178_v10 = vcombine.high %v11047_v35, %v11051_v9 }
 0x785   : > { %5866 = vmatpush1.bf16.msra.mxu1 %v11253_v37  ;;  %v11177_v37 = vcombine.low %v11047_v35, %v11051_v9 }
 0x786   : > { %7921 = vmatpush1.bf16.msra.mxu0 %v11767_v54  ;;  %5867 = vmatprep.subr.bf16.mxu1 %v11262_v34  ;;  %v11691_v54 = vcombine.low %v11560_v53, %v11564_v42  ;;  %v11186_v34 = vcombine.high %v11055_v8, %v11059_v31  ;;  %v11604_v53 = vld [vmem:[%s17481_s9 + $0xdf8] sm:$0xff] }
 0x787   : > { %7922 = vmatprep.subr.bf16.mxu0 %v11776_v4 }
 0x789   : > { %5868 = vmatpush1.bf16.msra.mxu1 %v11261_v60  ;;  %v11185_v60 = vcombine.low %v11055_v8, %v11059_v31 }
 0x78a   : > { %7923 = vmatpush1.bf16.msra.mxu0 %v11775_v63  ;;  %5869 = vmatprep.subr.bf16.mxu1 %v11270_v30  ;;  %v11194_v30 = vcombine.high %v11063_v43, %v11067_v57 }
 0x78b   : > { %7924 = vmatprep.subr.bf16.mxu0 %v11784_v12  ;;  %v13307_v12 = vmov 1966171168  }
 0x78c   : > { %v5011_v24 = vunpack.c.l.s4 %v13307_v12  ;;  %v11616_v12 = vld [vmem:[%s17481_s9 + $0xe58] sm:$0xff] }
 0x78d   : > { %5870 = vmatpush1.bf16.msra.mxu1 %v11269_v2  ;;  %v11584_v2 = vld [vmem:[%s17481_s9 + $0xd58] sm:$0xff] }
 0x78e   : > { %7925 = vmatpush1.bf16.msra.mxu0 %v11783_v5  ;;  %5871 = vmatprep.subr.bf16.mxu1 %v11278_v23  ;;  %v11588_v5 = vld [vmem:[%s17481_s9 + $0xd78] sm:$0xff]  ;;  %v11193_v23 = vcombine.low %v11063_v43, %v11067_v57  ;;  %v5012_v48 = vunpack.c.0.s8 %v5011_v24  ;;  %v11099_v43 = vld [vmem:[%s17481_s9 + $0x630] sm:$0xff] }
 0x78f   : > { %7926 = vmatprep.subr.bf16.mxu0 %v11792_v41  ;;  %v11707_v41 = vcombine.low %v11576_v61, %v11580_v59  ;;  %v11716_v56 = vcombine.high %v11584_v2, %v11588_v5  ;;  %v11608_v57 = vld [vmem:[%s17481_s9 + $0xe18] sm:$0xff] }
 0x790   : > { %v15846_v7 = vsub.s32 %v5012_v48, %v14926_v19  ;;  %v11620_v24 = vld [vmem:[%s17481_s9 + $0xe78] sm:$0xff]  ;;  %v11739_v3 = vcombine.low %v11608_v57, %v11612_v6 }
 0x791   : > { %5872 = vmatpush1.bf16.msra.mxu1 %v11277_v62  ;;  %v11083_v62 = vld [vmem:[%s17481_s9 + $0x5b0] sm:$0xff] }
 0x792   : > { %7927 = vmatpush1.bf16.msra.mxu0 %v11791_v17  ;;  %5923 = vmatprep.subr.bf16.mxu1 %v11162_v22  ;;  %v11592_v17 = vld [vmem:[%s17481_s9 + $0xd98] sm:$0xff]  ;;  %v11210_v50 = vcombine.high %v11079_v14, %v11083_v62 }
 0x793   : > { %7978 = vmatprep.subr.bf16.mxu0 %v11676_v27  ;;  %v11596_v22 = vld [vmem:[%s17481_s9 + $0xdb8] sm:$0xff]  ;;  %v11715_v27 = vcombine.low %v11584_v2, %v11588_v5  ;;  %v11748_v2 = vcombine.high %v11616_v12, %v11620_v24  ;;  %v11111_v5 = vld [vmem:[%s17481_s9 + $0x690] sm:$0xff] }
 0x794   : > { %5874 = vmatmul.mubr.bf16.vlgmr.msra.gmra.mrb[60].mxu1 %v14961_v21  ;;  %v11724_v44 = vcombine.high %v11592_v17, %v11596_v22 }
 0x795   : > { %7929 = vmatmul.mubr.bf16.vlgmr.msra.gmra.mrb[68].mxu0 %v15779_v45  ;;  %5924 = vmatpush1.bf16.msra.mxu1 %v11161_v28 }
 0x796   : > { %5955 = vmatprep.mubr.bf16.mxu1 %v14957_v20  ;;  %7979 = vmatpush1.bf16.msra.mxu0 %v11675_v33  ;;  %v11568_v20 = vld [vmem:[%s17481_s9 + $0xcd8] sm:$0xff]  ;;  %v11087_v33 = vld [vmem:[%s17481_s9 + $0x5d0] sm:$0xff] }
 0x797   : > { %8010 = vmatprep.mubr.bf16.mxu0 %v15581_v15  ;;  %5925 = vmatprep.subr.bf16.mxu1 %v11170_v36  ;;  %v11700_v4 = vcombine.high %v11568_v20, %v11572_v40  ;;  %v11699_v63 = vcombine.low %v11568_v20, %v11572_v40  ;;  %v11091_v36 = vld [vmem:[%s17481_s9 + $0x5f0] sm:$0xff]  ;;  %v11723_v20 = vcombine.low %v11592_v17, %v11596_v22 }
 0x798   : > { %7980 = vmatprep.subr.bf16.mxu0 %v11684_v29  ;;  %v11600_v29 = vld [vmem:[%s17481_s9 + $0xdd8] sm:$0xff]  ;;  %v11218_v40 = vcombine.high %v11087_v33, %v11091_v36  ;;  %v11119_v17 = vld [vmem:[%s17481_s9 + $0x6d0] sm:$0xff] }
 0x799   : > { %5926 = vmatpush1.bf16.msra.mxu1 %v11169_v16  ;;  %v11731_v61 = vcombine.low %v11600_v29, %v11604_v53  ;;  %v11123_v22 = vld [vmem:[%s17481_s9 + $0x6f0] sm:$0xff] }
 0x79a   : > { %7981 = vmatpush1.bf16.msra.mxu0 %v11683_v47  ;;  %5927 = vmatprep.subr.bf16.mxu1 %v11178_v10 }
 0x79b   : > { %7982 = vmatprep.subr.bf16.mxu0 %v11692_v52  ;;  %v11209_v52 = vcombine.low %v11079_v14, %v11083_v62 }
 0x79d   : > { %5928 = vmatpush1.bf16.msra.mxu1 %v11177_v37  ;;  %v15870_v37 = vrot.slane %v5006_v49, %v15846_v7  ;;  %v11217_v49 = vcombine.low %v11087_v33, %v11091_v36  ;;  %v11127_v36 = vld [vmem:[%s17481_s9 + $0x710] sm:$0xff] }
 0x79e   : > { %7983 = vmatpush1.bf16.msra.mxu0 %v11691_v54  ;;  %5929 = vmatprep.subr.bf16.mxu1 %v11186_v34  ;;  %v11732_v34 = vcombine.high %v11600_v29, %v11604_v53  ;;  %v11640_v29 = vld [vmem:[%s17481_s9 + $0xf18] sm:$0xff] }
 0x79f   : > { %7984 = vmatprep.subr.bf16.mxu0 %v11700_v4  ;;  %v11095_v4 = vld [vmem:[%s17481_s9 + $0x610] sm:$0xff]  ;;  %v11644_v53 = vld [vmem:[%s17481_s9 + $0xf38] sm:$0xff] }
 0x7a0   : > { %v11226_v59 = vcombine.high %v11095_v4, %v11099_v43 }
 0x7a1   : > { %5930 = vmatpush1.bf16.msra.mxu1 %v11185_v60  ;;  %v11740_v60 = vcombine.high %v11608_v57, %v11612_v6  ;;  %v11143_v6 = vld [vmem:[%s17481_s9 + $0x790] sm:$0xff] }
 0x7a2   : > { %7985 = vmatpush1.bf16.msra.mxu0 %v11699_v63  ;;  %5931 = vmatprep.subr.bf16.mxu1 %v11194_v30  ;;  %v11103_v63 = vld [vmem:[%s17481_s9 + $0x650] sm:$0xff] }
 0x7a3   : > { %7986 = vmatprep.subr.bf16.mxu0 %v11708_v1  ;;  %v11107_v30 = vld [vmem:[%s17481_s9 + $0x670] sm:$0xff]  ;;  %v11225_v1 = vcombine.low %v11095_v4, %v11099_v43  ;;  %v11771_v4 = vcombine.low %v11640_v29, %v11644_v53 }
 0x7a4   : > { %v11234_v13 = vcombine.high %v11103_v63, %v11107_v30  ;;  %v11233_v48 = vcombine.low %v11103_v63, %v11107_v30 }
 0x7a5   : > { %5932 = vmatpush1.bf16.msra.mxu1 %v11193_v23  ;;  %v11115_v23 = vld [vmem:[%s17481_s9 + $0x6b0] sm:$0xff] }
 0x7a6   : > { %7987 = vmatpush1.bf16.msra.mxu0 %v11707_v41  ;;  %5933 = vmatprep.subr.bf16.mxu1 %v11202_v38  ;;  %v11624_v41 = vld [vmem:[%s17481_s9 + $0xe98] sm:$0xff]  ;;  %v11242_v14 = vcombine.high %v11111_v5, %v11115_v23 }
 0x7a7   : > { %v4909_v28 = vpop.f32.mrb[48].mxu1  ;;  %v15848_v0 = vpop.f32.mrb[56].mxu0  ;;  %7988 = vmatprep.subr.bf16.mxu0 %v11716_v56  ;;  %v11628_v38 = vld [vmem:[%s17481_s9 + $0xeb8] sm:$0xff]  ;;  %v11747_v56 = vcombine.low %v11616_v12, %v11620_v24  ;;  %v11151_v24 = vld [vmem:[%s17481_s9 + $0x7d0] sm:$0xff] }
 0x7a8   : > { %v4911_v35 = vpop.f32.mrb[49].mxu1  ;;  %v15856_v9 = vpop.f32.mrb[57].mxu0  ;;  %v11756_v62 = vcombine.high %v11624_v41, %v11628_v38 }
 0x7a9   : > { %v5007_v42 = vcombine.low %v4909_v28, %v4911_v35  ;;  %v6016_v16 = vcombine.low %v15848_v0, %v15856_v9  ;;  %v4913_v47 = vpop.f32.mrb[50].mxu1  ;;  %5934 = vmatpush1.bf16.msra.mxu1 %v11201_v11  ;;  %v6002_v10 = vpop.f32.mrb[58].mxu0  ;;  %v11632_v11 = vld [vmem:[%s17481_s9 + $0xed8] sm:$0xff]  ;;  %v11755_v28 = vcombine.low %v11624_v41, %v11628_v38  ;;  %v11131_v35 = vld [vmem:[%s17481_s9 + $0x730] sm:$0xff]  ;;  %v11285_v38 = vld [vmem:[%s17481_s9 + $0x800] sm:$0xff] }
 0x7aa   : > { %7989 = vmatpush1.bf16.msra.mxu0 %v11715_v27  ;;  %v4914_v8 = vpop.f32.mrb[51].mxu1  ;;  %v6003_v31 = vpop.f32.mrb[59].mxu0  ;;  %5935 = vmatprep.subr.bf16.mxu1 %v11210_v50  ;;  %v11636_v27 = vld [vmem:[%s17481_s9 + $0xef8] sm:$0xff]  ;;  %v11241_v50 = vcombine.low %v11111_v5, %v11115_v23  ;;  %v11258_v10 = vcombine.high %v11127_v36, %v11131_v35 }
 0x7ab   : > { %v15873_v54 = vrot.slane %v5007_v42, %v15846_v7  ;;  %7990 = vmatprep.subr.bf16.mxu0 %v11724_v44  ;;  %v11250_v44 = vcombine.high %v11119_v17, %v11123_v22  ;;  %v11764_v33 = vcombine.high %v11632_v11, %v11636_v27  ;;  %v11249_v42 = vcombine.low %v11119_v17, %v11123_v22  ;;  %v11135_v8 = vld [vmem:[%s17481_s9 + $0x750] sm:$0xff]  ;;  %v11293_v17 = vld [vmem:[%s17481_s9 + $0x840] sm:$0xff] }
 0x7ac   : > { %v11763_v47 = vcombine.low %v11632_v11, %v11636_v27  ;;  %v11139_v31 = vld [vmem:[%s17481_s9 + $0x770] sm:$0xff]  ;;  %v11297_v22 = vld [vmem:[%s17481_s9 + $0x860] sm:$0xff] }
 0x7ad   : > { %v5038_v25 = vcombine.low %v15870_v37, %v15873_v54  ;;  %5936 = vmatpush1.bf16.msra.mxu1 %v11209_v52  ;;  %v11772_v52 = vcombine.high %v11640_v29, %v11644_v53  ;;  %v11266_v43 = vcombine.high %v11135_v8, %v11139_v31  ;;  %v11422_v27 = vcombine.high %v11293_v17, %v11297_v22  ;;  %v11317_v53 = vld [vmem:[%s17481_s9 + $0x900] sm:$0xff]  ;;  %v11367_v54 = vld [vmem:[%s17481_s9 + $0xa90] sm:$0xff] }
 0x7ae   : > { %7991 = vmatpush1.bf16.msra.mxu0 %v11723_v20  ;;  %5937 = vmatprep.subr.bf16.mxu1 %v11218_v40  ;;  %v11648_v20 = vld [vmem:[%s17481_s9 + $0xf58] sm:$0xff] }
 0x7af   : > { %7992 = vmatprep.subr.bf16.mxu0 %v11732_v34  ;;  %v11652_v40 = vld [vmem:[%s17481_s9 + $0xf78] sm:$0xff]  ;;  %v11257_v34 = vcombine.low %v11127_v36, %v11131_v35  ;;  %v11309_v36 = vld [vmem:[%s17481_s9 + $0x8c0] sm:$0xff] }
 0x7b0   : > { %v11780_v57 = vcombine.high %v11648_v20, %v11652_v40  ;;  %v11779_v63 = vcombine.low %v11648_v20, %v11652_v40  ;;  %v11313_v35 = vld [vmem:[%s17481_s9 + $0x8e0] sm:$0xff] }
 0x7b1   : > { %5938 = vmatpush1.bf16.msra.mxu1 %v11217_v49  ;;  %v11147_v49 = vld [vmem:[%s17481_s9 + $0x7b0] sm:$0xff]  ;;  %v11333_v40 = vld [vmem:[%s17481_s9 + $0x980] sm:$0xff] }
 0x7b2   : > { %7993 = vmatpush1.bf16.msra.mxu0 %v11731_v61  ;;  %5939 = vmatprep.subr.bf16.mxu1 %v11226_v59  ;;  %v11656_v61 = vld [vmem:[%s17481_s9 + $0xf98] sm:$0xff]  ;;  %v11274_v30 = vcombine.high %v11143_v6, %v11147_v49 }
 0x7b3   : > { %7994 = vmatprep.subr.bf16.mxu0 %v11740_v60  ;;  %v11660_v59 = vld [vmem:[%s17481_s9 + $0xfb8] sm:$0xff]  ;;  %v11265_v60 = vcombine.low %v11135_v8, %v11139_v31  ;;  %v11329_v8 = vld [vmem:[%s17481_s9 + $0x960] sm:$0xff] }
 0x7b4   : > { %v11788_v12 = vcombine.high %v11656_v61, %v11660_v59  ;;  %v11787_v5 = vcombine.low %v11656_v61, %v11660_v59 }
 0x7b5   : > { %5940 = vmatpush1.bf16.msra.mxu1 %v11225_v1  ;;  %v11155_v1 = vld [vmem:[%s17481_s9 + $0x7f0] sm:$0xff] }
 0x7b6   : > { %7995 = vmatpush1.bf16.msra.mxu0 %v11739_v3  ;;  %5941 = vmatprep.subr.bf16.mxu1 %v11234_v13  ;;  %v11664_v3 = vld [vmem:[%s17481_s9 + $0xfd8] sm:$0xff]  ;;  %v11282_v23 = vcombine.high %v11151_v24, %v11155_v1 }
 0x7b7   : > { %7996 = vmatprep.subr.bf16.mxu0 %v11748_v2  ;;  %v11668_v13 = vld [vmem:[%s17481_s9 + $0xff8] sm:$0xff]  ;;  %v11273_v2 = vcombine.low %v11143_v6, %v11147_v49  ;;  %v11341_v6 = vld [vmem:[%s17481_s9 + $0x9c0] sm:$0xff] }
 0x7b8   : > { %v11796_v41 = vcombine.high %v11664_v3, %v11668_v13  ;;  %v11345_v49 = vld [vmem:[%s17481_s9 + $0x9e0] sm:$0xff] }
 0x7b9   : > { %5942 = vmatpush1.bf16.msra.mxu1 %v11233_v48  ;;  %v11289_v48 = vld [vmem:[%s17481_s9 + $0x820] sm:$0xff] }
 0x7ba   : > { %7997 = vmatpush1.bf16.msra.mxu0 %v11747_v56  ;;  %5943 = vmatprep.subr.bf16.mxu1 %v11242_v14  ;;  %v11281_v56 = vcombine.low %v11151_v24, %v11155_v1  ;;  %v11795_v14 = vcombine.low %v11664_v3, %v11668_v13  ;;  %v11413_v11 = vcombine.low %v11285_v38, %v11289_v48 }
 0x7bb   : > { %7998 = vmatprep.subr.bf16.mxu0 %v11756_v62  ;;  %v11414_v62 = vcombine.high %v11285_v38, %v11289_v48  ;;  %v11470_v13 = vcombine.high %v11341_v6, %v11345_v49  ;;  %v11357_v48 = vld [vmem:[%s17481_s9 + $0xa40] sm:$0xff] }
 0x7bd   : > { %5944 = vmatpush1.bf16.msra.mxu1 %v11241_v50  ;;  %v11301_v50 = vld [vmem:[%s17481_s9 + $0x880] sm:$0xff] }
 0x7be   : > { %7999 = vmatpush1.bf16.msra.mxu0 %v11755_v28  ;;  %5945 = vmatprep.subr.bf16.mxu1 %v11250_v44  ;;  %v11305_v28 = vld [vmem:[%s17481_s9 + $0x8a0] sm:$0xff]  ;;  %v11421_v44 = vcombine.low %v11293_v17, %v11297_v22 }
 0x7bf   : > { %8000 = vmatprep.subr.bf16.mxu0 %v11764_v33  ;;  %v11430_v33 = vcombine.high %v11301_v50, %v11305_v28  ;;  %v11429_v29 = vcombine.low %v11301_v50, %v11305_v28  ;;  %v11365_v17 = vld [vmem:[%s17481_s9 + $0xa80] sm:$0xff] }
 0x7c0   : > { %v11369_v22 = vld [vmem:[%s17481_s9 + $0xaa0] sm:$0xff] }
 0x7c1   : > { %5946 = vmatpush1.bf16.msra.mxu1 %v11249_v42  ;;  %v11321_v42 = vld [vmem:[%s17481_s9 + $0x920] sm:$0xff] }
 0x7c2   : > { %8001 = vmatpush1.bf16.msra.mxu0 %v11763_v47  ;;  %5947 = vmatprep.subr.bf16.mxu1 %v11258_v10  ;;  %v11437_v47 = vcombine.low %v11309_v36, %v11313_v35  ;;  %v11446_v10 = vcombine.high %v11317_v53, %v11321_v42  ;;  %v11445_v31 = vcombine.low %v11317_v53, %v11321_v42  ;;  %v11373_v50 = vld [vmem:[%s17481_s9 + $0xac0] sm:$0xff] }
 0x7c3   : > { %8002 = vmatprep.subr.bf16.mxu0 %v11772_v52  ;;  %v11325_v52 = vld [vmem:[%s17481_s9 + $0x940] sm:$0xff] }
 0x7c4   : > { %v11454_v20 = vcombine.high %v11325_v52, %v11329_v8  ;;  %v11377_v28 = vld [vmem:[%s17481_s9 + $0xae0] sm:$0xff] }
 0x7c5   : > { %5948 = vmatpush1.bf16.msra.mxu1 %v11257_v34  ;;  %v11337_v34 = vld [vmem:[%s17481_s9 + $0x9a0] sm:$0xff] }
 0x7c6   : > { %8003 = vmatpush1.bf16.msra.mxu0 %v11771_v4  ;;  %5949 = vmatprep.subr.bf16.mxu1 %v11266_v43  ;;  %v11453_v4 = vcombine.low %v11325_v52, %v11329_v8  ;;  %v11462_v43 = vcombine.high %v11333_v40, %v11337_v34  ;;  %v11389_v53 = vld [vmem:[%s17481_s9 + $0xb40] sm:$0xff] }
 0x7c7   : > { %8004 = vmatprep.subr.bf16.mxu0 %v11780_v57  ;;  %v11393_v42 = vld [vmem:[%s17481_s9 + $0xb60] sm:$0xff] }
 0x7c8   : > { %v11397_v52 = vld [vmem:[%s17481_s9 + $0xb80] sm:$0xff] }
 0x7c9   : > { %5950 = vmatpush1.bf16.msra.mxu1 %v11265_v60  ;;  %v11401_v8 = vld [vmem:[%s17481_s9 + $0xba0] sm:$0xff] }
 0x7ca   : > { %8005 = vmatpush1.bf16.msra.mxu0 %v11779_v63  ;;  %5951 = vmatprep.subr.bf16.mxu1 %v11274_v30 }
 0x7cb   : > { %8006 = vmatprep.subr.bf16.mxu0 %v11788_v12  ;;  %v11461_v12 = vcombine.low %v11333_v40, %v11337_v34  ;;  %v11405_v40 = vld [vmem:[%s17481_s9 + $0xbc0] sm:$0xff] }
 0x7cc   : > { %v11409_v34 = vld [vmem:[%s17481_s9 + $0xbe0] sm:$0xff] }
 0x7cd   : > { %5952 = vmatpush1.bf16.msra.mxu1 %v11273_v2 }
 0x7ce   : > { %8007 = vmatpush1.bf16.msra.mxu0 %v11787_v5  ;;  %5953 = vmatprep.subr.bf16.mxu1 %v11282_v23  ;;  %v11349_v5 = vld [vmem:[%s17481_s9 + $0xa00] sm:$0xff] }
 0x7cf   : > { %8008 = vmatprep.subr.bf16.mxu0 %v11796_v41  ;;  %v11353_v23 = vld [vmem:[%s17481_s9 + $0xa20] sm:$0xff]  ;;  %v11469_v41 = vcombine.low %v11341_v6, %v11345_v49  ;;  %v11287_v6 = vld [vmem:[%s17481_s9 + $0x810] sm:$0xff] }
 0x7d0   : > { %v11478_v38 = vcombine.high %v11349_v5, %v11353_v23  ;;  %v11291_v49 = vld [vmem:[%s17481_s9 + $0x830] sm:$0xff] }
 0x7d1   : > { %5954 = vmatpush1.bf16.msra.mxu1 %v11281_v56  ;;  %v11361_v56 = vld [vmem:[%s17481_s9 + $0xa60] sm:$0xff] }
 0x7d2   : > { %8009 = vmatpush1.bf16.msra.mxu0 %v11795_v14  ;;  %6848 = vmatprep.subr.bf16.mxu1 %v11414_v62  ;;  %v11477_v14 = vcombine.low %v11349_v5, %v11353_v23  ;;  %v11486_v62 = vcombine.high %v11357_v48, %v11361_v56  ;;  %v11303_v5 = vld [vmem:[%s17481_s9 + $0x890] sm:$0xff] }
 0x7d3   : > { %v11307_v23 = vld [vmem:[%s17481_s9 + $0x8b0] sm:$0xff] }
 0x7d4   : > { %5956 = vmatmul.mubr.bf16.vlgmr.msra.gmra.mrb[64].mxu1 %v14961_v21  ;;  %v11438_v21 = vcombine.high %v11309_v36, %v11313_v35  ;;  %v11381_v36 = vld [vmem:[%s17481_s9 + $0xb00] sm:$0xff] }
 0x7d5   : > { %8011 = vmatmul.mubr.bf16.vlgmr.msra.gmra.mrb[72].mxu0 %v15779_v45  ;;  %6849 = vmatpush1.bf16.msra.mxu1 %v11413_v11  ;;  %v11485_v11 = vcombine.low %v11357_v48, %v11361_v56  ;;  %v11385_v35 = vld [vmem:[%s17481_s9 + $0xb20] sm:$0xff]  ;;  %v11311_v48 = vld [vmem:[%s17481_s9 + $0x8d0] sm:$0xff] }
 0x7d6   : > { %6880 = vmatprep.mubr.bf16.mxu1 %v15173_v26  ;;  %6850 = vmatprep.subr.bf16.mxu1 %v11422_v27  ;;  %v11494_v27 = vcombine.high %v11365_v17, %v11369_v22  ;;  %v11315_v56 = vld [vmem:[%s17481_s9 + $0x8f0] sm:$0xff] }
 0x7d9   : > { %6851 = vmatpush1.bf16.msra.mxu1 %v11421_v44  ;;  %v11493_v44 = vcombine.low %v11365_v17, %v11369_v22  ;;  %v11319_v17 = vld [vmem:[%s17481_s9 + $0x910] sm:$0xff]  ;;  %v11441_v22 = vcombine.low %v11311_v48, %v11315_v56 }
 0x7da   : > { %6852 = vmatprep.subr.bf16.mxu1 %v11430_v33  ;;  %v11502_v33 = vcombine.high %v11373_v50, %v11377_v28 }
 0x7dd   : > { %6853 = vmatpush1.bf16.msra.mxu1 %v11429_v29  ;;  %v11501_v29 = vcombine.low %v11373_v50, %v11377_v28  ;;  %v11331_v50 = vld [vmem:[%s17481_s9 + $0x970] sm:$0xff] }
 0x7de   : > { %6854 = vmatprep.subr.bf16.mxu1 %v11438_v21  ;;  %v11510_v21 = vcombine.high %v11381_v36, %v11385_v35 }
 0x7e1   : > { %6855 = vmatpush1.bf16.msra.mxu1 %v11437_v47  ;;  %v11509_v47 = vcombine.low %v11381_v36, %v11385_v35  ;;  %v11339_v36 = vld [vmem:[%s17481_s9 + $0x9b0] sm:$0xff] }
 0x7e2   : > { %6856 = vmatprep.subr.bf16.mxu1 %v11446_v10  ;;  %v11518_v10 = vcombine.high %v11389_v53, %v11393_v42 }
 0x7e5   : > { %6857 = vmatpush1.bf16.msra.mxu1 %v11445_v31  ;;  %v11517_v31 = vcombine.low %v11389_v53, %v11393_v42  ;;  %v11343_v53 = vld [vmem:[%s17481_s9 + $0x9d0] sm:$0xff] }
 0x7e6   : > { %6858 = vmatprep.subr.bf16.mxu1 %v11454_v20  ;;  %v11526_v20 = vcombine.high %v11397_v52, %v11401_v8  ;;  %v11347_v42 = vld [vmem:[%s17481_s9 + $0x9f0] sm:$0xff] }
 0x7e7   : > { %v16018_v57 = vpop.f32.mrb[52].mxu1 }
 0x7e8   : > { %v16026_v61 = vpop.f32.mrb[60].mxu0  ;;  %v16028_v59 = vpop.f32.mrb[53].mxu1 }
 0x7e9   : > { %v5008_v60 = vcombine.low %v16018_v57, %v16028_v59  ;;  %v16032_v63 = vpop.f32.mrb[61].mxu0  ;;  %v4954_v30 = vpop.f32.mrb[54].mxu1  ;;  %6859 = vmatpush1.bf16.msra.mxu1 %v11453_v4  ;;  %v11525_v4 = vcombine.low %v11397_v52, %v11401_v8  ;;  %v16155_v57 = vrot.slane %v5038_v25, %v15846_v7  ;;  %v11371_v25 = vld [vmem:[%s17481_s9 + $0xab0] sm:$0xff] }
 0x7ea   : > { %v7021_v24 = vcombine.low %v16026_v61, %v16032_v63  ;;  %v6927_v1 = vpop.f32.mrb[62].mxu0  ;;  %v4955_v3 = vpop.f32.mrb[55].mxu1  ;;  %6860 = vmatprep.subr.bf16.mxu1 %v11462_v43  ;;  %v11534_v43 = vcombine.high %v11405_v40, %v11409_v34  ;;  %v11533_v30 = vcombine.low %v11405_v40, %v11409_v34  ;;  %v12814_v61 = vld [vmem:[%s17483_s11 + $0x8] ss:$16 sps:$4 sm:$0xff]   ;;  %v12816_v63 = vld [vmem:[%s17483_s11 + $0xc] ss:$16 sps:$4 sm:$0xff]  }
 0x7eb   : > { %v6928_v2 = vpop.f32.mrb[63].mxu0  ;;  %v11295_v1 = vld [vmem:[%s17481_s9 + $0x850] sm:$0xff]  ;;  %9850 = vmatprep.subr.bf16.mxu0 %v12816_v63  ;;  %v12882_v63 = vld [vmem:[%s17483_s11 + $0x16c] ss:$16 sps:$4 sm:$0xff]  }
 0x7ec   : > { %v11299_v3 = vld [vmem:[%s17481_s9 + $0x870] sm:$0xff]  ;;  %9851 = vmatpush1.bf16.msra.mxu0 %v12814_v61  ;;  %v12880_v61 = vld [vmem:[%s17483_s11 + $0x168] ss:$16 sps:$4 sm:$0xff]  }
 0x7ed   : > { %6861 = vmatpush1.bf16.msra.mxu1 %v11461_v12  ;;  %v11418_v12 = vcombine.high %v11287_v6, %v11291_v49  ;;  %v11426_v2 = vcombine.high %v11295_v1, %v11299_v3 }
 0x7ee   : > { %6862 = vmatprep.subr.bf16.mxu1 %v11470_v13  ;;  %v11417_v13 = vcombine.low %v11287_v6, %v11291_v49  ;;  %v5030_v6 = vrot.slane %v5008_v60, %v15846_v7  ;;  %v11359_v60 = vld [vmem:[%s17481_s9 + $0xa50] sm:$0xff] }
 0x7f1   : > { %6863 = vmatpush1.bf16.msra.mxu1 %v11469_v41  ;;  %v11425_v41 = vcombine.low %v11295_v1, %v11299_v3  ;;  %v11355_v1 = vld [vmem:[%s17481_s9 + $0xa30] sm:$0xff] }
 0x7f2   : > { %6864 = vmatprep.subr.bf16.mxu1 %v11478_v38  ;;  %v11434_v38 = vcombine.high %v11303_v5, %v11307_v23 }
 0x7f5   : > { %6865 = vmatpush1.bf16.msra.mxu1 %v11477_v14  ;;  %v11433_v14 = vcombine.low %v11303_v5, %v11307_v23  ;;  %v11363_v5 = vld [vmem:[%s17481_s9 + $0xa70] sm:$0xff] }
 0x7f6   : > { %6866 = vmatprep.subr.bf16.mxu1 %v11486_v62  ;;  %v11442_v62 = vcombine.high %v11311_v48, %v11315_v56  ;;  %v11490_v37 = vcombine.high %v11359_v60, %v11363_v5  ;;  %v11498_v48 = vcombine.high %v11367_v54, %v11371_v25  ;;  %v11375_v56 = vld [vmem:[%s17481_s9 + $0xad0] sm:$0xff] }
 0x7f9   : > { %6867 = vmatpush1.bf16.msra.mxu1 %v11485_v11 }
 0x7fa   : > { %6868 = vmatprep.subr.bf16.mxu1 %v11494_v27  ;;  %v11327_v27 = vld [vmem:[%s17481_s9 + $0x950] sm:$0xff] }
 0x7fb   : > { %v11457_v35 = vcombine.low %v11327_v27, %v11331_v50 }
 0x7fd   : > { %6869 = vmatpush1.bf16.msra.mxu1 %v11493_v44  ;;  %v11458_v44 = vcombine.high %v11327_v27, %v11331_v50  ;;  %v11391_v50 = vld [vmem:[%s17481_s9 + $0xb50] sm:$0xff] }
 0x7fe   : > { %6870 = vmatprep.subr.bf16.mxu1 %v11502_v33  ;;  %v11335_v33 = vld [vmem:[%s17481_s9 + $0x990] sm:$0xff] }
 0x801   : > { %6871 = vmatpush1.bf16.msra.mxu1 %v11501_v29  ;;  %v11466_v29 = vcombine.high %v11335_v33, %v11339_v36 }
 0x802   : > { %6872 = vmatprep.subr.bf16.mxu1 %v11510_v21 }
 0x805   : > { %6873 = vmatpush1.bf16.msra.mxu1 %v11509_v47 }
 0x806   : > { %6874 = vmatprep.subr.bf16.mxu1 %v11518_v10 }
 0x809   : > { %6875 = vmatpush1.bf16.msra.mxu1 %v11517_v31 }
 0x80a   : > { %6876 = vmatprep.subr.bf16.mxu1 %v11526_v20  ;;  %v11465_v20 = vcombine.low %v11335_v33, %v11339_v36  ;;  %v11399_v36 = vld [vmem:[%s17481_s9 + $0xb90] sm:$0xff] }
 0x80d   : > { %6877 = vmatpush1.bf16.msra.mxu1 %v11525_v4 }
 0x80e   : > { %6878 = vmatprep.subr.bf16.mxu1 %v11534_v43  ;;  %v11474_v43 = vcombine.high %v11343_v53, %v11347_v42 }
 0x811   : > { %6879 = vmatpush1.bf16.msra.mxu1 %v11533_v30 }
 0x812   : > { %6930 = vmatprep.subr.bf16.mxu1 %v11418_v12  ;;  %v11351_v12 = vld [vmem:[%s17481_s9 + $0xa10] sm:$0xff] }
 0x814   : > { %6881 = vmatmul.mubr.bf16.vlgmr.msra.gmra.mrb[68].mxu1 %v15365_v58 }
 0x815   : > { %6931 = vmatpush1.bf16.msra.mxu1 %v11417_v13  ;;  %6962 = vmatprep.mubr.bf16.mxu1 %v15173_v26  ;;  %v11323_v26 = vld [vmem:[%s17481_s9 + $0x930] sm:$0xff]  ;;  %v11473_v13 = vcombine.low %v11343_v53, %v11347_v42 }
 0x816   : > { %6932 = vmatprep.subr.bf16.mxu1 %v11426_v2  ;;  %v11450_v11 = vcombine.high %v11319_v17, %v11323_v26  ;;  %v11449_v28 = vcombine.low %v11319_v17, %v11323_v26  ;;  %v11482_v2 = vcombine.high %v11351_v12, %v11355_v1  ;;  %v11383_v26 = vld [vmem:[%s17481_s9 + $0xb10] sm:$0xff] }
 0x817   : > { %v11407_v53 = vld [vmem:[%s17481_s9 + $0xbd0] sm:$0xff] }
 0x818   : > { %v11411_v42 = vld [vmem:[%s17481_s9 + $0xbf0] sm:$0xff] }
 0x819   : > { %6933 = vmatpush1.bf16.msra.mxu1 %v11425_v41  ;;  %v11481_v41 = vcombine.low %v11351_v12, %v11355_v1  ;;  %v11557_v12 = vld [vmem:[%s17481_s9 + $0xc80] sm:$0xff] }
 0x81a   : > { %6934 = vmatprep.subr.bf16.mxu1 %v11434_v38  ;;  %v11489_v38 = vcombine.low %v11359_v60, %v11363_v5  ;;  %v11561_v1 = vld [vmem:[%s17481_s9 + $0xca0] sm:$0xff] }
 0x81b   : > { %v11569_v60 = vld [vmem:[%s17481_s9 + $0xce0] sm:$0xff]  ;;  %v11685_v5 = vcombine.low %v11557_v12, %v11561_v1 }
 0x81d   : > { %6935 = vmatpush1.bf16.msra.mxu1 %v11433_v14  ;;  %v11379_v14 = vld [vmem:[%s17481_s9 + $0xaf0] sm:$0xff] }
 0x81e   : > { %6936 = vmatprep.subr.bf16.mxu1 %v11442_v62  ;;  %v11497_v62 = vcombine.low %v11367_v54, %v11371_v25  ;;  %v11506_v17 = vcombine.high %v11375_v56, %v11379_v14 }
 0x821   : > { %6937 = vmatpush1.bf16.msra.mxu1 %v11441_v22  ;;  %v11387_v22 = vld [vmem:[%s17481_s9 + $0xb30] sm:$0xff] }
 0x822   : > { %6938 = vmatprep.subr.bf16.mxu1 %v11450_v11  ;;  %v11505_v11 = vcombine.low %v11375_v56, %v11379_v14  ;;  %v11514_v27 = vcombine.high %v11383_v26, %v11387_v22 }
 0x825   : > { %6939 = vmatpush1.bf16.msra.mxu1 %v11449_v28  ;;  %v11395_v28 = vld [vmem:[%s17481_s9 + $0xb70] sm:$0xff] }
 0x826   : > { %6940 = vmatprep.subr.bf16.mxu1 %v11458_v44  ;;  %v11513_v44 = vcombine.low %v11383_v26, %v11387_v22  ;;  %v11522_v33 = vcombine.high %v11391_v50, %v11395_v28 }
 0x827   : > { %v4991_v21 = vpop.f32.mrb[56].mxu1 }
 0x828   : > { %v16134_v47 = vpop.f32.mrb[64].mxu0  ;;  %v4993_v10 = vpop.f32.mrb[57].mxu1 }
 0x829   : > { %v5009_v52 = vcombine.low %v4991_v21, %v4993_v10  ;;  %v16136_v8 = vpop.f32.mrb[65].mxu0  ;;  %v4995_v31 = vpop.f32.mrb[58].mxu1  ;;  %6941 = vmatpush1.bf16.msra.mxu1 %v11457_v35  ;;  %v11403_v35 = vld [vmem:[%s17481_s9 + $0xbb0] sm:$0xff] }
 0x82a   : > { %v7023_v40 = vcombine.low %v16134_v47, %v16136_v8  ;;  %v7009_v34 = vpop.f32.mrb[66].mxu0  ;;  %v4996_v4 = vpop.f32.mrb[59].mxu1  ;;  %6942 = vmatprep.subr.bf16.mxu1 %v11466_v29  ;;  %v11521_v29 = vcombine.low %v11391_v50, %v11395_v28  ;;  %v11530_v21 = vcombine.high %v11399_v36, %v11403_v35  ;;  %v11529_v10 = vcombine.low %v11399_v36, %v11403_v35  ;;  %v11541_v31 = vld [vmem:[%s17481_s9 + $0xc00] sm:$0xff]  ;;  %v12886_v8 = vld [vmem:[%s17483_s11 + $0x188] ss:$16 sps:$4 sm:$0xff]  }
 0x82b   : > { %v5037_v49 = vrot.slane %v5009_v52, %v15846_v7  ;;  %v7010_v30 = vpop.f32.mrb[67].mxu0  ;;  %v11538_v52 = vcombine.high %v11407_v53, %v11411_v42  ;;  %v11537_v34 = vcombine.low %v11407_v53, %v11411_v42  ;;  %v11601_v50 = vld [vmem:[%s17481_s9 + $0xde0] sm:$0xff] }
 0x82c   : > { %v12885_v47 = vld [vmem:[%s17483_s11 + $0x184] ss:$16 sps:$4 sm:$0xff]  }
 0x82d   : > { %v5039_v3 = vcombine.low %v5030_v6, %v5037_v49  ;;  %6943 = vmatpush1.bf16.msra.mxu1 %v11465_v20  ;;  %v11545_v20 = vld [vmem:[%s17481_s9 + $0xc20] sm:$0xff] }
 0x82e   : > { %6944 = vmatprep.subr.bf16.mxu1 %v11474_v43  ;;  %v11670_v4 = vcombine.high %v11541_v31, %v11545_v20  ;;  %v11549_v43 = vld [vmem:[%s17481_s9 + $0xc40] sm:$0xff]  ;;  %v11669_v49 = vcombine.low %v11541_v31, %v11545_v20 }
 0x82f   : > { %v16158_v59 = vrot.slane %v5039_v3, %v15846_v7  ;;  %v11553_v6 = vld [vmem:[%s17481_s9 + $0xc60] sm:$0xff] }
 0x830   : > { %v11678_v30 = vcombine.high %v11549_v43, %v11553_v6  ;;  %v11677_v3 = vcombine.low %v11549_v43, %v11553_v6 }
 0x831   : > { %v5054_v23 = vcombine.low %v16155_v57, %v16158_v59  ;;  %6945 = vmatpush1.bf16.msra.mxu1 %v11473_v13  ;;  %v11686_v13 = vcombine.high %v11557_v12, %v11561_v1  ;;  %v11621_v12 = vld [vmem:[%s17481_s9 + $0xe80] sm:$0xff]  ;;  %v11631_v59 = vld [vmem:[%s17481_s9 + $0xed0] sm:$0xff] }
 0x832   : > { %6946 = vmatprep.subr.bf16.mxu1 %v11482_v2  ;;  %v11565_v2 = vld [vmem:[%s17481_s9 + $0xcc0] sm:$0xff] }
 0x833   : > { %v11693_v54 = vcombine.low %v11565_v2, %v11569_v60  ;;  %v11625_v1 = vld [vmem:[%s17481_s9 + $0xea0] sm:$0xff] }
 0x835   : > { %6947 = vmatpush1.bf16.msra.mxu1 %v11481_v41  ;;  %v11694_v41 = vcombine.high %v11565_v2, %v11569_v60  ;;  %v11629_v2 = vld [vmem:[%s17481_s9 + $0xec0] sm:$0xff] }
 0x836   : > { %6948 = vmatprep.subr.bf16.mxu1 %v11490_v37  ;;  %v11577_v37 = vld [vmem:[%s17481_s9 + $0xd20] sm:$0xff] }
 0x837   : > { %v11633_v60 = vld [vmem:[%s17481_s9 + $0xee0] sm:$0xff] }
 0x839   : > { %6949 = vmatpush1.bf16.msra.mxu1 %v11489_v38  ;;  %v11581_v38 = vld [vmem:[%s17481_s9 + $0xd40] sm:$0xff] }
 0x83a   : > { %6950 = vmatprep.subr.bf16.mxu1 %v11498_v48  ;;  %v11585_v48 = vld [vmem:[%s17481_s9 + $0xd60] sm:$0xff] }
 0x83b   : > { %v11710_v14 = vcombine.high %v11581_v38, %v11585_v48  ;;  %v11709_v26 = vcombine.low %v11581_v38, %v11585_v48  ;;  %v11645_v38 = vld [vmem:[%s17481_s9 + $0xf40] sm:$0xff] }
 0x83c   : > { %v11649_v48 = vld [vmem:[%s17481_s9 + $0xf60] sm:$0xff] }
 0x83d   : > { %6951 = vmatpush1.bf16.msra.mxu1 %v11497_v62  ;;  %v11589_v62 = vld [vmem:[%s17481_s9 + $0xd80] sm:$0xff] }
 0x83e   : > { %6952 = vmatprep.subr.bf16.mxu1 %v11506_v17  ;;  %v11593_v17 = vld [vmem:[%s17481_s9 + $0xda0] sm:$0xff] }
 0x83f   : > { %v11718_v22 = vcombine.high %v11589_v62, %v11593_v17 }
 0x841   : > { %6953 = vmatpush1.bf16.msra.mxu1 %v11505_v11 }
 0x842   : > { %6954 = vmatprep.subr.bf16.mxu1 %v11514_v27  ;;  %v11597_v27 = vld [vmem:[%s17481_s9 + $0xdc0] sm:$0xff] }
 0x843   : > { %v11725_v6 = vcombine.low %v11597_v27, %v11601_v50 }
 0x845   : > { %6955 = vmatpush1.bf16.msra.mxu1 %v11513_v44 }
 0x846   : > { %6956 = vmatprep.subr.bf16.mxu1 %v11522_v33 }
 0x849   : > { %6957 = vmatpush1.bf16.msra.mxu1 %v11521_v29  ;;  %v11717_v29 = vcombine.low %v11589_v62, %v11593_v17  ;;  %v11653_v62 = vld [vmem:[%s17481_s9 + $0xf80] sm:$0xff] }
 0x84a   : > { %6958 = vmatprep.subr.bf16.mxu1 %v11530_v21  ;;  %v11657_v17 = vld [vmem:[%s17481_s9 + $0xfa0] sm:$0xff] }
 0x84d   : > { %6959 = vmatpush1.bf16.msra.mxu1 %v11529_v10  ;;  %v11726_v10 = vcombine.high %v11597_v27, %v11601_v50  ;;  %v11665_v27 = vld [vmem:[%s17481_s9 + $0xfe0] sm:$0xff]  ;;  %v11781_v50 = vcombine.low %v11653_v62, %v11657_v17 }
 0x84e   : > { %6960 = vmatprep.subr.bf16.mxu1 %v11538_v52  ;;  %v16264_v52 = vrot.slane %v6014_v55, %v15846_v7  ;;  %v11617_v55 = vld [vmem:[%s17481_s9 + $0xe60] sm:$0xff] }
 0x851   : > { %6961 = vmatpush1.bf16.msra.mxu1 %v11537_v34  ;;  %v11605_v34 = vld [vmem:[%s17481_s9 + $0xe00] sm:$0xff] }
 0x852   : > { %7855 = vmatprep.subr.bf16.mxu1 %v11670_v4  ;;  %v11609_v4 = vld [vmem:[%s17481_s9 + $0xe20] sm:$0xff] }
 0x853   : > { %v11734_v39 = vcombine.high %v11605_v34, %v11609_v4 }
 0x854   : > { %6963 = vmatmul.mubr.bf16.vlgmr.msra.gmra.mrb[72].mxu1 %v15365_v58  ;;  %v11573_v58 = vld [vmem:[%s17481_s9 + $0xd00] sm:$0xff] }
 0x855   : > { %7856 = vmatpush1.bf16.msra.mxu1 %v11669_v49  ;;  %7887 = vmatprep.mubr.bf16.mxu1 %v15581_v15  ;;  %v11702_v25 = vcombine.high %v11573_v58, %v11577_v37  ;;  %v11701_v56 = vcombine.low %v11573_v58, %v11577_v37  ;;  %v11733_v49 = vcombine.low %v11605_v34, %v11609_v4  ;;  %v11637_v58 = vld [vmem:[%s17481_s9 + $0xf00] sm:$0xff]  ;;  %v11559_v4 = vld [vmem:[%s17481_s9 + $0xc90] sm:$0xff] }
 0x856   : > { %7857 = vmatprep.subr.bf16.mxu1 %v11678_v30  ;;  %v11742_v30 = vcombine.high %v11613_v46, %v11617_v55  ;;  %v11641_v37 = vld [vmem:[%s17481_s9 + $0xf20] sm:$0xff] }
 0x859   : > { %7858 = vmatpush1.bf16.msra.mxu1 %v11677_v3  ;;  %v11741_v3 = vcombine.low %v11613_v46, %v11617_v55  ;;  %v11567_v55 = vld [vmem:[%s17481_s9 + $0xcd0] sm:$0xff] }
 0x85a   : > { %7859 = vmatprep.subr.bf16.mxu1 %v11686_v13  ;;  %v11750_v13 = vcombine.high %v11621_v12, %v11625_v1 }
 0x85d   : > { %7860 = vmatpush1.bf16.msra.mxu1 %v11685_v5  ;;  %v11749_v5 = vcombine.low %v11621_v12, %v11625_v1  ;;  %v11575_v1 = vld [vmem:[%s17481_s9 + $0xd10] sm:$0xff] }
 0x85e   : > { %7861 = vmatprep.subr.bf16.mxu1 %v11694_v41  ;;  %v11758_v41 = vcombine.high %v11629_v2, %v11633_v60 }
 0x861   : > { %7862 = vmatpush1.bf16.msra.mxu1 %v11693_v54  ;;  %v11757_v54 = vcombine.low %v11629_v2, %v11633_v60  ;;  %v11583_v2 = vld [vmem:[%s17481_s9 + $0xd50] sm:$0xff] }
 0x862   : > { %7863 = vmatprep.subr.bf16.mxu1 %v11702_v25  ;;  %v11766_v25 = vcombine.high %v11637_v58, %v11641_v37  ;;  %v11587_v60 = vld [vmem:[%s17481_s9 + $0xd70] sm:$0xff] }
 0x865   : > { %7864 = vmatpush1.bf16.msra.mxu1 %v11701_v56  ;;  %v11765_v56 = vcombine.low %v11637_v58, %v11641_v37  ;;  %v11591_v58 = vld [vmem:[%s17481_s9 + $0xd90] sm:$0xff] }
 0x866   : > { %7865 = vmatprep.subr.bf16.mxu1 %v11710_v14  ;;  %v11774_v14 = vcombine.high %v11645_v38, %v11649_v48  ;;  %v11595_v37 = vld [vmem:[%s17481_s9 + $0xdb0] sm:$0xff] }
 0x867   : > { %v5875_v11 = vpop.f32.mrb[60].mxu1 }
 0x868   : > { %v16254_v28 = vpop.f32.mrb[68].mxu0  ;;  %v5877_v44 = vpop.f32.mrb[61].mxu1 }
 0x869   : > { %v6013_v33 = vcombine.low %v5875_v11, %v5877_v44  ;;  %v16256_v36 = vpop.f32.mrb[69].mxu0  ;;  %v5879_v35 = vpop.f32.mrb[62].mxu1  ;;  %7866 = vmatpush1.bf16.msra.mxu1 %v11709_v26  ;;  %v11773_v26 = vcombine.low %v11645_v38, %v11649_v48  ;;  %v11661_v11 = vld [vmem:[%s17481_s9 + $0xfc0] sm:$0xff]  ;;  %v11599_v48 = vld [vmem:[%s17481_s9 + $0xdd0] sm:$0xff] }
 0x86a   : > { %v8028_v21 = vcombine.low %v16254_v28, %v16256_v36  ;;  %v7934_v53 = vpop.f32.mrb[70].mxu0  ;;  %v5880_v42 = vpop.f32.mrb[63].mxu1  ;;  %7867 = vmatprep.subr.bf16.mxu1 %v11718_v22  ;;  %v11782_v22 = vcombine.high %v11653_v62, %v11657_v17  ;;  %v11790_v44 = vcombine.high %v11661_v11, %v11665_v27  ;;  %v11547_v35 = vld [vmem:[%s17481_s9 + $0xc30] sm:$0xff] }
 0x86b   : > { %v16267_v31 = vrot.slane %v6013_v33, %v15846_v7  ;;  %v7935_v20 = vpop.f32.mrb[71].mxu0  ;;  %v11543_v33 = vld [vmem:[%s17481_s9 + $0xc10] sm:$0xff] }
 0x86c   : > { %v11674_v53 = vcombine.high %v11543_v33, %v11547_v35  ;;  %v11551_v42 = vld [vmem:[%s17481_s9 + $0xc50] sm:$0xff]  ;;  %v11673_v20 = vcombine.low %v11543_v33, %v11547_v35  ;;  %v6044_v35 = vrot.slane %v6016_v16, %v15846_v7 }
 0x86d   : > { %v6045_v43 = vcombine.low %v16267_v31, %v16264_v52  ;;  %7868 = vmatpush1.bf16.msra.mxu1 %v11717_v29  ;;  %v11789_v29 = vcombine.low %v11661_v11, %v11665_v27  ;;  %v11721_v11 = vcombine.low %v11591_v58, %v11595_v37 }
 0x86e   : > { %7869 = vmatprep.subr.bf16.mxu1 %v11726_v10  ;;  %v11555_v10 = vld [vmem:[%s17481_s9 + $0xc70] sm:$0xff] }
 0x86f   : > { %v11682_v34 = vcombine.high %v11551_v42, %v11555_v10  ;;  %v6053_v9 = vrot.slane %v6045_v43, %v15846_v7  ;;  %v11623_v43 = vld [vmem:[%s17481_s9 + $0xe90] sm:$0xff] }
 0x871   : > { %7870 = vmatpush1.bf16.msra.mxu1 %v11725_v6  ;;  %v11563_v6 = vld [vmem:[%s17481_s9 + $0xcb0] sm:$0xff] }
 0x872   : > { %7871 = vmatprep.subr.bf16.mxu1 %v11734_v39  ;;  %v11681_v39 = vcombine.low %v11551_v42, %v11555_v10  ;;  %v11690_v46 = vcombine.high %v11559_v4, %v11563_v6  ;;  %v11607_v42 = vld [vmem:[%s17481_s9 + $0xe10] sm:$0xff] }
 0x873   : > { %v11611_v10 = vld [vmem:[%s17481_s9 + $0xe30] sm:$0xff] }
 0x874   : > { %v11738_v0 = vcombine.high %v11607_v42, %v11611_v10 }
 0x875   : > { %7872 = vmatpush1.bf16.msra.mxu1 %v11733_v49  ;;  %v11571_v49 = vld [vmem:[%s17481_s9 + $0xcf0] sm:$0xff] }
 0x876   : > { %7873 = vmatprep.subr.bf16.mxu1 %v11742_v30  ;;  %v11689_v30 = vcombine.low %v11559_v4, %v11563_v6  ;;  %v11698_v12 = vcombine.high %v11567_v55, %v11571_v49  ;;  %v4051_v4 = vld [vmem:[%s17482_s10] sm:$0xff]  ;;  %v11615_v6 = vld [vmem:[%s17481_s9 + $0xe50] sm:$0xff] }
 0x879   : > { %7874 = vmatpush1.bf16.msra.mxu1 %v11741_v3  ;;  %v11697_v3 = vcombine.low %v11567_v55, %v11571_v49  ;;  %v11737_v49 = vcombine.low %v11607_v42, %v11611_v10 }
 0x87a   : > { %7875 = vmatprep.subr.bf16.mxu1 %v11750_v13 }
 0x87d   : > { %7876 = vmatpush1.bf16.msra.mxu1 %v11749_v5 }
 0x87e   : > { %7877 = vmatprep.subr.bf16.mxu1 %v11758_v41  ;;  %v11714_v41 = vcombine.high %v11583_v2, %v11587_v60 }
 0x881   : > { %7878 = vmatpush1.bf16.msra.mxu1 %v11757_v54  ;;  %v11713_v54 = vcombine.low %v11583_v2, %v11587_v60 }
 0x882   : > { %7879 = vmatprep.subr.bf16.mxu1 %v11766_v25  ;;  %v11722_v25 = vcombine.high %v11591_v58, %v11595_v37 }
 0x885   : > { %7880 = vmatpush1.bf16.msra.mxu1 %v11765_v56  ;;  %v11603_v56 = vld [vmem:[%s17481_s9 + $0xdf0] sm:$0xff] }
 0x886   : > { %7881 = vmatprep.subr.bf16.mxu1 %v11774_v14  ;;  %v11730_v33 = vcombine.high %v11599_v48, %v11603_v56 }
 0x889   : > { %7882 = vmatpush1.bf16.msra.mxu1 %v11773_v26 }
 0x88a   : > { %7883 = vmatprep.subr.bf16.mxu1 %v11782_v22 }
 0x88d   : > { %7884 = vmatpush1.bf16.msra.mxu1 %v11781_v50 }
 0x88e   : > { %7885 = vmatprep.subr.bf16.mxu1 %v11790_v44 }
 0x891   : > { %7886 = vmatpush1.bf16.msra.mxu1 %v11789_v29 }
 0x892   : > { %7937 = vmatprep.subr.bf16.mxu1 %v11674_v53 }
 0x894   : > { %7888 = vmatmul.mubr.bf16.vlgmr.msra.gmra.mrb[76].mxu1 %v15779_v45 }
 0x895   : > { %7938 = vmatpush1.bf16.msra.mxu1 %v11673_v20  ;;  %7969 = vmatprep.mubr.bf16.mxu1 %v15581_v15  ;;  %v11579_v15 = vld [vmem:[%s17481_s9 + $0xd30] sm:$0xff] }
 0x896   : > { %7939 = vmatprep.subr.bf16.mxu1 %v11682_v34  ;;  %v11706_v13 = vcombine.high %v11575_v1, %v11579_v15  ;;  %v11705_v5 = vcombine.low %v11575_v1, %v11579_v15  ;;  %v11729_v34 = vcombine.low %v11599_v48, %v11603_v56  ;;  %v11663_v56 = vld [vmem:[%s17481_s9 + $0xfd0] sm:$0xff] }
 0x899   : > { %7940 = vmatpush1.bf16.msra.mxu1 %v11681_v39  ;;  %v11619_v39 = vld [vmem:[%s17481_s9 + $0xe70] sm:$0xff] }
 0x89a   : > { %7941 = vmatprep.subr.bf16.mxu1 %v11690_v46  ;;  %v5056_v46 = vadd.f32 %v5054_v23, %v4051_v4  ;;  %v11746_v52 = vcombine.high %v11615_v6, %v11619_v39  ;;  %v11635_v23 = vld [vmem:[%s17481_s9 + $0xef0] sm:$0xff] }
 0x89b   : > { %v11762_v15 = vcombine.high %v11631_v59, %v11635_v23  ;;  %v11761_v2 = vcombine.low %v11631_v59, %v11635_v23  ;;  %v12817_v4 = vld [vmem:[%s17483_s11 + $0x20] ss:$16 sps:$4 sm:$0xff]   ;;  %v12843_v59 = vld [vmem:[%s17483_s11 + $0xa4] ss:$16 sps:$4 sm:$0xff]   ;;  %v12846_v23 = vld [vmem:[%s17483_s11 + $0xac] ss:$16 sps:$4 sm:$0xff]  }
 0x89d   : > { %7942 = vmatpush1.bf16.msra.mxu1 %v11689_v30  ;;  %v11627_v30 = vld [vmem:[%s17481_s9 + $0xeb0] sm:$0xff] }
 0x89e   : > { %7943 = vmatprep.subr.bf16.mxu1 %v11698_v12  ;;  %v11745_v12 = vcombine.low %v11615_v6, %v11619_v39  ;;  %v11754_v57 = vcombine.high %v11623_v43, %v11627_v30  ;;  %v11753_v1 = vcombine.low %v11623_v43, %v11627_v30  ;;  %v12823_v6 = vld [vmem:[%s17483_s11 + $0x40] ss:$16 sps:$4 sm:$0xff]   ;;  %v12826_v39 = vld [vmem:[%s17483_s11 + $0x48] ss:$16 sps:$4 sm:$0xff]   ;;  %v12837_v43 = vld [vmem:[%s17483_s11 + $0x84] ss:$16 sps:$4 sm:$0xff]  }
 0x89f   : > { %v12840_v30 = vld [vmem:[%s17483_s11 + $0x8c] ss:$16 sps:$4 sm:$0xff]  }
 0x8a1   : > { %7944 = vmatpush1.bf16.msra.mxu1 %v11697_v3  ;;  %v11639_v3 = vld [vmem:[%s17481_s9 + $0xf10] sm:$0xff] }
 0x8a2   : > { %7945 = vmatprep.subr.bf16.mxu1 %v11706_v13  ;;  %v11643_v13 = vld [vmem:[%s17481_s9 + $0xf30] sm:$0xff] }
 0x8a3   : > { %v11770_v60 = vcombine.high %v11639_v3, %v11643_v13  ;;  %v11769_v58 = vcombine.low %v11639_v3, %v11643_v13  ;;  %v12849_v3 = vld [vmem:[%s17483_s11 + $0xc4] ss:$16 sps:$4 sm:$0xff]   ;;  %v12852_v13 = vld [vmem:[%s17483_s11 + $0xcc] ss:$16 sps:$4 sm:$0xff]  }
 0x8a5   : > { %7946 = vmatpush1.bf16.msra.mxu1 %v11705_v5  ;;  %v11647_v5 = vld [vmem:[%s17481_s9 + $0xf50] sm:$0xff] }
 0x8a6   : > { %7947 = vmatprep.subr.bf16.mxu1 %v11714_v41  ;;  %v11651_v41 = vld [vmem:[%s17481_s9 + $0xf70] sm:$0xff] }
 0x8a7   : > { %v5957_v38 = vpop.f32.mrb[64].mxu1  ;;  %v11778_v37 = vcombine.high %v11647_v5, %v11651_v41 }
 0x8a8   : > { %v16369_v14 = vpop.f32.mrb[72].mxu0  ;;  %v5959_v62 = vpop.f32.mrb[65].mxu1 }
 0x8a9   : > { %v6015_v17 = vcombine.low %v5957_v38, %v5959_v62  ;;  %v16371_v26 = vpop.f32.mrb[73].mxu0  ;;  %v5961_v22 = vpop.f32.mrb[66].mxu1  ;;  %7948 = vmatpush1.bf16.msra.mxu1 %v11713_v54  ;;  %v11655_v54 = vld [vmem:[%s17481_s9 + $0xf90] sm:$0xff]  ;;  %v11777_v38 = vcombine.low %v11647_v5, %v11651_v41  ;;  %v12858_v41 = vld [vmem:[%s17483_s11 + $0xec] ss:$16 sps:$4 sm:$0xff]  }
 0x8aa   : > { %v8030_v27 = vcombine.low %v16369_v14, %v16371_v26  ;;  %v8016_v50 = vpop.f32.mrb[74].mxu0  ;;  %v5962_v44 = vpop.f32.mrb[67].mxu1  ;;  %7949 = vmatprep.subr.bf16.mxu1 %v11722_v25  ;;  %v11659_v25 = vld [vmem:[%s17481_s9 + $0xfb0] sm:$0xff] }
 0x8ab   : > { %v6037_v29 = vrot.slane %v6015_v17, %v15846_v7  ;;  %v8017_v53 = vpop.f32.mrb[75].mxu0  ;;  %v11786_v48 = vcombine.high %v11655_v54, %v11659_v25  ;;  %v11667_v62 = vld [vmem:[%s17481_s9 + $0xff0] sm:$0xff]  ;;  %v11785_v17 = vcombine.low %v11655_v54, %v11659_v25  ;;  %v12864_v25 = vld [vmem:[%s17483_s11 + $0x10c] ss:$16 sps:$4 sm:$0xff]  }
 0x8ac   : > { %v11794_v22 = vcombine.high %v11663_v56, %v11667_v62  ;;  %v16446_v53 = vrot.slane %v7021_v24, %v15846_v7  ;;  %v12819_v24 = vld [vmem:[%s17483_s11 + $0x24] ss:$16 sps:$4 sm:$0xff]  }
 0x8ad   : > { %v6046_v20 = vcombine.low %v6037_v29, %v6044_v35  ;;  %7950 = vmatpush1.bf16.msra.mxu1 %v11721_v11  ;;  %v11793_v11 = vcombine.low %v11663_v56, %v11667_v62  ;;  %v12855_v5 = vld [vmem:[%s17483_s11 + $0xe4] ss:$16 sps:$4 sm:$0xff]   ;;  %v12870_v62 = vld [vmem:[%s17483_s11 + $0x12c] ss:$16 sps:$4 sm:$0xff]  }
 0x8ae   : > { %7951 = vmatprep.subr.bf16.mxu1 %v11730_v33  ;;  %v12861_v54 = vld [vmem:[%s17483_s11 + $0x104] ss:$16 sps:$4 sm:$0xff]  }
 0x8af   : > { %v6060_v16 = vrot.slane %v6046_v20, %v15846_v7  ;;  %v12813_v20 = vld [vmem:[%s17483_s11 + $0x4] ss:$16 sps:$4 sm:$0xff]  }
 0x8b0   : > { %v12867_v56 = vld [vmem:[%s17483_s11 + $0x124] ss:$16 sps:$4 sm:$0xff]  }
 0x8b1   : > { %v6061_v55 = vcombine.low %v6053_v9, %v6060_v16  ;;  %7952 = vmatpush1.bf16.msra.mxu1 %v11729_v34  ;;  %v12822_v34 = vld [vmem:[%s17483_s11 + $0x2c] ss:$16 sps:$4 sm:$0xff]   ;;  %v12825_v9 = vld [vmem:[%s17483_s11 + $0x44] ss:$16 sps:$4 sm:$0xff]  }
 0x8b2   : > { %7953 = vmatprep.subr.bf16.mxu1 %v11738_v0  ;;  %v12820_v0 = vld [vmem:[%s17483_s11 + $0x28] ss:$16 sps:$4 sm:$0xff]   ;;  %9852 = vmatprep.subr.bf16.mxu0 %v12822_v34  ;;  %v12828_v16 = vld [vmem:[%s17483_s11 + $0x4c] ss:$16 sps:$4 sm:$0xff]  }
 0x8b3   : > { %v16403_v31 = vadd.f32 %v6061_v55, %v5056_v46  ;;  %9853 = vmatpush1.bf16.msra.mxu0 %v12820_v0  ;;  %v12831_v46 = vld [vmem:[%s17483_s11 + $0x64] ss:$16 sps:$4 sm:$0xff]   ;;  %v12834_v55 = vld [vmem:[%s17483_s11 + $0x6c] ss:$16 sps:$4 sm:$0xff]   ;;  %v7051_v0 = vrot.slane %v7023_v40, %v15846_v7 }
 0x8b4   : > { %9854 = vmatprep.subr.bf16.mxu0 %v12828_v16  ;;  %v12888_v40 = vld [vmem:[%s17483_s11 + $0x18c] ss:$16 sps:$4 sm:$0xff]  }
 0x8b5   : > { %7954 = vmatpush1.bf16.msra.mxu1 %v11737_v49  ;;  %v12829_v49 = vld [vmem:[%s17483_s11 + $0x60] ss:$16 sps:$4 sm:$0xff]  }
 0x8b6   : > { %7955 = vmatprep.subr.bf16.mxu1 %v11746_v52  ;;  %v12832_v52 = vld [vmem:[%s17483_s11 + $0x68] ss:$16 sps:$4 sm:$0xff]  }
 0x8b7   : > { %9855 = vmatpush1.bf16.msra.mxu0 %v12826_v39 }
 0x8b8   : > { %9856 = vmatprep.subr.bf16.mxu0 %v12834_v55 }
 0x8b9   : > { %7956 = vmatpush1.bf16.msra.mxu1 %v11745_v12  ;;  %v12835_v12 = vld [vmem:[%s17483_s11 + $0x80] ss:$16 sps:$4 sm:$0xff]  }
 0x8ba   : > { %7957 = vmatprep.subr.bf16.mxu1 %v11754_v57  ;;  %v12838_v57 = vld [vmem:[%s17483_s11 + $0x88] ss:$16 sps:$4 sm:$0xff]  }
 0x8bb   : > { %9857 = vmatpush1.bf16.msra.mxu0 %v12832_v52  ;;  %v12897_v52 = vld [vmem:[%s17483_s11 + $0x1c4] ss:$16 sps:$4 sm:$0xff]  }
 0x8bc   : > { %9858 = vmatprep.subr.bf16.mxu0 %v12840_v30  ;;  %v12895_v30 = vld [vmem:[%s17483_s11 + $0x1c0] ss:$16 sps:$4 sm:$0xff]  }
 0x8bd   : > { %7958 = vmatpush1.bf16.msra.mxu1 %v11753_v1  ;;  %v12841_v1 = vld [vmem:[%s17483_s11 + $0xa0] ss:$16 sps:$4 sm:$0xff]  }
 0x8be   : > { %7959 = vmatprep.subr.bf16.mxu1 %v11762_v15  ;;  %v12844_v15 = vld [vmem:[%s17483_s11 + $0xa8] ss:$16 sps:$4 sm:$0xff]  }
 0x8bf   : > { %9859 = vmatpush1.bf16.msra.mxu0 %v12838_v57  ;;  %v12903_v57 = vld [vmem:[%s17483_s11 + $0x1e4] ss:$16 sps:$4 sm:$0xff]  }
 0x8c0   : > { %9860 = vmatprep.subr.bf16.mxu0 %v12846_v23  ;;  %v12901_v23 = vld [vmem:[%s17483_s11 + $0x1e0] ss:$16 sps:$4 sm:$0xff]  }
 0x8c1   : > { %7960 = vmatpush1.bf16.msra.mxu1 %v11761_v2  ;;  %v12847_v2 = vld [vmem:[%s17483_s11 + $0xc0] ss:$16 sps:$4 sm:$0xff]  }
 0x8c2   : > { %7961 = vmatprep.subr.bf16.mxu1 %v11770_v60  ;;  %v12850_v60 = vld [vmem:[%s17483_s11 + $0xc8] ss:$16 sps:$4 sm:$0xff]  }
 0x8c3   : > { %9861 = vmatpush1.bf16.msra.mxu0 %v12844_v15  ;;  %v12909_v15 = vld [vmem:[%s17483_s11 + $0x204] ss:$16 sps:$4 sm:$0xff]  }
 0x8c4   : > { %9862 = vmatprep.subr.bf16.mxu0 %v12852_v13 }
 0x8c5   : > { %7962 = vmatpush1.bf16.msra.mxu1 %v11769_v58  ;;  %v12853_v58 = vld [vmem:[%s17483_s11 + $0xe0] ss:$16 sps:$4 sm:$0xff]  }
 0x8c6   : > { %7963 = vmatprep.subr.bf16.mxu1 %v11778_v37  ;;  %v12856_v37 = vld [vmem:[%s17483_s11 + $0xe8] ss:$16 sps:$4 sm:$0xff]  }
 0x8c7   : > { %9863 = vmatpush1.bf16.msra.mxu0 %v12850_v60 }
 0x8c8   : > { %9864 = vmatprep.subr.bf16.mxu0 %v12858_v41 }
 0x8c9   : > { %7964 = vmatpush1.bf16.msra.mxu1 %v11777_v38  ;;  %v12859_v38 = vld [vmem:[%s17483_s11 + $0x100] ss:$16 sps:$4 sm:$0xff]  }
 0x8ca   : > { %7965 = vmatprep.subr.bf16.mxu1 %v11786_v48  ;;  %v12862_v48 = vld [vmem:[%s17483_s11 + $0x108] ss:$16 sps:$4 sm:$0xff]  }
 0x8cb   : > { %9865 = vmatpush1.bf16.msra.mxu0 %v12856_v37 }
 0x8cc   : > { %9866 = vmatprep.subr.bf16.mxu0 %v12864_v25 }
 0x8cd   : > { %7966 = vmatpush1.bf16.msra.mxu1 %v11785_v17  ;;  %v12865_v17 = vld [vmem:[%s17483_s11 + $0x120] ss:$16 sps:$4 sm:$0xff]  }
 0x8ce   : > { %7967 = vmatprep.subr.bf16.mxu1 %v11794_v22  ;;  %v12868_v22 = vld [vmem:[%s17483_s11 + $0x128] ss:$16 sps:$4 sm:$0xff]  }
 0x8cf   : > { %9867 = vmatpush1.bf16.msra.mxu0 %v12862_v48 }
 0x8d0   : > { %9868 = vmatprep.subr.bf16.mxu0 %v12870_v62 }
 0x8d1   : > { %7968 = vmatpush1.bf16.msra.mxu1 %v11793_v11  ;;  %v12873_v11 = vld [vmem:[%s17483_s11 + $0x144] ss:$16 sps:$4 sm:$0xff]  }
 0x8d2   : > { %9686 = vmatprep.subr.bf16.mxu1 %v12813_v20 }
 0x8d3   : > { %9869 = vmatpush1.bf16.msra.mxu0 %v12868_v22 }
 0x8d4   : > { %7970 = vmatmul.mubr.bf16.vlgmr.msra.gmra.mrb[80].mxu1 %v15779_v45  ;;  %v12811_v45 = vld [vmem:[%s17483_s11] ss:$16 sps:$4 sm:$0xff]  }
 0x8d5   : > { %9687 = vmatpush1.bf16.msra.mxu1 %v12811_v45  ;;  %v12879_v45 = vld [vmem:[%s17483_s11 + $0x164] ss:$16 sps:$4 sm:$0xff]  }
 0x8d6   : > { %9688 = vmatprep.subr.bf16.mxu1 %v12819_v24 }
 0x8d9   : > { %9689 = vmatpush1.bf16.msra.mxu1 %v12817_v4 }
 0x8da   : > { %9690 = vmatprep.subr.bf16.mxu1 %v12825_v9 }
 0x8dd   : > { %9691 = vmatpush1.bf16.msra.mxu1 %v12823_v6 }
 0x8de   : > { %9692 = vmatprep.subr.bf16.mxu1 %v12831_v46 }
 0x8e1   : > { %9693 = vmatpush1.bf16.msra.mxu1 %v12829_v49  ;;  %v12883_v49 = vld [vmem:[%s17483_s11 + $0x180] ss:$16 sps:$4 sm:$0xff]  }
 0x8e2   : > { %9694 = vmatprep.subr.bf16.mxu1 %v12837_v43  ;;  %v12900_v43 = vld [vmem:[%s17483_s11 + $0x1cc] ss:$16 sps:$4 sm:$0xff]  }
 0x8e5   : > { %9695 = vmatpush1.bf16.msra.mxu1 %v12835_v12  ;;  %v12898_v12 = vld [vmem:[%s17483_s11 + $0x1c8] ss:$16 sps:$4 sm:$0xff]  }
 0x8e6   : > { %9696 = vmatprep.subr.bf16.mxu1 %v12843_v59  ;;  %v12906_v59 = vld [vmem:[%s17483_s11 + $0x1ec] ss:$16 sps:$4 sm:$0xff]  }
 0x8e7   : > { %v6882_v50 = vpop.f32.mrb[68].mxu1 }
 0x8e8   : > { %v6884_v44 = vpop.f32.mrb[69].mxu1 }
 0x8e9   : > { %v7020_v33 = vcombine.low %v6882_v50, %v6884_v44  ;;  %v6886_v35 = vpop.f32.mrb[70].mxu1  ;;  %9697 = vmatpush1.bf16.msra.mxu1 %v12841_v1  ;;  %v12876_v50 = vld [vmem:[%s17483_s11 + $0x14c] ss:$16 sps:$4 sm:$0xff]   ;;  %v12871_v44 = vld [vmem:[%s17483_s11 + $0x140] ss:$16 sps:$4 sm:$0xff]  }
 0x8ea   : > { %v6887_v29 = vpop.f32.mrb[71].mxu1  ;;  %9698 = vmatprep.subr.bf16.mxu1 %v12849_v3  ;;  %9870 = vmatprep.subr.bf16.mxu0 %v12876_v50  ;;  %v12904_v1 = vld [vmem:[%s17483_s11 + $0x1e8] ss:$16 sps:$4 sm:$0xff]   ;;  %v12912_v3 = vld [vmem:[%s17483_s11 + $0x20c] ss:$16 sps:$4 sm:$0xff]  }
 0x8eb   : > { %v16449_v42 = vrot.slane %v7020_v33, %v15846_v7  ;;  %v12874_v33 = vld [vmem:[%s17483_s11 + $0x148] ss:$16 sps:$4 sm:$0xff]   ;;  %v12877_v29 = vld [vmem:[%s17483_s11 + $0x160] ss:$16 sps:$4 sm:$0xff]  }
 0x8ec   : > { %9871 = vmatpush1.bf16.msra.mxu0 %v12874_v33 }
 0x8ed   : > { %v7052_v10 = vcombine.low %v16449_v42, %v16446_v53  ;;  %9699 = vmatpush1.bf16.msra.mxu1 %v12847_v2  ;;  %9872 = vmatprep.subr.bf16.mxu0 %v12882_v63  ;;  %v12894_v53 = vld [vmem:[%s17483_s11 + $0x1ac] ss:$16 sps:$4 sm:$0xff]   ;;  %v12889_v42 = vld [vmem:[%s17483_s11 + $0x1a0] ss:$16 sps:$4 sm:$0xff]  }
 0x8ee   : > { %9700 = vmatprep.subr.bf16.mxu1 %v12855_v5 }
 0x8ef   : > { %v7060_v6 = vrot.slane %v7052_v10, %v15846_v7  ;;  %v12892_v10 = vld [vmem:[%s17483_s11 + $0x1a8] ss:$16 sps:$4 sm:$0xff]  }
 0x8f0   : > { %9873 = vmatpush1.bf16.msra.mxu0 %v12880_v61  ;;  %v12918_v61 = vld [vmem:[%s17483_s11 + $0x22c] ss:$16 sps:$4 sm:$0xff]  }
 0x8f1   : > { %9701 = vmatpush1.bf16.msra.mxu1 %v12853_v58  ;;  %9874 = vmatprep.subr.bf16.mxu0 %v12888_v40  ;;  %v8044_v58 = vrot.slane %v8028_v21, %v15846_v7  ;;  %v12934_v40 = vld [vmem:[%s17483_s11 + $0x288] ss:$16 sps:$4 sm:$0xff]  }
 0x8f2   : > { %9702 = vmatprep.subr.bf16.mxu1 %v12861_v54 }
 0x8f4   : > { %9875 = vmatpush1.bf16.msra.mxu0 %v12886_v8  ;;  %v12931_v8 = vld [vmem:[%s17483_s11 + $0x280] ss:$16 sps:$4 sm:$0xff]  }
 0x8f5   : > { %9703 = vmatpush1.bf16.msra.mxu1 %v12859_v38  ;;  %9876 = vmatprep.subr.bf16.mxu0 %v12894_v53  ;;  %v12942_v53 = vld [vmem:[%s17483_s11 + $0x2ac] ss:$16 sps:$4 sm:$0xff]  }
 0x8f6   : > { %9704 = vmatprep.subr.bf16.mxu1 %v12867_v56 }
 0x8f8   : > { %9877 = vmatpush1.bf16.msra.mxu0 %v12892_v10  ;;  %v12940_v10 = vld [vmem:[%s17483_s11 + $0x2a8] ss:$16 sps:$4 sm:$0xff]  }
 0x8f9   : > { %9705 = vmatpush1.bf16.msra.mxu1 %v12865_v17  ;;  %9878 = vmatprep.subr.bf16.mxu0 %v12900_v43  ;;  %v8058_v17 = vrot.slane %v8030_v27, %v15846_v7  ;;  %v12948_v43 = vld [vmem:[%s17483_s11 + $0x2cc] ss:$16 sps:$4 sm:$0xff]  }
 0x8fa   : > { %9706 = vmatprep.subr.bf16.mxu1 %v12873_v11 }
 0x8fc   : > { %9879 = vmatpush1.bf16.msra.mxu0 %v12898_v12  ;;  %v12946_v12 = vld [vmem:[%s17483_s11 + $0x2c8] ss:$16 sps:$4 sm:$0xff]  }
 0x8fd   : > { %9707 = vmatpush1.bf16.msra.mxu1 %v12871_v44  ;;  %9880 = vmatprep.subr.bf16.mxu0 %v12906_v59  ;;  %v8094_v44 = vsub.s32 3, %v14926_v19  ;;  %v12954_v59 = vld [vmem:[%s17483_s11 + $0x2ec] ss:$16 sps:$4 sm:$0xff]  }
 0x8fe   : > { %9708 = vmatprep.subr.bf16.mxu1 %v12879_v45 }
 0x900   : > { %9881 = vmatpush1.bf16.msra.mxu0 %v12904_v1  ;;  %v12952_v1 = vld [vmem:[%s17483_s11 + $0x2e8] ss:$16 sps:$4 sm:$0xff]  }
 0x901   : > { %9709 = vmatpush1.bf16.msra.mxu1 %v12877_v29  ;;  %9891 = vmatprep.subr.bf16.mxu0 %v12912_v3  ;;  %v12910_v29 = vld [vmem:[%s17483_s11 + $0x208] ss:$16 sps:$4 sm:$0xff]   ;;  %v12960_v3 = vld [vmem:[%s17483_s11 + $0x30c] ss:$16 sps:$4 sm:$0xff]  }
 0x902   : > { %9710 = vmatprep.subr.bf16.mxu1 %v12885_v47  ;;  %v12936_v47 = vld [vmem:[%s17483_s11 + $0x28c] ss:$16 sps:$4 sm:$0xff]  }
 0x905   : > { %9711 = vmatpush1.bf16.msra.mxu1 %v12883_v49  ;;  %v12933_v49 = vld [vmem:[%s17483_s11 + $0x284] ss:$16 sps:$4 sm:$0xff]  }
 0x927   : > { %v6964_v35 = vpop.f32.mrb[72].mxu1 }
 0x928   : > { %v6966_v20 = vpop.f32.mrb[73].mxu1 }
 0x929   : > { %v7022_v24 = vcombine.low %v6964_v35, %v6966_v20  ;;  %v6968_v34 = vpop.f32.mrb[74].mxu1  ;;  %v12915_v20 = vld [vmem:[%s17483_s11 + $0x224] ss:$16 sps:$4 sm:$0xff]  }
 0x92a   : > { %v6969_v4 = vpop.f32.mrb[75].mxu1  ;;  %v12916_v34 = vld [vmem:[%s17483_s11 + $0x228] ss:$16 sps:$4 sm:$0xff]  }
 0x92b   : > { %v7044_v9 = vrot.slane %v7022_v24, %v15846_v7  ;;  %v12913_v24 = vld [vmem:[%s17483_s11 + $0x220] ss:$16 sps:$4 sm:$0xff]   ;;  %v12921_v4 = vld [vmem:[%s17483_s11 + $0x244] ss:$16 sps:$4 sm:$0xff]  }
 0x92d   : > { %v7053_v16 = vcombine.low %v7044_v9, %v7051_v0  ;;  %v12924_v0 = vld [vmem:[%s17483_s11 + $0x24c] ss:$16 sps:$4 sm:$0xff]   ;;  %v12919_v9 = vld [vmem:[%s17483_s11 + $0x240] ss:$16 sps:$4 sm:$0xff]  }
 0x92f   : > { %v7067_v39 = vrot.slane %v7053_v16, %v15846_v7  ;;  %v12922_v16 = vld [vmem:[%s17483_s11 + $0x248] ss:$16 sps:$4 sm:$0xff]  }
 0x931   : > { %v7068_v46 = vcombine.low %v7060_v6, %v7067_v39  ;;  %v12927_v6 = vld [vmem:[%s17483_s11 + $0x264] ss:$16 sps:$4 sm:$0xff]   ;;  %v12930_v39 = vld [vmem:[%s17483_s11 + $0x26c] ss:$16 sps:$4 sm:$0xff]  }
 0x933   : > { %v7070_v55 = vadd.f32 %v7068_v46, %v16403_v31  ;;  %v12891_v31 = vld [vmem:[%s17483_s11 + $0x1a4] ss:$16 sps:$4 sm:$0xff]   ;;  %v12925_v46 = vld [vmem:[%s17483_s11 + $0x260] ss:$16 sps:$4 sm:$0xff]  }
 0x934   : > { %9712 = vmatprep.subr.bf16.mxu1 %v12891_v31  ;;  %v12939_v31 = vld [vmem:[%s17483_s11 + $0x2a4] ss:$16 sps:$4 sm:$0xff]  }
 0x935   : > { %9713 = vmatpush1.bf16.msra.mxu1 %v12889_v42  ;;  %v12937_v42 = vld [vmem:[%s17483_s11 + $0x2a0] ss:$16 sps:$4 sm:$0xff]  }
 0x936   : > { %9714 = vmatprep.subr.bf16.mxu1 %v12897_v52  ;;  %v12945_v52 = vld [vmem:[%s17483_s11 + $0x2c4] ss:$16 sps:$4 sm:$0xff]  }
 0x939   : > { %9715 = vmatpush1.bf16.msra.mxu1 %v12895_v30  ;;  %v12943_v30 = vld [vmem:[%s17483_s11 + $0x2c0] ss:$16 sps:$4 sm:$0xff]  }
 0x93a   : > { %9716 = vmatprep.subr.bf16.mxu1 %v12903_v57  ;;  %v12951_v57 = vld [vmem:[%s17483_s11 + $0x2e4] ss:$16 sps:$4 sm:$0xff]  }
 0x93d   : > { %9717 = vmatpush1.bf16.msra.mxu1 %v12901_v23  ;;  %v12949_v23 = vld [vmem:[%s17483_s11 + $0x2e0] ss:$16 sps:$4 sm:$0xff]  }
 0x93e   : > { %9727 = vmatprep.subr.bf16.mxu1 %v12909_v15  ;;  %v12957_v15 = vld [vmem:[%s17483_s11 + $0x304] ss:$16 sps:$4 sm:$0xff]  }
 0x967   : > { %v7889_v13 = vpop.f32.mrb[76].mxu1 }
 0x968   : > { %v7891_v2 = vpop.f32.mrb[77].mxu1 }
 0x969   : > { %v8027_v60 = vcombine.low %v7889_v13, %v7891_v2  ;;  %v7893_v5 = vpop.f32.mrb[78].mxu1  ;;  %v12955_v13 = vld [vmem:[%s17483_s11 + $0x300] ss:$16 sps:$4 sm:$0xff]   ;;  %v12958_v2 = vld [vmem:[%s17483_s11 + $0x308] ss:$16 sps:$4 sm:$0xff]  }
 0x96a   : > { %v7894_v41 = vpop.f32.mrb[79].mxu1  ;;  %v12966_v5 = vld [vmem:[%s17483_s11 + $0x32c] ss:$16 sps:$4 sm:$0xff]  }
 0x96b   : > { %v8037_v37 = vrot.slane %v8027_v60, %v15846_v7  ;;  %v12963_v60 = vld [vmem:[%s17483_s11 + $0x324] ss:$16 sps:$4 sm:$0xff]   ;;  %v12961_v41 = vld [vmem:[%s17483_s11 + $0x320] ss:$16 sps:$4 sm:$0xff]  }
 0x96d   : > { %v8059_v54 = vcombine.low %v8037_v37, %v8044_v58  ;;  %v12964_v58 = vld [vmem:[%s17483_s11 + $0x328] ss:$16 sps:$4 sm:$0xff]   ;;  %v12969_v37 = vld [vmem:[%s17483_s11 + $0x344] ss:$16 sps:$4 sm:$0xff]  }
 0x96f   : > { %v8067_v50 = vrot.slane %v8059_v54, %v15846_v7  ;;  %v12972_v54 = vld [vmem:[%s17483_s11 + $0x34c] ss:$16 sps:$4 sm:$0xff]  }
 0x9a7   : > { %v7971_v25 = vpop.f32.mrb[80].mxu1 }
 0x9a8   : > { %v7973_v38 = vpop.f32.mrb[81].mxu1 }
 0x9a9   : > { %v8029_v48 = vcombine.low %v7971_v25, %v7973_v38  ;;  %v7975_v56 = vpop.f32.mrb[82].mxu1  ;;  %v12967_v25 = vld [vmem:[%s17483_s11 + $0x340] ss:$16 sps:$4 sm:$0xff]   ;;  %v12970_v38 = vld [vmem:[%s17483_s11 + $0x348] ss:$16 sps:$4 sm:$0xff]  }
 0x9aa   : > { %v7976_v62 = vpop.f32.mrb[83].mxu1  ;;  %v12978_v56 = vld [vmem:[%s17483_s11 + $0x36c] ss:$16 sps:$4 sm:$0xff]  }
 0x9ab   : > { %v8051_v22 = vrot.slane %v8029_v48, %v15846_v7  ;;  %v12975_v48 = vld [vmem:[%s17483_s11 + $0x364] ss:$16 sps:$4 sm:$0xff]   ;;  %v12973_v62 = vld [vmem:[%s17483_s11 + $0x360] ss:$16 sps:$4 sm:$0xff]  }
 0x9ad   : > { %v8060_v11 = vcombine.low %v8051_v22, %v8058_v17  ;;  %v12976_v17 = vld [vmem:[%s17483_s11 + $0x368] ss:$16 sps:$4 sm:$0xff]   ;;  %v12981_v22 = vld [vmem:[%s17483_s11 + $0x384] ss:$16 sps:$4 sm:$0xff]  }
 0x9af   : > { %v8074_v28 = vrot.slane %v8060_v11, %v15846_v7  ;;  %v12907_v7 = vld [vmem:[%s17483_s11 + $0x200] ss:$16 sps:$4 sm:$0xff]   ;;  %v12984_v11 = vld [vmem:[%s17483_s11 + $0x38c] ss:$16 sps:$4 sm:$0xff]  }
 0x9b1   : > { %v8075_v36 = vcombine.low %v8067_v50, %v8074_v28  ;;  %v12979_v50 = vld [vmem:[%s17483_s11 + $0x380] ss:$16 sps:$4 sm:$0xff]   ;;  %v12982_v28 = vld [vmem:[%s17483_s11 + $0x388] ss:$16 sps:$4 sm:$0xff]  }
 0x9b3   : > { %v8077_v21 = vadd.f32 %v8075_v36, %v7070_v55  ;;  %v12928_v55 = vld [vmem:[%s17483_s11 + $0x268] ss:$16 sps:$4 sm:$0xff]   ;;  %v12987_v36 = vld [vmem:[%s17483_s11 + $0x3a4] ss:$16 sps:$4 sm:$0xff]  }
 0x9b5   : > { %v16675_v33 = vmax.f32 %v8077_v21, 0.0  ;;  %v12990_v21 = vld [vmem:[%s17483_s11 + $0x3ac] ss:$16 sps:$4 sm:$0xff]  }
 0x9b7   : > { %v8087_v35 = vrot.slane %v16675_v33, %v14935_v18  ;;  %v8083_v14 = vrot.slane %v16675_v33, %v14929_v32  ;;  %v8095_v26 = vrot.slane %v16675_v33, %v8094_v44 }
 0x9b9   : > { %v8121_v27 = vpack.c.bf16 %v8087_v35, %v8087_v35  ;;  %v8120_v45 = vpack.c.bf16 %v8083_v14, %v8083_v14  ;;  %v8123_v63 = vpack.c.bf16 %v8095_v26, %v8095_v26  ;;  %v12985_v35 = vld [vmem:[%s17483_s11 + $0x3a0] ss:$16 sps:$4 sm:$0xff]   ;;  %v12988_v14 = vld [vmem:[%s17483_s11 + $0x3a8] ss:$16 sps:$4 sm:$0xff]   ;;  %v12993_v26 = vld [vmem:[%s17483_s11 + $0x3c4] ss:$16 sps:$4 sm:$0xff]  }
 0x9bb   : > { %9718 = vmatprep.mubr.bf16.mxu1 %v8121_v27  ;;  %9882 = vmatprep.mubr.bf16.mxu0 %v8121_v27  ;;  %v12996_v27 = vld [vmem:[%s17483_s11 + $0x3cc] ss:$16 sps:$4 sm:$0xff]  }
 0x9bc   : > { %9719 = vmatmul.mubr.bf16.vlgmr.msra.gmra.mrb[84].mxu1 %v8120_v45  ;;  %9883 = vmatmul.mubr.bf16.vlgmr.msra.gmra.mrb[76].mxu0 %v8120_v45  ;;  %v12999_v45 = vld [vmem:[%s17483_s11 + $0x3e4] ss:$16 sps:$4 sm:$0xff]  }
 0x9bd   : > { %9728 = vmatpush1.bf16.msra.mxu1 %v12907_v7  ;;  %9892 = vmatpush1.bf16.msra.mxu0 %v12910_v29  ;;  %v12991_v7 = vld [vmem:[%s17483_s11 + $0x3c0] ss:$16 sps:$4 sm:$0xff]   ;;  %v12994_v29 = vld [vmem:[%s17483_s11 + $0x3c8] ss:$16 sps:$4 sm:$0xff]  }
 0x9be   : > { %9759 = vmatprep.mubr.bf16.mxu1 %v8123_v63  ;;  %9923 = vmatprep.mubr.bf16.mxu0 %v8123_v63  ;;  %v8102_v63 = vsub.s32 5, %v14926_v19 }
 0x9bf   : > { %9729 = vmatprep.subr.bf16.mxu1 %v12915_v20  ;;  %9893 = vmatprep.subr.bf16.mxu0 %v12918_v61  ;;  %v13002_v20 = vld [vmem:[%s17483_s11 + $0x3ec] ss:$16 sps:$4 sm:$0xff]   ;;  %v8090_v61 = vsub.s32 2, %v14926_v19 }
 0x9c1   : > { %9730 = vmatpush1.bf16.msra.mxu1 %v12913_v24  ;;  %9894 = vmatpush1.bf16.msra.mxu0 %v12916_v34  ;;  %v12997_v24 = vld [vmem:[%s17483_s11 + $0x3e0] ss:$16 sps:$4 sm:$0xff]   ;;  %v13000_v34 = vld [vmem:[%s17483_s11 + $0x3e8] ss:$16 sps:$4 sm:$0xff]  }
 0x9c2   : > { %9731 = vmatprep.subr.bf16.mxu1 %v12921_v4  ;;  %9895 = vmatprep.subr.bf16.mxu0 %v12924_v0  ;;  %v8091_v4 = vrot.slane %v16675_v33, %v8090_v61  ;;  %v13005_v0 = vld [vmem:[%s17483_s11 + $0x404] ss:$16 sps:$4 sm:$0xff]  }
 0x9c5   : > { %9732 = vmatpush1.bf16.msra.mxu1 %v12919_v9  ;;  %9896 = vmatpush1.bf16.msra.mxu0 %v12922_v16  ;;  %v13008_v9 = vld [vmem:[%s17483_s11 + $0x40c] ss:$16 sps:$4 sm:$0xff]   ;;  %v8103_v16 = vrot.slane %v16675_v33, %v8102_v63  ;;  %v13075_v63 = vld [vmem:[%s17483_s11 + $0x580] ss:$16 sps:$4 sm:$0xff]  }
 0x9c6   : > { %9733 = vmatprep.subr.bf16.mxu1 %v12927_v6  ;;  %9897 = vmatprep.subr.bf16.mxu0 %v12930_v39  ;;  %v13003_v6 = vld [vmem:[%s17483_s11 + $0x400] ss:$16 sps:$4 sm:$0xff]   ;;  %v8122_v39 = vpack.c.bf16 %v8091_v4, %v8091_v4  ;;  %v13086_v4 = vld [vmem:[%s17483_s11 + $0x5ac] ss:$16 sps:$4 sm:$0xff]  }
 0x9c9   : > { %9734 = vmatpush1.bf16.msra.mxu1 %v12925_v46  ;;  %9898 = vmatpush1.bf16.msra.mxu0 %v12928_v55  ;;  %v13006_v46 = vld [vmem:[%s17483_s11 + $0x408] ss:$16 sps:$4 sm:$0xff]   ;;  %v8125_v55 = vpack.c.bf16 %v8103_v16, %v8103_v16  ;;  %v13089_v16 = vld [vmem:[%s17483_s11 + $0x5c4] ss:$16 sps:$4 sm:$0xff]  }
 0x9ca   : > { %9735 = vmatprep.subr.bf16.mxu1 %v12933_v49  ;;  %9899 = vmatprep.subr.bf16.mxu0 %v12936_v47  ;;  %v13011_v49 = vld [vmem:[%s17483_s11 + $0x424] ss:$16 sps:$4 sm:$0xff]   ;;  %v13014_v47 = vld [vmem:[%s17483_s11 + $0x42c] ss:$16 sps:$4 sm:$0xff]  }
 0x9cd   : > { %9736 = vmatpush1.bf16.msra.mxu1 %v12931_v8  ;;  %9900 = vmatpush1.bf16.msra.mxu0 %v12934_v40  ;;  %v13009_v8 = vld [vmem:[%s17483_s11 + $0x420] ss:$16 sps:$4 sm:$0xff]   ;;  %v13012_v40 = vld [vmem:[%s17483_s11 + $0x428] ss:$16 sps:$4 sm:$0xff]  }
 0x9ce   : > { %9737 = vmatprep.subr.bf16.mxu1 %v12939_v31  ;;  %9901 = vmatprep.subr.bf16.mxu0 %v12942_v53  ;;  %v13017_v31 = vld [vmem:[%s17483_s11 + $0x444] ss:$16 sps:$4 sm:$0xff]   ;;  %v13020_v53 = vld [vmem:[%s17483_s11 + $0x44c] ss:$16 sps:$4 sm:$0xff]  }
 0x9d1   : > { %9738 = vmatpush1.bf16.msra.mxu1 %v12937_v42  ;;  %9902 = vmatpush1.bf16.msra.mxu0 %v12940_v10  ;;  %v13015_v42 = vld [vmem:[%s17483_s11 + $0x440] ss:$16 sps:$4 sm:$0xff]   ;;  %v13018_v10 = vld [vmem:[%s17483_s11 + $0x448] ss:$16 sps:$4 sm:$0xff]  }
 0x9d2   : > { %9739 = vmatprep.subr.bf16.mxu1 %v12945_v52  ;;  %9903 = vmatprep.subr.bf16.mxu0 %v12948_v43  ;;  %v13023_v52 = vld [vmem:[%s17483_s11 + $0x464] ss:$16 sps:$4 sm:$0xff]   ;;  %v13026_v43 = vld [vmem:[%s17483_s11 + $0x46c] ss:$16 sps:$4 sm:$0xff]  }
 0x9d5   : > { %9740 = vmatpush1.bf16.msra.mxu1 %v12943_v30  ;;  %9904 = vmatpush1.bf16.msra.mxu0 %v12946_v12  ;;  %v13021_v30 = vld [vmem:[%s17483_s11 + $0x460] ss:$16 sps:$4 sm:$0xff]   ;;  %v13024_v12 = vld [vmem:[%s17483_s11 + $0x468] ss:$16 sps:$4 sm:$0xff]  }
 0x9d6   : > { %9741 = vmatprep.subr.bf16.mxu1 %v12951_v57  ;;  %9905 = vmatprep.subr.bf16.mxu0 %v12954_v59  ;;  %v13029_v57 = vld [vmem:[%s17483_s11 + $0x484] ss:$16 sps:$4 sm:$0xff]   ;;  %v13032_v59 = vld [vmem:[%s17483_s11 + $0x48c] ss:$16 sps:$4 sm:$0xff]  }
 0x9d9   : > { %9742 = vmatpush1.bf16.msra.mxu1 %v12949_v23  ;;  %9906 = vmatpush1.bf16.msra.mxu0 %v12952_v1  ;;  %v13027_v23 = vld [vmem:[%s17483_s11 + $0x480] ss:$16 sps:$4 sm:$0xff]   ;;  %v13030_v1 = vld [vmem:[%s17483_s11 + $0x488] ss:$16 sps:$4 sm:$0xff]  }
 0x9da   : > { %9743 = vmatprep.subr.bf16.mxu1 %v12957_v15  ;;  %9907 = vmatprep.subr.bf16.mxu0 %v12960_v3  ;;  %v13035_v15 = vld [vmem:[%s17483_s11 + $0x4a4] ss:$16 sps:$4 sm:$0xff]   ;;  %v13038_v3 = vld [vmem:[%s17483_s11 + $0x4ac] ss:$16 sps:$4 sm:$0xff]  }
 0x9dd   : > { %9744 = vmatpush1.bf16.msra.mxu1 %v12955_v13  ;;  %9908 = vmatpush1.bf16.msra.mxu0 %v12958_v2  ;;  %v13033_v13 = vld [vmem:[%s17483_s11 + $0x4a0] ss:$16 sps:$4 sm:$0xff]   ;;  %v13036_v2 = vld [vmem:[%s17483_s11 + $0x4a8] ss:$16 sps:$4 sm:$0xff]  }
 0x9de   : > { %9745 = vmatprep.subr.bf16.mxu1 %v12963_v60  ;;  %9909 = vmatprep.subr.bf16.mxu0 %v12966_v5  ;;  %v13041_v60 = vld [vmem:[%s17483_s11 + $0x4c4] ss:$16 sps:$4 sm:$0xff]   ;;  %v13044_v5 = vld [vmem:[%s17483_s11 + $0x4cc] ss:$16 sps:$4 sm:$0xff]  }
 0x9e1   : > { %9746 = vmatpush1.bf16.msra.mxu1 %v12961_v41  ;;  %9910 = vmatpush1.bf16.msra.mxu0 %v12964_v58  ;;  %v13039_v41 = vld [vmem:[%s17483_s11 + $0x4c0] ss:$16 sps:$4 sm:$0xff]   ;;  %v13042_v58 = vld [vmem:[%s17483_s11 + $0x4c8] ss:$16 sps:$4 sm:$0xff]  }
 0x9e2   : > { %9747 = vmatprep.subr.bf16.mxu1 %v12969_v37  ;;  %9911 = vmatprep.subr.bf16.mxu0 %v12972_v54  ;;  %v13047_v37 = vld [vmem:[%s17483_s11 + $0x4e4] ss:$16 sps:$4 sm:$0xff]   ;;  %v13050_v54 = vld [vmem:[%s17483_s11 + $0x4ec] ss:$16 sps:$4 sm:$0xff]  }
 0x9e5   : > { %9748 = vmatpush1.bf16.msra.mxu1 %v12967_v25  ;;  %9912 = vmatpush1.bf16.msra.mxu0 %v12970_v38  ;;  %v13045_v25 = vld [vmem:[%s17483_s11 + $0x4e0] ss:$16 sps:$4 sm:$0xff]   ;;  %v13048_v38 = vld [vmem:[%s17483_s11 + $0x4e8] ss:$16 sps:$4 sm:$0xff]  }
 0x9e6   : > { %9749 = vmatprep.subr.bf16.mxu1 %v12975_v48  ;;  %9913 = vmatprep.subr.bf16.mxu0 %v12978_v56  ;;  %v13053_v48 = vld [vmem:[%s17483_s11 + $0x504] ss:$16 sps:$4 sm:$0xff]   ;;  %v13056_v56 = vld [vmem:[%s17483_s11 + $0x50c] ss:$16 sps:$4 sm:$0xff]  }
 0x9e9   : > { %9750 = vmatpush1.bf16.msra.mxu1 %v12973_v62  ;;  %9914 = vmatpush1.bf16.msra.mxu0 %v12976_v17  ;;  %v13051_v62 = vld [vmem:[%s17483_s11 + $0x500] ss:$16 sps:$4 sm:$0xff]   ;;  %v13054_v17 = vld [vmem:[%s17483_s11 + $0x508] ss:$16 sps:$4 sm:$0xff]  }
 0x9ea   : > { %9751 = vmatprep.subr.bf16.mxu1 %v12981_v22  ;;  %9915 = vmatprep.subr.bf16.mxu0 %v12984_v11  ;;  %v13059_v22 = vld [vmem:[%s17483_s11 + $0x524] ss:$16 sps:$4 sm:$0xff]   ;;  %v13062_v11 = vld [vmem:[%s17483_s11 + $0x52c] ss:$16 sps:$4 sm:$0xff]  }
 0x9ed   : > { %9752 = vmatpush1.bf16.msra.mxu1 %v12979_v50  ;;  %9916 = vmatpush1.bf16.msra.mxu0 %v12982_v28  ;;  %v13057_v50 = vld [vmem:[%s17483_s11 + $0x520] ss:$16 sps:$4 sm:$0xff]   ;;  %v13060_v28 = vld [vmem:[%s17483_s11 + $0x528] ss:$16 sps:$4 sm:$0xff]  }
 0x9ee   : > { %9753 = vmatprep.subr.bf16.mxu1 %v12987_v36  ;;  %9917 = vmatprep.subr.bf16.mxu0 %v12990_v21  ;;  %v13065_v36 = vld [vmem:[%s17483_s11 + $0x544] ss:$16 sps:$4 sm:$0xff]   ;;  %v13068_v21 = vld [vmem:[%s17483_s11 + $0x54c] ss:$16 sps:$4 sm:$0xff]  }
 0x9f1   : > { %9754 = vmatpush1.bf16.msra.mxu1 %v12985_v35  ;;  %9918 = vmatpush1.bf16.msra.mxu0 %v12988_v14  ;;  %v13063_v35 = vld [vmem:[%s17483_s11 + $0x540] ss:$16 sps:$4 sm:$0xff]   ;;  %v13066_v14 = vld [vmem:[%s17483_s11 + $0x548] ss:$16 sps:$4 sm:$0xff]  }
 0x9f2   : > { %9755 = vmatprep.subr.bf16.mxu1 %v12993_v26  ;;  %9919 = vmatprep.subr.bf16.mxu0 %v12996_v27  ;;  %v13071_v26 = vld [vmem:[%s17483_s11 + $0x564] ss:$16 sps:$4 sm:$0xff]   ;;  %v13074_v27 = vld [vmem:[%s17483_s11 + $0x56c] ss:$16 sps:$4 sm:$0xff]  }
 0x9f5   : > { %9756 = vmatpush1.bf16.msra.mxu1 %v12991_v7  ;;  %9920 = vmatpush1.bf16.msra.mxu0 %v12994_v29  ;;  %v13069_v7 = vld [vmem:[%s17483_s11 + $0x560] ss:$16 sps:$4 sm:$0xff]   ;;  %v13072_v29 = vld [vmem:[%s17483_s11 + $0x568] ss:$16 sps:$4 sm:$0xff]  }
 0x9f6   : > { %9757 = vmatprep.subr.bf16.mxu1 %v12999_v45  ;;  %9921 = vmatprep.subr.bf16.mxu0 %v13002_v20  ;;  %v13077_v45 = vld [vmem:[%s17483_s11 + $0x584] ss:$16 sps:$4 sm:$0xff]   ;;  %v13080_v20 = vld [vmem:[%s17483_s11 + $0x58c] ss:$16 sps:$4 sm:$0xff]  }
 0x9f9   : > { %9758 = vmatpush1.bf16.msra.mxu1 %v12997_v24  ;;  %9922 = vmatpush1.bf16.msra.mxu0 %v13000_v34  ;;  %v13078_v24 = vld [vmem:[%s17483_s11 + $0x588] ss:$16 sps:$4 sm:$0xff]   ;;  %v13083_v34 = vld [vmem:[%s17483_s11 + $0x5a4] ss:$16 sps:$4 sm:$0xff]  }
 0x9fa   : > { %9768 = vmatprep.subr.bf16.mxu1 %v13005_v0  ;;  %9932 = vmatprep.subr.bf16.mxu0 %v13008_v9  ;;  %v13081_v0 = vld [vmem:[%s17483_s11 + $0x5a0] ss:$16 sps:$4 sm:$0xff]   ;;  %v13084_v9 = vld [vmem:[%s17483_s11 + $0x5a8] ss:$16 sps:$4 sm:$0xff]  }
 0x9fc   : > { %9760 = vmatmul.mubr.bf16.vlgmr.msra.gmra.mrb[84].mxu1 %v8122_v39  ;;  %9924 = vmatmul.mubr.bf16.vlgmr.msra.gmra.mrb[76].mxu0 %v8122_v39  ;;  %v13087_v39 = vld [vmem:[%s17483_s11 + $0x5c0] ss:$16 sps:$4 sm:$0xff]  }
 0x9fd   : > { %9769 = vmatpush1.bf16.msra.mxu1 %v13003_v6  ;;  %9800 = vmatprep.mubr.bf16.mxu1 %v8125_v55  ;;  %v13092_v6 = vld [vmem:[%s17483_s11 + $0x5cc] ss:$16 sps:$4 sm:$0xff]  }
 0x9fe   : > { %9933 = vmatpush1.bf16.msra.mxu0 %v13006_v46  ;;  %9964 = vmatprep.mubr.bf16.mxu0 %v8125_v55  ;;  %v13090_v46 = vld [vmem:[%s17483_s11 + $0x5c8] ss:$16 sps:$4 sm:$0xff]   ;;  %v13095_v55 = vld [vmem:[%s17483_s11 + $0x5e4] ss:$16 sps:$4 sm:$0xff]  }
 0x9ff   : > { %9770 = vmatprep.subr.bf16.mxu1 %v13011_v49  ;;  %9934 = vmatprep.subr.bf16.mxu0 %v13014_v47  ;;  %v8098_v49 = vsub.s32 4, %v14926_v19  ;;  %v13098_v47 = vld [vmem:[%s17483_s11 + $0x5ec] ss:$16 sps:$4 sm:$0xff]  }
 0xa01   : > { %9771 = vmatpush1.bf16.msra.mxu1 %v13009_v8  ;;  %v8110_v8 = vsub.s32 7, %v14926_v19 }
 0xa02   : > { %9935 = vmatpush1.bf16.msra.mxu0 %v13012_v40  ;;  %9772 = vmatprep.subr.bf16.mxu1 %v13017_v31  ;;  %v13093_v40 = vld [vmem:[%s17483_s11 + $0x5e0] ss:$16 sps:$4 sm:$0xff]   ;;  %v13096_v31 = vld [vmem:[%s17483_s11 + $0x5e8] ss:$16 sps:$4 sm:$0xff]  }
 0xa03   : > { %9936 = vmatprep.subr.bf16.mxu0 %v13020_v53  ;;  %v8099_v53 = vrot.slane %v16675_v33, %v8098_v49  ;;  %v13173_v49 = vld [vmem:[%s17483_s11 + $0x784] ss:$16 sps:$4 sm:$0xff]  }
 0xa05   : > { %9773 = vmatpush1.bf16.msra.mxu1 %v13015_v42  ;;  %v13101_v42 = vld [vmem:[%s17483_s11 + $0x604] ss:$16 sps:$4 sm:$0xff]  }
 0xa06   : > { %9937 = vmatpush1.bf16.msra.mxu0 %v13018_v10  ;;  %9774 = vmatprep.subr.bf16.mxu1 %v13023_v52  ;;  %v13104_v10 = vld [vmem:[%s17483_s11 + $0x60c] ss:$16 sps:$4 sm:$0xff]   ;;  %v8111_v52 = vrot.slane %v16675_v33, %v8110_v8  ;;  %v13171_v8 = vld [vmem:[%s17483_s11 + $0x780] ss:$16 sps:$4 sm:$0xff]  }
 0xa07   : > { %9938 = vmatprep.subr.bf16.mxu0 %v13026_v43  ;;  %v13099_v43 = vld [vmem:[%s17483_s11 + $0x600] ss:$16 sps:$4 sm:$0xff]  }
 0xa09   : > { %9775 = vmatpush1.bf16.msra.mxu1 %v13021_v30  ;;  %v8124_v30 = vpack.c.bf16 %v8099_v53, %v8099_v53  ;;  %v13182_v53 = vld [vmem:[%s17483_s11 + $0x7ac] ss:$16 sps:$4 sm:$0xff]  }
 0xa0a   : > { %9939 = vmatpush1.bf16.msra.mxu0 %v13024_v12  ;;  %9776 = vmatprep.subr.bf16.mxu1 %v13029_v57  ;;  %v13102_v12 = vld [vmem:[%s17483_s11 + $0x608] ss:$16 sps:$4 sm:$0xff]   ;;  %v13107_v57 = vld [vmem:[%s17483_s11 + $0x624] ss:$16 sps:$4 sm:$0xff]  }
 0xa0b   : > { %9940 = vmatprep.subr.bf16.mxu0 %v13032_v59  ;;  %v8127_v59 = vpack.c.bf16 %v8111_v52, %v8111_v52  ;;  %v13185_v52 = vld [vmem:[%s17483_s11 + $0x7c4] ss:$16 sps:$4 sm:$0xff]  }
 0xa0d   : > { %9777 = vmatpush1.bf16.msra.mxu1 %v13027_v23  ;;  %v13110_v23 = vld [vmem:[%s17483_s11 + $0x62c] ss:$16 sps:$4 sm:$0xff]  }
 0xa0e   : > { %9941 = vmatpush1.bf16.msra.mxu0 %v13030_v1  ;;  %9778 = vmatprep.subr.bf16.mxu1 %v13035_v15  ;;  %v13105_v1 = vld [vmem:[%s17483_s11 + $0x620] ss:$16 sps:$4 sm:$0xff]   ;;  %v13108_v15 = vld [vmem:[%s17483_s11 + $0x628] ss:$16 sps:$4 sm:$0xff]  }
 0xa0f   : > { %9942 = vmatprep.subr.bf16.mxu0 %v13038_v3  ;;  %v13113_v3 = vld [vmem:[%s17483_s11 + $0x644] ss:$16 sps:$4 sm:$0xff]  }
 0xa11   : > { %9779 = vmatpush1.bf16.msra.mxu1 %v13033_v13  ;;  %v13116_v13 = vld [vmem:[%s17483_s11 + $0x64c] ss:$16 sps:$4 sm:$0xff]  }
 0xa12   : > { %9943 = vmatpush1.bf16.msra.mxu0 %v13036_v2  ;;  %9780 = vmatprep.subr.bf16.mxu1 %v13041_v60  ;;  %v13111_v2 = vld [vmem:[%s17483_s11 + $0x640] ss:$16 sps:$4 sm:$0xff]   ;;  %v13114_v60 = vld [vmem:[%s17483_s11 + $0x648] ss:$16 sps:$4 sm:$0xff]  }
 0xa13   : > { %9944 = vmatprep.subr.bf16.mxu0 %v13044_v5  ;;  %v13119_v5 = vld [vmem:[%s17483_s11 + $0x664] ss:$16 sps:$4 sm:$0xff]  }
 0xa15   : > { %9781 = vmatpush1.bf16.msra.mxu1 %v13039_v41  ;;  %v13122_v41 = vld [vmem:[%s17483_s11 + $0x66c] ss:$16 sps:$4 sm:$0xff]  }
 0xa16   : > { %9945 = vmatpush1.bf16.msra.mxu0 %v13042_v58  ;;  %9782 = vmatprep.subr.bf16.mxu1 %v13047_v37  ;;  %v13117_v58 = vld [vmem:[%s17483_s11 + $0x660] ss:$16 sps:$4 sm:$0xff]   ;;  %v13120_v37 = vld [vmem:[%s17483_s11 + $0x668] ss:$16 sps:$4 sm:$0xff]  }
 0xa17   : > { %9946 = vmatprep.subr.bf16.mxu0 %v13050_v54  ;;  %v13125_v54 = vld [vmem:[%s17483_s11 + $0x684] ss:$16 sps:$4 sm:$0xff]  }
 0xa19   : > { %9783 = vmatpush1.bf16.msra.mxu1 %v13045_v25  ;;  %v13128_v25 = vld [vmem:[%s17483_s11 + $0x68c] ss:$16 sps:$4 sm:$0xff]  }
 0xa1a   : > { %9947 = vmatpush1.bf16.msra.mxu0 %v13048_v38  ;;  %9784 = vmatprep.subr.bf16.mxu1 %v13053_v48  ;;  %v13123_v38 = vld [vmem:[%s17483_s11 + $0x680] ss:$16 sps:$4 sm:$0xff]   ;;  %v13126_v48 = vld [vmem:[%s17483_s11 + $0x688] ss:$16 sps:$4 sm:$0xff]  }
 0xa1b   : > { %9948 = vmatprep.subr.bf16.mxu0 %v13056_v56  ;;  %v13131_v56 = vld [vmem:[%s17483_s11 + $0x6a4] ss:$16 sps:$4 sm:$0xff]  }
 0xa1d   : > { %9785 = vmatpush1.bf16.msra.mxu1 %v13051_v62  ;;  %v13134_v62 = vld [vmem:[%s17483_s11 + $0x6ac] ss:$16 sps:$4 sm:$0xff]  }
 0xa1e   : > { %9949 = vmatpush1.bf16.msra.mxu0 %v13054_v17  ;;  %9786 = vmatprep.subr.bf16.mxu1 %v13059_v22  ;;  %v13129_v17 = vld [vmem:[%s17483_s11 + $0x6a0] ss:$16 sps:$4 sm:$0xff]   ;;  %v13132_v22 = vld [vmem:[%s17483_s11 + $0x6a8] ss:$16 sps:$4 sm:$0xff]  }
 0xa1f   : > { %9950 = vmatprep.subr.bf16.mxu0 %v13062_v11  ;;  %v13137_v11 = vld [vmem:[%s17483_s11 + $0x6c4] ss:$16 sps:$4 sm:$0xff]  }
 0xa21   : > { %9787 = vmatpush1.bf16.msra.mxu1 %v13057_v50  ;;  %v13140_v50 = vld [vmem:[%s17483_s11 + $0x6cc] ss:$16 sps:$4 sm:$0xff]  }
 0xa22   : > { %9951 = vmatpush1.bf16.msra.mxu0 %v13060_v28  ;;  %9788 = vmatprep.subr.bf16.mxu1 %v13065_v36  ;;  %v13135_v28 = vld [vmem:[%s17483_s11 + $0x6c0] ss:$16 sps:$4 sm:$0xff]   ;;  %v13138_v36 = vld [vmem:[%s17483_s11 + $0x6c8] ss:$16 sps:$4 sm:$0xff]  }
 0xa23   : > { %9952 = vmatprep.subr.bf16.mxu0 %v13068_v21  ;;  %v13143_v21 = vld [vmem:[%s17483_s11 + $0x6e4] ss:$16 sps:$4 sm:$0xff]  }
 0xa25   : > { %9789 = vmatpush1.bf16.msra.mxu1 %v13063_v35  ;;  %v13146_v35 = vld [vmem:[%s17483_s11 + $0x6ec] ss:$16 sps:$4 sm:$0xff]  }
 0xa26   : > { %9953 = vmatpush1.bf16.msra.mxu0 %v13066_v14  ;;  %9790 = vmatprep.subr.bf16.mxu1 %v13071_v26  ;;  %v13141_v14 = vld [vmem:[%s17483_s11 + $0x6e0] ss:$16 sps:$4 sm:$0xff]   ;;  %v13144_v26 = vld [vmem:[%s17483_s11 + $0x6e8] ss:$16 sps:$4 sm:$0xff]  }
 0xa27   : > { %9954 = vmatprep.subr.bf16.mxu0 %v13074_v27  ;;  %v13149_v27 = vld [vmem:[%s17483_s11 + $0x704] ss:$16 sps:$4 sm:$0xff]  }
 0xa29   : > { %9791 = vmatpush1.bf16.msra.mxu1 %v13069_v7  ;;  %v13152_v7 = vld [vmem:[%s17483_s11 + $0x70c] ss:$16 sps:$4 sm:$0xff]  }
 0xa2a   : > { %9955 = vmatpush1.bf16.msra.mxu0 %v13072_v29  ;;  %9792 = vmatprep.subr.bf16.mxu1 %v13077_v45  ;;  %v13147_v29 = vld [vmem:[%s17483_s11 + $0x700] ss:$16 sps:$4 sm:$0xff]   ;;  %v13150_v45 = vld [vmem:[%s17483_s11 + $0x708] ss:$16 sps:$4 sm:$0xff]  }
 0xa2b   : > { %9956 = vmatprep.subr.bf16.mxu0 %v13080_v20  ;;  %v13155_v20 = vld [vmem:[%s17483_s11 + $0x724] ss:$16 sps:$4 sm:$0xff]  }
 0xa2d   : > { %9793 = vmatpush1.bf16.msra.mxu1 %v13075_v63  ;;  %v13158_v63 = vld [vmem:[%s17483_s11 + $0x72c] ss:$16 sps:$4 sm:$0xff]  }
 0xa2e   : > { %9957 = vmatpush1.bf16.msra.mxu0 %v13078_v24  ;;  %9794 = vmatprep.subr.bf16.mxu1 %v13083_v34  ;;  %v13153_v24 = vld [vmem:[%s17483_s11 + $0x720] ss:$16 sps:$4 sm:$0xff]   ;;  %v13156_v34 = vld [vmem:[%s17483_s11 + $0x728] ss:$16 sps:$4 sm:$0xff]  }
 0xa2f   : > { %9958 = vmatprep.subr.bf16.mxu0 %v13086_v4  ;;  %v13161_v4 = vld [vmem:[%s17483_s11 + $0x744] ss:$16 sps:$4 sm:$0xff]  }
 0xa31   : > { %9795 = vmatpush1.bf16.msra.mxu1 %v13081_v0  ;;  %v13164_v0 = vld [vmem:[%s17483_s11 + $0x74c] ss:$16 sps:$4 sm:$0xff]  }
 0xa32   : > { %9959 = vmatpush1.bf16.msra.mxu0 %v13084_v9  ;;  %9796 = vmatprep.subr.bf16.mxu1 %v13089_v16  ;;  %v13159_v9 = vld [vmem:[%s17483_s11 + $0x740] ss:$16 sps:$4 sm:$0xff]   ;;  %v13162_v16 = vld [vmem:[%s17483_s11 + $0x748] ss:$16 sps:$4 sm:$0xff]  }
 0xa33   : > { %9960 = vmatprep.subr.bf16.mxu0 %v13092_v6  ;;  %v13167_v6 = vld [vmem:[%s17483_s11 + $0x764] ss:$16 sps:$4 sm:$0xff]  }
 0xa35   : > { %9797 = vmatpush1.bf16.msra.mxu1 %v13087_v39  ;;  %v13170_v39 = vld [vmem:[%s17483_s11 + $0x76c] ss:$16 sps:$4 sm:$0xff]  }
 0xa36   : > { %9961 = vmatpush1.bf16.msra.mxu0 %v13090_v46  ;;  %9798 = vmatprep.subr.bf16.mxu1 %v13095_v55  ;;  %v13165_v46 = vld [vmem:[%s17483_s11 + $0x760] ss:$16 sps:$4 sm:$0xff]   ;;  %v13168_v55 = vld [vmem:[%s17483_s11 + $0x768] ss:$16 sps:$4 sm:$0xff]  }
 0xa37   : > { %9962 = vmatprep.subr.bf16.mxu0 %v13098_v47  ;;  %v13176_v47 = vld [vmem:[%s17483_s11 + $0x78c] ss:$16 sps:$4 sm:$0xff]  }
 0xa39   : > { %9799 = vmatpush1.bf16.msra.mxu1 %v13093_v40  ;;  %v13174_v40 = vld [vmem:[%s17483_s11 + $0x788] ss:$16 sps:$4 sm:$0xff]  }
 0xa3a   : > { %9963 = vmatpush1.bf16.msra.mxu0 %v13096_v31  ;;  %9809 = vmatprep.subr.bf16.mxu1 %v13101_v42  ;;  %v13179_v31 = vld [vmem:[%s17483_s11 + $0x7a4] ss:$16 sps:$4 sm:$0xff]   ;;  %v13177_v42 = vld [vmem:[%s17483_s11 + $0x7a0] ss:$16 sps:$4 sm:$0xff]  }
 0xa3b   : > { %9973 = vmatprep.subr.bf16.mxu0 %v13104_v10  ;;  %v13180_v10 = vld [vmem:[%s17483_s11 + $0x7a8] ss:$16 sps:$4 sm:$0xff]  }
 0xa3c   : > { %9801 = vmatmul.mubr.bf16.vlgmr.msra.gmra.mrb[84].mxu1 %v8124_v30 }
 0xa3d   : > { %9965 = vmatmul.mubr.bf16.vlgmr.msra.gmra.mrb[76].mxu0 %v8124_v30  ;;  %9810 = vmatpush1.bf16.msra.mxu1 %v13099_v43  ;;  %v13188_v43 = vld [vmem:[%s17483_s11 + $0x7cc] ss:$16 sps:$4 sm:$0xff]   ;;  %v13183_v30 = vld [vmem:[%s17483_s11 + $0x7c0] ss:$16 sps:$4 sm:$0xff]  }
 0xa3e   : > { %9841 = vmatprep.mubr.bf16.mxu1 %v8127_v59  ;;  %9974 = vmatpush1.bf16.msra.mxu0 %v13102_v12  ;;  %v13186_v12 = vld [vmem:[%s17483_s11 + $0x7c8] ss:$16 sps:$4 sm:$0xff]  }
 0xa3f   : > { %10005 = vmatprep.mubr.bf16.mxu0 %v8127_v59  ;;  %9811 = vmatprep.subr.bf16.mxu1 %v13107_v57  ;;  %v13191_v57 = vld [vmem:[%s17483_s11 + $0x7e4] ss:$16 sps:$4 sm:$0xff]   ;;  %v8106_v59 = vsub.s32 6, %v14926_v19 }
 0xa40   : > { %9975 = vmatprep.subr.bf16.mxu0 %v13110_v23  ;;  %v13194_v23 = vld [vmem:[%s17483_s11 + $0x7ec] ss:$16 sps:$4 sm:$0xff]   ;;  %v13227_v19 = vld [vmem:[%s17487_s15] sm:$0xff]  }
 0xa41   : > { %9812 = vmatpush1.bf16.msra.mxu1 %v13105_v1  ;;  %v13189_v1 = vld [vmem:[%s17483_s11 + $0x7e0] ss:$16 sps:$4 sm:$0xff]  }
 0xa42   : > { %9976 = vmatpush1.bf16.msra.mxu0 %v13108_v15  ;;  %9813 = vmatprep.subr.bf16.mxu1 %v13113_v3  ;;  %v13192_v15 = vld [vmem:[%s17483_s11 + $0x7e8] ss:$16 sps:$4 sm:$0xff]   ;;  %v8107_v3 = vrot.slane %v16675_v33, %v8106_v59  ;;  %v13198_v33 = vld [vmem:[%s17485_s13 + $0x80] sm:$0xff]  }
 0xa43   : > { %9977 = vmatprep.subr.bf16.mxu0 %v13116_v13  ;;  %v13195_v13 = vld [vmem:[%s17485_s13 + $0x40] sm:$0xff]  }
 0xa45   : > { %9814 = vmatpush1.bf16.msra.mxu1 %v13111_v2  ;;  %v13196_v2 = vld [vmem:[%s17485_s13 + $0xc0] sm:$0xff]  }
 0xa46   : > { %9978 = vmatpush1.bf16.msra.mxu0 %v13114_v60  ;;  %9815 = vmatprep.subr.bf16.mxu1 %v13119_v5  ;;  %v13197_v60 = vld [vmem:[%s17485_s13] sm:$0xff]   ;;  %v8126_v5 = vpack.c.bf16 %v8107_v3, %v8107_v3 }
 0xa47   : > { %9979 = vmatprep.subr.bf16.mxu0 %v13122_v41  ;;  %v13199_v41 = vld [vmem:[%s17485_s13 + $0x48] sm:$0xff]   ;;  %v13231_v3 = vld [vmem:[%s17487_s15 + $0x20] sm:$0xff]  }
 0xa49   : > { %9816 = vmatpush1.bf16.msra.mxu1 %v13117_v58  ;;  %v13200_v58 = vld [vmem:[%s17485_s13 + $0xc8] sm:$0xff]  }
 0xa4a   : > { %9980 = vmatpush1.bf16.msra.mxu0 %v13120_v37  ;;  %9817 = vmatprep.subr.bf16.mxu1 %v13125_v54  ;;  %v13201_v37 = vld [vmem:[%s17485_s13 + $0x8] sm:$0xff]  }
 0xa4b   : > { %9981 = vmatprep.subr.bf16.mxu0 %v13128_v25  ;;  %v13202_v54 = vld [vmem:[%s17485_s13 + $0x88] sm:$0xff]   ;;  %v13203_v25 = vld [vmem:[%s17485_s13 + $0x50] sm:$0xff]  }
 0xa4d   : > { %9818 = vmatpush1.bf16.msra.mxu1 %v13123_v38  ;;  %v13204_v38 = vld [vmem:[%s17485_s13 + $0xd0] sm:$0xff]  }
 0xa4e   : > { %9982 = vmatpush1.bf16.msra.mxu0 %v13126_v48  ;;  %9819 = vmatprep.subr.bf16.mxu1 %v13131_v56  ;;  %v13205_v48 = vld [vmem:[%s17485_s13 + $0x10] sm:$0xff]  }
 0xa4f   : > { %9983 = vmatprep.subr.bf16.mxu0 %v13134_v62  ;;  %v13206_v56 = vld [vmem:[%s17485_s13 + $0x90] sm:$0xff]   ;;  %v13207_v62 = vld [vmem:[%s17485_s13 + $0x58] sm:$0xff]  }
 0xa51   : > { %9820 = vmatpush1.bf16.msra.mxu1 %v13129_v17  ;;  %v13208_v17 = vld [vmem:[%s17485_s13 + $0xd8] sm:$0xff]  }
 0xa52   : > { %9984 = vmatpush1.bf16.msra.mxu0 %v13132_v22  ;;  %9821 = vmatprep.subr.bf16.mxu1 %v13137_v11  ;;  %v13209_v22 = vld [vmem:[%s17485_s13 + $0x18] sm:$0xff]  }
 0xa53   : > { %9985 = vmatprep.subr.bf16.mxu0 %v13140_v50  ;;  %v13210_v11 = vld [vmem:[%s17485_s13 + $0x98] sm:$0xff]   ;;  %v13211_v50 = vld [vmem:[%s17485_s13 + $0x60] sm:$0xff]  }
 0xa55   : > { %9822 = vmatpush1.bf16.msra.mxu1 %v13135_v28  ;;  %v13212_v28 = vld [vmem:[%s17485_s13 + $0xe0] sm:$0xff]  }
 0xa56   : > { %9986 = vmatpush1.bf16.msra.mxu0 %v13138_v36  ;;  %9823 = vmatprep.subr.bf16.mxu1 %v13143_v21  ;;  %v13213_v36 = vld [vmem:[%s17485_s13 + $0x20] sm:$0xff]  }
 0xa57   : > { %9987 = vmatprep.subr.bf16.mxu0 %v13146_v35  ;;  %v13214_v21 = vld [vmem:[%s17485_s13 + $0xa0] sm:$0xff]   ;;  %v13215_v35 = vld [vmem:[%s17485_s13 + $0x68] sm:$0xff]  }
 0xa59   : > { %9824 = vmatpush1.bf16.msra.mxu1 %v13141_v14  ;;  %v13216_v14 = vld [vmem:[%s17485_s13 + $0xe8] sm:$0xff]  }
 0xa5a   : > { %9988 = vmatpush1.bf16.msra.mxu0 %v13144_v26  ;;  %9825 = vmatprep.subr.bf16.mxu1 %v13149_v27  ;;  %v13217_v26 = vld [vmem:[%s17485_s13 + $0x28] sm:$0xff]  }
 0xa5b   : > { %9989 = vmatprep.subr.bf16.mxu0 %v13152_v7  ;;  %v13218_v27 = vld [vmem:[%s17485_s13 + $0xa8] sm:$0xff]   ;;  %v13219_v7 = vld [vmem:[%s17485_s13 + $0x70] sm:$0xff]  }
 0xa5d   : > { %9826 = vmatpush1.bf16.msra.mxu1 %v13147_v29  ;;  %v13220_v29 = vld [vmem:[%s17485_s13 + $0xf0] sm:$0xff]  }
 0xa5e   : > { %9990 = vmatpush1.bf16.msra.mxu0 %v13150_v45  ;;  %9827 = vmatprep.subr.bf16.mxu1 %v13155_v20  ;;  %v13221_v45 = vld [vmem:[%s17485_s13 + $0x30] sm:$0xff]  }
 0xa5f   : > { %9991 = vmatprep.subr.bf16.mxu0 %v13158_v63  ;;  %v13222_v20 = vld [vmem:[%s17485_s13 + $0xb0] sm:$0xff]   ;;  %v13223_v63 = vld [vmem:[%s17485_s13 + $0x78] sm:$0xff]  }
 0xa61   : > { %9828 = vmatpush1.bf16.msra.mxu1 %v13153_v24  ;;  %v13224_v24 = vld [vmem:[%s17485_s13 + $0xf8] sm:$0xff]  }
 0xa62   : > { %9992 = vmatpush1.bf16.msra.mxu0 %v13156_v34  ;;  %9829 = vmatprep.subr.bf16.mxu1 %v13161_v4  ;;  %v13225_v34 = vld [vmem:[%s17485_s13 + $0x38] sm:$0xff]  }
 0xa63   : > { %9993 = vmatprep.subr.bf16.mxu0 %v13164_v0  ;;  %v13226_v4 = vld [vmem:[%s17485_s13 + $0xb8] sm:$0xff]   ;;  %v8384_v0 = vld [vmem:[%s17484_s12] sm:$0xf] }
 0xa65   : > { %9830 = vmatpush1.bf16.msra.mxu1 %v13159_v9  ;;  %v9669_v9 = vrot.slane %v8384_v0, %v14929_v32 }
 0xa66   : > { %9994 = vmatpush1.bf16.msra.mxu0 %v13162_v16  ;;  %9831 = vmatprep.subr.bf16.mxu1 %v13167_v6  ;;  %v9677_v16 = vrot.slane %v8384_v0, %v8090_v61  ;;  %v9673_v6 = vrot.slane %v8384_v0, %v14935_v18 }
 0xa67   : > { %9995 = vmatprep.subr.bf16.mxu0 %v13170_v39  ;;  %v9681_v39 = vrot.slane %v8384_v0, %v8094_v44 }
 0xa69   : > { %9832 = vmatpush1.bf16.msra.mxu1 %v13165_v46 }
 0xa6a   : > { %9996 = vmatpush1.bf16.msra.mxu0 %v13168_v55  ;;  %9833 = vmatprep.subr.bf16.mxu1 %v13173_v49 }
 0xa6b   : > { %9997 = vmatprep.subr.bf16.mxu0 %v13176_v47 }
 0xa6d   : > { %9834 = vmatpush1.bf16.msra.mxu1 %v13171_v8 }
 0xa6e   : > { %9998 = vmatpush1.bf16.msra.mxu0 %v13174_v40  ;;  %9835 = vmatprep.subr.bf16.mxu1 %v13179_v31 }
 0xa6f   : > { %9999 = vmatprep.subr.bf16.mxu0 %v13182_v53 }
 0xa71   : > { %9836 = vmatpush1.bf16.msra.mxu1 %v13177_v42 }
 0xa72   : > { %10000 = vmatpush1.bf16.msra.mxu0 %v13180_v10  ;;  %9837 = vmatprep.subr.bf16.mxu1 %v13185_v52 }
 0xa73   : > { %10001 = vmatprep.subr.bf16.mxu0 %v13188_v43 }
 0xa75   : > { %9838 = vmatpush1.bf16.msra.mxu1 %v13183_v30 }
 0xa76   : > { %10002 = vmatpush1.bf16.msra.mxu0 %v13186_v12  ;;  %9839 = vmatprep.subr.bf16.mxu1 %v13191_v57 }
 0xa77   : > { %10003 = vmatprep.subr.bf16.mxu0 %v13194_v23  ;;  %v13228_v23 = vld [vmem:[%s17487_s15 + $0x8] sm:$0xff]  }
 0xa79   : > { %9840 = vmatpush1.bf16.msra.mxu1 %v13189_v1  ;;  %v13229_v1 = vld [vmem:[%s17487_s15 + $0x10] sm:$0xff]  }
 0xa7a   : > { %10004 = vmatpush1.bf16.msra.mxu0 %v13192_v15  ;;  %12248 = vmatprep.subr.bf16.mxu1 %v13195_v13  ;;  %v13230_v15 = vld [vmem:[%s17487_s15 + $0x18] sm:$0xff]   ;;  %v13232_v13 = vld [vmem:[%s17487_s15 + $0x28] sm:$0xff]  }
 0xa7b   : > { %12270 = vmatprep.subr.bf16.mxu0 %v13196_v2  ;;  %v13233_v2 = vld [vmem:[%s17487_s15 + $0x30] sm:$0xff]  }
 0xa7c   : > { %9842 = vmatmul.mubr.bf16.vlgmr.msra.gmra.mrb[84].mxu1 %v8126_v5 }
 0xa7d   : > { %10006 = vmatmul.mubr.bf16.vlgmr.msra.gmra.mrb[76].mxu0 %v8126_v5  ;;  %12249 = vmatpush3.bf16.msra.mxu1 %v13197_v60  ;;  %v13235_v60 = vld [vmem:[%s17489_s17] sm:$0xff]   ;;  %v13234_v5 = vld [vmem:[%s17487_s15 + $0x38] sm:$0xff]  }
 0xa7e   : > { %12271 = vmatpush3.bf16.msra.mxu0 %v13198_v33  ;;  %12250 = vmatprep.subr.bf16.mxu1 %v13199_v41 }
 0xa7f   : > { %12272 = vmatprep.subr.bf16.mxu0 %v13200_v58  ;;  %v10086_v58 = vld [vmem:[%s17486_s14] sm:$0x1] }
 0xa81   : > { %12251 = vmatpush3.bf16.msra.mxu1 %v13201_v37 }
 0xa82   : > { %12273 = vmatpush3.bf16.msra.mxu0 %v13202_v54  ;;  %12252 = vmatprep.subr.bf16.mxu1 %v13203_v25 }
 0xa83   : > { %12274 = vmatprep.subr.bf16.mxu0 %v13204_v38 }
 0xa85   : > { %12253 = vmatpush3.bf16.msra.mxu1 %v13205_v48 }
 0xa86   : > { %12275 = vmatpush3.bf16.msra.mxu0 %v13206_v56  ;;  %12254 = vmatprep.subr.bf16.mxu1 %v13207_v62 }
 0xa87   : > { %12276 = vmatprep.subr.bf16.mxu0 %v13208_v17 }
 0xa89   : > { %12255 = vmatpush3.bf16.msra.mxu1 %v13209_v22 }
 0xa8a   : > { %12277 = vmatpush3.bf16.msra.mxu0 %v13210_v11  ;;  %12256 = vmatprep.subr.bf16.mxu1 %v13211_v50 }
 0xa8b   : > { %12278 = vmatprep.subr.bf16.mxu0 %v13212_v28  ;;  %v13236_v28 = vld [vmem:[%s17489_s17 + $0x8] sm:$0xff]  }
 0xa8d   : > { %12257 = vmatpush3.bf16.msra.mxu1 %v13213_v36  ;;  %v10377_v36 = vld [vmem:[%s17488_s16] sm:$0x1] }
 0xa8e   : > { %12279 = vmatpush3.bf16.msra.mxu0 %v13214_v21  ;;  %12258 = vmatprep.subr.bf16.mxu1 %v13215_v35 }
 0xa8f   : > { %12280 = vmatprep.subr.bf16.mxu0 %v13216_v14 }
 0xa91   : > { %12259 = vmatpush3.bf16.msra.mxu1 %v13217_v26 }
 0xa92   : > { %12281 = vmatpush3.bf16.msra.mxu0 %v13218_v27  ;;  %12260 = vmatprep.subr.bf16.mxu1 %v13219_v7 }
 0xa93   : > { %12282 = vmatprep.subr.bf16.mxu0 %v13220_v29 }
 0xa95   : > { %12261 = vmatpush3.bf16.msra.mxu1 %v13221_v45  ;;  %v10472_v45 = vld [vmem:[%s17490_s18] sm:$0x1] }
 0xa96   : > { %12283 = vmatpush3.bf16.msra.mxu0 %v13222_v20  ;;  %12262 = vmatprep.subr.bf16.mxu1 %v13223_v63 }
 0xa97   : > { %12284 = vmatprep.subr.bf16.mxu0 %v13224_v24 }
 0xa99   : > { %12263 = vmatpush3.bf16.msra.mxu1 %v13225_v34 }
 0xa9a   : > { %12285 = vmatpush3.bf16.msra.mxu0 %v13226_v4  ;;  %12378 = vmatprep.subr.bf16.mxu1 %v13305_v51 }
 0xa9b   : > { %12398 = vmatprep.subr.bf16.mxu0 %v13305_v51 }
 0xb4f   : > { %v9843_v46 = vpop.f32.mrb[84].mxu1 }
 0xb50   : > { %v12408_v55 = vadd.f32 %v9843_v46, %v9669_v9  ;;  %v10007_v49 = vpop.f32.mrb[76].mxu0  ;;  %v9845_v47 = vpop.f32.mrb[85].mxu1 }
 0xb51   : > { %v12410_v8 = vadd.f32 %v10007_v49, %v9677_v16  ;;  %v12409_v40 = vadd.f32 %v9845_v47, %v9673_v6  ;;  %v10009_v31 = vpop.f32.mrb[77].mxu0  ;;  %v9847_v53 = vpop.f32.mrb[86].mxu1 }
 0xb52   : > { %v10014_v42 = vmax.f32 %v12408_v55, 0.0  ;;  %v12411_v10 = vadd.f32 %v10009_v31, %v9681_v39  ;;  %v10011_v52 = vpop.f32.mrb[78].mxu0  ;;  %v9848_v32 = vpop.f32.mrb[87].mxu1 }
 0xb53   : > { %v10016_v43 = vmax.f32 %v12410_v8, 0.0  ;;  %v10015_v30 = vmax.f32 %v12409_v40, 0.0  ;;  %v10012_v61 = vpop.f32.mrb[79].mxu0 }
 0xb54   : > { %v10017_v12 = vmax.f32 %v12411_v10, 0.0  ;;  %v10018_v44 = vpack.c.bf16 %v10014_v42, %v10014_v42 }
 0xb55   : > { %v10019_v18 = vpack.c.bf16 %v10015_v30, %v10015_v30  ;;  %v10020_v59 = vpack.c.bf16 %v10016_v43, %v10016_v43 }
 0xb56   : > { %v10021_v57 = vpack.c.bf16 %v10017_v12, %v10017_v12 }
 0xb57   : > { %10311 = vmatprep.mubr.bf16.mxu1 %v10019_v18 }
 0xb58   : > { %10351 = vmatprep.mubr.bf16.mxu0 %v10021_v57  ;;  %10312 = vmatmul.mubr.bf16.vlgmr.msra.gmra.mrb[88].mxu1 %v10018_v44 }
 0xb59   : > { %10352 = vmatmul.mubr.bf16.vlgmr.msra.gmra.mrb[80].mxu0 %v10020_v59  ;;  %12379 = vmatpush3.bf16.msra.mxu1 %v13227_v19 }
 0xb5a   : > { %12380 = vmatprep.subr.bf16.mxu1 %v13305_v51  ;;  %12394 = vmatprep.mubr.msk.bf16.mxu1 %vm13306_vm10, %v13305_v51 }
 0xb5b   : > { %12402 = vmatprep.mubr.msk.bf16.mxu0 %vm13306_vm10, %v13305_v51  ;;  %12399 = vmatpush3.bf16.msra.mxu0 %v13235_v60  ;;  %vm10528_vm10 = vcmask 73728  }
 0xb5c   : > { %12400 = vmatprep.subr.bf16.mxu0 %v13305_v51 }
 0xb5d   : > { %12381 = vmatpush3.bf16.msra.mxu1 %v13228_v23 }
 0xb5e   : > { %12382 = vmatprep.subr.bf16.mxu1 %v13305_v51 }
 0xb5f   : > { %12401 = vmatpush3.bf16.msra.mxu0 %v13236_v28 }
 0xb61   : > { %12383 = vmatpush3.bf16.msra.mxu1 %v13229_v1 }
 0xb62   : > { %12384 = vmatprep.subr.bf16.mxu1 %v13305_v51 }
 0xb65   : > { %12385 = vmatpush3.bf16.msra.mxu1 %v13230_v15 }
 0xb66   : > { %12386 = vmatprep.subr.bf16.mxu1 %v13305_v51 }
 0xb69   : > { %12387 = vmatpush3.bf16.msra.mxu1 %v13231_v3 }
 0xb6a   : > { %12388 = vmatprep.subr.bf16.mxu1 %v13305_v51 }
 0xb6d   : > { %12389 = vmatpush3.bf16.msra.mxu1 %v13232_v13 }
 0xb6e   : > { %12390 = vmatprep.subr.bf16.mxu1 %v13305_v51 }
 0xb71   : > { %12391 = vmatpush3.bf16.msra.mxu1 %v13233_v2 }
 0xb72   : > { %12392 = vmatprep.subr.bf16.mxu1 %v13305_v51 }
 0xb75   : > { %12393 = vmatpush3.bf16.msra.mxu1 %v13234_v5 }
 0xc2b   : > { %v12264_v33 = vpop.f32.mrb[88].mxu1 }
 0xc2c   : > { %v12286_v41 = vpop.f32.mrb[80].mxu0  ;;  %v12265_v37 = vpop.f32.mrb[89].mxu1 }
 0xc2d   : > { %v12266_v54 = vadd.f32 %v12265_v37, %v12264_v33  ;;  %v12287_v25 = vpop.f32.mrb[81].mxu0  ;;  %v12267_v38 = vpop.f32.mrb[90].mxu1 }
 0xc2e   : > { %v12288_v48 = vadd.f32 %v12287_v25, %v12286_v41  ;;  %v12289_v56 = vpop.f32.mrb[82].mxu0  ;;  %v12268_v62 = vpop.f32.mrb[91].mxu1 }
 0xc2f   : > { %v10314_v17 = vadd.f32 %v12266_v54, %v10086_v58  ;;  %v12290_v22 = vpop.f32.mrb[83].mxu0 }
 0xc31   : > { %v10354_v11 = vadd.f32 %v12288_v48, %v10314_v17 }
 0xc33   : > { %v10359_v50 = vmax.f32 %v10354_v11, 0.0 }
 0xc35   : > { %v10360_v51 = vpack.c.bf16 %v10359_v50, %v10359_v50 }
 0xc37   : > { %12395 = vmatmul.mubr.bf16.vlgmr.msra.gmra.mrb[92].mxu1 %v10360_v51 }
 0xd0a   : > { %v10460_v21 = vpop.f32.mrb[92].mxu1 }
 0xd0b   : > { %v10461_v35 = vadd.f32 %v10460_v21, %v10377_v36  ;;  %v12396_v14 = vpop.f32.mrb[93].mxu1 }
 0xd0c   : > { %v10463_v26 = vpop.f32.mrb[94].mxu1 }
 0xd0d   : > { %v10466_v27 = vmax.f32 %v10461_v35, 0.0  ;;  %v12397_v7 = vpop.f32.mrb[95].mxu1 }
 0xd0f   : > { %v10467_v29 = vpack.c.bf16 %v10466_v27, %v10466_v27 }
 0xd11   : > { %12403 = vmatmul.mubr.msk.bf16.vlgmr.msra.gmra.mrb[84].mxu0 %vm986_vm7, %v10467_v29 }
 0xde4   : > { %v10522_v20 = vpop.f32.mrb[84].mxu0 }
 0xde5   : > { %v10523_v63 = vadd.f32 %v10522_v20, %v10472_v45  ;;  %v12404_v24 = vpop.f32.mrb[85].mxu0 }
 0xde6   : > { %v10525_v34 = vpop.f32.mrb[86].mxu0 }
 0xde7   : > { %v12405_v4 = vpop.f32.mrb[87].mxu0  ;;  %10529 = vst.msk [vmem:[%s594_s4] sm:$0x1] %vm10528_vm10, %v10523_v63 }
 0xde8   : > { %13250 = shalt.err (!%p13247_p3)
}
 0xde9   : > { %s13251_s28 = scalar_lea.hbm %s17430_s26, 16  ;;  %s13255_s4 = scalar_lea.hbm %s17491_s19, 32 }
 0xdea   : > { %p13252_p4 = scmp.ne.s32.totalorder %s17430_s26, %s13251_s28  ;;  %p13256_p9 = scmp.lt.u32.totalorder %s17430_s26, %s17491_s19 }
 0xdeb   : > { %p13257_p10 = scmp.lt.u32.totalorder %s13255_s4, %s13251_s28  ;;  %p13259_p12 = scmp.lt.u32.totalorder %s13251_s28, %s17430_s26 }
 0xdec   : > { %p13253_p7 = pnand %p13252_p4, %p13447_p5 }
 0xded   : > { %p13258_p11 = por %p13257_p10, %p13256_p9 }
 0xdee   : > { %p13254_p8 = pneg %p13253_p7 }
 0xdef   : > { %p13260_p13 = por %p13259_p12, %p13258_p11 }
 0xdf1   : > { %p13261_p0 = pnand %p13260_p13, %p13254_p8 }
 0xdf3   : > { %13264 = shalt.err (!%p13261_p0)
}
 0xdf4   : > { %12453 = dma.vmem_to_hbm [thread:$0]  (%p13447_p5), %s17432_s25, 16, %s17430_s26, %s10531_s1  }
 0xdf5 PF: > { %s17546_s24 = sld [smem:[#allocation12_spill]]  ;;  %p12459_p1 = scmp.ge.s32.totalorder %s13299_s21, 2 }
 0xdf7   : > { %p12456_p2 = pnand %p12459_p1, %p13451_p6 }
 0xdfb   : > { %s10555_s27 = sand.u32 1, %s17546_s24  }
 0xdfc   : > { %s10556_s0 = scalar_lea.sflag [#allocation10], %s10555_s27 }
 0xdfd   : > { %13282 = dma.done.wait (!%p12456_p2), %s10556_s0, 16  }
 0xdfe   : > { %13284 = vsyncadd (!%p12456_p2), %s10556_s0, 4294967280  ;;  %s17548_s21 = sld [smem:[#allocation14_spill]]  ;;  %s17549_s28 = sld [smem:[#allocation13_spill]] }
 0xdff   : > { %s17550_s20 = sld [smem:[#allocation15_spill]]  ;;  %s17551_s0 = smov %s13291_s30 }
 0xe04   : > { %p29_p3 = scmp.ge.s32.totalorder %s17548_s21, 4   ;;  %s17552_s30 = smov %s17549_s28 }
 0xe06   :  { %31 = sbr.rel (!%p29_p3) target bundleno = 10 (0xa), region = 180 }
 0xe0d   :  { %10560 = vsyncpa [#allocation10], 1 }
 0xe0e   :  { %10562 = vsyncpa [#allocation10 + $0x1], 1 }

</bundles_post_ra>
